<compile_context>
chip_gen: v7x
topology: tpu7x:2x2x1
jax: 0.10.0
libtpu: 0.0.40
codegen_flags: <defaults>
</compile_context>

<pallas_src>
import functools

import jax
import jax.numpy as jnp
from jax.experimental import pallas as pl
from jax.experimental.pallas import tpu as pltpu


# ----------------------------------------------------------------------------
# Kernels.
# ----------------------------------------------------------------------------
def _conv_bn_silu_fused_kernel(x_ref, w_ref, shift_ref, o_ref, patch_ref, *,
                               k, stride, dilation, th, wout, cin, act):
    """In-VMEM im2col + one wide-contraction matmul + BN shift + SiLU.

    x_ref:     (1, Hp, Wp, Cin)       bf16  padded NHWC image (resident per n)
    w_ref:     (K*K*Cin, Cout_p)      bf16  BN-scale-folded conv weights
    shift_ref: (1, Cout_p)            f32   folded BN shift (beta - mean*scale)
    o_ref:     (1, TH*Wout, Cout_p)   bf16  lane-dense output row block
    patch_ref: (TH, Wout, K*K*Cin)    bf16  im2col staging scratch
    """
    hb = pl.program_id(1)
    row0 = pl.multiple_of(hb * (th * stride), th * stride)

    # Stage the K*K shifted slabs next to each other along the lane axis.
    for kh in range(k):
        for kw in range(k):
            r0 = row0 + kh * dilation
            c0 = kw * dilation
            if stride == 1:
                slab = x_ref[0, pl.ds(r0, th), pl.ds(c0, wout), :]
            else:
                slab = x_ref[0, pl.ds(r0, th, stride), pl.ds(c0, wout, stride), :]
            tap = kh * k + kw
            patch_ref[:, :, pl.ds(tap * cin, cin)] = slab

    # Single matmul, contraction K*K*Cin, f32 accumulation on the MXU.
    patches = patch_ref[...].reshape(th * wout, k * k * cin)
    y = jnp.dot(patches, w_ref[...], preferred_element_type=jnp.float32)
    y = y + shift_ref[...]
    if act:
        y = y * jax.nn.sigmoid(y)          # SiLU; f32 VPU/EUP is safe on v5e too
    o_ref[0] = y.astype(o_ref.dtype)


def _conv_bn_silu_pertap_kernel(x_ref, w_ref, shift_ref, o_ref, *,
                                k, stride, dilation, th, wout, cin, act):
    """Fallback: per-tap matmuls accumulated in registers (no scratch refs)."""
    hb = pl.program_id(1)
    row0 = pl.multiple_of(hb * (th * stride), th * stride)
    acc = None
    for kh in range(k):
        for kw in range(k):
            r0 = row0 + kh * dilation
            c0 = kw * dilation
            if stride == 1:
                slab = x_ref[0, pl.ds(r0, th), pl.ds(c0, wout), :]
            else:
                slab = x_ref[0, pl.ds(r0, th, stride), pl.ds(c0, wout, stride), :]
            slab2d = slab.reshape(th * wout, cin)
            tap = kh * k + kw
            contrib = jnp.dot(slab2d, w_ref[pl.ds(tap * cin, cin), :],
                              preferred_element_type=jnp.float32)
            acc = contrib if acc is None else acc + contrib
    y = acc + shift_ref[...]
    if act:
        y = y * jax.nn.sigmoid(y)
    o_ref[0] = y.astype(o_ref.dtype)


# ----------------------------------------------------------------------------
# VMEM sizing helpers.
# ----------------------------------------------------------------------------
def _sublane(dtype):
    return 8 * (4 // jnp.dtype(dtype).itemsize)


def _padded_bytes(shape, dtype):
    """Rough VMEM footprint: last dim padded to 128 lanes, 2nd-to-last to the
    sublane packing of the dtype."""
    itemsize = jnp.dtype(dtype).itemsize
    s = list(shape)
    if len(s) >= 1:
        s[-1] = -(-s[-1] // 128) * 128
    if len(s) >= 2:
        sub = _sublane(dtype)
        s[-2] = -(-s[-2] // sub) * sub
    n = 1
    for d in s:
        n *= d
    return n * itemsize


def _vmem_estimate(th, hp, wp, cin, wout, cout_p, kk, single_buffer_inputs=True):
    in_mult = 1 if single_buffer_inputs else 2
    x_b = in_mult * _padded_bytes((hp, wp, cin), jnp.bfloat16)        # resident image
    w_b = in_mult * _padded_bytes((kk * cin, cout_p), jnp.bfloat16)   # weights
    s_b = in_mult * _padded_bytes((1, cout_p), jnp.float32)           # BN shift
    o_b = 2 * _padded_bytes((th * wout, cout_p), jnp.bfloat16)        # out (dbl-buf)
    p_b = _padded_bytes((th, wout, kk * cin), jnp.bfloat16)           # im2col scratch
    return x_b + w_b + s_b + o_b + p_b


def _vmem_capacity():
    # TODO(synk): confirm this is per-TensorCore (64 MiB) and not per-chip on v7x.
    try:
        return int(pltpu.get_tpu_info().vmem_capacity_bytes)
    except Exception:
        return 64 * 1024 * 1024  # conservative default (v7x per-TC VMEM)


def _pick_th(hout, wout, hp, wp, cin, cout_p, kk, vmem_budget, target_rows=1024):
    """Output-row tile height: divides Hout, flattened row block a multiple of
    the bf16 sublane packing (16) when possible, ~target_rows matmul rows,
    fits the VMEM budget."""
    def fits(d):
        return _vmem_estimate(d, hp, wp, cin, wout, cout_p, kk, True) <= vmem_budget

    best = hout
    for align in (16, 8, 1):
        cands = [d for d in range(1, hout + 1)
                 if hout % d == 0 and ((d * wout) % align == 0 or d == hout)]
        th = cands[0]
        for d in cands:
            if d * wout <= target_rows:
                th = d
        while not fits(th):
            smaller = [d for d in cands if d < th]
            if not smaller:
                break
            th = max(smaller)
        if fits(th):
            return th
        best = min(best, th)
    # Nothing fits (the resident padded image alone is too big).
    # TODO(synk): halo row-tile x via manual DMA instead of shrinking TH.
    return best


# ----------------------------------------------------------------------------
# Wrapper.
# ----------------------------------------------------------------------------
def conv_bn_act(x, weight, gamma, beta, running_mean, running_var, *,
                stride=1, padding=1, dilation=1, act=True, eps=1e-5):
    """ConvBnAct forward (inference-mode BN).
    x: (N, Cin, H, W) NCHW, weight: (Cout, Cin, K, K)."""
    n, cin, h, w = x.shape
    cout, _, k, _ = weight.shape

    hout = (h + 2 * padding - dilation * (k - 1) - 1) // stride + 1
    wout = (w + 2 * padding - dilation * (k - 1) - 1) // stride + 1
    hp, wp = h + 2 * padding, w + 2 * padding
    cout_p = -(-cout // 128) * 128
    kk = k * k

    # NCHW -> padded NHWC, bf16 for the MXU.
    x_nhwc = jnp.pad(x.transpose(0, 2, 3, 1),
                     ((0, 0), (padding, padding), (padding, padding), (0, 0)))
    x_nhwc = x_nhwc.astype(jnp.bfloat16)

    # Fold inference-mode BN: scale into the weights, shift becomes a bias.
    scale = gamma / jnp.sqrt(running_var + eps)                  # (Cout,)
    shift = beta - running_mean * scale                          # (Cout,)
    w_t = weight.transpose(2, 3, 1, 0) * scale                   # (K, K, Cin, Cout)
    w_t = jnp.pad(w_t, ((0, 0), (0, 0), (0, 0), (0, cout_p - cout)))
    w_2d = w_t.reshape(kk * cin, cout_p).astype(jnp.bfloat16)    # tap-major rows
    shift_p = jnp.pad(shift, (0, cout_p - cout)).reshape(1, cout_p)
    shift_p = shift_p.astype(jnp.float32)

    vmem_cap = _vmem_capacity()
    th = _pick_th(hout, wout, hp, wp, cin, cout_p, kk,
                  vmem_budget=int(0.6 * vmem_cap))
    est = _vmem_estimate(th, hp, wp, cin, wout, cout_p, kk, True)
    # Never clamp the scoped limit below the actual footprint.
    vmem_limit = int(min(vmem_cap, max(est + (8 << 20), 32 << 20)))

    grid = (n, hout // th)
    out_shape = jax.ShapeDtypeStruct((n, hout * wout, cout_p), jnp.bfloat16)

    flops = 2 * n * hout * wout * kk * cin * cout_p
    bytes_accessed = (x_nhwc.size * 2 + w_2d.size * 2 + shift_p.size * 4
                      + n * hout * wout * cout_p * 2)
    cost = pl.CostEstimate(
        flops=flops,
        transcendentals=(n * hout * wout * cout_p) if act else 0,
        bytes_accessed=bytes_accessed)

    compiler_params = pltpu.CompilerParams(
        # Megacore (v7x) shards the batch axis; row blocks stay on one core so
        # the resident image is DMA'd once per (core, batch element).
        dimension_semantics=("parallel", "arbitrary"),
        vmem_limit_bytes=vmem_limit)

    def make_in_specs(single_buffer):
        def spec(shape, index_map):
            if single_buffer:
                return pl.BlockSpec(shape, index_map, pipeline_mode=pl.Buffered(1))
            return pl.BlockSpec(shape, index_map)
        return [
            spec((1, hp, wp, cin), lambda b, hb: (b, 0, 0, 0)),      # resident image
            spec((kk * cin, cout_p), lambda b, hb: (0, 0)),          # weights
            spec((1, cout_p), lambda b, hb: (0, 0)),                 # BN shift
        ]

    out_spec = pl.BlockSpec((1, th * wout, cout_p), lambda b, hb: (b, hb, 0))

    def run(fused, single_buffer):
        if fused:
            kern = functools.partial(_conv_bn_silu_fused_kernel, k=k,
                                     stride=stride, dilation=dilation,
                                     th=th, wout=wout, cin=cin, act=act)
            scratch = [pltpu.VMEM((th, wout, kk * cin), jnp.bfloat16)]
        else:
            kern = functools.partial(_conv_bn_silu_pertap_kernel, k=k,
                                     stride=stride, dilation=dilation,
                                     th=th, wout=wout, cin=cin, act=act)
            scratch = []
        return pl.pallas_call(
            kern,
            out_shape=out_shape,
            grid_spec=pltpu.PrefetchScalarGridSpec(
                num_scalar_prefetch=0,
                grid=grid,
                in_specs=make_in_specs(single_buffer),
                out_specs=out_spec,
                scratch_shapes=scratch),
            compiler_params=compiler_params,
            cost_estimate=cost,
        )(x_nhwc, w_2d, shift_p)

    # Preferred path: fused im2col matmul + single-buffered resident inputs.
    # Fallback ladder keeps the module runnable if a given jax/Mosaic build
    # rejects pl.Buffered(1) or the lane-offset scratch stores.
    try:
        out3 = jax.block_until_ready(run(fused=True, single_buffer=True))
    except Exception:
        try:
            out3 = jax.block_until_ready(run(fused=True, single_buffer=False))
        except Exception:
            out3 = jax.block_until_ready(run(fused=False, single_buffer=False))

    out = out3.reshape(n, hout, wout, cout_p)[..., :cout]
    # Back to the PyTorch NCHW / f32 contract at the module boundary.
    return out.transpose(0, 3, 1, 2).astype(jnp.float32)


if __name__ == "__main__":
    # ConvBnAct(in_channel=4, out_channel=8, kernel=3, stride=1, padding=1)
    N, CIN, H, W = 2, 4, 16, 16
    COUT, K = 8, 3

    key = jax.random.PRNGKey(0)
    kx, kw, kg, kb, km, kv = jax.random.split(key, 6)

    x = jax.random.normal(kx, (N, CIN, H, W), dtype=jnp.float32)
    weight = 0.1 * jax.random.normal(kw, (COUT, CIN, K, K), dtype=jnp.float32)
    gamma = 1.0 + 0.1 * jax.random.normal(kg, (COUT,), dtype=jnp.float32)
    beta = 0.1 * jax.random.normal(kb, (COUT,), dtype=jnp.float32)
    running_mean = 0.05 * jax.random.normal(km, (COUT,), dtype=jnp.float32)
    running_var = jnp.abs(1.0 + 0.1 * jax.random.normal(kv, (COUT,), dtype=jnp.float32))

    out = conv_bn_act(x, weight, gamma, beta, running_mean, running_var,
                      stride=1, padding=1, dilation=1, act=True)
    out = jax.block_until_ready(out)
    assert out.shape == (N, COUT, H, W), out.shape

    # Loose-tolerance check vs. a pure-JAX f32 reference (the kernel uses bf16
    # MXU inputs and a bf16 output store; accumulation is f32).
    conv = jax.lax.conv_general_dilated(
        x, weight, window_strides=(1, 1), padding=((1, 1), (1, 1)),
        rhs_dilation=(1, 1), dimension_numbers=("NCHW", "OIHW", "NCHW"))
    scale = gamma / jnp.sqrt(running_var + 1e-5)
    ref = conv * scale[None, :, None, None] \
        + (beta - running_mean * scale)[None, :, None, None]
    ref = ref * jax.nn.sigmoid(ref)
    err = float(jnp.max(jnp.abs(out - ref)))
    assert err < 0.15, f"max abs err {err}"

    print("KERNEL_OK")
</pallas_src>

<mosaic_0001>
module attributes {stable_mosaic.version = 11 : i64} {
  func.func @_conv_bn_silu_fused_kernel(%arg0: i32, %arg1: i32, %arg2: memref<1x18x18x4xbf16, #tpu.memory_space<vmem>>, %arg3: memref<36x128xbf16, #tpu.memory_space<vmem>>, %arg4: memref<1x128xf32, #tpu.memory_space<vmem>>, %arg5: memref<1x256x128xbf16, #tpu.memory_space<vmem>>, %arg6: memref<16x16x36xbf16, #tpu.memory_space<vmem>>) attributes {dimension_semantics = [#tpu.dimension_semantics<parallel>, #tpu.dimension_semantics<arbitrary>], iteration_bounds = array<i64: 2, 1>, scalar_prefetch = 0 : i64, scratch_operands = 1 : i64, tpu.core_type = #tpu.core_type<tc>, window_params = [{pipeline_mode = #tpu.pipeline_mode<synchronous>, transform_indices = @transform_0, window_bounds = array<i64: 1, 18, 18, 4>}, {pipeline_mode = #tpu.pipeline_mode<synchronous>, transform_indices = @transform_1, window_bounds = array<i64: 36, 128>}, {pipeline_mode = #tpu.pipeline_mode<synchronous>, transform_indices = @transform_2, window_bounds = array<i64: 1, 128>}, {transform_indices = @transform_3, window_bounds = array<i64: 1, 256, 128>}]} {
    %c16_i32 = arith.constant 16 : i32
    %0 = arith.muli %arg1, %c16_i32 : i32
    %1 = tpu.assume_multiple %0, 16 : i32
    %c0_i32 = arith.constant 0 : i32
    %2 = arith.addi %1, %c0_i32 : i32
    %c0 = arith.constant 0 : index
    %3 = arith.index_cast %2 : i32 to index
    %c0_0 = arith.constant 0 : index
    %c0_1 = arith.constant 0 : index
    %4 = vector.load %arg2[%c0, %3, %c0_0, %c0_1] : memref<1x18x18x4xbf16, #tpu.memory_space<vmem>>, vector<1x16x16x4xbf16>
    %5 = vector.shape_cast %4 : vector<1x16x16x4xbf16> to vector<16x16x4xbf16>
    %c0_2 = arith.constant 0 : index
    %c0_3 = arith.constant 0 : index
    %c0_4 = arith.constant 0 : index
    %6 = vector.load %arg6[%c0_2, %c0_3, %c0_4] : memref<16x16x36xbf16, #tpu.memory_space<vmem>>, vector<16x16x4xbf16>
    tpu.vector_store %arg6[%c0_2, %c0_3, %c0_4], %5 {strides = array<i32>} : memref<16x16x36xbf16, #tpu.memory_space<vmem>>, vector<16x16x4xbf16>,
    %c0_i32_5 = arith.constant 0 : i32
    %7 = arith.addi %1, %c0_i32_5 : i32
    %c0_6 = arith.constant 0 : index
    %8 = arith.index_cast %7 : i32 to index
    %c1 = arith.constant 1 : index
    %c0_7 = arith.constant 0 : index
    %9 = vector.load %arg2[%c0_6, %8, %c1, %c0_7] : memref<1x18x18x4xbf16, #tpu.memory_space<vmem>>, vector<1x16x16x4xbf16>
    %10 = vector.shape_cast %9 : vector<1x16x16x4xbf16> to vector<16x16x4xbf16>
    %c0_8 = arith.constant 0 : index
    %c0_9 = arith.constant 0 : index
    %c4 = arith.constant 4 : index
    %11 = vector.load %arg6[%c0_8, %c0_9, %c4] : memref<16x16x36xbf16, #tpu.memory_space<vmem>>, vector<16x16x4xbf16>
    tpu.vector_store %arg6[%c0_8, %c0_9, %c4], %10 {strides = array<i32>} : memref<16x16x36xbf16, #tpu.memory_space<vmem>>, vector<16x16x4xbf16>,
    %c0_i32_10 = arith.constant 0 : i32
    %12 = arith.addi %1, %c0_i32_10 : i32
    %c0_11 = arith.constant 0 : index
    %13 = arith.index_cast %12 : i32 to index
    %c2 = arith.constant 2 : index
    %c0_12 = arith.constant 0 : index
    %14 = vector.load %arg2[%c0_11, %13, %c2, %c0_12] : memref<1x18x18x4xbf16, #tpu.memory_space<vmem>>, vector<1x16x16x4xbf16>
    %15 = vector.shape_cast %14 : vector<1x16x16x4xbf16> to vector<16x16x4xbf16>
    %c0_13 = arith.constant 0 : index
    %c0_14 = arith.constant 0 : index
    %c8 = arith.constant 8 : index
    %16 = vector.load %arg6[%c0_13, %c0_14, %c8] : memref<16x16x36xbf16, #tpu.memory_space<vmem>>, vector<16x16x4xbf16>
    tpu.vector_store %arg6[%c0_13, %c0_14, %c8], %15 {strides = array<i32>} : memref<16x16x36xbf16, #tpu.memory_space<vmem>>, vector<16x16x4xbf16>,
    %c1_i32 = arith.constant 1 : i32
    %17 = arith.addi %1, %c1_i32 : i32
    %c0_15 = arith.constant 0 : index
    %18 = arith.index_cast %17 : i32 to index
    %c0_16 = arith.constant 0 : index
    %c0_17 = arith.constant 0 : index
    %19 = vector.load %arg2[%c0_15, %18, %c0_16, %c0_17] : memref<1x18x18x4xbf16, #tpu.memory_space<vmem>>, vector<1x16x16x4xbf16>
    %20 = vector.shape_cast %19 : vector<1x16x16x4xbf16> to vector<16x16x4xbf16>
    %c0_18 = arith.constant 0 : index
    %c0_19 = arith.constant 0 : index
    %c12 = arith.constant 12 : index
    %21 = vector.load %arg6[%c0_18, %c0_19, %c12] : memref<16x16x36xbf16, #tpu.memory_space<vmem>>, vector<16x16x4xbf16>
    tpu.vector_store %arg6[%c0_18, %c0_19, %c12], %20 {strides = array<i32>} : memref<16x16x36xbf16, #tpu.memory_space<vmem>>, vector<16x16x4xbf16>,
    %c1_i32_20 = arith.constant 1 : i32
    %22 = arith.addi %1, %c1_i32_20 : i32
    %c0_21 = arith.constant 0 : index
    %23 = arith.index_cast %22 : i32 to index
    %c1_22 = arith.constant 1 : index
    %c0_23 = arith.constant 0 : index
    %24 = vector.load %arg2[%c0_21, %23, %c1_22, %c0_23] : memref<1x18x18x4xbf16, #tpu.memory_space<vmem>>, vector<1x16x16x4xbf16>
    %25 = vector.shape_cast %24 : vector<1x16x16x4xbf16> to vector<16x16x4xbf16>
    %c0_24 = arith.constant 0 : index
    %c0_25 = arith.constant 0 : index
    %c16 = arith.constant 16 : index
    %26 = vector.load %arg6[%c0_24, %c0_25, %c16] : memref<16x16x36xbf16, #tpu.memory_space<vmem>>, vector<16x16x4xbf16>
    tpu.vector_store %arg6[%c0_24, %c0_25, %c16], %25 {strides = array<i32>} : memref<16x16x36xbf16, #tpu.memory_space<vmem>>, vector<16x16x4xbf16>,
    %c1_i32_26 = arith.constant 1 : i32
    %27 = arith.addi %1, %c1_i32_26 : i32
    %c0_27 = arith.constant 0 : index
    %28 = arith.index_cast %27 : i32 to index
    %c2_28 = arith.constant 2 : index
    %c0_29 = arith.constant 0 : index
    %29 = vector.load %arg2[%c0_27, %28, %c2_28, %c0_29] : memref<1x18x18x4xbf16, #tpu.memory_space<vmem>>, vector<1x16x16x4xbf16>
    %30 = vector.shape_cast %29 : vector<1x16x16x4xbf16> to vector<16x16x4xbf16>
    %c0_30 = arith.constant 0 : index
    %c0_31 = arith.constant 0 : index
    %c20 = arith.constant 20 : index
    %31 = vector.load %arg6[%c0_30, %c0_31, %c20] : memref<16x16x36xbf16, #tpu.memory_space<vmem>>, vector<16x16x4xbf16>
    tpu.vector_store %arg6[%c0_30, %c0_31, %c20], %30 {strides = array<i32>} : memref<16x16x36xbf16, #tpu.memory_space<vmem>>, vector<16x16x4xbf16>,
    %c2_i32 = arith.constant 2 : i32
    %32 = arith.addi %1, %c2_i32 : i32
    %c0_32 = arith.constant 0 : index
    %33 = arith.index_cast %32 : i32 to index
    %c0_33 = arith.constant 0 : index
    %c0_34 = arith.constant 0 : index
    %34 = vector.load %arg2[%c0_32, %33, %c0_33, %c0_34] : memref<1x18x18x4xbf16, #tpu.memory_space<vmem>>, vector<1x16x16x4xbf16>
    %35 = vector.shape_cast %34 : vector<1x16x16x4xbf16> to vector<16x16x4xbf16>
    %c0_35 = arith.constant 0 : index
    %c0_36 = arith.constant 0 : index
    %c24 = arith.constant 24 : index
    %36 = vector.load %arg6[%c0_35, %c0_36, %c24] : memref<16x16x36xbf16, #tpu.memory_space<vmem>>, vector<16x16x4xbf16>
    tpu.vector_store %arg6[%c0_35, %c0_36, %c24], %35 {strides = array<i32>} : memref<16x16x36xbf16, #tpu.memory_space<vmem>>, vector<16x16x4xbf16>,
    %c2_i32_37 = arith.constant 2 : i32
    %37 = arith.addi %1, %c2_i32_37 : i32
    %c0_38 = arith.constant 0 : index
    %38 = arith.index_cast %37 : i32 to index
    %c1_39 = arith.constant 1 : index
    %c0_40 = arith.constant 0 : index
    %39 = vector.load %arg2[%c0_38, %38, %c1_39, %c0_40] : memref<1x18x18x4xbf16, #tpu.memory_space<vmem>>, vector<1x16x16x4xbf16>
    %40 = vector.shape_cast %39 : vector<1x16x16x4xbf16> to vector<16x16x4xbf16>
    %c0_41 = arith.constant 0 : index
    %c0_42 = arith.constant 0 : index
    %c28 = arith.constant 28 : index
    %41 = vector.load %arg6[%c0_41, %c0_42, %c28] : memref<16x16x36xbf16, #tpu.memory_space<vmem>>, vector<16x16x4xbf16>
    tpu.vector_store %arg6[%c0_41, %c0_42, %c28], %40 {strides = array<i32>} : memref<16x16x36xbf16, #tpu.memory_space<vmem>>, vector<16x16x4xbf16>,
    %c2_i32_43 = arith.constant 2 : i32
    %42 = arith.addi %1, %c2_i32_43 : i32
    %c0_44 = arith.constant 0 : index
    %43 = arith.index_cast %42 : i32 to index
    %c2_45 = arith.constant 2 : index
    %c0_46 = arith.constant 0 : index
    %44 = vector.load %arg2[%c0_44, %43, %c2_45, %c0_46] : memref<1x18x18x4xbf16, #tpu.memory_space<vmem>>, vector<1x16x16x4xbf16>
    %45 = vector.shape_cast %44 : vector<1x16x16x4xbf16> to vector<16x16x4xbf16>
    %c0_47 = arith.constant 0 : index
    %c0_48 = arith.constant 0 : index
    %c32 = arith.constant 32 : index
    %46 = vector.load %arg6[%c0_47, %c0_48, %c32] : memref<16x16x36xbf16, #tpu.memory_space<vmem>>, vector<16x16x4xbf16>
    tpu.vector_store %arg6[%c0_47, %c0_48, %c32], %45 {strides = array<i32>} : memref<16x16x36xbf16, #tpu.memory_space<vmem>>, vector<16x16x4xbf16>,
    %c0_49 = arith.constant 0 : index
    %c0_50 = arith.constant 0 : index
    %c0_51 = arith.constant 0 : index
    %47 = vector.load %arg6[%c0_49, %c0_50, %c0_51] : memref<16x16x36xbf16, #tpu.memory_space<vmem>>, vector<16x16x36xbf16>
    %48 = vector.shape_cast %47 : vector<16x16x36xbf16> to vector<256x36xbf16>
    %c0_52 = arith.constant 0 : index
    %c0_53 = arith.constant 0 : index
    %49 = vector.load %arg3[%c0_52, %c0_53] : memref<36x128xbf16, #tpu.memory_space<vmem>>, vector<36x128xbf16>
    %cst = arith.constant dense<0.000000e+00> : vector<256x128xf32>
    %50 = tpu.matmul %48, %49, %cst {dimension_numbers = #tpu.dot_dimension_numbers<[1], [0], [0], [1], [0, 0, 1, 1], [], []>} : vector<256x36xbf16>, vector<36x128xbf16>, vector<256x128xf32> -> vector<256x128xf32>
    %c0_54 = arith.constant 0 : index
    %c0_55 = arith.constant 0 : index
    %51 = vector.load %arg4[%c0_54, %c0_55] : memref<1x128xf32, #tpu.memory_space<vmem>>, vector<1x128xf32>
    %52 = vector.broadcast %51 : vector<1x128xf32> to vector<256x128xf32>
    %53 = arith.addf %50, %52 : vector<256x128xf32>
    %54 = arith.negf %53 : vector<256x128xf32>
    %55 = math.exp %54 : vector<256x128xf32>
    %cst_56 = arith.constant 1.000000e+00 : f32
    %56 = vector.broadcast %cst_56 : f32 to vector<256x128xf32>
    %57 = arith.addf %56, %55 : vector<256x128xf32>
    %58 = arith.divf %56, %57 : vector<256x128xf32>
    %59 = arith.mulf %53, %58 : vector<256x128xf32>
    %60 = arith.truncf %59 : vector<256x128xf32> to vector<256x128xbf16>
    %c0_57 = arith.constant 0 : index
    %c0_58 = arith.constant 0 : index
    %c0_59 = arith.constant 0 : index
    %61 = vector.load %arg5[%c0_57, %c0_58, %c0_59] : memref<1x256x128xbf16, #tpu.memory_space<vmem>>, vector<1x256x128xbf16>
    %62 = vector.shape_cast %61 : vector<1x256x128xbf16> to vector<256x128xbf16>
    %63 = vector.shape_cast %60 : vector<256x128xbf16> to vector<1x256x128xbf16>
    tpu.vector_store %arg5[%c0_57, %c0_58, %c0_59], %63 {strides = array<i32>} : memref<1x256x128xbf16, #tpu.memory_space<vmem>>, vector<1x256x128xbf16>,
    return
  }
  func.func @transform_0(%arg0: i32, %arg1: i32) -> (i32, i32, i32, i32) {
    %c0_i32 = arith.constant 0 : i32
    %c0_i32_0 = arith.constant 0 : i32
    %c0_i32_1 = arith.constant 0 : i32
    %c0_i32_2 = arith.constant 0 : i32
    return %arg0, %c0_i32, %c0_i32_0, %c0_i32_1 : i32, i32, i32, i32
  }
  func.func @transform_1(%arg0: i32, %arg1: i32) -> (i32, i32) {
    %c0_i32 = arith.constant 0 : i32
    %c0_i32_0 = arith.constant 0 : i32
    %c0_i32_1 = arith.constant 0 : i32
    return %c0_i32, %c0_i32_0 : i32, i32
  }
  func.func @transform_2(%arg0: i32, %arg1: i32) -> (i32, i32) {
    %c0_i32 = arith.constant 0 : i32
    %c0_i32_0 = arith.constant 0 : i32
    %c0_i32_1 = arith.constant 0 : i32
    return %c0_i32, %c0_i32_0 : i32, i32
  }
  func.func @transform_3(%arg0: i32, %arg1: i32) -> (i32, i32, i32) {
    %c0_i32 = arith.constant 0 : i32
    %c0_i32_0 = arith.constant 0 : i32
    return %arg0, %arg1, %c0_i32 : i32, i32, i32
  }
}

module attributes {stable_mosaic.version = 11 : i64} {
  func.func @_conv_bn_silu_fused_kernel(%arg0: i32, %arg1: i32, %arg2: memref<1x18x18x4xbf16, #tpu.memory_space<vmem>>, %arg3: memref<36x128xbf16, #tpu.memory_space<vmem>>, %arg4: memref<1x128xf32, #tpu.memory_space<vmem>>, %arg5: memref<1x256x128xbf16, #tpu.memory_space<vmem>>, %arg6: memref<16x16x36xbf16, #tpu.memory_space<vmem>>) attributes {dimension_semantics = [#tpu.dimension_semantics<parallel>, #tpu.dimension_semantics<arbitrary>], iteration_bounds = array<i64: 2, 1>, scalar_prefetch = 0 : i64, scratch_operands = 1 : i64, tpu.core_type = #tpu.core_type<tc>, window_params = [{transform_indices = @transform_0, window_bounds = array<i64: 1, 18, 18, 4>}, {pipeline_mode = #tpu.pipeline_mode<synchronous>, transform_indices = @transform_1, window_bounds = array<i64: 36, 128>}, {pipeline_mode = #tpu.pipeline_mode<synchronous>, transform_indices = @transform_2, window_bounds = array<i64: 1, 128>}, {transform_indices = @transform_3, window_bounds = array<i64: 1, 256, 128>}]} {
    %c16_i32 = arith.constant 16 : i32
    %0 = arith.muli %arg1, %c16_i32 : i32
    %1 = tpu.assume_multiple %0, 16 : i32
    %c0_i32 = arith.constant 0 : i32
    %2 = arith.addi %1, %c0_i32 : i32
    %c0 = arith.constant 0 : index
    %3 = arith.index_cast %2 : i32 to index
    %c0_0 = arith.constant 0 : index
    %c0_1 = arith.constant 0 : index
    %4 = vector.load %arg2[%c0, %3, %c0_0, %c0_1] : memref<1x18x18x4xbf16, #tpu.memory_space<vmem>>, vector<1x16x16x4xbf16>
    %5 = vector.shape_cast %4 : vector<1x16x16x4xbf16> to vector<16x16x4xbf16>
    %c0_2 = arith.constant 0 : index
    %c0_3 = arith.constant 0 : index
    %c0_4 = arith.constant 0 : index
    %6 = vector.load %arg6[%c0_2, %c0_3, %c0_4] : memref<16x16x36xbf16, #tpu.memory_space<vmem>>, vector<16x16x4xbf16>
    tpu.vector_store %arg6[%c0_2, %c0_3, %c0_4], %5 {strides = array<i32>} : memref<16x16x36xbf16, #tpu.memory_space<vmem>>, vector<16x16x4xbf16>,
    %c0_i32_5 = arith.constant 0 : i32
    %7 = arith.addi %1, %c0_i32_5 : i32
    %c0_6 = arith.constant 0 : index
    %8 = arith.index_cast %7 : i32 to index
    %c1 = arith.constant 1 : index
    %c0_7 = arith.constant 0 : index
    %9 = vector.load %arg2[%c0_6, %8, %c1, %c0_7] : memref<1x18x18x4xbf16, #tpu.memory_space<vmem>>, vector<1x16x16x4xbf16>
    %10 = vector.shape_cast %9 : vector<1x16x16x4xbf16> to vector<16x16x4xbf16>
    %c0_8 = arith.constant 0 : index
    %c0_9 = arith.constant 0 : index
    %c4 = arith.constant 4 : index
    %11 = vector.load %arg6[%c0_8, %c0_9, %c4] : memref<16x16x36xbf16, #tpu.memory_space<vmem>>, vector<16x16x4xbf16>
    tpu.vector_store %arg6[%c0_8, %c0_9, %c4], %10 {strides = array<i32>} : memref<16x16x36xbf16, #tpu.memory_space<vmem>>, vector<16x16x4xbf16>,
    %c0_i32_10 = arith.constant 0 : i32
    %12 = arith.addi %1, %c0_i32_10 : i32
    %c0_11 = arith.constant 0 : index
    %13 = arith.index_cast %12 : i32 to index
    %c2 = arith.constant 2 : index
    %c0_12 = arith.constant 0 : index
    %14 = vector.load %arg2[%c0_11, %13, %c2, %c0_12] : memref<1x18x18x4xbf16, #tpu.memory_space<vmem>>, vector<1x16x16x4xbf16>
    %15 = vector.shape_cast %14 : vector<1x16x16x4xbf16> to vector<16x16x4xbf16>
    %c0_13 = arith.constant 0 : index
    %c0_14 = arith.constant 0 : index
    %c8 = arith.constant 8 : index
    %16 = vector.load %arg6[%c0_13, %c0_14, %c8] : memref<16x16x36xbf16, #tpu.memory_space<vmem>>, vector<16x16x4xbf16>
    tpu.vector_store %arg6[%c0_13, %c0_14, %c8], %15 {strides = array<i32>} : memref<16x16x36xbf16, #tpu.memory_space<vmem>>, vector<16x16x4xbf16>,
    %c1_i32 = arith.constant 1 : i32
    %17 = arith.addi %1, %c1_i32 : i32
    %c0_15 = arith.constant 0 : index
    %18 = arith.index_cast %17 : i32 to index
    %c0_16 = arith.constant 0 : index
    %c0_17 = arith.constant 0 : index
    %19 = vector.load %arg2[%c0_15, %18, %c0_16, %c0_17] : memref<1x18x18x4xbf16, #tpu.memory_space<vmem>>, vector<1x16x16x4xbf16>
    %20 = vector.shape_cast %19 : vector<1x16x16x4xbf16> to vector<16x16x4xbf16>
    %c0_18 = arith.constant 0 : index
    %c0_19 = arith.constant 0 : index
    %c12 = arith.constant 12 : index
    %21 = vector.load %arg6[%c0_18, %c0_19, %c12] : memref<16x16x36xbf16, #tpu.memory_space<vmem>>, vector<16x16x4xbf16>
    tpu.vector_store %arg6[%c0_18, %c0_19, %c12], %20 {strides = array<i32>} : memref<16x16x36xbf16, #tpu.memory_space<vmem>>, vector<16x16x4xbf16>,
    %c1_i32_20 = arith.constant 1 : i32
    %22 = arith.addi %1, %c1_i32_20 : i32
    %c0_21 = arith.constant 0 : index
    %23 = arith.index_cast %22 : i32 to index
    %c1_22 = arith.constant 1 : index
    %c0_23 = arith.constant 0 : index
    %24 = vector.load %arg2[%c0_21, %23, %c1_22, %c0_23] : memref<1x18x18x4xbf16, #tpu.memory_space<vmem>>, vector<1x16x16x4xbf16>
    %25 = vector.shape_cast %24 : vector<1x16x16x4xbf16> to vector<16x16x4xbf16>
    %c0_24 = arith.constant 0 : index
    %c0_25 = arith.constant 0 : index
    %c16 = arith.constant 16 : index
    %26 = vector.load %arg6[%c0_24, %c0_25, %c16] : memref<16x16x36xbf16, #tpu.memory_space<vmem>>, vector<16x16x4xbf16>
    tpu.vector_store %arg6[%c0_24, %c0_25, %c16], %25 {strides = array<i32>} : memref<16x16x36xbf16, #tpu.memory_space<vmem>>, vector<16x16x4xbf16>,
    %c1_i32_26 = arith.constant 1 : i32
    %27 = arith.addi %1, %c1_i32_26 : i32
    %c0_27 = arith.constant 0 : index
    %28 = arith.index_cast %27 : i32 to index
    %c2_28 = arith.constant 2 : index
    %c0_29 = arith.constant 0 : index
    %29 = vector.load %arg2[%c0_27, %28, %c2_28, %c0_29] : memref<1x18x18x4xbf16, #tpu.memory_space<vmem>>, vector<1x16x16x4xbf16>
    %30 = vector.shape_cast %29 : vector<1x16x16x4xbf16> to vector<16x16x4xbf16>
    %c0_30 = arith.constant 0 : index
    %c0_31 = arith.constant 0 : index
    %c20 = arith.constant 20 : index
    %31 = vector.load %arg6[%c0_30, %c0_31, %c20] : memref<16x16x36xbf16, #tpu.memory_space<vmem>>, vector<16x16x4xbf16>
    tpu.vector_store %arg6[%c0_30, %c0_31, %c20], %30 {strides = array<i32>} : memref<16x16x36xbf16, #tpu.memory_space<vmem>>, vector<16x16x4xbf16>,
    %c2_i32 = arith.constant 2 : i32
    %32 = arith.addi %1, %c2_i32 : i32
    %c0_32 = arith.constant 0 : index
    %33 = arith.index_cast %32 : i32 to index
    %c0_33 = arith.constant 0 : index
    %c0_34 = arith.constant 0 : index
    %34 = vector.load %arg2[%c0_32, %33, %c0_33, %c0_34] : memref<1x18x18x4xbf16, #tpu.memory_space<vmem>>, vector<1x16x16x4xbf16>
    %35 = vector.shape_cast %34 : vector<1x16x16x4xbf16> to vector<16x16x4xbf16>
    %c0_35 = arith.constant 0 : index
    %c0_36 = arith.constant 0 : index
    %c24 = arith.constant 24 : index
    %36 = vector.load %arg6[%c0_35, %c0_36, %c24] : memref<16x16x36xbf16, #tpu.memory_space<vmem>>, vector<16x16x4xbf16>
    tpu.vector_store %arg6[%c0_35, %c0_36, %c24], %35 {strides = array<i32>} : memref<16x16x36xbf16, #tpu.memory_space<vmem>>, vector<16x16x4xbf16>,
    %c2_i32_37 = arith.constant 2 : i32
    %37 = arith.addi %1, %c2_i32_37 : i32
    %c0_38 = arith.constant 0 : index
    %38 = arith.index_cast %37 : i32 to index
    %c1_39 = arith.constant 1 : index
    %c0_40 = arith.constant 0 : index
    %39 = vector.load %arg2[%c0_38, %38, %c1_39, %c0_40] : memref<1x18x18x4xbf16, #tpu.memory_space<vmem>>, vector<1x16x16x4xbf16>
    %40 = vector.shape_cast %39 : vector<1x16x16x4xbf16> to vector<16x16x4xbf16>
    %c0_41 = arith.constant 0 : index
    %c0_42 = arith.constant 0 : index
    %c28 = arith.constant 28 : index
    %41 = vector.load %arg6[%c0_41, %c0_42, %c28] : memref<16x16x36xbf16, #tpu.memory_space<vmem>>, vector<16x16x4xbf16>
    tpu.vector_store %arg6[%c0_41, %c0_42, %c28], %40 {strides = array<i32>} : memref<16x16x36xbf16, #tpu.memory_space<vmem>>, vector<16x16x4xbf16>,
    %c2_i32_43 = arith.constant 2 : i32
    %42 = arith.addi %1, %c2_i32_43 : i32
    %c0_44 = arith.constant 0 : index
    %43 = arith.index_cast %42 : i32 to index
    %c2_45 = arith.constant 2 : index
    %c0_46 = arith.constant 0 : index
    %44 = vector.load %arg2[%c0_44, %43, %c2_45, %c0_46] : memref<1x18x18x4xbf16, #tpu.memory_space<vmem>>, vector<1x16x16x4xbf16>
    %45 = vector.shape_cast %44 : vector<1x16x16x4xbf16> to vector<16x16x4xbf16>
    %c0_47 = arith.constant 0 : index
    %c0_48 = arith.constant 0 : index
    %c32 = arith.constant 32 : index
    %46 = vector.load %arg6[%c0_47, %c0_48, %c32] : memref<16x16x36xbf16, #tpu.memory_space<vmem>>, vector<16x16x4xbf16>
    tpu.vector_store %arg6[%c0_47, %c0_48, %c32], %45 {strides = array<i32>} : memref<16x16x36xbf16, #tpu.memory_space<vmem>>, vector<16x16x4xbf16>,
    %c0_49 = arith.constant 0 : index
    %c0_50 = arith.constant 0 : index
    %c0_51 = arith.constant 0 : index
    %47 = vector.load %arg6[%c0_49, %c0_50, %c0_51] : memref<16x16x36xbf16, #tpu.memory_space<vmem>>, vector<16x16x36xbf16>
    %48 = vector.shape_cast %47 : vector<16x16x36xbf16> to vector<256x36xbf16>
    %c0_52 = arith.constant 0 : index
    %c0_53 = arith.constant 0 : index
    %49 = vector.load %arg3[%c0_52, %c0_53] : memref<36x128xbf16, #tpu.memory_space<vmem>>, vector<36x128xbf16>
    %cst = arith.constant dense<0.000000e+00> : vector<256x128xf32>
    %50 = tpu.matmul %48, %49, %cst {dimension_numbers = #tpu.dot_dimension_numbers<[1], [0], [0], [1], [0, 0, 1, 1], [], []>} : vector<256x36xbf16>, vector<36x128xbf16>, vector<256x128xf32> -> vector<256x128xf32>
    %c0_54 = arith.constant 0 : index
    %c0_55 = arith.constant 0 : index
    %51 = vector.load %arg4[%c0_54, %c0_55] : memref<1x128xf32, #tpu.memory_space<vmem>>, vector<1x128xf32>
    %52 = vector.broadcast %51 : vector<1x128xf32> to vector<256x128xf32>
    %53 = arith.addf %50, %52 : vector<256x128xf32>
    %54 = arith.negf %53 : vector<256x128xf32>
    %55 = math.exp %54 : vector<256x128xf32>
    %cst_56 = arith.constant 1.000000e+00 : f32
    %56 = vector.broadcast %cst_56 : f32 to vector<256x128xf32>
    %57 = arith.addf %56, %55 : vector<256x128xf32>
    %58 = arith.divf %56, %57 : vector<256x128xf32>
    %59 = arith.mulf %53, %58 : vector<256x128xf32>
    %60 = arith.truncf %59 : vector<256x128xf32> to vector<256x128xbf16>
    %c0_57 = arith.constant 0 : index
    %c0_58 = arith.constant 0 : index
    %c0_59 = arith.constant 0 : index
    %61 = vector.load %arg5[%c0_57, %c0_58, %c0_59] : memref<1x256x128xbf16, #tpu.memory_space<vmem>>, vector<1x256x128xbf16>
    %62 = vector.shape_cast %61 : vector<1x256x128xbf16> to vector<256x128xbf16>
    %63 = vector.shape_cast %60 : vector<256x128xbf16> to vector<1x256x128xbf16>
    tpu.vector_store %arg5[%c0_57, %c0_58, %c0_59], %63 {strides = array<i32>} : memref<1x256x128xbf16, #tpu.memory_space<vmem>>, vector<1x256x128xbf16>,
    return
  }
  func.func @transform_0(%arg0: i32, %arg1: i32) -> (i32, i32, i32, i32) {
    %c0_i32 = arith.constant 0 : i32
    %c0_i32_0 = arith.constant 0 : i32
    %c0_i32_1 = arith.constant 0 : i32
    %c0_i32_2 = arith.constant 0 : i32
    return %arg0, %c0_i32, %c0_i32_0, %c0_i32_1 : i32, i32, i32, i32
  }
  func.func @transform_1(%arg0: i32, %arg1: i32) -> (i32, i32) {
    %c0_i32 = arith.constant 0 : i32
    %c0_i32_0 = arith.constant 0 : i32
    %c0_i32_1 = arith.constant 0 : i32
    return %c0_i32, %c0_i32_0 : i32, i32
  }
  func.func @transform_2(%arg0: i32, %arg1: i32) -> (i32, i32) {
    %c0_i32 = arith.constant 0 : i32
    %c0_i32_0 = arith.constant 0 : i32
    %c0_i32_1 = arith.constant 0 : i32
    return %c0_i32, %c0_i32_0 : i32, i32
  }
  func.func @transform_3(%arg0: i32, %arg1: i32) -> (i32, i32, i32) {
    %c0_i32 = arith.constant 0 : i32
    %c0_i32_0 = arith.constant 0 : i32
    return %arg0, %arg1, %c0_i32 : i32, i32, i32
  }
}

module attributes {stable_mosaic.version = 11 : i64} {
  func.func @_conv_bn_silu_pertap_kernel(%arg0: i32, %arg1: i32, %arg2: memref<1x18x18x4xbf16, #tpu.memory_space<vmem>>, %arg3: memref<36x128xbf16, #tpu.memory_space<vmem>>, %arg4: memref<1x128xf32, #tpu.memory_space<vmem>>, %arg5: memref<1x256x128xbf16, #tpu.memory_space<vmem>>) attributes {dimension_semantics = [#tpu.dimension_semantics<parallel>, #tpu.dimension_semantics<arbitrary>], iteration_bounds = array<i64: 2, 1>, scalar_prefetch = 0 : i64, scratch_operands = 0 : i64, tpu.core_type = #tpu.core_type<tc>, window_params = [{transform_indices = @transform_0, window_bounds = array<i64: 1, 18, 18, 4>}, {pipeline_mode = #tpu.pipeline_mode<synchronous>, transform_indices = @transform_1, window_bounds = array<i64: 36, 128>}, {pipeline_mode = #tpu.pipeline_mode<synchronous>, transform_indices = @transform_2, window_bounds = array<i64: 1, 128>}, {transform_indices = @transform_3, window_bounds = array<i64: 1, 256, 128>}]} {
    %c16_i32 = arith.constant 16 : i32
    %0 = arith.muli %arg1, %c16_i32 : i32
    %1 = tpu.assume_multiple %0, 16 : i32
    %c0_i32 = arith.constant 0 : i32
    %2 = arith.addi %1, %c0_i32 : i32
    %c0 = arith.constant 0 : index
    %3 = arith.index_cast %2 : i32 to index
    %c0_0 = arith.constant 0 : index
    %c0_1 = arith.constant 0 : index
    %4 = vector.load %arg2[%c0, %3, %c0_0, %c0_1] : memref<1x18x18x4xbf16, #tpu.memory_space<vmem>>, vector<1x16x16x4xbf16>
    %5 = vector.shape_cast %4 : vector<1x16x16x4xbf16> to vector<16x16x4xbf16>
    %6 = vector.shape_cast %5 : vector<16x16x4xbf16> to vector<256x4xbf16>
    %c0_2 = arith.constant 0 : index
    %c0_3 = arith.constant 0 : index
    %7 = vector.load %arg3[%c0_2, %c0_3] : memref<36x128xbf16, #tpu.memory_space<vmem>>, vector<4x128xbf16>
    %cst = arith.constant dense<0.000000e+00> : vector<256x128xf32>
    %8 = tpu.matmul %6, %7, %cst {dimension_numbers = #tpu.dot_dimension_numbers<[1], [0], [0], [1], [0, 0, 1, 1], [], []>} : vector<256x4xbf16>, vector<4x128xbf16>, vector<256x128xf32> -> vector<256x128xf32>
    %c0_i32_4 = arith.constant 0 : i32
    %9 = arith.addi %1, %c0_i32_4 : i32
    %c0_5 = arith.constant 0 : index
    %10 = arith.index_cast %9 : i32 to index
    %c1 = arith.constant 1 : index
    %c0_6 = arith.constant 0 : index
    %11 = vector.load %arg2[%c0_5, %10, %c1, %c0_6] : memref<1x18x18x4xbf16, #tpu.memory_space<vmem>>, vector<1x16x16x4xbf16>
    %12 = vector.shape_cast %11 : vector<1x16x16x4xbf16> to vector<16x16x4xbf16>
    %13 = vector.shape_cast %12 : vector<16x16x4xbf16> to vector<256x4xbf16>
    %c4 = arith.constant 4 : index
    %c0_7 = arith.constant 0 : index
    %14 = vector.load %arg3[%c4, %c0_7] : memref<36x128xbf16, #tpu.memory_space<vmem>>, vector<4x128xbf16>
    %cst_8 = arith.constant dense<0.000000e+00> : vector<256x128xf32>
    %15 = tpu.matmul %13, %14, %cst_8 {dimension_numbers = #tpu.dot_dimension_numbers<[1], [0], [0], [1], [0, 0, 1, 1], [], []>} : vector<256x4xbf16>, vector<4x128xbf16>, vector<256x128xf32> -> vector<256x128xf32>
    %16 = arith.addf %8, %15 : vector<256x128xf32>
    %c0_i32_9 = arith.constant 0 : i32
    %17 = arith.addi %1, %c0_i32_9 : i32
    %c0_10 = arith.constant 0 : index
    %18 = arith.index_cast %17 : i32 to index
    %c2 = arith.constant 2 : index
    %c0_11 = arith.constant 0 : index
    %19 = vector.load %arg2[%c0_10, %18, %c2, %c0_11] : memref<1x18x18x4xbf16, #tpu.memory_space<vmem>>, vector<1x16x16x4xbf16>
    %20 = vector.shape_cast %19 : vector<1x16x16x4xbf16> to vector<16x16x4xbf16>
    %21 = vector.shape_cast %20 : vector<16x16x4xbf16> to vector<256x4xbf16>
    %c8 = arith.constant 8 : index
    %c0_12 = arith.constant 0 : index
    %22 = vector.load %arg3[%c8, %c0_12] : memref<36x128xbf16, #tpu.memory_space<vmem>>, vector<4x128xbf16>
    %cst_13 = arith.constant dense<0.000000e+00> : vector<256x128xf32>
    %23 = tpu.matmul %21, %22, %cst_13 {dimension_numbers = #tpu.dot_dimension_numbers<[1], [0], [0], [1], [0, 0, 1, 1], [], []>} : vector<256x4xbf16>, vector<4x128xbf16>, vector<256x128xf32> -> vector<256x128xf32>
    %24 = arith.addf %16, %23 : vector<256x128xf32>
    %c1_i32 = arith.constant 1 : i32
    %25 = arith.addi %1, %c1_i32 : i32
    %c0_14 = arith.constant 0 : index
    %26 = arith.index_cast %25 : i32 to index
    %c0_15 = arith.constant 0 : index
    %c0_16 = arith.constant 0 : index
    %27 = vector.load %arg2[%c0_14, %26, %c0_15, %c0_16] : memref<1x18x18x4xbf16, #tpu.memory_space<vmem>>, vector<1x16x16x4xbf16>
    %28 = vector.shape_cast %27 : vector<1x16x16x4xbf16> to vector<16x16x4xbf16>
    %29 = vector.shape_cast %28 : vector<16x16x4xbf16> to vector<256x4xbf16>
    %c12 = arith.constant 12 : index
    %c0_17 = arith.constant 0 : index
    %30 = vector.load %arg3[%c12, %c0_17] : memref<36x128xbf16, #tpu.memory_space<vmem>>, vector<4x128xbf16>
    %cst_18 = arith.constant dense<0.000000e+00> : vector<256x128xf32>
    %31 = tpu.matmul %29, %30, %cst_18 {dimension_numbers = #tpu.dot_dimension_numbers<[1], [0], [0], [1], [0, 0, 1, 1], [], []>} : vector<256x4xbf16>, vector<4x128xbf16>, vector<256x128xf32> -> vector<256x128xf32>
    %32 = arith.addf %24, %31 : vector<256x128xf32>
    %c1_i32_19 = arith.constant 1 : i32
    %33 = arith.addi %1, %c1_i32_19 : i32
    %c0_20 = arith.constant 0 : index
    %34 = arith.index_cast %33 : i32 to index
    %c1_21 = arith.constant 1 : index
    %c0_22 = arith.constant 0 : index
    %35 = vector.load %arg2[%c0_20, %34, %c1_21, %c0_22] : memref<1x18x18x4xbf16, #tpu.memory_space<vmem>>, vector<1x16x16x4xbf16>
    %36 = vector.shape_cast %35 : vector<1x16x16x4xbf16> to vector<16x16x4xbf16>
    %37 = vector.shape_cast %36 : vector<16x16x4xbf16> to vector<256x4xbf16>
    %c16 = arith.constant 16 : index
    %c0_23 = arith.constant 0 : index
    %38 = vector.load %arg3[%c16, %c0_23] : memref<36x128xbf16, #tpu.memory_space<vmem>>, vector<4x128xbf16>
    %cst_24 = arith.constant dense<0.000000e+00> : vector<256x128xf32>
    %39 = tpu.matmul %37, %38, %cst_24 {dimension_numbers = #tpu.dot_dimension_numbers<[1], [0], [0], [1], [0, 0, 1, 1], [], []>} : vector<256x4xbf16>, vector<4x128xbf16>, vector<256x128xf32> -> vector<256x128xf32>
    %40 = arith.addf %32, %39 : vector<256x128xf32>
    %c1_i32_25 = arith.constant 1 : i32
    %41 = arith.addi %1, %c1_i32_25 : i32
    %c0_26 = arith.constant 0 : index
    %42 = arith.index_cast %41 : i32 to index
    %c2_27 = arith.constant 2 : index
    %c0_28 = arith.constant 0 : index
    %43 = vector.load %arg2[%c0_26, %42, %c2_27, %c0_28] : memref<1x18x18x4xbf16, #tpu.memory_space<vmem>>, vector<1x16x16x4xbf16>
    %44 = vector.shape_cast %43 : vector<1x16x16x4xbf16> to vector<16x16x4xbf16>
    %45 = vector.shape_cast %44 : vector<16x16x4xbf16> to vector<256x4xbf16>
    %c20 = arith.constant 20 : index
    %c0_29 = arith.constant 0 : index
    %46 = vector.load %arg3[%c20, %c0_29] : memref<36x128xbf16, #tpu.memory_space<vmem>>, vector<4x128xbf16>
    %cst_30 = arith.constant dense<0.000000e+00> : vector<256x128xf32>
    %47 = tpu.matmul %45, %46, %cst_30 {dimension_numbers = #tpu.dot_dimension_numbers<[1], [0], [0], [1], [0, 0, 1, 1], [], []>} : vector<256x4xbf16>, vector<4x128xbf16>, vector<256x128xf32> -> vector<256x128xf32>
    %48 = arith.addf %40, %47 : vector<256x128xf32>
    %c2_i32 = arith.constant 2 : i32
    %49 = arith.addi %1, %c2_i32 : i32
    %c0_31 = arith.constant 0 : index
    %50 = arith.index_cast %49 : i32 to index
    %c0_32 = arith.constant 0 : index
    %c0_33 = arith.constant 0 : index
    %51 = vector.load %arg2[%c0_31, %50, %c0_32, %c0_33] : memref<1x18x18x4xbf16, #tpu.memory_space<vmem>>, vector<1x16x16x4xbf16>
    %52 = vector.shape_cast %51 : vector<1x16x16x4xbf16> to vector<16x16x4xbf16>
    %53 = vector.shape_cast %52 : vector<16x16x4xbf16> to vector<256x4xbf16>
    %c24 = arith.constant 24 : index
    %c0_34 = arith.constant 0 : index
    %54 = vector.load %arg3[%c24, %c0_34] : memref<36x128xbf16, #tpu.memory_space<vmem>>, vector<4x128xbf16>
    %cst_35 = arith.constant dense<0.000000e+00> : vector<256x128xf32>
    %55 = tpu.matmul %53, %54, %cst_35 {dimension_numbers = #tpu.dot_dimension_numbers<[1], [0], [0], [1], [0, 0, 1, 1], [], []>} : vector<256x4xbf16>, vector<4x128xbf16>, vector<256x128xf32> -> vector<256x128xf32>
    %56 = arith.addf %48, %55 : vector<256x128xf32>
    %c2_i32_36 = arith.constant 2 : i32
    %57 = arith.addi %1, %c2_i32_36 : i32
    %c0_37 = arith.constant 0 : index
    %58 = arith.index_cast %57 : i32 to index
    %c1_38 = arith.constant 1 : index
    %c0_39 = arith.constant 0 : index
    %59 = vector.load %arg2[%c0_37, %58, %c1_38, %c0_39] : memref<1x18x18x4xbf16, #tpu.memory_space<vmem>>, vector<1x16x16x4xbf16>
    %60 = vector.shape_cast %59 : vector<1x16x16x4xbf16> to vector<16x16x4xbf16>
    %61 = vector.shape_cast %60 : vector<16x16x4xbf16> to vector<256x4xbf16>
    %c28 = arith.constant 28 : index
    %c0_40 = arith.constant 0 : index
    %62 = vector.load %arg3[%c28, %c0_40] : memref<36x128xbf16, #tpu.memory_space<vmem>>, vector<4x128xbf16>
    %cst_41 = arith.constant dense<0.000000e+00> : vector<256x128xf32>
    %63 = tpu.matmul %61, %62, %cst_41 {dimension_numbers = #tpu.dot_dimension_numbers<[1], [0], [0], [1], [0, 0, 1, 1], [], []>} : vector<256x4xbf16>, vector<4x128xbf16>, vector<256x128xf32> -> vector<256x128xf32>
    %64 = arith.addf %56, %63 : vector<256x128xf32>
    %c2_i32_42 = arith.constant 2 : i32
    %65 = arith.addi %1, %c2_i32_42 : i32
    %c0_43 = arith.constant 0 : index
    %66 = arith.index_cast %65 : i32 to index
    %c2_44 = arith.constant 2 : index
    %c0_45 = arith.constant 0 : index
    %67 = vector.load %arg2[%c0_43, %66, %c2_44, %c0_45] : memref<1x18x18x4xbf16, #tpu.memory_space<vmem>>, vector<1x16x16x4xbf16>
    %68 = vector.shape_cast %67 : vector<1x16x16x4xbf16> to vector<16x16x4xbf16>
    %69 = vector.shape_cast %68 : vector<16x16x4xbf16> to vector<256x4xbf16>
    %c32 = arith.constant 32 : index
    %c0_46 = arith.constant 0 : index
    %70 = vector.load %arg3[%c32, %c0_46] : memref<36x128xbf16, #tpu.memory_space<vmem>>, vector<4x128xbf16>
    %cst_47 = arith.constant dense<0.000000e+00> : vector<256x128xf32>
    %71 = tpu.matmul %69, %70, %cst_47 {dimension_numbers = #tpu.dot_dimension_numbers<[1], [0], [0], [1], [0, 0, 1, 1], [], []>} : vector<256x4xbf16>, vector<4x128xbf16>, vector<256x128xf32> -> vector<256x128xf32>
    %72 = arith.addf %64, %71 : vector<256x128xf32>
    %c0_48 = arith.constant 0 : index
    %c0_49 = arith.constant 0 : index
    %73 = vector.load %arg4[%c0_48, %c0_49] : memref<1x128xf32, #tpu.memory_space<vmem>>, vector<1x128xf32>
    %74 = vector.broadcast %73 : vector<1x128xf32> to vector<256x128xf32>
    %75 = arith.addf %72, %74 : vector<256x128xf32>
    %76 = arith.negf %75 : vector<256x128xf32>
    %77 = math.exp %76 : vector<256x128xf32>
    %cst_50 = arith.constant 1.000000e+00 : f32
    %78 = vector.broadcast %cst_50 : f32 to vector<256x128xf32>
    %79 = arith.addf %78, %77 : vector<256x128xf32>
    %80 = arith.divf %78, %79 : vector<256x128xf32>
    %81 = arith.mulf %75, %80 : vector<256x128xf32>
    %82 = arith.truncf %81 : vector<256x128xf32> to vector<256x128xbf16>
    %c0_51 = arith.constant 0 : index
    %c0_52 = arith.constant 0 : index
    %c0_53 = arith.constant 0 : index
    %83 = vector.load %arg5[%c0_51, %c0_52, %c0_53] : memref<1x256x128xbf16, #tpu.memory_space<vmem>>, vector<1x256x128xbf16>
    %84 = vector.shape_cast %83 : vector<1x256x128xbf16> to vector<256x128xbf16>
    %85 = vector.shape_cast %82 : vector<256x128xbf16> to vector<1x256x128xbf16>
    tpu.vector_store %arg5[%c0_51, %c0_52, %c0_53], %85 {strides = array<i32>} : memref<1x256x128xbf16, #tpu.memory_space<vmem>>, vector<1x256x128xbf16>,
    return
  }
  func.func @transform_0(%arg0: i32, %arg1: i32) -> (i32, i32, i32, i32) {
    %c0_i32 = arith.constant 0 : i32
    %c0_i32_0 = arith.constant 0 : i32
    %c0_i32_1 = arith.constant 0 : i32
    %c0_i32_2 = arith.constant 0 : i32
    return %arg0, %c0_i32, %c0_i32_0, %c0_i32_1 : i32, i32, i32, i32
  }
  func.func @transform_1(%arg0: i32, %arg1: i32) -> (i32, i32) {
    %c0_i32 = arith.constant 0 : i32
    %c0_i32_0 = arith.constant 0 : i32
    %c0_i32_1 = arith.constant 0 : i32
    return %c0_i32, %c0_i32_0 : i32, i32
  }
  func.func @transform_2(%arg0: i32, %arg1: i32) -> (i32, i32) {
    %c0_i32 = arith.constant 0 : i32
    %c0_i32_0 = arith.constant 0 : i32
    %c0_i32_1 = arith.constant 0 : i32
    return %c0_i32, %c0_i32_0 : i32, i32
  }
  func.func @transform_3(%arg0: i32, %arg1: i32) -> (i32, i32, i32) {
    %c0_i32 = arith.constant 0 : i32
    %c0_i32_0 = arith.constant 0 : i32
    return %arg0, %arg1, %c0_i32 : i32, i32, i32
  }
}

</mosaic_0001>

<bundles_post_ra>
// kernel: tpu_custom_call.1
= control target key start
LH: loop header
LB: loop body
LE: loop exit
PB: predicated region body
PF: predicated region fallthrough
CT: control target
= control target key end

     0   :  { %8 = vsyncpa [#allocation4], 0  ;;  %s5780_s0 = inlined_call_operand.vmem [shape: bf16[2,18,18,4], index: 0, kind: input, shape index: {}]   ;;  %s5781_s1 = inlined_call_operand.vmem [shape: bf16[36,128], index: 1, kind: input, shape index: {}]   ;;  %s5782_s2 = inlined_call_operand.vmem [shape: f32[1,128], index: 2, kind: input, shape index: {}]   ;;  %s5783_s3 = inlined_call_operand.hbm [shape: bf16[2,256,128], index: 3, kind: output, shape index: {}]  }
   0x1   :  { %10 = vsyncpa [#allocation4 + $0x1], 0  ;;  %s4937_s12 = smov 0   ;;  %s4939_s13 = smov 0  }
   0x2   :  { %s4941_s14 = smov 0   ;;  %s4943_s15 = smov 0  }
   0x3   :  { %s4945_s16 = smov 0   ;;  %s4947_s17 = smov 0  }
   0x4 LB: > { %s3607_s18 = sadd.s32 4294967295, %s4905_s17   ;;  %s3608_s19 = sadd.s32 4294967294, %s4905_s17   ;;  %s4905_s17 = sphi %s4947_s17, %s16_s17   ;;  %s4901_s16 = sphi %s4945_s16, %s5790_s16   ;;  %s4897_s15 = sphi %s4943_s15, %s5789_s15   ;;  %s4893_s14 = sphi %s4941_s14, %s5788_s14   ;;  %s4889_s13 = sphi %s4939_s13, %s5787_s13   ;;  %s4885_s12 = sphi %s4937_s12, %s5786_s12  }
   0x5   : > { %s28_s20 = sadd.s32 1, %s4901_s16  ;;  %s105_s21 = sadd.s32 1, %s4893_s14 }
   0x6   : > { %p30_p0 = scmp.ge.s32.totalorder %s28_s20, 2  ;;  %p115_p1 = scmp.ne.s32.totalorder %s4893_s14, %s4889_s13 }
   0x7   : > { %p116_p2 = scmp.eq.s32.totalorder %s3607_s18, 1  ;;  %p121_p3 = scmp.ne.s32.totalorder %s4889_s13, %s4885_s12 }
   0x8   : > { %s5792_s20 = smov (%p30_p0, %s28_s20), 0  ;;  %p122_p5 = scmp.eq.s32.totalorder %s3608_s19, 1 }
   0x9   : > { %p4977_p4 = por %p116_p2, %p115_p1  ;;  %s100_s23 = ssub.s32 %s4901_s16, %s5792_s20 }
   0xa   : > { %p3610_p6 = scmp.ge.s32.totalorder %s4905_s17, 1  ;;  %p103_p7 = scmp.eq.s32.totalorder %s100_s23, 0 }
   0xb   : > { %p4984_p8 = por %p122_p5, %p121_p3  ;;  %p154_p9 = scmp.lt.s32.totalorder %s4905_s17, 3 }
   0xc   : > { %s4990_s25 = scalar_select %p103_p7, %s4893_s14, %s105_s21  }
   0xd   : > { %p155_p10 = pnand %p3610_p6, %p154_p9 }
   0xe   : > { %p178_p11 = scmp.lt.s32.totalorder (!%p155_p10), %s4897_s15, 1  ;;  %vm944_vm0 = vcmask (!%p155_p10), 1046528   ;;  %s4907_s4 = smov (!%p155_p10), 12   ;;  %vm510_vm1 = vsmask.f32 (!%p155_p10), 7424  ;;  %vm317_vm2 = vcmask (!%p155_p10), 31744  }
   0xf   : > { %158 = sbr.rel (%p155_p10) target bundleno = 669 (0x29d), region = 32  ;;  %s4908_s5 = smov (!%p155_p10), 8   ;;  %vm751_vm3 = vcmask (!%p155_p10), 64544   ;;  %vm1041_vm4 = vcmask (!%p155_p10), 97344   ;;  %vm1222_vm5 = vcmask (!%p155_p10), 130144   ;;  %vm1655_vm6 = vcmask (!%p155_p10), 162944  }
  0x10   : > { %s4909_s6 = smov (!%p155_p10), 4   ;;  %s4910_s7 = smov (!%p155_p10), 16   ;;  %vm1944_vm7 = vcmask (!%p155_p10), 195744   ;;  %vm2125_vm8 = vcmask (!%p155_p10), 228544   ;;  %vm2558_vm9 = vcmask (!%p155_p10), 261344   ;;  %vm2847_vm10 = vcmask (!%p155_p10), 294144  }
  0x11   : > { %s4911_s8 = smov (!%p155_p10), 20   ;;  %s4912_s9 = smov (!%p155_p10), 24   ;;  %vm2907_vm11 = vcmask (!%p155_p10), 293888   ;;  %vm2956_vm12 = vcmask (!%p155_p10), 1041408  }
  0x12   : > { %s4913_s10 = smov (!%p155_p10), 28   ;;  %s4914_s11 = smov (!%p155_p10), 32  }
  0x13   : > { %s4915_s19 = smov (!%p155_p10), [#allocation3]  }
  0x14   : > { %s4831_s21 = sshll.u32 (!%p155_p10), %s4915_s19, 4  ;;  %s4832_s21 = int_to_ptr.vmem [resolvable:$false] %s4831_s21 }
  0x15   : > { %s4833_s23 = scalar_lea.vmem (!%p155_p10), %s4832_s21, 4096 }
  0x16   : > { %s179_s26 = scalar_select %p178_p11, %s4897_s15, 1 }
  0x18   : > { %s4391_s27 = smul.u32 216, %s179_s26 }
  0x1a   : > { %s4997_s30 = scalar_lea.vmem %s5780_s0, %s4391_s27 }
  0x1b   : > { %v4456_v0 = vld [vmem:[%s4997_s30 + $0x6c] sm:$0xff]   ;;  %v4458_v2 = vld [vmem:[%s4997_s30 + $0x60] sm:$0xfe]   ;;  %v4459_v3 = vld [vmem:[%s4997_s30 + $0x68] ss:$0 sps:$4 sm:$0x11]  }
  0x1c   : > { %v4457_v1 = vld [vmem:[%s4997_s30 + $0xc] sm:$0xff]   ;;  %1190 = vrot.lane.b32.xlu1 %v4456_v0, %s4907_s4  ;;  %v969_v5 = vrot.slane %v4458_v2, 1  ;;  %v970_v6 = vrot.slane %v4459_v3, 1  ;;  %v4460_v7 = vld [vmem:[%s4997_s30] sm:$0xfe]   ;;  %v4474_v58 = vld [vmem:[%s4997_s30 + $0x78] sm:$0xff]  }
  0x1d   : > { %1174 = vrot.lane.b32.xlu0 %v4457_v1, %s4907_s4  ;;  %v4466_v4 = vld [vmem:[%s4997_s30 + $0xc] sm:$0xff]   ;;  %v4461_v8 = vld [vmem:[%s4997_s30 + $0x8] ss:$0 sps:$4 sm:$0x11]   ;;  %v945_v11 = vrot.slane %v4460_v7, 1  ;;  %v4468_v26 = vld [vmem:[%s4997_s30] sm:$0xff]  }
  0x1e   : > { %v524_v9 = vshrl.u32 %v4466_v4, 16  ;;  %v971_v10 = vsel %vm944_vm0, %v969_v5, %v970_v6  ;;  %v4462_v12 = vld [vmem:[%s4997_s30 + $0x6c] sm:$0xfe]   ;;  %v526_v13 = vshll.u32 %v4466_v4, 16  ;;  %v946_v14 = vrot.slane %v4461_v8, 1  ;;  %v4472_v38 = vld [vmem:[%s4997_s30 + $0x60] sm:$0xff]  }
  0x1f   : > { %v4463_v15 = vld [vmem:[%s4997_s30 + $0x74] ss:$0 sps:$4 sm:$0x11]   ;;  %v972_v16 = vrot.slane %v4462_v12, 1  ;;  %v4464_v20 = vld [vmem:[%s4997_s30 + $0xc] sm:$0xfe]  }
  0x20   : > { %1009 = vrot.lane.b32.xlu1 %v971_v10, %s4908_s5  ;;  %v528_v17 = vrot.slane %v526_v13, 1  ;;  %v947_v18 = vsel %vm944_vm0, %v945_v11, %v946_v14  ;;  %v973_v19 = vrot.slane %v4463_v15, 1  ;;  %v4465_v21 = vld [vmem:[%s4997_s30 + $0x14] ss:$0 sps:$4 sm:$0x11]   ;;  %v948_v23 = vrot.slane %v4464_v20, 1 }
  0x21   : > { %993 = vrot.lane.b32.xlu0 %v947_v18, %s4908_s5  ;;  %v949_v24 = vrot.slane %v4465_v21, 1  ;;  %v4467_v25 = vld [vmem:[%s4997_s30 + $0x14] ss:$0 sps:$4 sm:$0x11]   ;;  %v512_v31 = vshrl.u32 %v4468_v26, 16  ;;  %v514_v32 = vshll.u32 %v4468_v26, 16 }
  0x22   : > { %v974_v22 = vsel %vm944_vm0, %v972_v16, %v973_v19  ;;  %v529_v27 = vor.u32 %v528_v17, %v524_v9  ;;  %v531_v29 = vshll.u32 %v4467_v25, 16  ;;  %v4469_v30 = vld [vmem:[%s4997_s30 + $0x8] ss:$0 sps:$4 sm:$0x11]   ;;  %v4470_v36 = vld [vmem:[%s4997_s30 + $0x6c] sm:$0xff]   ;;  %v608_v47 = vshrl.u32 %v4472_v38, 16 }
  0x23   : > { %v950_v28 = vsel %vm944_vm0, %v948_v23, %v949_v24  ;;  %v516_v34 = vrot.slane %v514_v32, 1  ;;  %v519_v35 = vshll.u32 %v4469_v30, 16  ;;  %v4471_v37 = vld [vmem:[%s4997_s30 + $0x74] ss:$0 sps:$4 sm:$0x11]   ;;  %v620_v42 = vshrl.u32 %v4470_v36, 16 }
  0x24   : > { %1011 = vrot.lane.b32.xlu1 %v974_v22, %s4908_s5  ;;  %v533_v33 = vrot.slane %v531_v29, 1  ;;  %v622_v43 = vshll.u32 %v4470_v36, 16  ;;  %v627_v44 = vshll.u32 %v4471_v37, 16  ;;  %v4473_v45 = vld [vmem:[%s4997_s30 + $0x68] ss:$0 sps:$4 sm:$0x11]  }
  0x25   : > { %995 = vrot.lane.b32.xlu0 %v950_v28, %s4908_s5  ;;  %v517_v40 = vor.u32 %v516_v34, %v512_v31  ;;  %v521_v41 = vrot.slane %v519_v35, 1  ;;  %v610_v48 = vshll.u32 %v4472_v38, 16  ;;  %v615_v51 = vshll.u32 %v4473_v45, 16  ;;  %v4476_v53 = vld [vmem:[%s4997_s30 + $0x6c] sm:$0xff]   ;;  %v4475_v62 = vld [vmem:[%s4997_s30 + $0x18] sm:$0xff]  }
  0x26   : > { %v534_v39 = vsel %vm510_vm1, %v529_v27, %v533_v33  ;;  %v624_v49 = vrot.slane %v622_v43, 1  ;;  %v629_v50 = vrot.slane %v627_v44, 1  ;;  %v4477_v56 = vld [vmem:[%s4997_s30 + $0x74] ss:$0 sps:$4 sm:$0x11]   ;;  %v1512_v59 = vshrl.u32 %v4476_v53, 16 }
  0x27   : > { %v522_v46 = vsel %vm510_vm1, %v517_v40, %v521_v41  ;;  %v612_v52 = vrot.slane %v610_v48, 1  ;;  %v617_v55 = vrot.slane %v615_v51, 1  ;;  %v1514_v60 = vshll.u32 %v4476_v53, 16  ;;  %v4478_v0 = vld [vmem:[%s4997_s30 + $0xc] sm:$0xff]   ;;  %v4480_v7 = vld [vmem:[%s4997_s30 + $0x78] sm:$0xff]  }
  0x28   : > { %705 = vrot.lane.b32.xlu1 %v534_v39, %s4909_s6  ;;  %v625_v54 = vor.u32 %v624_v49, %v620_v42  ;;  %v1519_v63 = vshll.u32 %v4477_v56, 16  ;;  %v4479_v3 = vld [vmem:[%s4997_s30 + $0x14] ss:$0 sps:$4 sm:$0x11]   ;;  %v1416_v5 = vshrl.u32 %v4478_v0, 16  ;;  %v1418_v6 = vshll.u32 %v4478_v0, 16 }
  0x29   : > { %703 = vrot.lane.b32.xlu0 %v522_v46, %s4909_s6  ;;  %v613_v57 = vor.u32 %v612_v52, %v608_v47  ;;  %v1516_v2 = vrot.slane %v1514_v60, 1  ;;  %v1423_v9 = vshll.u32 %v4479_v3, 16  ;;  %v4481_v10 = vld [vmem:[%s4997_s30 + $0x80] ss:$0 sps:$4 sm:$0x11]   ;;  %v1524_v12 = vshrl.u32 %v4480_v7, 16 }
  0x2a   : > { %v630_v61 = vsel %vm510_vm1, %v625_v54, %v629_v50  ;;  %v1521_v4 = vrot.slane %v1519_v63, 1  ;;  %v1420_v11 = vrot.slane %v1418_v6, 1  ;;  %v1526_v13 = vshll.u32 %v4480_v7, 16  ;;  %v4482_v14 = vld [vmem:[%s4997_s30 + $0x18] sm:$0xff]   ;;  %v4484_v28 = vld [vmem:[%s4997_s30 + $0x6c] sm:$0xfe]  }
  0x2b   : > { %v618_v1 = vsel %vm510_vm1, %v613_v57, %v617_v55  ;;  %v1517_v8 = vor.u32 %v1516_v2, %v1512_v59  ;;  %v1425_v16 = vrot.slane %v1423_v9, 1  ;;  %v1531_v17 = vshll.u32 %v4481_v10, 16  ;;  %v4483_v20 = vld [vmem:[%s4997_s30 + $0x20] ss:$0 sps:$4 sm:$0x11]   ;;  %v4496_v49 = vld [vmem:[%s4997_s30 + $0x78] sm:$0xff]  }
  0x2c   : > { %721 = vrot.lane.b32.xlu1 %v630_v61, %s4909_s6  ;;  %v1421_v18 = vor.u32 %v1420_v11, %v1416_v5  ;;  %v1528_v19 = vrot.slane %v1526_v13, 1  ;;  %v1428_v21 = vshrl.u32 %v4482_v14, 16  ;;  %v1430_v22 = vshll.u32 %v4482_v14, 16  ;;  %v4485_v29 = vld [vmem:[%s4997_s30 + $0x74] ss:$0 sps:$4 sm:$0x11]  }
  0x2d   : > { %719 = vrot.lane.b32.xlu0 %v618_v1, %s4909_s6  ;;  %v1522_v15 = vsel %vm510_vm1, %v1517_v8, %v1521_v4  ;;  %v1533_v23 = vrot.slane %v1531_v17, 1  ;;  %v1435_v27 = vshll.u32 %v4483_v20, 16  ;;  %v1872_v33 = vrot.slane %v4484_v28, 1  ;;  %v4486_v34 = vld [vmem:[%s4997_s30 + $0xc] sm:$0xfe]   ;;  %v4498_v52 = vld [vmem:[%s4997_s30 + $0x18] sm:$0xff]  }
  0x2e   : > { %v1426_v24 = vsel %vm510_vm1, %v1421_v18, %v1425_v16  ;;  %v1529_v25 = vor.u32 %v1528_v19, %v1524_v12  ;;  %v1432_v26 = vrot.slane %v1430_v22, 1  ;;  %v1873_v35 = vrot.slane %v4485_v29, 1  ;;  %v4487_v36 = vld [vmem:[%s4997_s30 + $0x14] ss:$0 sps:$4 sm:$0x11]   ;;  %v4492_v53 = vld [vmem:[%s4997_s30 + $0x78] sm:$0xff]  }
  0x2f   : > { %v1437_v32 = vrot.slane %v1435_v27, 1  ;;  %v1848_v38 = vrot.slane %v4486_v34, 1  ;;  %v1849_v39 = vrot.slane %v4487_v36, 1  ;;  %v4488_v40 = vld [vmem:[%s4997_s30 + $0x78] sm:$0xfe]   ;;  %v2415_v56 = vshrl.u32 %v4496_v49, 16 }
  0x30   : > { %1192 = vrot.lane.b32.xlu1 %v4474_v58, %s4907_s4  ;;  %v1534_v30 = vsel %vm510_vm1, %v1529_v25, %v1533_v23  ;;  %v1433_v31 = vor.u32 %v1432_v26, %v1428_v21  ;;  %v4489_v41 = vld [vmem:[%s4997_s30 + $0x80] ss:$0 sps:$4 sm:$0x11]   ;;  %v1874_v42 = vsel %vm944_vm0, %v1872_v33, %v1873_v35  ;;  %v1875_v44 = vrot.slane %v4488_v40, 1  ;;  %v4490_v46 = vld [vmem:[%s4997_s30 + $0x18] sm:$0xfe]  }
  0x31   : > { %1176 = vrot.lane.b32.xlu0 %v4475_v62, %s4907_s4  ;;  %v1850_v43 = vsel %vm944_vm0, %v1848_v38, %v1849_v39  ;;  %v1876_v45 = vrot.slane %v4489_v41, 1  ;;  %v4491_v47 = vld [vmem:[%s4997_s30 + $0x20] ss:$0 sps:$4 sm:$0x11]   ;;  %v1851_v48 = vrot.slane %v4490_v46, 1  ;;  %v4493_v55 = vld [vmem:[%s4997_s30 + $0x18] sm:$0xff]  }
  0x32   : > { %v1438_v37 = vsel %vm510_vm1, %v1433_v31, %v1437_v32  ;;  %v1852_v51 = vrot.slane %v4491_v47, 1  ;;  %v2417_v57 = vshll.u32 %v4496_v49, 16  ;;  %v4497_v58 = vld [vmem:[%s4997_s30 + $0x80] ss:$0 sps:$4 sm:$0x11]   ;;  %v2319_v59 = vshrl.u32 %v4498_v52, 16 }
  0x33   : > { %v1877_v50 = vsel %vm944_vm0, %v1875_v44, %v1876_v45  ;;  %v2321_v61 = vshll.u32 %v4498_v52, 16  ;;  %v4494_v62 = vld [vmem:[%s4997_s30 + $0x84] sm:$0xff]   ;;  %v2422_v63 = vshll.u32 %v4497_v58, 16  ;;  %v4499_v0 = vld [vmem:[%s4997_s30 + $0x20] ss:$0 sps:$4 sm:$0x11]  }
  0x34   : > { %1623 = vrot.lane.b32.xlu1 %v1522_v15, %s4910_s7  ;;  %v1853_v54 = vsel %vm944_vm0, %v1851_v48, %v1852_v51  ;;  %v2419_v60 = vrot.slane %v2417_v57, 1  ;;  %v4495_v1 = vld [vmem:[%s4997_s30 + $0x24] sm:$0xff]   ;;  %v2326_v5 = vshll.u32 %v4499_v0, 16  ;;  %v4501_v6 = vld [vmem:[%s4997_s30 + $0x8c] ss:$0 sps:$4 sm:$0x11]  }
  0x35   : > { %1607 = vrot.lane.b32.xlu0 %v1426_v24, %s4910_s7  ;;  %v2323_v2 = vrot.slane %v2321_v61, 1  ;;  %v4500_v3 = vld [vmem:[%s4997_s30 + $0x84] sm:$0xff]   ;;  %v2424_v4 = vrot.slane %v2422_v63, 1  ;;  %v2434_v13 = vshll.u32 %v4501_v6, 16  ;;  %v4508_v14 = vld [vmem:[%s4997_s30 + $0x78] sm:$0xff]  }
  0x36   : > { %v4502_v7 = vld [vmem:[%s4997_s30 + $0x24] sm:$0xff]   ;;  %v2420_v8 = vor.u32 %v2419_v60, %v2415_v56  ;;  %v2427_v9 = vshrl.u32 %v4500_v3, 16  ;;  %v2429_v10 = vshll.u32 %v4500_v3, 16  ;;  %v2328_v12 = vrot.slane %v2326_v5, 1  ;;  %v4504_v25 = vld [vmem:[%s4997_s30 + $0x78] sm:$0xfe]  }
  0x37   : > { %v2324_v11 = vor.u32 %v2323_v2, %v2319_v59  ;;  %v4503_v16 = vld [vmem:[%s4997_s30 + $0x2c] ss:$0 sps:$4 sm:$0x11]   ;;  %v2331_v17 = vshrl.u32 %v4502_v7, 16  ;;  %v2333_v18 = vshll.u32 %v4502_v7, 16  ;;  %v2436_v19 = vrot.slane %v2434_v13, 1 }
  0x38   : > { %1625 = vrot.lane.b32.xlu1 %v1534_v30, %s4910_s7  ;;  %v2431_v15 = vrot.slane %v2429_v10, 1  ;;  %v632_v20 = vshrl.u32 %v4508_v14, 16  ;;  %v2425_v21 = vsel %vm510_vm1, %v2420_v8, %v2424_v4  ;;  %v2338_v24 = vshll.u32 %v4503_v16, 16  ;;  %v4505_v27 = vld [vmem:[%s4997_s30 + $0x80] ss:$0 sps:$4 sm:$0x11]  }
  0x39   : > { %1609 = vrot.lane.b32.xlu0 %v1438_v37, %s4910_s7  ;;  %v2335_v23 = vrot.slane %v2333_v18, 1  ;;  %v2329_v26 = vsel %vm510_vm1, %v2324_v11, %v2328_v12  ;;  %v634_v28 = vshll.u32 %v4508_v14, 16  ;;  %v2775_v31 = vrot.slane %v4504_v25, 1  ;;  %v4510_v32 = vld [vmem:[%s4997_s30 + $0x18] sm:$0xff]   ;;  %v4512_v51 = vld [vmem:[%s4997_s30 + $0x84] sm:$0xfe]  }
  0x3a   : > { %v2432_v22 = vor.u32 %v2431_v15, %v2427_v9  ;;  %v2340_v30 = vrot.slane %v2338_v24, 1  ;;  %v2776_v33 = vrot.slane %v4505_v27, 1  ;;  %v4506_v34 = vld [vmem:[%s4997_s30 + $0x18] sm:$0xfe]   ;;  %v536_v46 = vshrl.u32 %v4510_v32, 16  ;;  %v4516_v52 = vld [vmem:[%s4997_s30 + $0x84] sm:$0xff]  }
  0x3b   : > { %v2336_v29 = vor.u32 %v2335_v23, %v2331_v17  ;;  %v4507_v35 = vld [vmem:[%s4997_s30 + $0x20] ss:$0 sps:$4 sm:$0x11]   ;;  %v2751_v38 = vrot.slane %v4506_v34, 1  ;;  %v636_v41 = vrot.slane %v634_v28, 1  ;;  %v538_v47 = vshll.u32 %v4510_v32, 16 }
  0x3c   : > { %1912 = vrot.lane.b32.xlu1 %v1874_v42, %s4911_s8  ;;  %v2437_v36 = vsel %vm510_vm1, %v2432_v22, %v2436_v19  ;;  %v2752_v39 = vrot.slane %v4507_v35, 1  ;;  %v4509_v40 = vld [vmem:[%s4997_s30 + $0x80] ss:$0 sps:$4 sm:$0x11]   ;;  %v2777_v44 = vsel %vm944_vm0, %v2775_v31, %v2776_v33  ;;  %v2778_v56 = vrot.slane %v4512_v51, 1  ;;  %v4518_v57 = vld [vmem:[%s4997_s30 + $0x24] sm:$0xff]  }
  0x3d   : > { %1896 = vrot.lane.b32.xlu0 %v1850_v43, %s4911_s8  ;;  %v2341_v37 = vsel %vm510_vm1, %v2336_v29, %v2340_v30  ;;  %v639_v42 = vshll.u32 %v4509_v40, 16  ;;  %v4511_v43 = vld [vmem:[%s4997_s30 + $0x20] ss:$0 sps:$4 sm:$0x11]   ;;  %v637_v45 = vor.u32 %v636_v41, %v632_v20  ;;  %v4514_v61 = vld [vmem:[%s4997_s30 + $0x24] sm:$0xfe]  }
  0x3e   : > { %v2753_v48 = vsel %vm944_vm0, %v2751_v38, %v2752_v39  ;;  %v2754_v0 = vrot.slane %v4514_v61, 1  ;;  %v4517_v2 = vld [vmem:[%s4997_s30 + $0x8c] ss:$0 sps:$4 sm:$0x11]   ;;  %v644_v3 = vshrl.u32 %v4516_v52, 16  ;;  %v646_v4 = vshll.u32 %v4516_v52, 16 }
  0x3f   : > { %v641_v49 = vrot.slane %v639_v42, 1  ;;  %v651_v6 = vshll.u32 %v4517_v2, 16  ;;  %v4519_v7 = vld [vmem:[%s4997_s30 + $0x2c] ss:$0 sps:$4 sm:$0x11]   ;;  %v548_v10 = vshrl.u32 %v4518_v57, 16 }
  0x40   : > { %1914 = vrot.lane.b32.xlu1 %v1877_v50, %s4911_s8  ;;  %v543_v50 = vshll.u32 %v4511_v43, 16  ;;  %v648_v9 = vrot.slane %v646_v4, 1  ;;  %v550_v11 = vshll.u32 %v4518_v57, 16  ;;  %v555_v13 = vshll.u32 %v4519_v7, 16  ;;  %v4520_v16 = vld [vmem:[%s4997_s30 + $0x78] sm:$0xfe]  }
  0x41   : > { %1898 = vrot.lane.b32.xlu0 %v1853_v54, %s4911_s8  ;;  %v4513_v54 = vld [vmem:[%s4997_s30 + $0x8c] ss:$0 sps:$4 sm:$0x11]   ;;  %v642_v58 = vsel %vm510_vm1, %v637_v45, %v641_v49  ;;  %v653_v12 = vrot.slane %v651_v6, 1  ;;  %v4522_v23 = vld [vmem:[%s4997_s30 + $0x18] sm:$0xfe]  }
  0x42   : > { %v2779_v60 = vrot.slane %v4513_v54, 1  ;;  %v649_v14 = vor.u32 %v648_v9, %v644_v3  ;;  %v552_v15 = vrot.slane %v550_v11, 1  ;;  %v4521_v17 = vld [vmem:[%s4997_s30 + $0x80] ss:$0 sps:$4 sm:$0x11]   ;;  %v557_v18 = vrot.slane %v555_v13, 1 }
  0x43   : > { %v976_v22 = vrot.slane %v4521_v17, 1  ;;  %v4523_v24 = vld [vmem:[%s4997_s30 + $0x20] ss:$0 sps:$4 sm:$0x11]   ;;  %v4532_v27 = vld [vmem:[%s4997_s30 + $0x84] sm:$0xff]   ;;  %v4531_v51 = vld [vmem:[%s4997_s30 + $0x30] sm:$0xff]  }
  0x44   : > { %2093 = vrot.lane.b32.xlu1 %v4492_v53, %s4912_s9  ;;  %v540_v53 = vrot.slane %v538_v47, 1  ;;  %v2780_v5 = vsel %vm944_vm0, %v2778_v56, %v2779_v60  ;;  %v654_v19 = vsel %vm510_vm1, %v649_v14, %v653_v12  ;;  %v553_v20 = vor.u32 %v552_v15, %v548_v10  ;;  %v4524_v30 = vld [vmem:[%s4997_s30 + $0x84] sm:$0xfe]   ;;  %v4525_v31 = vld [vmem:[%s4997_s30 + $0x8c] ss:$0 sps:$4 sm:$0x11]  }
  0x45   : > { %2077 = vrot.lane.b32.xlu0 %v4493_v55, %s4912_s9  ;;  %v545_v55 = vrot.slane %v543_v50, 1  ;;  %v952_v29 = vrot.slane %v4523_v24, 1  ;;  %v978_v33 = vrot.slane %v4524_v30, 1  ;;  %v979_v34 = vrot.slane %v4525_v31, 1  ;;  %v4526_v35 = vld [vmem:[%s4997_s30 + $0x24] sm:$0xfe]  }
  0x46   : > { %v541_v59 = vor.u32 %v540_v53, %v536_v46  ;;  %v558_v25 = vsel %vm510_vm1, %v553_v20, %v557_v18  ;;  %v954_v39 = vrot.slane %v4526_v35, 1  ;;  %v1538_v40 = vshll.u32 %v4532_v27, 16  ;;  %v4528_v42 = vld [vmem:[%s4997_s30 + $0x84] sm:$0xff]   ;;  %v4530_v50 = vld [vmem:[%s4997_s30 + $0x90] sm:$0xff]  }
  0x47   : > { %v980_v38 = vsel %vm944_vm0, %v978_v33, %v979_v34  ;;  %v4534_v43 = vld [vmem:[%s4997_s30 + $0x24] sm:$0xff]   ;;  %v4535_v53 = vld [vmem:[%s4997_s30 + $0x2c] ss:$0 sps:$4 sm:$0x11]   ;;  %v4546_v30 = vld [vmem:[%s4997_s30 + $0x30] sm:$0xfe]  }
  0x48   : > { %2095 = vrot.lane.b32.xlu1 %v4494_v62, %s4912_s9  ;;  %v4515_v62 = vld [vmem:[%s4997_s30 + $0x2c] ss:$0 sps:$4 sm:$0x11]   ;;  %v546_v63 = vsel %vm510_vm1, %v541_v59, %v545_v55  ;;  %v1540_v46 = vrot.slane %v1538_v40, 1  ;;  %v1440_v47 = vshrl.u32 %v4534_v43, 16  ;;  %v1442_v49 = vshll.u32 %v4534_v43, 16 }
  0x49   : > { %2079 = vrot.lane.b32.xlu0 %v4495_v1, %s4912_s9  ;;  %v2755_v1 = vrot.slane %v4515_v62, 1  ;;  %v4536_v55 = vld [vmem:[%s4997_s30 + $0x90] sm:$0xff]   ;;  %v4537_v59 = vld [vmem:[%s4997_s30 + $0x98] ss:$0 sps:$4 sm:$0x11]   ;;  %v1857_v34 = vrot.slane %v4546_v30, 1 }
  0x4a   : > { %v1444_v54 = vrot.slane %v1442_v49, 1  ;;  %v1548_v60 = vshrl.u32 %v4536_v55, 16  ;;  %v1550_v62 = vshll.u32 %v4536_v55, 16  ;;  %v4539_v2 = vld [vmem:[%s4997_s30 + $0x38] ss:$0 sps:$4 sm:$0x11]  }
  0x4b   : > { %v2756_v8 = vsel %vm944_vm0, %v2754_v0, %v2755_v1  ;;  %v1555_v1 = vshll.u32 %v4537_v59, 16  ;;  %v4540_v12 = vld [vmem:[%s4997_s30 + $0x84] sm:$0xfe]   ;;  %v4541_v13 = vld [vmem:[%s4997_s30 + $0x8c] ss:$0 sps:$4 sm:$0x11]  }
  0x4c   : > { %2526 = vrot.lane.b32.xlu1 %v2425_v21, %s4913_s10  ;;  %v975_v21 = vrot.slane %v4520_v16, 1  ;;  %v1445_v61 = vor.u32 %v1444_v54, %v1440_v47  ;;  %v1552_v3 = vrot.slane %v1550_v62, 1  ;;  %v1878_v16 = vrot.slane %v4540_v12, 1  ;;  %v4542_v17 = vld [vmem:[%s4997_s30 + $0x24] sm:$0xfe]   ;;  %v4548_v40 = vld [vmem:[%s4997_s30 + $0x90] sm:$0xff]  }
  0x4d   : > { %2510 = vrot.lane.b32.xlu0 %v2329_v26, %s4913_s10  ;;  %v951_v26 = vrot.slane %v4522_v23, 1  ;;  %v1557_v7 = vrot.slane %v1555_v1, 1  ;;  %v4543_v20 = vld [vmem:[%s4997_s30 + $0x2c] ss:$0 sps:$4 sm:$0x11]   ;;  %v4552_v23 = vld [vmem:[%s4997_s30 + $0x90] sm:$0xff]  }
  0x4e   : > { %v977_v28 = vsel %vm944_vm0, %v975_v21, %v976_v22  ;;  %v1553_v10 = vor.u32 %v1552_v3, %v1548_v60  ;;  %v1854_v22 = vrot.slane %v4542_v17, 1  ;;  %v1855_v24 = vrot.slane %v4543_v20, 1  ;;  %v4549_v43 = vld [vmem:[%s4997_s30 + $0x30] sm:$0xff]   ;;  %v4555_v47 = vld [vmem:[%s4997_s30 + $0x38] ss:$0 sps:$4 sm:$0x11]  }
  0x4f   : > { %v953_v32 = vsel %vm944_vm0, %v951_v26, %v952_v29  ;;  %v4545_v26 = vld [vmem:[%s4997_s30 + $0x98] ss:$0 sps:$4 sm:$0x11]   ;;  %v2439_v33 = vshrl.u32 %v4552_v23, 16  ;;  %v2441_v35 = vshll.u32 %v4552_v23, 16  ;;  %v4556_v49 = vld [vmem:[%s4997_s30 + $0x9c] sm:$0xff]  }
  0x50   : > { %2528 = vrot.lane.b32.xlu1 %v2437_v36, %s4913_s10  ;;  %v4527_v36 = vld [vmem:[%s4997_s30 + $0x2c] ss:$0 sps:$4 sm:$0x11]   ;;  %v1558_v18 = vsel %vm510_vm1, %v1553_v10, %v1557_v7  ;;  %v1882_v29 = vrot.slane %v4545_v26, 1  ;;  %v1856_v31 = vsel %vm944_vm0, %v1854_v22, %v1855_v24  ;;  %v2453_v55 = vshll.u32 %v4556_v49, 16  ;;  %v4564_v3 = vld [vmem:[%s4997_s30 + $0x90] sm:$0xff]  }
  0x51   : > { %2512 = vrot.lane.b32.xlu0 %v2341_v37, %s4913_s10  ;;  %v1536_v37 = vshrl.u32 %v4532_v27, 16  ;;  %v955_v41 = vrot.slane %v4527_v36, 1  ;;  %v4557_v54 = vld [vmem:[%s4997_s30 + $0xa4] ss:$0 sps:$4 sm:$0x11]   ;;  %v2451_v59 = vshrl.u32 %v4556_v49, 16 }
  0x52   : > { %v2458_v60 = vshll.u32 %v4557_v54, 16  ;;  %v4563_v20 = vld [vmem:[%s4997_s30 + $0x38] ss:$0 sps:$4 sm:$0x11]   ;;  %v4575_v49 = vld [vmem:[%s4997_s30 + $0x60] sm:$0xff]  }
  0x53   : > { %v956_v45 = vsel %vm944_vm0, %v954_v39, %v955_v41  ;;  %v1541_v56 = vor.u32 %v1540_v46, %v1536_v37  ;;  %v4554_v37 = vld [vmem:[%s4997_s30 + $0x30] sm:$0xff]   ;;  %v2443_v41 = vrot.slane %v2441_v35, 1  ;;  %v2758_v26 = vrot.slane %v4563_v20, 1  ;;  %326 = vst.msk [vmem:[#allocation2 + $0x40] sm:$0xff] %vm317_vm2, %v4575_v49  ;;  %v4594_v49 = vld [vmem:[%s4997_s30 + $0x3c] sm:$0xff]  }
  0x54   : > { %2815 = vrot.lane.b32.xlu1 %v2777_v44, %s4914_s11  ;;  %v4529_v44 = vld [vmem:[%s4997_s30 + $0x24] sm:$0xff]   ;;  %v4568_v35 = vld [vmem:[%s4997_s30 + $0xc] sm:$0xff]  }
  0x55   : > { %2799 = vrot.lane.b32.xlu0 %v2753_v48, %s4914_s11  ;;  %v4533_v48 = vld [vmem:[%s4997_s30 + $0x8c] ss:$0 sps:$4 sm:$0x11]   ;;  %319 = vst.msk [vmem:[#allocation2 + $0x8] sm:$0xff] %vm317_vm2, %v4568_v35 }
  0x56   : > { %v1543_v52 = vshll.u32 %v4533_v48, 16 }
  0x58   : > { %723 = vrot.lane.b32.xlu1 %v642_v58, %s4909_s6  ;;  %v1545_v57 = vrot.slane %v1543_v52, 1  ;;  %v1447_v58 = vshll.u32 %v4535_v53, 16  ;;  %v2350_v53 = vshll.u32 %v4555_v47, 16  ;;  %v4574_v47 = vld [vmem:[%s4997_s30 + $0x6c] sm:$0xff]  }
  0x59   : > { %707 = vrot.lane.b32.xlu0 %v546_v63, %s4909_s6  ;;  %v4538_v63 = vld [vmem:[%s4997_s30 + $0x30] sm:$0xff]   ;;  %327 = vst.msk [vmem:[#allocation2 + $0x48] sm:$0xff] %vm317_vm2, %v4574_v47  ;;  %v4592_v47 = vld [vmem:[%s4997_s30 + $0x9c] sm:$0xff]  }
  0x5a   : > { %v1449_v0 = vrot.slane %v1447_v58, 1  ;;  %v1452_v4 = vshrl.u32 %v4538_v63, 16  ;;  %v1546_v6 = vsel %vm510_vm1, %v1541_v56, %v1545_v57  ;;  %v4558_v56 = vld [vmem:[%s4997_s30 + $0x3c] sm:$0xff]   ;;  %v2444_v57 = vor.u32 %v2443_v41, %v2439_v33  ;;  %v4567_v33 = vld [vmem:[%s4997_s30 + $0x38] ss:$0 sps:$4 sm:$0x11]  }
  0x5b   : > { %v2352_v58 = vrot.slane %v2350_v53, 1  ;;  %v2355_v1 = vshrl.u32 %v4558_v56, 16  ;;  %v4569_v41 = vld [vmem:[%s4997_s30] sm:$0xff]  }
  0x5c   : > { %2817 = vrot.lane.b32.xlu1 %v2780_v5, %s4914_s11  ;;  %v1454_v5 = vshll.u32 %v4538_v63, 16  ;;  %v1450_v9 = vsel %vm510_vm1, %v1445_v61, %v1449_v0  ;;  %v4559_v61 = vld [vmem:[%s4997_s30 + $0x44] ss:$0 sps:$4 sm:$0x11]   ;;  %v2455_v0 = vrot.slane %v2453_v55, 1  ;;  %318 = vst.msk [vmem:[#allocation2] sm:$0xff] %vm317_vm2, %v4569_v41 }
  0x5d   : > { %2801 = vrot.lane.b32.xlu0 %v2756_v8, %s4914_s11  ;;  %v1459_v8 = vshll.u32 %v4539_v2, 16  ;;  %v2357_v2 = vshll.u32 %v4558_v56, 16  ;;  %v4572_v55 = vld [vmem:[%s4997_s30 + $0x3c] sm:$0xfe]  }
  0x5e   : > { %v1456_v11 = vrot.slane %v1454_v5, 1  ;;  %v2362_v5 = vshll.u32 %v4559_v61, 16  ;;  %v2456_v12 = vor.u32 %v2455_v0, %v2451_v59  ;;  %v4573_v56 = vld [vmem:[%s4997_s30 + $0x44] ss:$0 sps:$4 sm:$0x11]  }
  0x5f   : > { %v1461_v14 = vrot.slane %v1459_v8, 1  ;;  %v2359_v7 = vrot.slane %v2357_v2, 1  ;;  %v4560_v8 = vld [vmem:[%s4997_s30 + $0x90] sm:$0xfe]   ;;  %v2761_v59 = vrot.slane %v4573_v56, 1  ;;  %v1464_v56 = vshrl.u32 %v4594_v49, 16 }
  0x60   : > { %725 = vrot.lane.b32.xlu1 %v654_v19, %s4909_s6  ;;  %v1457_v15 = vor.u32 %v1456_v11, %v1452_v4  ;;  %v1879_v19 = vrot.slane %v4541_v13, 1  ;;  %v2460_v4 = vrot.slane %v2458_v60, 1  ;;  %v2364_v13 = vrot.slane %v2362_v5, 1  ;;  %v4577_v2 = vld [vmem:[%s4997_s30 + $0xa4] ss:$0 sps:$4 sm:$0x11]  }
  0x61   : > { %709 = vrot.lane.b32.xlu0 %v558_v25, %s4909_s6  ;;  %v4544_v25 = vld [vmem:[%s4997_s30 + $0x90] sm:$0xfe]   ;;  %v2781_v17 = vrot.slane %v4560_v8, 1  ;;  %v675_v5 = vshll.u32 %v4577_v2, 16 }
  0x62   : > { %v1462_v21 = vsel %vm510_vm1, %v1457_v15, %v1461_v14  ;;  %v1880_v27 = vsel %vm944_vm0, %v1878_v16, %v1879_v19  ;;  %v656_v14 = vshrl.u32 %v4564_v3, 16  ;;  %v2360_v16 = vor.u32 %v2359_v7, %v2355_v1  ;;  %v4562_v19 = vld [vmem:[%s4997_s30 + $0x30] sm:$0xfe]  }
  0x63   : > { %v2757_v23 = vrot.slane %v4562_v19, 1 }
  0x64   : > { %1013 = vrot.lane.b32.xlu1 %v977_v28, %s4908_s5  ;;  %v1881_v28 = vrot.slane %v4544_v25, 1  ;;  %v2461_v25 = vsel %vm510_vm1, %v2456_v12, %v2460_v4  ;;  %v2365_v30 = vsel %vm510_vm1, %v2360_v16, %v2364_v13  ;;  %v677_v12 = vrot.slane %v675_v5, 1 }
  0x65   : > { %997 = vrot.lane.b32.xlu0 %v953_v32, %s4908_s5  ;;  %v4547_v32 = vld [vmem:[%s4997_s30 + $0x38] ss:$0 sps:$4 sm:$0x11]  }
  0x66   : > { %v1858_v36 = vrot.slane %v4547_v32, 1 }
  0x68   : > { %1015 = vrot.lane.b32.xlu1 %v980_v38, %s4908_s5  ;;  %v1883_v38 = vsel %vm944_vm0, %v1881_v28, %v1882_v29  ;;  %v1859_v39 = vsel %vm944_vm0, %v1857_v34, %v1858_v36 }
  0x69   : > { %999 = vrot.lane.b32.xlu0 %v956_v45, %s4908_s5  ;;  %v2345_v45 = vshll.u32 %v4554_v37, 16 }
  0x6b   : > { %v2347_v48 = vrot.slane %v2345_v45, 1 }
  0x6c   : > { %1194 = vrot.lane.b32.xlu1 %v4528_v42, %s4907_s4  ;;  %v2343_v42 = vshrl.u32 %v4554_v37, 16 }
  0x6d   : > { %1178 = vrot.lane.b32.xlu0 %v4529_v44, %s4907_s4  ;;  %v4553_v44 = vld [vmem:[%s4997_s30 + $0x98] ss:$0 sps:$4 sm:$0x11]  }
  0x6e   : > { %v2446_v46 = vshll.u32 %v4553_v44, 16  ;;  %v2348_v62 = vor.u32 %v2347_v48, %v2343_v42  ;;  %v2759_v42 = vsel %vm944_vm0, %v2757_v23, %v2758_v26  ;;  %v4571_v48 = vld [vmem:[%s4997_s30 + $0xa4] ss:$0 sps:$4 sm:$0x11]   ;;  %v4582_v23 = vld [vmem:[%s4997_s30 + $0x30] sm:$0xfe]  }
  0x6f   : > { %v2785_v54 = vrot.slane %v4571_v48, 1  ;;  %v4593_v48 = vld [vmem:[%s4997_s30 + $0xa4] ss:$0 sps:$4 sm:$0x11]  }
  0x70   : > { %1196 = vrot.lane.b32.xlu1 %v4530_v50, %s4907_s4  ;;  %v4550_v50 = vld [vmem:[%s4997_s30 + $0x9c] sm:$0xff]   ;;  %v2448_v52 = vrot.slane %v2446_v46, 1  ;;  %v2353_v15 = vsel %vm510_vm1, %v2348_v62, %v2352_v58  ;;  %v2760_v58 = vrot.slane %v4572_v55, 1 }
  0x71   : > { %1180 = vrot.lane.b32.xlu0 %v4531_v51, %s4907_s4  ;;  %v4551_v51 = vld [vmem:[%s4997_s30 + $0x3c] sm:$0xff]  }
  0x72   : > { %v2449_v10 = vsel %vm510_vm1, %v2444_v57, %v2448_v52  ;;  %v4570_v46 = vld [vmem:[%s4997_s30 + $0x9c] sm:$0xfe]   ;;  %v2762_v1 = vsel %vm944_vm0, %v2760_v58, %v2761_v59 }
  0x73   : > { %v4576_v52 = vld [vmem:[%s4997_s30 + $0x9c] sm:$0xff]  }
  0x74   : > { %1627 = vrot.lane.b32.xlu1 %v1546_v6, %s4910_s7  ;;  %v4566_v6 = vld [vmem:[%s4997_s30 + $0x30] sm:$0xff]   ;;  %v668_v62 = vshrl.u32 %v4576_v52, 16  ;;  %v670_v0 = vshll.u32 %v4576_v52, 16  ;;  %v1562_v52 = vshll.u32 %v4592_v47, 16 }
  0x75   : > { %1611 = vrot.lane.b32.xlu0 %v1450_v9, %s4910_s7  ;;  %v4561_v9 = vld [vmem:[%s4997_s30 + $0x98] ss:$0 sps:$4 sm:$0x11]   ;;  %v560_v24 = vshrl.u32 %v4566_v6, 16  ;;  %v562_v29 = vshll.u32 %v4566_v6, 16 }
  0x76   : > { %v672_v4 = vrot.slane %v670_v0, 1  ;;  %v4579_v6 = vld [vmem:[%s4997_s30 + $0x44] ss:$0 sps:$4 sm:$0x11]   ;;  %v1564_v59 = vrot.slane %v1562_v52, 1  ;;  %v4609_v52 = vld [vmem:[%s4997_s30 + $0x48] sm:$0xff]  }
  0x77   : > { %v564_v34 = vrot.slane %v562_v29, 1 }
  0x78   : > { %1629 = vrot.lane.b32.xlu1 %v1558_v18, %s4910_s7  ;;  %v2782_v18 = vrot.slane %v4561_v9, 1  ;;  %v673_v9 = vor.u32 %v672_v4, %v668_v62  ;;  %v4596_v62 = vld [vmem:[%s4997_s30 + $0xa8] sm:$0xff]  }
  0x79   : > { %1613 = vrot.lane.b32.xlu0 %v1462_v21, %s4910_s7  ;;  %v658_v21 = vshll.u32 %v4564_v3, 16  ;;  %v4578_v3 = vld [vmem:[%s4997_s30 + $0x3c] sm:$0xff]   ;;  %v1572_v4 = vshrl.u32 %v4596_v62, 16  ;;  %v1574_v5 = vshll.u32 %v4596_v62, 16 }
  0x7a   : > { %v2783_v36 = vsel %vm944_vm0, %v2781_v17, %v2782_v18  ;;  %v572_v7 = vshrl.u32 %v4578_v3, 16  ;;  %v574_v8 = vshll.u32 %v4578_v3, 16  ;;  %v4581_v17 = vld [vmem:[%s4997_s30 + $0x98] ss:$0 sps:$4 sm:$0x11]  }
  0x7b   : > { %v660_v28 = vrot.slane %v658_v21, 1  ;;  %v982_v21 = vrot.slane %v4581_v17, 1 }
  0x7c   : > { %1916 = vrot.lane.b32.xlu1 %v1880_v27, %s4911_s8  ;;  %v4565_v27 = vld [vmem:[%s4997_s30 + $0x98] ss:$0 sps:$4 sm:$0x11]   ;;  %v576_v13 = vrot.slane %v574_v8, 1 }
  0x7d   : > { %1900 = vrot.lane.b32.xlu0 %v1856_v31, %s4911_s8  ;;  %v663_v32 = vshll.u32 %v4565_v27, 16 }
  0x7e   : > { %v577_v18 = vor.u32 %v576_v13, %v572_v7 }
  0x80   : > { %1918 = vrot.lane.b32.xlu1 %v1883_v38, %s4911_s8  ;;  %v661_v38 = vor.u32 %v660_v28, %v656_v14  ;;  %v579_v14 = vshll.u32 %v4579_v6, 16  ;;  %v957_v28 = vrot.slane %v4582_v23, 1  ;;  %v4598_v6 = vld [vmem:[%s4997_s30 + $0x48] sm:$0xff]   ;;  %v4601_v23 = vld [vmem:[%s4997_s30 + $0xa4] ss:$0 sps:$4 sm:$0x11]  }
  0x81   : > { %1902 = vrot.lane.b32.xlu0 %v1859_v39, %s4911_s8  ;;  %v665_v39 = vrot.slane %v663_v32, 1 }
  0x82   : > { %v581_v19 = vrot.slane %v579_v14, 1  ;;  %v1576_v14 = vrot.slane %v1574_v5, 1 }
  0x84   : > { %2097 = vrot.lane.b32.xlu1 %v4548_v40, %s4912_s9  ;;  %v567_v40 = vshll.u32 %v4567_v33, 16  ;;  %v4586_v33 = vld [vmem:[%s4997_s30 + $0x3c] sm:$0xfe]  }
  0x85   : > { %2081 = vrot.lane.b32.xlu0 %v4549_v43, %s4912_s9  ;;  %v565_v43 = vor.u32 %v564_v34, %v560_v24  ;;  %v4583_v24 = vld [vmem:[%s4997_s30 + $0x38] ss:$0 sps:$4 sm:$0x11]  }
  0x86   : > { %v569_v45 = vrot.slane %v567_v40, 1  ;;  %v958_v29 = vrot.slane %v4583_v24, 1 }
  0x88   : > { %2099 = vrot.lane.b32.xlu1 %v4550_v50, %s4912_s9  ;;  %v666_v50 = vsel %vm510_vm1, %v661_v38, %v665_v39  ;;  %v570_v53 = vsel %vm510_vm1, %v565_v43, %v569_v45  ;;  %v960_v38 = vrot.slane %v4586_v33, 1  ;;  %v4588_v39 = vld [vmem:[%s4997_s30 + $0x9c] sm:$0xff]  }
  0x89   : > { %2083 = vrot.lane.b32.xlu0 %v4551_v51, %s4912_s9  ;;  %v2784_v51 = vrot.slane %v4570_v46, 1  ;;  %v4590_v46 = vld [vmem:[%s4997_s30 + $0xa8] sm:$0xff]  }
  0x8b   : > { %v2786_v61 = vsel %vm944_vm0, %v2784_v51, %v2785_v54  ;;  %v1560_v51 = vshrl.u32 %v4592_v47, 16  ;;  %v4595_v54 = vld [vmem:[%s4997_s30 + $0x44] ss:$0 sps:$4 sm:$0x11]  }
  0x8c   : > { %2530 = vrot.lane.b32.xlu1 %v2449_v10, %s4913_s10 }
  0x8d   : > { %2514 = vrot.lane.b32.xlu0 %v2353_v15, %s4913_s10  ;;  %v4580_v15 = vld [vmem:[%s4997_s30 + $0x90] sm:$0xfe]   ;;  %v1565_v2 = vor.u32 %v1564_v59, %v1560_v51  ;;  %v4616_v59 = vld [vmem:[%s4997_s30 + $0xb0] ss:$0 sps:$4 sm:$0x11]  }
  0x8e   : > { %v5197_v63 = vpop.permute.xlu1 %1190  ;;  %v981_v20 = vrot.slane %v4580_v15, 1  ;;  %v1476_v15 = vshrl.u32 %v4598_v6, 16 }
  0x8f   : > { %v5206_v11 = vpop.permute.xlu0 %1174 }
  0x90   : > { %2532 = vrot.lane.b32.xlu1 %v2461_v25, %s4913_s10  ;;  %v582_v25 = vsel %vm510_vm1, %v577_v18, %v581_v19  ;;  %v1577_v19 = vor.u32 %v1576_v14, %v1572_v4 }
  0x91   : > { %2516 = vrot.lane.b32.xlu0 %v2365_v30, %s4913_s10  ;;  %v4584_v30 = vld [vmem:[%s4997_s30 + $0x9c] sm:$0xfe]  }
  0x92   : > { %v5212_v22 = vpop.permute.xlu1 %1009  ;;  %v984_v32 = vrot.slane %v4584_v30, 1  ;;  %v4602_v30 = vld [vmem:[%s4997_s30 + $0x3c] sm:$0xfe]  }
  0x93   : > { %v994_v31 = vpop.permute.xlu0 %993 }
  0x94   : > { %2819 = vrot.lane.b32.xlu1 %v2783_v36, %s4914_s11  ;;  %v4587_v36 = vld [vmem:[%s4997_s30 + $0x44] ss:$0 sps:$4 sm:$0x11]  }
  0x95   : > { %2803 = vrot.lane.b32.xlu0 %v2759_v42, %s4914_s11  ;;  %v961_v41 = vrot.slane %v4587_v36, 1  ;;  %v4589_v42 = vld [vmem:[%s4997_s30 + $0x3c] sm:$0xff]   ;;  %v4604_v36 = vld [vmem:[%s4997_s30 + $0xa8] sm:$0xfe]  }
  0x96   : > { %v1012_v37 = vpop.permute.xlu1 %1011 }
  0x97   : > { %v996_v44 = vpop.permute.xlu0 %995  ;;  %v962_v43 = vsel %vm944_vm0, %v960_v38, %v961_v41 }
  0x98   : > { %727 = vrot.lane.b32.xlu1 %v666_v50, %s4909_s6  ;;  %v4591_v50 = vld [vmem:[%s4997_s30 + $0x48] sm:$0xff]  }
  0x99   : > { %711 = vrot.lane.b32.xlu0 %v570_v53, %s4909_s6  ;;  %v1567_v53 = vshll.u32 %v4593_v48, 16 }
  0x9a   : > { %v706_v57 = vpop.permute.xlu1 %705 }
  0x9b   : > { %753 = vst.msk [vmem:[#allocation2 + $0x8] sm:$0xff] %vm751_vm3, %v706_v57  ;;  %v704_v60 = vpop.permute.xlu0 %703  ;;  %v1466_v57 = vshll.u32 %v4594_v49, 16  ;;  %v4608_v49 = vld [vmem:[%s4997_s30 + $0xa8] sm:$0xff]  }
  0x9c   : > { %1043 = vst.msk [vmem:[#allocation2 + $0x8] sm:$0xff] %vm1041_vm4, %v996_v44  ;;  %2821 = vrot.lane.b32.xlu1 %v2786_v61, %s4914_s11  ;;  %v1471_v61 = vshll.u32 %v4595_v54, 16  ;;  %v4613_v54 = vld [vmem:[%s4997_s30 + $0x18] sm:$0xff]  }
  0x9d   : > { %752 = vst.msk [vmem:[#allocation2] sm:$0xff] %vm751_vm3, %v704_v60  ;;  %2805 = vrot.lane.b32.xlu0 %v2762_v1, %s4914_s11  ;;  %v1569_v60 = vrot.slane %v1567_v53, 1  ;;  %v1468_v0 = vrot.slane %v1466_v57, 1  ;;  %v4597_v1 = vld [vmem:[%s4997_s30 + $0xb0] ss:$0 sps:$4 sm:$0x11]  }
  0x9e   : > { %1042 = vst.msk [vmem:[#allocation2] sm:$0xff] %vm1041_vm4, %v994_v31  ;;  %v722_v10 = vpop.permute.xlu1 %721  ;;  %v4585_v31 = vld [vmem:[%s4997_s30 + $0xa4] ss:$0 sps:$4 sm:$0x11]   ;;  %v1473_v3 = vrot.slane %v1471_v61, 1  ;;  %v4610_v57 = vld [vmem:[%s4997_s30 + $0xb4] sm:$0xff]  }
  0x9f   : > { %1223 = vst.msk [vmem:[#allocation2] sm:$0xff] %vm1222_vm5, %v5206_v11  ;;  %v720_v16 = vpop.permute.xlu0 %719  ;;  %v678_v11 = vsel %vm510_vm1, %v673_v9, %v677_v12  ;;  %v985_v35 = vrot.slane %v4585_v31, 1  ;;  %v1469_v8 = vor.u32 %v1468_v0, %v1464_v56  ;;  %v1579_v9 = vshll.u32 %v4597_v1, 16  ;;  %v4603_v31 = vld [vmem:[%s4997_s30 + $0x44] ss:$0 sps:$4 sm:$0x11]  }
  0xa0   : > { %761 = vst.msk [vmem:[#allocation2 + $0x48] sm:$0xff] %vm751_vm3, %v722_v10  ;;  %760 = vst.msk [vmem:[#allocation2 + $0x40] sm:$0xff] %vm751_vm3, %v720_v16  ;;  %729 = vrot.lane.b32.xlu1 %v678_v11, %s4909_s6  ;;  %v4599_v10 = vld [vmem:[%s4997_s30 + $0x50] ss:$0 sps:$4 sm:$0x11]   ;;  %v1570_v13 = vsel %vm510_vm1, %v1565_v2, %v1569_v60  ;;  %v1478_v16 = vshll.u32 %v4598_v6, 16 }
  0xa1   : > { %1051 = vst.msk [vmem:[#allocation2 + $0x48] sm:$0xff] %vm1041_vm4, %v1012_v37  ;;  %1050 = vst.msk [vmem:[#allocation2 + $0x40] sm:$0xff] %vm1041_vm4, %v5212_v22  ;;  %713 = vrot.lane.b32.xlu0 %v582_v25, %s4909_s6  ;;  %v983_v22 = vsel %vm944_vm0, %v981_v20, %v982_v21  ;;  %v986_v40 = vsel %vm944_vm0, %v984_v32, %v985_v35  ;;  %v1474_v17 = vsel %vm510_vm1, %v1469_v8, %v1473_v3  ;;  %v4600_v21 = vld [vmem:[%s4997_s30 + $0x9c] sm:$0xfe]   ;;  %v4617_v60 = vld [vmem:[%s4997_s30 + $0x48] sm:$0xff]  }
  0xa2   : > { %v1193_v26 = vpop.permute.xlu1 %1192  ;;  %1231 = vst.msk [vmem:[#allocation2 + $0x40] sm:$0xff] %vm1222_vm5, %v5197_v63  ;;  %v959_v63 = vsel %vm944_vm0, %v957_v28, %v958_v29  ;;  %v1581_v11 = vrot.slane %v1579_v9, 1  ;;  %v1483_v18 = vshll.u32 %v4599_v10, 16  ;;  %v1480_v20 = vrot.slane %v1478_v16, 1  ;;  %v4611_v61 = vld [vmem:[%s4997_s30 + $0x54] sm:$0xff]   ;;  %v4619_v8 = vld [vmem:[%s5781_s1 + $0x8] sm:$0xff]  }
  0xa3   : > { %1232 = vst.msk [vmem:[#allocation2 + $0x48] sm:$0xff] %vm1222_vm5, %v1193_v26  ;;  %v1177_v27 = vpop.permute.xlu0 %1176  ;;  %v1884_v28 = vrot.slane %v4600_v21, 1  ;;  %v1885_v29 = vrot.slane %v4601_v23, 1  ;;  %v1860_v32 = vrot.slane %v4602_v30, 1  ;;  %v1861_v35 = vrot.slane %v4603_v31, 1  ;;  %v4622_v16 = vld [vmem:[%s4997_s30 + $0x54] sm:$0xff]  }
  0xa4   : > { %1224 = vst.msk [vmem:[#allocation2 + $0x8] sm:$0xff] %vm1222_vm5, %v1177_v27  ;;  %1017 = vrot.lane.b32.xlu1 %v983_v22, %s4908_s5  ;;  %v1485_v25 = vrot.slane %v1483_v18, 1  ;;  %v1582_v27 = vsel %vm510_vm1, %v1577_v19, %v1581_v11  ;;  %v1481_v22 = vor.u32 %v1480_v20, %v1476_v15  ;;  %v2470_v2 = vshll.u32 %v4616_v59, 16  ;;  %v4618_v3 = vld [vmem:[%s4997_s30 + $0x50] ss:$0 sps:$4 sm:$0x11]  }
  0xa5   : > { %1001 = vrot.lane.b32.xlu0 %v959_v63, %s4908_s5  ;;  %320 = vst.msk [vmem:[#allocation2 + $0x10] sm:$0xff] %vm317_vm2, %v4613_v54  ;;  %v2367_v4 = vshrl.u32 %v4617_v60, 16  ;;  %v2369_v5 = vshll.u32 %v4617_v60, 16  ;;  %v4621_v15 = vld [vmem:[%s4997_s30 + $0xbc] ss:$0 sps:$4 sm:$0x11]  }
  0xa6   : > { %v1624_v34 = vpop.permute.xlu1 %1623  ;;  %v1486_v63 = vsel %vm510_vm1, %v1481_v22, %v1485_v25  ;;  %v2472_v9 = vrot.slane %v2470_v2, 1  ;;  %v4624_v21 = vld [vmem:[%s4997_s30 + $0x84] sm:$0xff]   ;;  %v2482_v25 = vshll.u32 %v4621_v15, 16 }
  0xa7   : > { %1664 = vst.msk [vmem:[#allocation2 + $0x40] sm:$0xff] %vm1655_vm6, %v1624_v34  ;;  %v1608_v37 = vpop.permute.xlu0 %1607  ;;  %v1886_v34 = vsel %vm944_vm0, %v1884_v28, %v1885_v29  ;;  %v2371_v10 = vrot.slane %v2369_v5, 1  ;;  %v2379_v28 = vshrl.u32 %v4622_v16, 16  ;;  %v2381_v29 = vshll.u32 %v4622_v16, 16  ;;  %v4625_v30 = vld [vmem:[%s4997_s30 + $0x24] sm:$0xff]   ;;  %v4639_v5 = vld [vmem:[%s4997_s30 + $0xb4] sm:$0xff]  }
  0xa8   : > { %1656 = vst.msk [vmem:[#allocation2] sm:$0xff] %vm1655_vm6, %v1608_v37  ;;  %1019 = vrot.lane.b32.xlu1 %v986_v40, %s4908_s5  ;;  %v4605_v37 = vld [vmem:[%s4997_s30 + $0xb0] ss:$0 sps:$4 sm:$0x11]   ;;  %v1887_v40 = vrot.slane %v4604_v36, 1  ;;  %v2484_v31 = vrot.slane %v2482_v25, 1 }
  0xa9   : > { %1003 = vrot.lane.b32.xlu0 %v962_v43, %s4908_s5  ;;  %v1888_v41 = vrot.slane %v4605_v37, 1  ;;  %v4607_v43 = vld [vmem:[%s4997_s30 + $0x50] ss:$0 sps:$4 sm:$0x11]   ;;  %v2372_v11 = vor.u32 %v2371_v10, %v2367_v4  ;;  %329 = vst.msk [vmem:[#allocation2 + $0x58] sm:$0xff] %vm317_vm2, %v4624_v21  ;;  %321 = vst.msk [vmem:[#allocation2 + $0x18] sm:$0xff] %vm317_vm2, %v4625_v30 }
  0xaa   : > { %v1626_v44 = vpop.permute.xlu1 %1625  ;;  %v1864_v48 = vrot.slane %v4607_v43, 1  ;;  %v4627_v43 = vld [vmem:[%s4997_s30 + $0xa8] sm:$0xfe]   ;;  %v4634_v4 = vld [vmem:[%s4997_s30 + $0x50] ss:$0 sps:$4 sm:$0x11]  }
  0xab   : > { %1665 = vst.msk [vmem:[#allocation2 + $0x48] sm:$0xff] %vm1655_vm6, %v1626_v44  ;;  %v1610_v45 = vpop.permute.xlu0 %1609  ;;  %v591_v10 = vshll.u32 %v4634_v4, 16  ;;  %v4638_v25 = vld [vmem:[%s4997_s30 + $0x5c] ss:$0 sps:$4 sm:$0x11]  }
  0xac   : > { %1657 = vst.msk [vmem:[#allocation2 + $0x8] sm:$0xff] %vm1655_vm6, %v1610_v45  ;;  %1198 = vrot.lane.b32.xlu1 %v4588_v39, %s4907_s4  ;;  %v1862_v39 = vsel %vm944_vm0, %v1860_v32, %v1861_v35  ;;  %v1889_v45 = vsel %vm944_vm0, %v1887_v40, %v1888_v41  ;;  %v2383_v35 = vrot.slane %v2381_v29, 1  ;;  %v4631_v40 = vld [vmem:[%s4997_s30 + $0xa8] sm:$0xff]   ;;  %v2767_v29 = vrot.slane %v4638_v25, 1  ;;  %v4654_v25 = vld [vmem:[%s4997_s30 + $0x60] sm:$0xff]  }
  0xad   : > { %1182 = vrot.lane.b32.xlu0 %v4589_v42, %s4907_s4  ;;  %v4606_v42 = vld [vmem:[%s4997_s30 + $0x48] sm:$0xfe]  }
  0xae   : > { %v1913_v55 = vpop.permute.xlu1 %1912 }
  0xaf   : > { %1953 = vst.msk [vmem:[#allocation2 + $0x40] sm:$0xff] %vm1944_vm7, %v1913_v55  ;;  %v1897_v58 = vpop.permute.xlu0 %1896  ;;  %v4614_v55 = vld [vmem:[%s5781_s1] sm:$0xff]  }
  0xb0   : > { %1945 = vst.msk [vmem:[#allocation2] sm:$0xff] %vm1944_vm7, %v1897_v58  ;;  %1200 = vrot.lane.b32.xlu1 %v4590_v46, %s4907_s4  ;;  %v1863_v46 = vrot.slane %v4606_v42, 1  ;;  %v4615_v58 = vld [vmem:[%s4997_s30 + $0xa8] sm:$0xff]   ;;  %4345 = vmatprep.subr.bf16.mxu0 %v4614_v55  ;;  %v2384_v42 = vor.u32 %v2383_v35, %v2379_v28  ;;  %v4642_v35 = vld [vmem:[%s4997_s30 + $0x5c] ss:$0 sps:$4 sm:$0x11]  }
  0xb1   : > { %1184 = vrot.lane.b32.xlu0 %v4591_v50, %s4907_s4  ;;  %v4612_v50 = vld [vmem:[%s4997_s30 + $0x78] sm:$0xff]   ;;  %4383 = vmatprep.subr.bf16.mxu1 %v4614_v55  ;;  %v2463_v62 = vshrl.u32 %v4615_v58, 16  ;;  %v2465_v0 = vshll.u32 %v4615_v58, 16  ;;  %v682_v58 = vshll.u32 %v4631_v40, 16 }
  0xb2   : > { %v1915_v7 = vpop.permute.xlu1 %1914  ;;  %v1865_v51 = vsel %vm944_vm0, %v1863_v46, %v1864_v48  ;;  %328 = vst.msk [vmem:[#allocation2 + $0x50] sm:$0xff] %vm317_vm2, %v4612_v50  ;;  %4346 = vmatpush3.bf16.msra.mxu0 %v4614_v55  ;;  %4386 = vmatpush3.bf16.msra.mxu1 %v4614_v55  ;;  %v2787_v48 = vrot.slane %v4627_v43, 1 }
  0xb3   : > { %1954 = vst.msk [vmem:[#allocation2 + $0x48] sm:$0xff] %vm1944_vm7, %v1915_v7  ;;  %v1899_v12 = vpop.permute.xlu0 %1898  ;;  %v2467_v7 = vrot.slane %v2465_v0, 1  ;;  %4347 = vmatprep.subr.bf16.mxu0 %v4619_v8  ;;  %4384 = vmatprep.subr.bf16.mxu1 %v4619_v8 }
  0xb4   : > { %1946 = vst.msk [vmem:[#allocation2 + $0x8] sm:$0xff] %vm1944_vm7, %v1899_v12  ;;  %1631 = vrot.lane.b32.xlu1 %v1570_v13, %s4910_s7  ;;  %v2374_v12 = vshll.u32 %v4618_v3, 16  ;;  %v4620_v13 = vld [vmem:[%s4997_s30 + $0xb4] sm:$0xff]   ;;  %v4633_v3 = vld [vmem:[%s4997_s30 + $0x48] sm:$0xff]  }
  0xb5   : > { %1615 = vrot.lane.b32.xlu0 %v1474_v17, %s4910_s7  ;;  %v2468_v14 = vor.u32 %v2467_v7, %v2463_v62  ;;  %v2475_v19 = vshrl.u32 %v4620_v13, 16  ;;  %v2477_v20 = vshll.u32 %v4620_v13, 16  ;;  %v4635_v13 = vld [vmem:[%s4997_s30 + $0xb4] sm:$0xfe]  }
  0xb6   : > { %v2094_v24 = vpop.permute.xlu1 %2093  ;;  %v2376_v18 = vrot.slane %v2374_v12, 1  ;;  %4348 = vmatpush3.bf16.msra.mxu0 %v4619_v8  ;;  %4387 = vmatpush3.bf16.msra.mxu1 %v4619_v8  ;;  %v584_v8 = vshrl.u32 %v4633_v3, 16 }
  0xb7   : > { %2134 = vst.msk [vmem:[#allocation2 + $0x40] sm:$0xff] %vm2125_vm8, %v2094_v24  ;;  %v2078_v26 = vpop.permute.xlu0 %2077  ;;  %v2473_v24 = vsel %vm510_vm1, %v2468_v14, %v2472_v9  ;;  %v2479_v22 = vrot.slane %v2477_v20, 1  ;;  %v586_v9 = vshll.u32 %v4633_v3, 16  ;;  %v692_v14 = vshrl.u32 %v4639_v5, 16  ;;  %v4641_v20 = vld [vmem:[%s4997_s30 + $0x54] sm:$0xff]  }
  0xb8   : > { %2126 = vst.msk [vmem:[#allocation2] sm:$0xff] %vm2125_vm8, %v2078_v26  ;;  %1633 = vrot.lane.b32.xlu1 %v1582_v27, %s4910_s7  ;;  %v4623_v26 = vld [vmem:[%s4997_s30 + $0x5c] ss:$0 sps:$4 sm:$0x11]   ;;  %v2377_v27 = vsel %vm510_vm1, %v2372_v11, %v2376_v18  ;;  %v593_v18 = vrot.slane %v591_v10, 1 }
  0xb9   : > { %1617 = vrot.lane.b32.xlu0 %v1486_v63, %s4910_s7  ;;  %v2386_v63 = vshll.u32 %v4623_v26, 16  ;;  %v588_v16 = vrot.slane %v586_v9, 1  ;;  %v4636_v11 = vld [vmem:[%s4997_s30 + $0xbc] ss:$0 sps:$4 sm:$0x11]   ;;  %v4655_v9 = vld [vmem:[%s4997_s30 + $0xb4] sm:$0xff]  }
  0xba   : > { %v2096_v33 = vpop.permute.xlu1 %2095  ;;  %v4650_v3 = vld [vmem:[%s4997_s30 + $0x5c] ss:$0 sps:$4 sm:$0x11]  }
  0xbb   : > { %2135 = vst.msk [vmem:[#allocation2 + $0x48] sm:$0xff] %vm2125_vm8, %v2096_v33  ;;  %v2080_v38 = vpop.permute.xlu0 %2079  ;;  %v589_v21 = vor.u32 %v588_v16, %v584_v8  ;;  %v4651_v8 = vld [vmem:[%s4997_s30 + $0xb4] sm:$0xff]   ;;  %v1584_v16 = vshrl.u32 %v4655_v9, 16 }
  0xbc   : > { %2127 = vst.msk [vmem:[#allocation2 + $0x8] sm:$0xff] %vm2125_vm8, %v2080_v38  ;;  %1920 = vrot.lane.b32.xlu1 %v1886_v34, %s4911_s8  ;;  %v2480_v34 = vor.u32 %v2479_v22, %v2475_v19  ;;  %v2388_v38 = vrot.slane %v2386_v63, 1  ;;  %v2790_v19 = vrot.slane %v4635_v13, 1  ;;  %v694_v63 = vshll.u32 %v4639_v5, 16  ;;  %v4652_v13 = vld [vmem:[%s4997_s30 + $0x54] sm:$0xff]  }
  0xbd   : > { %1904 = vrot.lane.b32.xlu0 %v1862_v39, %s4911_s8  ;;  %v4626_v39 = vld [vmem:[%s5781_s1 + $0x10] ss:$0 sps:$4 sm:$0x33]  }
  0xbe   : > { %v2527_v44 = vpop.permute.xlu1 %2526  ;;  %v2485_v41 = vsel %vm510_vm1, %v2480_v34, %v2484_v31  ;;  %4389 = vmatprep.subr.msk.bf16.mxu0 %vm2956_vm12, %v4626_v39  ;;  %v2389_v46 = vsel %vm510_vm1, %v2384_v42, %v2388_v38  ;;  %4390 = vmatprep.subr.msk.bf16.mxu1 %vm2956_vm12, %v4626_v39  ;;  %v4640_v31 = vld [vmem:[%s4997_s30 + $0xbc] ss:$0 sps:$4 sm:$0x11]   ;;  %v4643_v42 = vld [vmem:[%s4997_s30 + $0xa8] sm:$0xfe]  }
  0xbf   : > { %2567 = vst.msk [vmem:[#allocation2 + $0x40] sm:$0xff] %vm2558_vm9, %v2527_v44  ;;  %v2511_v47 = vpop.permute.xlu0 %2510  ;;  %v2958_v44 = vsel %vm2956_vm12, %v4626_v39, 0  ;;  %v699_v34 = vshll.u32 %v4640_v31, 16 }
  0xc0   : > { %2559 = vst.msk [vmem:[#allocation2] sm:$0xff] %vm2558_vm9, %v2511_v47  ;;  %1922 = vrot.lane.b32.xlu1 %v1889_v45, %s4911_s8  ;;  %v4628_v45 = vld [vmem:[%s4997_s30 + $0xb0] ss:$0 sps:$4 sm:$0x11]   ;;  %4350 = vmatpush3.bf16.msra.mxu0 %v2958_v44 }
  0xc1   : > { %1906 = vrot.lane.b32.xlu0 %v1865_v51, %s4911_s8  ;;  %4388 = vmatpush3.bf16.msra.mxu1 %v2958_v44  ;;  %v2788_v51 = vrot.slane %v4628_v45, 1  ;;  %v701_v39 = vrot.slane %v699_v34, 1  ;;  %v4644_v45 = vld [vmem:[%s4997_s30 + $0xb0] ss:$0 sps:$4 sm:$0x11]  }
  0xc2   : > { %v2529_v53 = vpop.permute.xlu1 %2528 }
  0xc3   : > { %2568 = vst.msk [vmem:[#allocation2 + $0x48] sm:$0xff] %vm2558_vm9, %v2529_v53  ;;  %v2513_v56 = vpop.permute.xlu0 %2512  ;;  %v4630_v53 = vld [vmem:[%s4997_s30 + $0x50] ss:$0 sps:$4 sm:$0x11]   ;;  %v2789_v54 = vsel %vm944_vm0, %v2787_v48, %v2788_v51  ;;  %v4645_v51 = vld [vmem:[%s4997_s30 + $0x48] sm:$0xfe]  }
  0xc4   : > { %2560 = vst.msk [vmem:[#allocation2 + $0x8] sm:$0xff] %vm2558_vm9, %v2513_v56  ;;  %2101 = vrot.lane.b32.xlu1 %v4608_v49, %s4912_s9  ;;  %v680_v49 = vshrl.u32 %v4631_v40, 16  ;;  %v2764_v56 = vrot.slane %v4630_v53, 1  ;;  %v603_v40 = vshll.u32 %v4642_v35, 16 }
  0xc5   : > { %2085 = vrot.lane.b32.xlu0 %v4609_v52, %s4912_s9  ;;  %v4629_v52 = vld [vmem:[%s4997_s30 + $0x48] sm:$0xfe]  }
  0xc6   : > { %v2816_v1 = vpop.permute.xlu1 %2815  ;;  %v2763_v55 = vrot.slane %v4629_v52, 1  ;;  %v4646_v52 = vld [vmem:[%s4997_s30 + $0x50] ss:$0 sps:$4 sm:$0x11]  }
  0xc7   : > { %2856 = vst.msk [vmem:[#allocation2 + $0x40] sm:$0xff] %vm2847_vm10, %v2816_v1  ;;  %v2800_v6 = vpop.permute.xlu0 %2799  ;;  %v684_v1 = vrot.slane %v682_v58, 1  ;;  %v964_v58 = vrot.slane %v4646_v52, 1  ;;  %v4664_v52 = vld [vmem:[%s4997_s30 + $0xbc] ss:$0 sps:$4 sm:$0x11]  }
  0xc8   : > { %2848 = vst.msk [vmem:[#allocation2] sm:$0xff] %vm2847_vm10, %v2800_v6  ;;  %2103 = vrot.lane.b32.xlu1 %v4610_v57, %s4912_s9  ;;  %v4632_v57 = vld [vmem:[%s4997_s30 + $0xb0] ss:$0 sps:$4 sm:$0x11]  }
  0xc9   : > { %2087 = vrot.lane.b32.xlu0 %v4611_v61, %s4912_s9  ;;  %v2765_v61 = vsel %vm944_vm0, %v2763_v55, %v2764_v56  ;;  %v687_v2 = vshll.u32 %v4632_v57, 16  ;;  %v685_v6 = vor.u32 %v684_v1, %v680_v49  ;;  %v963_v57 = vrot.slane %v4645_v51, 1 }
  0xca   : > { %v724_v17 = vpop.permute.xlu1 %723 }
  0xcb   : > { %762 = vst.msk [vmem:[#allocation2 + $0x50] sm:$0xff] %vm751_vm3, %v724_v17  ;;  %v708_v23 = vpop.permute.xlu0 %707  ;;  %v689_v7 = vrot.slane %v687_v2, 1 }
  0xcc   : > { %754 = vst.msk [vmem:[#allocation2 + $0x10] sm:$0xff] %vm751_vm3, %v708_v23  ;;  %2534 = vrot.lane.b32.xlu1 %v2473_v24, %s4913_s10  ;;  %v2791_v23 = vrot.slane %v4636_v11, 1  ;;  %v4637_v24 = vld [vmem:[%s4997_s30 + $0x54] sm:$0xfe]  }
  0xcd   : > { %2518 = vrot.lane.b32.xlu0 %v2377_v27, %s4913_s10  ;;  %v690_v15 = vsel %vm510_vm1, %v685_v6, %v689_v7  ;;  %v594_v27 = vsel %vm510_vm1, %v589_v21, %v593_v18  ;;  %v2766_v28 = vrot.slane %v4637_v24, 1  ;;  %v967_v7 = vrot.slane %v4650_v3, 1  ;;  %v4657_v11 = vld [vmem:[%s4997_s30 + $0x54] sm:$0xff]   ;;  %v4653_v18 = vld [vmem:[%s4997_s30 + $0xc0] sm:$0xff]  }
  0xce   : > { %v2818_v32 = vpop.permute.xlu1 %2817  ;;  %v2872_v33 = vld [vmem:[#allocation2 + $0x40] sm:$0xff]  ;;  %v2792_v22 = vsel %vm944_vm0, %v2790_v19, %v2791_v23  ;;  %v4658_v23 = vld [vmem:[%s4997_s30 + $0x5c] ss:$0 sps:$4 sm:$0x11]   ;;  %v1488_v24 = vshrl.u32 %v4657_v11, 16 }
  0xcf   : > { %2857 = vst.msk [vmem:[#allocation2 + $0x48] sm:$0xff] %vm2847_vm10, %v2818_v32  ;;  %v2802_v36 = vpop.permute.xlu0 %2801  ;;  %v2864_v37 = vld [vmem:[#allocation2] sm:$0xff]  ;;  %4367 = vmatprep.mubr.msk.bf16.mxu1 %vm2907_vm11, %v2872_v33  ;;  %v596_v32 = vshrl.u32 %v4641_v20, 16  ;;  %v2768_v33 = vsel %vm944_vm0, %v2766_v28, %v2767_v29 }
  0xd0   : > { %2849 = vst.msk [vmem:[#allocation2 + $0x8] sm:$0xff] %vm2847_vm10, %v2802_v36  ;;  %4351 = vmatprep.mubr.msk.bf16.mxu0 %vm2907_vm11, %v2864_v37  ;;  %2536 = vrot.lane.b32.xlu1 %v2485_v41, %s4913_s10  ;;  %v696_v36 = vrot.slane %v694_v63, 1  ;;  %v598_v37 = vshll.u32 %v4641_v20, 16  ;;  %v4660_v63 = vld [vmem:[%s4997_s30 + $0xc8] ss:$0 sps:$4 sm:$0x11]  }
  0xd1   : > { %2520 = vrot.lane.b32.xlu0 %v2389_v46, %s4913_s10  ;;  %v605_v46 = vrot.slane %v603_v40, 1  ;;  %v1603_v40 = vshll.u32 %v4660_v63, 16 }
  0xd2   : > { %v726_v47 = vpop.permute.xlu1 %725  ;;  %v697_v43 = vor.u32 %v696_v36, %v692_v14  ;;  %v600_v44 = vrot.slane %v598_v37, 1  ;;  %v4661_v36 = vld [vmem:[%s4997_s30 + $0x60] sm:$0xff]  }
  0xd3   : > { %763 = vst.msk [vmem:[#allocation2 + $0x58] sm:$0xff] %vm751_vm3, %v726_v47  ;;  %v710_v50 = vpop.permute.xlu0 %709  ;;  %v987_v47 = vrot.slane %v4643_v42, 1 }
  0xd4   : > { %755 = vst.msk [vmem:[#allocation2 + $0x18] sm:$0xff] %vm751_vm3, %v710_v50  ;;  %2823 = vrot.lane.b32.xlu1 %v2789_v54, %s4914_s11  ;;  %v702_v48 = vsel %vm510_vm1, %v697_v43, %v701_v39  ;;  %v601_v49 = vor.u32 %v600_v44, %v596_v32  ;;  %v988_v50 = vrot.slane %v4644_v45, 1  ;;  %v1500_v43 = vshrl.u32 %v4661_v36, 16 }
  0xd5   : > { %2807 = vrot.lane.b32.xlu0 %v2765_v61, %s4914_s11  ;;  %v965_v61 = vsel %vm944_vm0, %v963_v57, %v964_v58  ;;  %v1502_v44 = vshll.u32 %v4661_v36, 16  ;;  %v1891_v58 = vrot.slane %v4664_v52, 1  ;;  %v4681_v36 = vld [vmem:[%s4997_s30 + $0xcc] sm:$0xff]  }
  0xd6   : > { %v1014_v59 = vpop.permute.xlu1 %1013  ;;  %v2873_v60 = vld [vmem:[#allocation2 + $0x48] sm:$0xff]  ;;  %v606_v55 = vsel %vm510_vm1, %v601_v49, %v605_v46  ;;  %v989_v56 = vsel %vm944_vm0, %v987_v47, %v988_v50  ;;  %v1605_v46 = vrot.slane %v1603_v40, 1  ;;  %v4683_v40 = vld [vmem:[%s4997_s30 + $0x6c] sm:$0xff]  }
  0xd7   : > { %1052 = vst.msk [vmem:[#allocation2 + $0x50] sm:$0xff] %vm1041_vm4, %v1014_v59  ;;  %v998_v62 = vpop.permute.xlu0 %997  ;;  %v2865_v0 = vld [vmem:[#allocation2 + $0x8] sm:$0xff]  ;;  %4368 = vmatmul.mubr.msk.bf16.vlgmr.msra.gmra.mrb[0].mxu1 %vm2907_vm11, %v2873_v60  ;;  %v1504_v50 = vrot.slane %v1502_v44, 1  ;;  %v2501_v44 = vshll.u32 %v4681_v36, 16 }
  0xd8   : > { %1044 = vst.msk [vmem:[#allocation2 + $0x10] sm:$0xff] %vm1041_vm4, %v998_v62  ;;  %4352 = vmatmul.mubr.msk.bf16.vlgmr.msra.gmra.mrb[0].mxu0 %vm2907_vm11, %v2865_v0  ;;  %731 = vrot.lane.b32.xlu1 %v690_v15, %s4909_s6  ;;  %v4647_v59 = vld [vmem:[%s4997_s30 + $0xb4] sm:$0xfe]   ;;  %v4648_v60 = vld [vmem:[%s4997_s30 + $0xbc] ss:$0 sps:$4 sm:$0x11]  }
  0xd9   : > { %715 = vrot.lane.b32.xlu0 %v594_v27, %s4909_s6  ;;  %v990_v62 = vrot.slane %v4647_v59, 1  ;;  %v4649_v0 = vld [vmem:[%s4997_s30 + $0x54] sm:$0xfe]   ;;  %v991_v2 = vrot.slane %v4648_v60, 1  ;;  %v1490_v27 = vshll.u32 %v4657_v11, 16  ;;  %v1505_v57 = vor.u32 %v1504_v50, %v1500_v43  ;;  %v4671_v11 = vld [vmem:[%s4997_s30 + $0xc0] sm:$0xff]  }
  0xda   : > { %v1016_v12 = vpop.permute.xlu1 %1015  ;;  %v966_v5 = vrot.slane %v4649_v0, 1  ;;  %v4656_v15 = vld [vmem:[%s4997_s30 + $0xbc] ss:$0 sps:$4 sm:$0x11]   ;;  %v4665_v59 = vld [vmem:[%s4997_s30 + $0x54] sm:$0xfe]  }
  0xdb   : > { %1053 = vst.msk [vmem:[#allocation2 + $0x58] sm:$0xff] %vm1041_vm4, %v1016_v12  ;;  %v1000_v17 = vpop.permute.xlu0 %999  ;;  %v992_v6 = vsel %vm944_vm0, %v990_v62, %v991_v2  ;;  %v1591_v21 = vshll.u32 %v4656_v15, 16  ;;  %v1492_v31 = vrot.slane %v1490_v27, 1  ;;  %v4666_v60 = vld [vmem:[%s4997_s30 + $0x5c] ss:$0 sps:$4 sm:$0x11]  }
  0xdc   : > { %1045 = vst.msk [vmem:[#allocation2 + $0x18] sm:$0xff] %vm1041_vm4, %v1000_v17  ;;  %2825 = vrot.lane.b32.xlu1 %v2792_v22, %s4914_s11  ;;  %v968_v12 = vsel %vm944_vm0, %v966_v5, %v967_v7  ;;  %v1586_v17 = vshll.u32 %v4655_v9, 16  ;;  %v4659_v22 = vld [vmem:[%s4997_s30 + $0xc0] sm:$0xff]   ;;  %v1866_v62 = vrot.slane %v4665_v59, 1  ;;  %v1867_v0 = vrot.slane %v4666_v60, 1  ;;  %v4673_v27 = vld [vmem:[%s4997_s30 + $0xcc] sm:$0xff]  }
  0xdd   : > { %2809 = vrot.lane.b32.xlu0 %v2768_v33, %s4914_s11  ;;  %v1593_v29 = vrot.slane %v1591_v21, 1  ;;  %v1596_v32 = vshrl.u32 %v4659_v22, 16  ;;  %v1598_v33 = vshll.u32 %v4659_v22, 16  ;;  %v1493_v37 = vor.u32 %v1492_v31, %v1488_v24  ;;  %v4667_v2 = vld [vmem:[%s4997_s30 + $0xc0] sm:$0xfe]  }
  0xde   : > { %v1195_v26 = vpop.permute.xlu1 %1194  ;;  %v1588_v20 = vrot.slane %v1586_v17, 1  ;;  %v4669_v7 = vld [vmem:[%s4997_s30 + $0x60] sm:$0xfe]   ;;  %v4670_v9 = vld [vmem:[%s4997_s30 + $0x68] ss:$0 sps:$4 sm:$0x11]  }
  0xdf   : > { %1233 = vst.msk [vmem:[#allocation2 + $0x50] sm:$0xff] %vm1222_vm5, %v1195_v26  ;;  %v1179_v30 = vpop.permute.xlu0 %1178  ;;  %v1600_v39 = vrot.slane %v1598_v33, 1  ;;  %v4672_v21 = vld [vmem:[%s4997_s30 + $0x60] sm:$0xff]   ;;  %v4680_v31 = vld [vmem:[%s4997_s30 + $0x68] ss:$0 sps:$4 sm:$0x11]  }
  0xe0   : > { %1225 = vst.msk [vmem:[#allocation2 + $0x10] sm:$0xff] %vm1222_vm5, %v1179_v30  ;;  %733 = vrot.lane.b32.xlu1 %v702_v48, %s4909_s6  ;;  %v1589_v28 = vor.u32 %v1588_v20, %v1584_v16  ;;  %v1495_v30 = vshll.u32 %v4658_v23, 16  ;;  %v4663_v48 = vld [vmem:[%s4997_s30 + $0xb4] sm:$0xfe]   ;;  %v4677_v24 = vld [vmem:[%s4997_s30 + $0xc0] sm:$0xff]   ;;  %v4674_v33 = vld [vmem:[%s4997_s30 + $0x6c] sm:$0xff]  }
  0xe1   : > { %717 = vrot.lane.b32.xlu0 %v606_v55, %s4909_s6  ;;  %v1601_v45 = vor.u32 %v1600_v39, %v1596_v32  ;;  %v1890_v55 = vrot.slane %v4663_v48, 1  ;;  %v4675_v16 = vld [vmem:[%s4997_s30 + $0x90] sm:$0xff]   ;;  %v2487_v22 = vshrl.u32 %v4677_v24, 16  ;;  %v2398_v39 = vshll.u32 %v4680_v31, 16  ;;  %v4686_v60 = vld [vmem:[%s4997_s30 + $0x3c] sm:$0xff]  }
  0xe2   : > { %v1197_v38 = vpop.permute.xlu1 %1196  ;;  %v1497_v34 = vrot.slane %v1495_v30, 1  ;;  %v1594_v42 = vsel %vm510_vm1, %v1589_v28, %v1593_v29  ;;  %330 = vst.msk [vmem:[#allocation2 + $0x60] sm:$0xff] %vm317_vm2, %v4675_v16  ;;  %v4676_v20 = vld [vmem:[%s4997_s30 + $0x30] sm:$0xff]   ;;  %v2489_v28 = vshll.u32 %v4677_v24, 16  ;;  %v2499_v43 = vshrl.u32 %v4681_v36, 16  ;;  %323 = vst.msk [vmem:[#allocation2 + $0x28] sm:$0xff] %vm317_vm2, %v4686_v60 }
  0xe3   : > { %1234 = vst.msk [vmem:[#allocation2 + $0x58] sm:$0xff] %vm1222_vm5, %v1197_v38  ;;  %v1181_v41 = vpop.permute.xlu0 %1180  ;;  %v1892_v5 = vsel %vm944_vm0, %v1890_v55, %v1891_v58  ;;  %v2503_v52 = vrot.slane %v2501_v44, 1  ;;  %v4696_v24 = vld [vmem:[%s4997_s30 + $0x48] sm:$0xff]  }
  0xe4   : > { %1226 = vst.msk [vmem:[#allocation2 + $0x18] sm:$0xff] %vm1222_vm5, %v1181_v41  ;;  %1021 = vrot.lane.b32.xlu1 %v989_v56, %s4908_s5  ;;  %v4662_v41 = vld [vmem:[%s4997_s30 + $0x68] ss:$0 sps:$4 sm:$0x11]   ;;  %v1498_v49 = vsel %vm510_vm1, %v1493_v37, %v1497_v34  ;;  %v1606_v56 = vsel %vm510_vm1, %v1601_v45, %v1605_v46  ;;  %v4685_v45 = vld [vmem:[%s4997_s30 + $0x9c] sm:$0xff]  }
  0xe5   : > { %1005 = vrot.lane.b32.xlu0 %v965_v61, %s4908_s5  ;;  %v1507_v47 = vshll.u32 %v4662_v41, 16  ;;  %322 = vst.msk [vmem:[#allocation2 + $0x20] sm:$0xff] %vm317_vm2, %v4676_v20  ;;  %331 = vst.msk [vmem:[#allocation2 + $0x68] sm:$0xff] %vm317_vm2, %v4685_v45  ;;  %v2504_v58 = vor.u32 %v2503_v52, %v2499_v43 }
  0xe6   : > { %v1628_v53 = vpop.permute.xlu1 %1627  ;;  %324 = vst.msk [vmem:[#allocation2 + $0x30] sm:$0xff] %vm317_vm2, %v4696_v24 }
  0xe7   : > { %1666 = vst.msk [vmem:[#allocation2 + $0x50] sm:$0xff] %vm1655_vm6, %v1628_v53  ;;  %v1612_v54 = vpop.permute.xlu0 %1611  ;;  %v1509_v53 = vrot.slane %v1507_v47, 1  ;;  %v2400_v47 = vrot.slane %v2398_v39, 1 }
  0xe8   : > { %1658 = vst.msk [vmem:[#allocation2 + $0x10] sm:$0xff] %vm1655_vm6, %v1612_v54  ;;  %1023 = vrot.lane.b32.xlu1 %v992_v6, %s4908_s5  ;;  %v1893_v6 = vrot.slane %v4667_v2, 1  ;;  %v4687_v2 = vld [vmem:[%s4997_s30 + $0xc0] sm:$0xfe]  }
  0xe9   : > { %1007 = vrot.lane.b32.xlu0 %v968_v12, %s4908_s5  ;;  %v1510_v61 = vsel %vm510_vm1, %v1505_v57, %v1509_v53  ;;  %v1869_v12 = vrot.slane %v4669_v7, 1  ;;  %v2405_v57 = vshll.u32 %v4683_v40, 16 }
  0xea   : > { %v1630_v1 = vpop.permute.xlu1 %1629 }
  0xeb   : > { %1667 = vst.msk [vmem:[#allocation2 + $0x58] sm:$0xff] %vm1655_vm6, %v1630_v1  ;;  %v1614_v4 = vpop.permute.xlu0 %1613 }
  0xec   : > { %1659 = vst.msk [vmem:[#allocation2 + $0x18] sm:$0xff] %vm1655_vm6, %v1614_v4  ;;  %1202 = vrot.lane.b32.xlu1 %v4651_v8, %s4907_s4  ;;  %v4668_v4 = vld [vmem:[%s4997_s30 + $0xc8] ss:$0 sps:$4 sm:$0x11]  }
  0xed   : > { %1186 = vrot.lane.b32.xlu0 %v4652_v13, %s4907_s4  ;;  %v1894_v8 = vrot.slane %v4668_v4, 1 }
  0xee   : > { %v1917_v10 = vpop.permute.xlu1 %1916 }
  0xef   : > { %1955 = vst.msk [vmem:[#allocation2 + $0x50] sm:$0xff] %vm1944_vm7, %v1917_v10  ;;  %v1901_v14 = vpop.permute.xlu0 %1900  ;;  %v1868_v10 = vsel %vm944_vm0, %v1866_v62, %v1867_v0  ;;  %v1895_v17 = vsel %vm944_vm0, %v1893_v6, %v1894_v8  ;;  %v2407_v62 = vrot.slane %v2405_v57, 1  ;;  %v4688_v6 = vld [vmem:[%s4997_s30 + $0xc8] ss:$0 sps:$4 sm:$0x11]   ;;  %v2793_v8 = vrot.slane %v4687_v2, 1 }
  0xf0   : > { %1947 = vst.msk [vmem:[#allocation2 + $0x10] sm:$0xff] %vm1944_vm7, %v1901_v14  ;;  %1204 = vrot.lane.b32.xlu1 %v4653_v18, %s4907_s4  ;;  %v1870_v14 = vrot.slane %v4670_v9, 1  ;;  %v4695_v9 = vld [vmem:[%s4997_s30 + $0xa8] sm:$0xff]  }
  0xf1   : > { %1188 = vrot.lane.b32.xlu0 %v4654_v25, %s4907_s4  ;;  %v4678_v25 = vld [vmem:[%s4997_s30 + $0xc8] ss:$0 sps:$4 sm:$0x11]   ;;  %332 = vst.msk [vmem:[#allocation2 + $0x70] sm:$0xff] %vm317_vm2, %v4695_v9 }
  0xf2   : > { %v1919_v19 = vpop.permute.xlu1 %1918  ;;  %v1871_v18 = vsel %vm944_vm0, %v1869_v12, %v1870_v14  ;;  %v2494_v30 = vshll.u32 %v4678_v25, 16  ;;  %v2794_v12 = vrot.slane %v4688_v6, 1  ;;  %v4690_v14 = vld [vmem:[%s4997_s30 + $0x68] ss:$0 sps:$4 sm:$0x11]  }
  0xf3   : > { %1956 = vst.msk [vmem:[#allocation2 + $0x58] sm:$0xff] %vm1944_vm7, %v1919_v19  ;;  %v1903_v26 = vpop.permute.xlu0 %1902 }
  0xf4   : > { %1948 = vst.msk [vmem:[#allocation2 + $0x18] sm:$0xff] %vm1944_vm7, %v1903_v26  ;;  %1635 = vrot.lane.b32.xlu1 %v1594_v42, %s4910_s7  ;;  %v4679_v26 = vld [vmem:[%s4997_s30 + $0x60] sm:$0xff]   ;;  %v2496_v37 = vrot.slane %v2494_v30, 1  ;;  %v4682_v42 = vld [vmem:[%s4997_s30 + $0xd4] ss:$0 sps:$4 sm:$0x11]  }
  0xf5   : > { %1619 = vrot.lane.b32.xlu0 %v1498_v49, %s4910_s7  ;;  %v2391_v63 = vshrl.u32 %v4679_v26, 16  ;;  %v2393_v32 = vshll.u32 %v4679_v26, 16  ;;  %v2506_v53 = vshll.u32 %v4682_v42, 16  ;;  %v4697_v30 = vld [vmem:[%s4997_s30 + $0xb4] sm:$0xff]  }
  0xf6   : > { %v2098_v35 = vpop.permute.xlu1 %2097  ;;  %333 = vst.msk [vmem:[#allocation2 + $0x78] sm:$0xff] %vm317_vm2, %v4697_v30 }
  0xf7   : > { %2136 = vst.msk [vmem:[#allocation2 + $0x50] sm:$0xff] %vm2125_vm8, %v2098_v35  ;;  %v2082_v38 = vpop.permute.xlu0 %2081  ;;  %v2491_v35 = vrot.slane %v2489_v28, 1  ;;  %v2508_v59 = vrot.slane %v2506_v53, 1 }
  0xf8   : > { %2128 = vst.msk [vmem:[#allocation2 + $0x10] sm:$0xff] %vm2125_vm8, %v2082_v38  ;;  %1637 = vrot.lane.b32.xlu1 %v1606_v56, %s4910_s7  ;;  %v2395_v38 = vrot.slane %v2393_v32, 1  ;;  %v4684_v56 = vld [vmem:[%s4997_s30 + $0x74] ss:$0 sps:$4 sm:$0x11]  }
  0xf9   : > { %1621 = vrot.lane.b32.xlu0 %v1510_v61, %s4910_s7  ;;  %v2492_v41 = vor.u32 %v2491_v35, %v2487_v22  ;;  %v2410_v0 = vshll.u32 %v4684_v56, 16  ;;  %v4693_v22 = vld [vmem:[%s4997_s30 + $0x6c] sm:$0xfe]   ;;  %s4230_s7 = sshll.u32 %s4897_s15, 11 }
  0xfa   : > { %v2100_v51 = vpop.permute.xlu1 %2099  ;;  %v2396_v46 = vor.u32 %v2395_v38, %v2391_v63  ;;  %v2772_v63 = vrot.slane %v4693_v22, 1 }
  0xfb   : > { %2137 = vst.msk [vmem:[#allocation2 + $0x58] sm:$0xff] %vm2125_vm8, %v2100_v51  ;;  %v2084_v54 = vpop.permute.xlu0 %2083  ;;  %v2497_v55 = vsel %vm510_vm1, %v2492_v41, %v2496_v37 }
  0xfc   : > { %2129 = vst.msk [vmem:[#allocation2 + $0x18] sm:$0xff] %vm2125_vm8, %v2084_v54  ;;  %1924 = vrot.lane.b32.xlu1 %v1892_v5, %s4911_s8  ;;  %v2403_v54 = vshrl.u32 %v4683_v40, 16  ;;  %v2401_v61 = vsel %vm510_vm1, %v2396_v46, %v2400_v47  ;;  %v2412_v5 = vrot.slane %v2410_v0, 1 }
  0xfd   : > { %1908 = vrot.lane.b32.xlu0 %v1868_v10, %s4911_s8 }
  0xfe   : > { %v2531_v1 = vpop.permute.xlu1 %2530  ;;  %v2408_v4 = vor.u32 %v2407_v62, %v2403_v54 }
  0xff   : > { %2569 = vst.msk [vmem:[#allocation2 + $0x50] sm:$0xff] %vm2558_vm9, %v2531_v1  ;;  %v2515_v3 = vpop.permute.xlu0 %2514 }
 0x100   : > { %2561 = vst.msk [vmem:[#allocation2 + $0x10] sm:$0xff] %vm2558_vm9, %v2515_v3  ;;  %1926 = vrot.lane.b32.xlu1 %v1895_v17, %s4911_s8  ;;  %v2509_v3 = vsel %vm510_vm1, %v2504_v58, %v2508_v59  ;;  %v2413_v10 = vsel %vm510_vm1, %v2408_v4, %v2412_v5 }
 0x101   : > { %1910 = vrot.lane.b32.xlu0 %v1871_v18, %s4911_s8 }
 0x102   : > { %v2533_v13 = vpop.permute.xlu1 %2532 }
 0x103   : > { %2570 = vst.msk [vmem:[#allocation2 + $0x58] sm:$0xff] %vm2558_vm9, %v2533_v13  ;;  %v2517_v15 = vpop.permute.xlu0 %2516  ;;  %v4689_v13 = vld [vmem:[%s4997_s30 + $0x60] sm:$0xfe]  }
 0x104   : > { %2562 = vst.msk [vmem:[#allocation2 + $0x18] sm:$0xff] %vm2558_vm9, %v2517_v15  ;;  %2105 = vrot.lane.b32.xlu1 %v4671_v11, %s4912_s9  ;;  %v2795_v11 = vsel %vm944_vm0, %v2793_v8, %v2794_v12  ;;  %v2769_v18 = vrot.slane %v4689_v13, 1 }
 0x105   : > { %2089 = vrot.lane.b32.xlu0 %v4672_v21, %s4912_s9  ;;  %v4691_v21 = vld [vmem:[%s4997_s30 + $0xcc] sm:$0xfe]  }
 0x106   : > { %v2820_v19 = vpop.permute.xlu1 %2819  ;;  %v2796_v26 = vrot.slane %v4691_v21, 1 }
 0x107   : > { %2858 = vst.msk [vmem:[#allocation2 + $0x50] sm:$0xff] %vm2847_vm10, %v2820_v19  ;;  %v2804_v23 = vpop.permute.xlu0 %2803  ;;  %v2770_v19 = vrot.slane %v4690_v14, 1 }
 0x108   : > { %2850 = vst.msk [vmem:[#allocation2 + $0x10] sm:$0xff] %vm2847_vm10, %v2804_v23  ;;  %2107 = vrot.lane.b32.xlu1 %v4673_v27, %s4912_s9  ;;  %v4692_v23 = vld [vmem:[%s4997_s30 + $0xd4] ss:$0 sps:$4 sm:$0x11]  }
 0x109   : > { %2091 = vrot.lane.b32.xlu0 %v4674_v33, %s4912_s9  ;;  %v2771_v25 = vsel %vm944_vm0, %v2769_v18, %v2770_v19  ;;  %v2797_v27 = vrot.slane %v4692_v23, 1  ;;  %v4698_v33 = vld [vmem:[%s4997_s30 + $0x54] sm:$0xff]  }
 0x10a   : > { %v728_v29 = vpop.permute.xlu1 %727  ;;  %325 = vst.msk [vmem:[#allocation2 + $0x38] sm:$0xff] %vm317_vm2, %v4698_v33 }
 0x10b   : > { %764 = vst.msk [vmem:[#allocation2 + $0x60] sm:$0xff] %vm751_vm3, %v728_v29  ;;  %v712_v34 = vpop.permute.xlu0 %711  ;;  %v4694_v29 = vld [vmem:[%s4997_s30 + $0x74] ss:$0 sps:$4 sm:$0x11]   ;;  %v2798_v31 = vsel %vm944_vm0, %v2796_v26, %v2797_v27  ;;  %s175_s30 = sand.u32 1, %s4889_s13  }
 0x10c   : > { %756 = vst.msk [vmem:[#allocation2 + $0x20] sm:$0xff] %vm751_vm3, %v712_v34  ;;  %2538 = vrot.lane.b32.xlu1 %v2497_v55, %s4913_s10  ;;  %v2773_v34 = vrot.slane %v4694_v29, 1  ;;  %s3611_s4 = sshll.u32 %s175_s30, 7  ;;  %s5733_s15 = scalar_lea.sflag [#allocation4], %s175_s30 }
 0x10d   : > { %2522 = vrot.lane.b32.xlu0 %v2401_v61, %s4913_s10  ;;  %s5668_s5 = scalar_lea.vmem [#allocation3], %s3611_s4 }
 0x10e   : > { %v2822_v48 = vpop.permute.xlu1 %2821  ;;  %v2874_v49 = vld [vmem:[#allocation2 + $0x50] sm:$0xff]  ;;  %v2774_v36 = vsel %vm944_vm0, %v2772_v63, %v2773_v34  ;;  %s3521_s8 = sshll.u32 %s5668_s5, 4  ;;  %s5727_s8 = int_to_ptr.vmem [resolvable:$true] %s3521_s8 }
 0x10f   : > { %2859 = vst.msk [vmem:[#allocation2 + $0x58] sm:$0xff] %vm2847_vm10, %v2822_v48  ;;  %v2806_v50 = vpop.permute.xlu0 %2805  ;;  %v2866_v51 = vld [vmem:[#allocation2 + $0x10] sm:$0xff]  ;;  %4371 = vmatprep.mubr.msk.bf16.mxu1 %vm2907_vm11, %v2874_v49  ;;  %s4827_s18 = scalar_lea.vmem %s5727_s8, 2048  ;;  %p4834_p1 = scmp.lt.s32.totalorder %s5727_s8, %s4832_s21 }
 0x110   : > { %2851 = vst.msk [vmem:[#allocation2 + $0x18] sm:$0xff] %vm2847_vm10, %v2806_v50  ;;  %4355 = vmatprep.mubr.msk.bf16.mxu0 %vm2907_vm11, %v2866_v51  ;;  %2540 = vrot.lane.b32.xlu1 %v2509_v3, %s4913_s10  ;;  %p4828_p12 = scmp.ne.s32.totalorder %s5727_s8, %s4827_s18  ;;  %p4835_p2 = scmp.lt.s32.totalorder %s4833_s23, %s4827_s18 }
 0x111   : > { %2524 = vrot.lane.b32.xlu0 %v2413_v10, %s4913_s10 }
 0x112   : > { %v730_v1 = vpop.permute.xlu1 %729  ;;  %p4829_p13 = pnand %p4828_p12, %p4977_p4  ;;  %p4836_p3 = por %p4835_p2, %p4834_p1 }
 0x113   : > { %765 = vst.msk [vmem:[#allocation2 + $0x68] sm:$0xff] %vm751_vm3, %v730_v1  ;;  %v714_v7 = vpop.permute.xlu0 %713 }
 0x114   : > { %757 = vst.msk [vmem:[#allocation2 + $0x28] sm:$0xff] %vm751_vm3, %v714_v7  ;;  %2827 = vrot.lane.b32.xlu1 %v2795_v11, %s4914_s11  ;;  %p4830_p0 = pneg %p4829_p13 }
 0x115   : > { %2811 = vrot.lane.b32.xlu0 %v2771_v25, %s4914_s11 }
 0x116   : > { %v1018_v15 = vpop.permute.xlu1 %1017  ;;  %v2875_v17 = vld [vmem:[#allocation2 + $0x58] sm:$0xff]  ;;  %p4837_p5 = pnand %p4836_p3, %p4830_p0 }
 0x117   : > { %v2867_v16 = vld [vmem:[#allocation2 + $0x18] sm:$0xff]  ;;  %1054 = vst.msk [vmem:[#allocation2 + $0x60] sm:$0xff] %vm1041_vm4, %v1018_v15  ;;  %4372 = vmatmul.mubr.msk.bf16.gmra.mrb[4].mxu1 %vm2907_vm11, %v2875_v17  ;;  %v1002_v20 = vpop.permute.xlu0 %1001 }
 0x118   : > { %4356 = vmatmul.mubr.msk.bf16.gmra.mrb[4].mxu0 %vm2907_vm11, %v2867_v16  ;;  %1046 = vst.msk [vmem:[#allocation2 + $0x20] sm:$0xff] %vm1041_vm4, %v1002_v20  ;;  %2829 = vrot.lane.b32.xlu1 %v2798_v31, %s4914_s11 }
 0x119   : > { %2813 = vrot.lane.b32.xlu0 %v2774_v36, %s4914_s11  ;;  %v5647_v36 = vld [vmem:[%s5782_s2] ss:$0 sm:$0xff]  ;;  %s5724_s11 = scalar_lea.hbm %s5783_s3, %s4230_s7 }
 0x11a   : > { %v1020_v28 = vpop.permute.xlu1 %1019 }
 0x11b   : > { %1055 = vst.msk [vmem:[#allocation2 + $0x68] sm:$0xff] %vm1041_vm4, %v1020_v28  ;;  %v1004_v32 = vpop.permute.xlu0 %1003 }
 0x11c   : > { %1047 = vst.msk [vmem:[#allocation2 + $0x28] sm:$0xff] %vm1041_vm4, %v1004_v32 }
 0x11e   : > { %v1199_v35 = vpop.permute.xlu1 %1198 }
 0x11f   : > { %1235 = vst.msk [vmem:[#allocation2 + $0x60] sm:$0xff] %vm1222_vm5, %v1199_v35  ;;  %v1183_v37 = vpop.permute.xlu0 %1182 }
 0x120   : > { %1227 = vst.msk [vmem:[#allocation2 + $0x20] sm:$0xff] %vm1222_vm5, %v1183_v37 }
 0x122   : > { %v1201_v38 = vpop.permute.xlu1 %1200 }
 0x123   : > { %1236 = vst.msk [vmem:[#allocation2 + $0x68] sm:$0xff] %vm1222_vm5, %v1201_v38  ;;  %v1185_v39 = vpop.permute.xlu0 %1184 }
 0x124   : > { %1228 = vst.msk [vmem:[#allocation2 + $0x28] sm:$0xff] %vm1222_vm5, %v1185_v39 }
 0x126   : > { %v1632_v40 = vpop.permute.xlu1 %1631 }
 0x127   : > { %1668 = vst.msk [vmem:[#allocation2 + $0x60] sm:$0xff] %vm1655_vm6, %v1632_v40  ;;  %v1616_v41 = vpop.permute.xlu0 %1615 }
 0x128   : > { %1660 = vst.msk [vmem:[#allocation2 + $0x20] sm:$0xff] %vm1655_vm6, %v1616_v41 }
 0x12a   : > { %v1634_v42 = vpop.permute.xlu1 %1633 }
 0x12b   : > { %1669 = vst.msk [vmem:[#allocation2 + $0x68] sm:$0xff] %vm1655_vm6, %v1634_v42  ;;  %v1618_v43 = vpop.permute.xlu0 %1617 }
 0x12c   : > { %1661 = vst.msk [vmem:[#allocation2 + $0x28] sm:$0xff] %vm1655_vm6, %v1618_v43 }
 0x12e   : > { %v1921_v44 = vpop.permute.xlu1 %1920 }
 0x12f   : > { %1957 = vst.msk [vmem:[#allocation2 + $0x60] sm:$0xff] %vm1944_vm7, %v1921_v44  ;;  %v1905_v45 = vpop.permute.xlu0 %1904 }
 0x130   : > { %1949 = vst.msk [vmem:[#allocation2 + $0x20] sm:$0xff] %vm1944_vm7, %v1905_v45 }
 0x132   : > { %v1923_v46 = vpop.permute.xlu1 %1922 }
 0x133   : > { %1958 = vst.msk [vmem:[#allocation2 + $0x68] sm:$0xff] %vm1944_vm7, %v1923_v46  ;;  %v1907_v47 = vpop.permute.xlu0 %1906 }
 0x134   : > { %1950 = vst.msk [vmem:[#allocation2 + $0x28] sm:$0xff] %vm1944_vm7, %v1907_v47 }
 0x136   : > { %v2102_v48 = vpop.permute.xlu1 %2101 }
 0x137   : > { %2138 = vst.msk [vmem:[#allocation2 + $0x60] sm:$0xff] %vm2125_vm8, %v2102_v48  ;;  %v2086_v49 = vpop.permute.xlu0 %2085 }
 0x138   : > { %2130 = vst.msk [vmem:[#allocation2 + $0x20] sm:$0xff] %vm2125_vm8, %v2086_v49 }
 0x13a   : > { %v2104_v50 = vpop.permute.xlu1 %2103 }
 0x13b   : > { %2139 = vst.msk [vmem:[#allocation2 + $0x68] sm:$0xff] %vm2125_vm8, %v2104_v50  ;;  %v2088_v51 = vpop.permute.xlu0 %2087 }
 0x13c   : > { %2131 = vst.msk [vmem:[#allocation2 + $0x28] sm:$0xff] %vm2125_vm8, %v2088_v51 }
 0x13e   : > { %v2535_v52 = vpop.permute.xlu1 %2534 }
 0x13f   : > { %2571 = vst.msk [vmem:[#allocation2 + $0x60] sm:$0xff] %vm2558_vm9, %v2535_v52  ;;  %v2519_v53 = vpop.permute.xlu0 %2518 }
 0x140   : > { %2563 = vst.msk [vmem:[#allocation2 + $0x20] sm:$0xff] %vm2558_vm9, %v2519_v53 }
 0x142   : > { %v2537_v54 = vpop.permute.xlu1 %2536 }
 0x143   : > { %2572 = vst.msk [vmem:[#allocation2 + $0x68] sm:$0xff] %vm2558_vm9, %v2537_v54  ;;  %v2521_v55 = vpop.permute.xlu0 %2520 }
 0x144   : > { %2564 = vst.msk [vmem:[#allocation2 + $0x28] sm:$0xff] %vm2558_vm9, %v2521_v55 }
 0x146   : > { %v2824_v56 = vpop.permute.xlu1 %2823 }
 0x147   : > { %2860 = vst.msk [vmem:[#allocation2 + $0x60] sm:$0xff] %vm2847_vm10, %v2824_v56  ;;  %v2808_v57 = vpop.permute.xlu0 %2807 }
 0x148   : > { %2852 = vst.msk [vmem:[#allocation2 + $0x20] sm:$0xff] %vm2847_vm10, %v2808_v57 }
 0x14a   : > { %v732_v58 = vpop.permute.xlu1 %731 }
 0x14b   : > { %766 = vst.msk [vmem:[#allocation2 + $0x70] sm:$0xff] %vm751_vm3, %v732_v58  ;;  %v716_v60 = vpop.permute.xlu0 %715 }
 0x14c   : > { %758 = vst.msk [vmem:[#allocation2 + $0x30] sm:$0xff] %vm751_vm3, %v716_v60 }
 0x14e   : > { %v2876_v59 = vld [vmem:[#allocation2 + $0x60] sm:$0xff]  ;;  %v2826_v61 = vpop.permute.xlu1 %2825 }
 0x14f   : > { %4375 = vmatprep.mubr.msk.bf16.mxu1 %vm2907_vm11, %v2876_v59  ;;  %v2868_v62 = vld [vmem:[#allocation2 + $0x20] sm:$0xff]  ;;  %2861 = vst.msk [vmem:[#allocation2 + $0x68] sm:$0xff] %vm2847_vm10, %v2826_v61  ;;  %v2810_v0 = vpop.permute.xlu0 %2809 }
 0x150   : > { %4359 = vmatprep.mubr.msk.bf16.mxu0 %vm2907_vm11, %v2868_v62  ;;  %2853 = vst.msk [vmem:[#allocation2 + $0x28] sm:$0xff] %vm2847_vm10, %v2810_v0 }
 0x152   : > { %v734_v1 = vpop.permute.xlu1 %733 }
 0x153   : > { %767 = vst.msk [vmem:[#allocation2 + $0x78] sm:$0xff] %vm751_vm3, %v734_v1  ;;  %v718_v3 = vpop.permute.xlu0 %717 }
 0x154   : > { %759 = vst.msk [vmem:[#allocation2 + $0x38] sm:$0xff] %vm751_vm3, %v718_v3 }
 0x156   : > { %v2877_v2 = vld [vmem:[#allocation2 + $0x68] sm:$0xff]  ;;  %v1022_v4 = vpop.permute.xlu1 %1021 }
 0x157   : > { %4376 = vmatmul.mubr.msk.bf16.gmra.mrb[8].mxu1 %vm2907_vm11, %v2877_v2  ;;  %1056 = vst.msk [vmem:[#allocation2 + $0x70] sm:$0xff] %vm1041_vm4, %v1022_v4  ;;  %v2869_v5 = vld [vmem:[#allocation2 + $0x28] sm:$0xff]  ;;  %v1006_v6 = vpop.permute.xlu0 %1005 }
 0x158   : > { %4360 = vmatmul.mubr.msk.bf16.gmra.mrb[8].mxu0 %vm2907_vm11, %v2869_v5  ;;  %1048 = vst.msk [vmem:[#allocation2 + $0x30] sm:$0xff] %vm1041_vm4, %v1006_v6 }
 0x15a   : > { %v1024_v7 = vpop.permute.xlu1 %1023 }
 0x15b   : > { %1057 = vst.msk [vmem:[#allocation2 + $0x78] sm:$0xff] %vm1041_vm4, %v1024_v7  ;;  %v1008_v8 = vpop.permute.xlu0 %1007 }
 0x15c   : > { %1049 = vst.msk [vmem:[#allocation2 + $0x38] sm:$0xff] %vm1041_vm4, %v1008_v8 }
 0x15e   : > { %v1203_v9 = vpop.permute.xlu1 %1202 }
 0x15f   : > { %1237 = vst.msk [vmem:[#allocation2 + $0x70] sm:$0xff] %vm1222_vm5, %v1203_v9  ;;  %v1187_v10 = vpop.permute.xlu0 %1186 }
 0x160   : > { %1229 = vst.msk [vmem:[#allocation2 + $0x30] sm:$0xff] %vm1222_vm5, %v1187_v10 }
 0x162   : > { %v1205_v12 = vpop.permute.xlu1 %1204 }
 0x163   : > { %1238 = vst.msk [vmem:[#allocation2 + $0x78] sm:$0xff] %vm1222_vm5, %v1205_v12  ;;  %v1189_v13 = vpop.permute.xlu0 %1188 }
 0x164   : > { %1230 = vst.msk [vmem:[#allocation2 + $0x38] sm:$0xff] %vm1222_vm5, %v1189_v13 }
 0x166   : > { %v1636_v14 = vpop.permute.xlu1 %1635 }
 0x167   : > { %1670 = vst.msk [vmem:[#allocation2 + $0x70] sm:$0xff] %vm1655_vm6, %v1636_v14  ;;  %v1620_v15 = vpop.permute.xlu0 %1619 }
 0x168   : > { %1662 = vst.msk [vmem:[#allocation2 + $0x30] sm:$0xff] %vm1655_vm6, %v1620_v15 }
 0x16a   : > { %v1638_v16 = vpop.permute.xlu1 %1637 }
 0x16b   : > { %1671 = vst.msk [vmem:[#allocation2 + $0x78] sm:$0xff] %vm1655_vm6, %v1638_v16  ;;  %v1622_v17 = vpop.permute.xlu0 %1621 }
 0x16c   : > { %1663 = vst.msk [vmem:[#allocation2 + $0x38] sm:$0xff] %vm1655_vm6, %v1622_v17 }
 0x16e   : > { %v1925_v11 = vpop.permute.xlu1 %1924 }
 0x16f   : > { %1959 = vst.msk [vmem:[#allocation2 + $0x70] sm:$0xff] %vm1944_vm7, %v1925_v11  ;;  %v1909_v18 = vpop.permute.xlu0 %1908 }
 0x170   : > { %1951 = vst.msk [vmem:[#allocation2 + $0x30] sm:$0xff] %vm1944_vm7, %v1909_v18 }
 0x172   : > { %v1927_v19 = vpop.permute.xlu1 %1926 }
 0x173   : > { %1960 = vst.msk [vmem:[#allocation2 + $0x78] sm:$0xff] %vm1944_vm7, %v1927_v19  ;;  %v1911_v20 = vpop.permute.xlu0 %1910 }
 0x174   : > { %1952 = vst.msk [vmem:[#allocation2 + $0x38] sm:$0xff] %vm1944_vm7, %v1911_v20 }
 0x176   : > { %v2106_v21 = vpop.permute.xlu1 %2105 }
 0x177   : > { %2140 = vst.msk [vmem:[#allocation2 + $0x70] sm:$0xff] %vm2125_vm8, %v2106_v21  ;;  %v2090_v23 = vpop.permute.xlu0 %2089 }
 0x178   : > { %2132 = vst.msk [vmem:[#allocation2 + $0x30] sm:$0xff] %vm2125_vm8, %v2090_v23 }
 0x17a   : > { %v2108_v24 = vpop.permute.xlu1 %2107 }
 0x17b   : > { %2141 = vst.msk [vmem:[#allocation2 + $0x78] sm:$0xff] %vm2125_vm8, %v2108_v24  ;;  %v2092_v25 = vpop.permute.xlu0 %2091 }
 0x17c   : > { %2133 = vst.msk [vmem:[#allocation2 + $0x38] sm:$0xff] %vm2125_vm8, %v2092_v25 }
 0x17e   : > { %v2539_v26 = vpop.permute.xlu1 %2538 }
 0x17f   : > { %2573 = vst.msk [vmem:[#allocation2 + $0x70] sm:$0xff] %vm2558_vm9, %v2539_v26  ;;  %v2523_v27 = vpop.permute.xlu0 %2522 }
 0x180   : > { %2565 = vst.msk [vmem:[#allocation2 + $0x30] sm:$0xff] %vm2558_vm9, %v2523_v27 }
 0x182   : > { %v2541_v22 = vpop.permute.xlu1 %2540 }
 0x183   : > { %2574 = vst.msk [vmem:[#allocation2 + $0x78] sm:$0xff] %vm2558_vm9, %v2541_v22  ;;  %v2525_v28 = vpop.permute.xlu0 %2524 }
 0x184   : > { %2566 = vst.msk [vmem:[#allocation2 + $0x38] sm:$0xff] %vm2558_vm9, %v2525_v28 }
 0x186   : > { %v2828_v29 = vpop.permute.xlu1 %2827 }
 0x187   : > { %2862 = vst.msk [vmem:[#allocation2 + $0x70] sm:$0xff] %vm2847_vm10, %v2828_v29  ;;  %v2812_v30 = vpop.permute.xlu0 %2811 }
 0x188   : > { %2854 = vst.msk [vmem:[#allocation2 + $0x30] sm:$0xff] %vm2847_vm10, %v2812_v30 }
 0x18a   : > { %v2830_v31 = vpop.permute.xlu1 %2829 }
 0x18b   : > { %2863 = vst.msk [vmem:[#allocation2 + $0x78] sm:$0xff] %vm2847_vm10, %v2830_v31  ;;  %v2814_v63 = vpop.permute.xlu0 %2813 }
 0x18c   : > { %2855 = vst.msk [vmem:[#allocation2 + $0x38] sm:$0xff] %vm2847_vm10, %v2814_v63 }
 0x18e   : > { %v2878_v32 = vld [vmem:[#allocation2 + $0x70] sm:$0xff] }
 0x18f   : > { %4379 = vmatprep.mubr.msk.bf16.mxu1 %vm2907_vm11, %v2878_v32  ;;  %v2870_v33 = vld [vmem:[#allocation2 + $0x30] sm:$0xff] }
 0x190   : > { %4363 = vmatprep.mubr.msk.bf16.mxu0 %vm2907_vm11, %v2870_v33 }
 0x192   : > { %v2879_v34 = vld [vmem:[#allocation2 + $0x78] sm:$0xff] }
 0x193   : > { %4380 = vmatmul.mubr.msk.bf16.gmra.mrb[12].mxu1 %vm2907_vm11, %v2879_v34  ;;  %v2871_v35 = vld [vmem:[#allocation2 + $0x38] sm:$0xff] }
 0x194   : > { %4364 = vmatmul.mubr.msk.bf16.gmra.mrb[12].mxu0 %vm2907_vm11, %v2871_v35 }
 0x1aa   : > { %v4369_v37 = vpop.f32.mrb[0].mxu1 }
 0x1ab   : > { %v4353_v38 = vpop.f32.mrb[0].mxu0  ;;  %v5650_v39 = vadd.f32 %v4369_v37, %v5647_v36  ;;  %v3058_v40 = vpop.f32.mrb[1].mxu1 }
 0x1ac   : > { %v3003_v41 = vadd.f32 %v4353_v38, %v5647_v36  ;;  %v2994_v42 = vpop.f32.mrb[1].mxu0  ;;  %v5654_v43 = vadd.f32 %v5647_v36, %v3058_v40  ;;  %v4370_v44 = vpop.f32.mrb[2].mxu1 }
 0x1ad   : > { %v4147_v45 = vmul.f32 -1.442695, %v5650_v39  ;;  %v2995_v46 = vadd.f32 %v5647_v36, %v2994_v42  ;;  %v4354_v47 = vpop.f32.mrb[2].mxu0  ;;  %v3070_v48 = vadd.f32 %v4370_v44, %v5647_v36  ;;  %v3061_v49 = vpop.f32.mrb[3].mxu1 }
 0x1ae   : > { %v4131_v50 = vmul.f32 -1.442695, %v3003_v41  ;;  %v4145_v51 = vmul.f32 -1.442695, %v5654_v43  ;;  %v3006_v52 = vadd.f32 %v4354_v47, %v5647_v36  ;;  %v2997_v53 = vpop.f32.mrb[3].mxu0  ;;  %v3062_v54 = vadd.f32 %v5647_v36, %v3061_v49 }
 0x1af   : > { %4699 = vpow2.f32 %v4147_v45  ;;  %v4129_v55 = vmul.f32 -1.442695, %v2995_v46  ;;  %v2998_v56 = vadd.f32 %v5647_v36, %v2997_v53  ;;  %v4148_v58 = vmul.f32 -1.442695, %v3070_v48 }
 0x1b0   : > { %4701 = vpow2.f32 %v4131_v50  ;;  %v4132_v57 = vmul.f32 -1.442695, %v3006_v52  ;;  %v4146_v60 = vmul.f32 -1.442695, %v3062_v54 }
 0x1b1   : > { %4703 = vpow2.f32 %v4129_v55  ;;  %v4130_v59 = vmul.f32 -1.442695, %v2998_v56 }
 0x1b2   : > { %4705 = vpow2.f32 %v4145_v51 }
 0x1b3   : > { %4707 = vpow2.f32 %v4132_v57 }
 0x1b4   : > { %4709 = vpow2.f32 %v4148_v58 }
 0x1b5   : > { %4711 = vpow2.f32 %v4130_v59 }
 0x1b6   : > { %4713 = vpow2.f32 %v4146_v60 }
 0x1b9   : > { %v4700_v61 = vpop.eup %4699 }
 0x1ba   : > { %v4702_v62 = vpop.eup %4701  ;;  %v3235_v0 = vadd.f32 1.0, %v4700_v61 }
 0x1bb   : > { %v4704_v1 = vpop.eup %4703  ;;  %v3219_v2 = vadd.f32 1.0, %v4702_v62 }
 0x1bc   : > { %v4706_v3 = vpop.eup %4705  ;;  %4715 = vrcp.f32 %v3235_v0  ;;  %v3217_v4 = vadd.f32 1.0, %v4704_v1 }
 0x1bd   : > { %v4708_v5 = vpop.eup %4707  ;;  %4717 = vrcp.f32 %v3219_v2  ;;  %v3233_v6 = vadd.f32 1.0, %v4706_v3 }
 0x1be   : > { %v4710_v7 = vpop.eup %4709  ;;  %4719 = vrcp.f32 %v3217_v4  ;;  %v3220_v8 = vadd.f32 1.0, %v4708_v5 }
 0x1bf   : > { %v4712_v9 = vpop.eup %4711  ;;  %4721 = vrcp.f32 %v3233_v6  ;;  %v3236_v10 = vadd.f32 1.0, %v4710_v7 }
 0x1c0   : > { %v4714_v12 = vpop.eup %4713  ;;  %4723 = vrcp.f32 %v3220_v8  ;;  %v3218_v13 = vadd.f32 1.0, %v4712_v9 }
 0x1c1   : > { %4725 = vrcp.f32 %v3236_v10  ;;  %v3234_v14 = vadd.f32 1.0, %v4714_v12 }
 0x1c2   : > { %4727 = vrcp.f32 %v3218_v13 }
 0x1c3   : > { %4729 = vrcp.f32 %v3234_v14 }
 0x1c6   : > { %v4716_v15 = vpop.eup %4715 }
 0x1c7   : > { %v4718_v16 = vpop.eup %4717  ;;  %v3331_v24 = vmul.f32 %v4716_v15, %v5650_v39 }
 0x1c8   : > { %v4720_v17 = vpop.eup %4719  ;;  %v3315_v20 = vmul.f32 %v4718_v16, %v3003_v41 }
 0x1c9   : > { %v4722_v11 = vpop.eup %4721  ;;  %v3313_v27 = vmul.f32 %v4720_v17, %v2995_v46 }
 0x1ca   : > { %v4724_v18 = vpop.eup %4723  ;;  %v3329_v29 = vmul.f32 %v4722_v11, %v5654_v43 }
 0x1cb   : > { %v4726_v19 = vpop.eup %4725  ;;  %v3316_v21 = vmul.f32 %v4724_v18, %v3006_v52 }
 0x1cc   : > { %v4728_v23 = vpop.eup %4727  ;;  %v3332_v25 = vmul.f32 %v4726_v19, %v3070_v48 }
 0x1cd   : > { %v4730_v26 = vpop.eup %4729  ;;  %v4239_v22 = vpack.c.bf16 %v3316_v21, %v3315_v20  ;;  %v3314_v28 = vmul.f32 %v4728_v23, %v2998_v56 }
 0x1ce   : > { %v4279_v30 = vpack.c.bf16 %v3332_v25, %v3331_v24  ;;  %v3330_v31 = vmul.f32 %v4730_v26, %v3062_v54 }
 0x1cf   : > { %4311 = vst [vmem:[%s5668_s5 + $0x8] sm:$0xff] %v4239_v22   ;;  %v4234_v63 = vpack.c.bf16 %v3314_v28, %v3313_v27 }
 0x1d0   : > { %4319 = vst [vmem:[%s5668_s5 + $0x48] sm:$0xff] %v4279_v30   ;;  %v4274_v32 = vpack.c.bf16 %v3330_v31, %v3329_v29 }
 0x1d1   : > { %4235 = vst [vmem:[%s5668_s5] sm:$0xff] %v4234_v63  }
 0x1d2   : > { %4318 = vst [vmem:[%s5668_s5 + $0x40] sm:$0xff] %v4274_v32  }
 0x1ea   : > { %v4373_v34 = vpop.f32.mrb[4].mxu1 }
 0x1eb   : > { %v4357_v33 = vpop.f32.mrb[4].mxu0  ;;  %v3083_v37 = vadd.f32 %v4373_v34, %v5647_v36  ;;  %v3074_v39 = vpop.f32.mrb[5].mxu1 }
 0x1ec   : > { %v3019_v35 = vadd.f32 %v4357_v33, %v5647_v36  ;;  %v3010_v38 = vpop.f32.mrb[5].mxu0  ;;  %v5678_v41 = vadd.f32 %v5647_v36, %v3074_v39  ;;  %v4374_v43 = vpop.f32.mrb[6].mxu1 }
 0x1ed   : > { %v3011_v40 = vadd.f32 %v5647_v36, %v3010_v38  ;;  %v4358_v42 = vpop.f32.mrb[6].mxu0  ;;  %v4151_v45 = vmul.f32 -1.442695, %v3083_v37  ;;  %v3086_v47 = vadd.f32 %v4374_v43, %v5647_v36  ;;  %v3077_v49 = vpop.f32.mrb[7].mxu1 }
 0x1ee   : > { %v4135_v44 = vmul.f32 -1.442695, %v3019_v35  ;;  %v3022_v46 = vadd.f32 %v4358_v42, %v5647_v36  ;;  %v3013_v48 = vpop.f32.mrb[7].mxu0  ;;  %v4149_v51 = vmul.f32 -1.442695, %v5678_v41  ;;  %v3078_v53 = vadd.f32 %v5647_v36, %v3077_v49 }
 0x1ef   : > { %v4133_v50 = vmul.f32 -1.442695, %v3011_v40  ;;  %v3014_v52 = vadd.f32 %v5647_v36, %v3013_v48  ;;  %v4152_v55 = vmul.f32 -1.442695, %v3086_v47 }
 0x1f0   : > { %4731 = vpow2.f32 %v4135_v44  ;;  %v4136_v54 = vmul.f32 -1.442695, %v3022_v46  ;;  %v4150_v57 = vmul.f32 -1.442695, %v3078_v53 }
 0x1f1   : > { %4733 = vpow2.f32 %v4151_v45  ;;  %v4134_v56 = vmul.f32 -1.442695, %v3014_v52 }
 0x1f2   : > { %4735 = vpow2.f32 %v4133_v50 }
 0x1f3   : > { %4737 = vpow2.f32 %v4149_v51 }
 0x1f4   : > { %4739 = vpow2.f32 %v4136_v54 }
 0x1f5   : > { %4741 = vpow2.f32 %v4152_v55 }
 0x1f6   : > { %4743 = vpow2.f32 %v4134_v56 }
 0x1f7   : > { %4745 = vpow2.f32 %v4150_v57 }
 0x1fa   : > { %v4732_v58 = vpop.eup %4731 }
 0x1fb   : > { %v4734_v59 = vpop.eup %4733  ;;  %v3223_v60 = vadd.f32 1.0, %v4732_v58 }
 0x1fc   : > { %v4736_v61 = vpop.eup %4735  ;;  %v3239_v62 = vadd.f32 1.0, %v4734_v59 }
 0x1fd   : > { %v4738_v0 = vpop.eup %4737  ;;  %4747 = vrcp.f32 %v3223_v60  ;;  %v3221_v1 = vadd.f32 1.0, %v4736_v61 }
 0x1fe   : > { %v4740_v2 = vpop.eup %4739  ;;  %4749 = vrcp.f32 %v3239_v62  ;;  %v3237_v3 = vadd.f32 1.0, %v4738_v0 }
 0x1ff   : > { %v4742_v4 = vpop.eup %4741  ;;  %4751 = vrcp.f32 %v3221_v1  ;;  %v3224_v5 = vadd.f32 1.0, %v4740_v2 }
 0x200   : > { %v4744_v6 = vpop.eup %4743  ;;  %4753 = vrcp.f32 %v3237_v3  ;;  %v3240_v7 = vadd.f32 1.0, %v4742_v4 }
 0x201   : > { %v4746_v8 = vpop.eup %4745  ;;  %4755 = vrcp.f32 %v3224_v5  ;;  %v3222_v9 = vadd.f32 1.0, %v4744_v6 }
 0x202   : > { %4757 = vrcp.f32 %v3240_v7  ;;  %v3238_v10 = vadd.f32 1.0, %v4746_v8 }
 0x203   : > { %4759 = vrcp.f32 %v3222_v9 }
 0x204   : > { %4761 = vrcp.f32 %v3238_v10 }
 0x207   : > { %v4748_v12 = vpop.eup %4747 }
 0x208   : > { %v4750_v13 = vpop.eup %4749  ;;  %v3319_v11 = vmul.f32 %v4748_v12, %v3019_v35 }
 0x209   : > { %v4752_v14 = vpop.eup %4751  ;;  %v3335_v20 = vmul.f32 %v4750_v13, %v3083_v37 }
 0x20a   : > { %v4754_v15 = vpop.eup %4753  ;;  %v3317_v24 = vmul.f32 %v4752_v14, %v3011_v40 }
 0x20b   : > { %v4756_v16 = vpop.eup %4755  ;;  %v3333_v27 = vmul.f32 %v4754_v15, %v5678_v41 }
 0x20c   : > { %v4758_v17 = vpop.eup %4757  ;;  %v3320_v18 = vmul.f32 %v4756_v16, %v3022_v46 }
 0x20d   : > { %v4760_v19 = vpop.eup %4759  ;;  %v3336_v21 = vmul.f32 %v4758_v17, %v3086_v47 }
 0x20e   : > { %v4762_v23 = vpop.eup %4761  ;;  %v4249_v25 = vpack.c.bf16 %v3320_v18, %v3319_v11  ;;  %v3318_v26 = vmul.f32 %v4760_v19, %v3014_v52 }
 0x20f   : > { %v4289_v22 = vpack.c.bf16 %v3336_v21, %v3335_v20  ;;  %v3334_v28 = vmul.f32 %v4762_v23, %v3078_v53 }
 0x210   : > { %4313 = vst [vmem:[%s5668_s5 + $0x18] sm:$0xff] %v4249_v25   ;;  %v4244_v29 = vpack.c.bf16 %v3318_v26, %v3317_v24 }
 0x211   : > { %4321 = vst [vmem:[%s5668_s5 + $0x58] sm:$0xff] %v4289_v22   ;;  %v4284_v30 = vpack.c.bf16 %v3334_v28, %v3333_v27 }
 0x212   : > { %4312 = vst [vmem:[%s5668_s5 + $0x10] sm:$0xff] %v4244_v29  }
 0x213   : > { %4320 = vst [vmem:[%s5668_s5 + $0x50] sm:$0xff] %v4284_v30  }
 0x22a   : > { %v4377_v31 = vpop.f32.mrb[8].mxu1 }
 0x22b   : > { %v3099_v63 = vadd.f32 %v4377_v31, %v5647_v36  ;;  %v3090_v32 = vpop.f32.mrb[9].mxu1  ;;  %v4361_v39 = vpop.f32.mrb[8].mxu0 }
 0x22c   : > { %v3091_v33 = vadd.f32 %v5647_v36, %v3090_v32  ;;  %v4378_v34 = vpop.f32.mrb[10].mxu1  ;;  %v3035_v42 = vadd.f32 %v4361_v39, %v5647_v36  ;;  %v3026_v43 = vpop.f32.mrb[9].mxu0 }
 0x22d   : > { %v4155_v35 = vmul.f32 -1.442695, %v3099_v63  ;;  %v3102_v37 = vadd.f32 %v4378_v34, %v5647_v36  ;;  %v3093_v38 = vpop.f32.mrb[11].mxu1  ;;  %v3027_v45 = vadd.f32 %v5647_v36, %v3026_v43  ;;  %v4362_v46 = vpop.f32.mrb[10].mxu0 }
 0x22e   : > { %v4153_v40 = vmul.f32 -1.442695, %v3091_v33  ;;  %v3094_v41 = vadd.f32 %v5647_v36, %v3093_v38  ;;  %v4139_v48 = vmul.f32 -1.442695, %v3035_v42  ;;  %v3038_v49 = vadd.f32 %v4362_v46, %v5647_v36  ;;  %v3029_v50 = vpop.f32.mrb[11].mxu0 }
 0x22f   : > { %4763 = vpow2.f32 %v4155_v35  ;;  %v4156_v44 = vmul.f32 -1.442695, %v3102_v37  ;;  %v4137_v51 = vmul.f32 -1.442695, %v3027_v45  ;;  %v3030_v52 = vadd.f32 %v5647_v36, %v3029_v50 }
 0x230   : > { %4765 = vpow2.f32 %v4153_v40  ;;  %v4154_v47 = vmul.f32 -1.442695, %v3094_v41  ;;  %v4140_v53 = vmul.f32 -1.442695, %v3038_v49 }
 0x231   : > { %4767 = vpow2.f32 %v4156_v44  ;;  %v4138_v54 = vmul.f32 -1.442695, %v3030_v52 }
 0x232   : > { %4769 = vpow2.f32 %v4154_v47 }
 0x233   : > { %4771 = vpow2.f32 %v4139_v48 }
 0x234   : > { %4773 = vpow2.f32 %v4137_v51 }
 0x235   : > { %4775 = vpow2.f32 %v4140_v53 }
 0x236   : > { %4777 = vpow2.f32 %v4138_v54 }
 0x239   : > { %v4764_v55 = vpop.eup %4763 }
 0x23a   : > { %v4766_v56 = vpop.eup %4765  ;;  %v3243_v57 = vadd.f32 1.0, %v4764_v55 }
 0x23b   : > { %v4768_v58 = vpop.eup %4767  ;;  %v3241_v59 = vadd.f32 1.0, %v4766_v56 }
 0x23c   : > { %v4770_v60 = vpop.eup %4769  ;;  %4779 = vrcp.f32 %v3243_v57  ;;  %v3244_v61 = vadd.f32 1.0, %v4768_v58 }
 0x23d   : > { %v4772_v62 = vpop.eup %4771  ;;  %4781 = vrcp.f32 %v3241_v59  ;;  %v3242_v0 = vadd.f32 1.0, %v4770_v60 }
 0x23e   : > { %v4774_v1 = vpop.eup %4773  ;;  %v3227_v2 = vadd.f32 1.0, %v4772_v62  ;;  %4783 = vrcp.f32 %v3244_v61 }
 0x23f   : > { %v4776_v3 = vpop.eup %4775  ;;  %v3225_v4 = vadd.f32 1.0, %v4774_v1  ;;  %4785 = vrcp.f32 %v3242_v0 }
 0x240   : > { %v4778_v5 = vpop.eup %4777  ;;  %4787 = vrcp.f32 %v3227_v2  ;;  %v3228_v6 = vadd.f32 1.0, %v4776_v3 }
 0x241   : > { %4789 = vrcp.f32 %v3225_v4  ;;  %v3226_v7 = vadd.f32 1.0, %v4778_v5 }
 0x242   : > { %4791 = vrcp.f32 %v3228_v6 }
 0x243   : > { %4793 = vrcp.f32 %v3226_v7 }
 0x246   : > { %v4780_v8 = vpop.eup %4779 }
 0x247   : > { %v4782_v9 = vpop.eup %4781  ;;  %v3339_v13 = vmul.f32 %v4780_v8, %v3099_v63 }
 0x248   : > { %v4784_v10 = vpop.eup %4783  ;;  %v3337_v16 = vmul.f32 %v4782_v9, %v3091_v33 }
 0x249   : > { %v4786_v12 = vpop.eup %4785  ;;  %v3340_v14 = vmul.f32 %v4784_v10, %v3102_v37 }
 0x24a   : > { %v4788_v15 = vpop.eup %4787  ;;  %v3338_v17 = vmul.f32 %v4786_v12, %v3094_v41 }
 0x24b   : > { %v4790_v11 = vpop.eup %4789  ;;  %v4299_v18 = vpack.c.bf16 %v3340_v14, %v3339_v13  ;;  %v3323_v23 = vmul.f32 %v4788_v15, %v3035_v42 }
 0x24c   : > { %v4792_v19 = vpop.eup %4791  ;;  %v4294_v20 = vpack.c.bf16 %v3338_v17, %v3337_v16  ;;  %v3321_v25 = vmul.f32 %v4790_v11, %v3027_v45 }
 0x24d   : > { %v4794_v21 = vpop.eup %4793  ;;  %v3324_v24 = vmul.f32 %v4792_v19, %v3038_v49  ;;  %4323 = vst [vmem:[%s5668_s5 + $0x68] sm:$0xff] %v4299_v18  }
 0x24e   : > { %v3322_v26 = vmul.f32 %v4794_v21, %v3030_v52  ;;  %4322 = vst [vmem:[%s5668_s5 + $0x60] sm:$0xff] %v4294_v20  }
 0x24f   : > { %v4259_v27 = vpack.c.bf16 %v3324_v24, %v3323_v23 }
 0x250   : > { %v4254_v22 = vpack.c.bf16 %v3322_v26, %v3321_v25 }
 0x251   : > { %4315 = vst [vmem:[%s5668_s5 + $0x28] sm:$0xff] %v4259_v27  }
 0x252   : > { %4314 = vst [vmem:[%s5668_s5 + $0x20] sm:$0xff] %v4254_v22  }
 0x266   : > { %v4381_v28 = vpop.f32.mrb[12].mxu1 }
 0x267   : > { %v5703_v29 = vadd.f32 %v4381_v28, %v5647_v36  ;;  %v3106_v30 = vpop.f32.mrb[13].mxu1  ;;  %v4365_v31 = vpop.f32.mrb[12].mxu0 }
 0x268   : > { %v5706_v63 = vadd.f32 %v5647_v36, %v3106_v30  ;;  %v4382_v32 = vpop.f32.mrb[14].mxu1  ;;  %v3051_v33 = vadd.f32 %v4365_v31, %v5647_v36  ;;  %v3042_v35 = vpop.f32.mrb[13].mxu0 }
 0x269   : > { %v4159_v34 = vmul.f32 -1.442695, %v5703_v29  ;;  %v3118_v37 = vadd.f32 %v4382_v32, %v5647_v36  ;;  %v3109_v38 = vpop.f32.mrb[15].mxu1  ;;  %v3043_v39 = vadd.f32 %v5647_v36, %v3042_v35  ;;  %v4366_v41 = vpop.f32.mrb[14].mxu0 }
 0x26a   : > { %v4157_v40 = vmul.f32 -1.442695, %v5706_v63  ;;  %v3110_v42 = vadd.f32 %v5647_v36, %v3109_v38  ;;  %v4143_v43 = vmul.f32 -1.442695, %v3051_v33  ;;  %v3054_v44 = vadd.f32 %v4366_v41, %v5647_v36  ;;  %v3045_v45 = vpop.f32.mrb[15].mxu0 }
 0x26b   : > { %4795 = vpow2.f32 %v4159_v34  ;;  %v4141_v46 = vmul.f32 -1.442695, %v3043_v39  ;;  %v4160_v47 = vmul.f32 -1.442695, %v3118_v37  ;;  %v3046_v48 = vadd.f32 %v5647_v36, %v3045_v45 }
 0x26c   : > { %4797 = vpow2.f32 %v4157_v40  ;;  %v4144_v49 = vmul.f32 -1.442695, %v3054_v44  ;;  %v4158_v51 = vmul.f32 -1.442695, %v3110_v42 }
 0x26d   : > { %4799 = vpow2.f32 %v4143_v43  ;;  %v4142_v50 = vmul.f32 -1.442695, %v3046_v48 }
 0x26e   : > { %4801 = vpow2.f32 %v4141_v46 }
 0x26f   : > { %4803 = vpow2.f32 %v4144_v49 }
 0x270   : > { %4805 = vpow2.f32 %v4160_v47 }
 0x271   : > { %4807 = vpow2.f32 %v4142_v50 }
 0x272   : > { %4809 = vpow2.f32 %v4158_v51 }
 0x275   : > { %v4796_v52 = vpop.eup %4795 }
 0x276   : > { %v4798_v53 = vpop.eup %4797  ;;  %v3247_v54 = vadd.f32 1.0, %v4796_v52 }
 0x277   : > { %v4800_v55 = vpop.eup %4799  ;;  %v3245_v56 = vadd.f32 1.0, %v4798_v53 }
 0x278   : > { %v4802_v57 = vpop.eup %4801  ;;  %v3231_v58 = vadd.f32 1.0, %v4800_v55  ;;  %4811 = vrcp.f32 %v3247_v54 }
 0x279   : > { %v4804_v59 = vpop.eup %4803  ;;  %v3229_v60 = vadd.f32 1.0, %v4802_v57  ;;  %4813 = vrcp.f32 %v3245_v56 }
 0x27a   : > { %v4806_v36 = vpop.eup %4805  ;;  %4815 = vrcp.f32 %v3231_v58  ;;  %v3232_v61 = vadd.f32 1.0, %v4804_v59 }
 0x27b   : > { %v4808_v62 = vpop.eup %4807  ;;  %4817 = vrcp.f32 %v3229_v60  ;;  %v3248_v0 = vadd.f32 1.0, %v4806_v36 }
 0x27c   : > { %v4810_v1 = vpop.eup %4809  ;;  %4819 = vrcp.f32 %v3232_v61  ;;  %v3230_v2 = vadd.f32 1.0, %v4808_v62 }
 0x27d   : > { %4821 = vrcp.f32 %v3248_v0  ;;  %v3246_v3 = vadd.f32 1.0, %v4810_v1 }
 0x27e   : > { %4823 = vrcp.f32 %v3230_v2 }
 0x27f   : > { %4825 = vrcp.f32 %v3246_v3 }
 0x282   : > { %v4812_v4 = vpop.eup %4811 }
 0x283   : > { %v4814_v5 = vpop.eup %4813  ;;  %v3343_v14 = vmul.f32 %v4812_v4, %v5703_v29 }
 0x284   : > { %v4816_v6 = vpop.eup %4815  ;;  %v3341_v19 = vmul.f32 %v4814_v5, %v5706_v63 }
 0x285   : > { %v4818_v7 = vpop.eup %4817  ;;  %v3327_v10 = vmul.f32 %v4816_v6, %v3051_v33 }
 0x286   : > { %v4820_v8 = vpop.eup %4819  ;;  %v3325_v17 = vmul.f32 %v4818_v7, %v3043_v39 }
 0x287   : > { %v4822_v9 = vpop.eup %4821  ;;  %v3328_v12 = vmul.f32 %v4820_v8, %v3054_v44 }
 0x288   : > { %v4824_v13 = vpop.eup %4823  ;;  %v3344_v15 = vmul.f32 %v4822_v9, %v3118_v37 }
 0x289   : > { %v4826_v16 = vpop.eup %4825  ;;  %v4269_v11 = vpack.c.bf16 %v3328_v12, %v3327_v10  ;;  %v3326_v18 = vmul.f32 %v4824_v13, %v3046_v48 }
 0x28a   : > { %v4309_v20 = vpack.c.bf16 %v3344_v15, %v3343_v14  ;;  %v3342_v21 = vmul.f32 %v4826_v16, %v3110_v42 }
 0x28b   : > { %4317 = vst [vmem:[%s5668_s5 + $0x38] sm:$0xff] %v4269_v11   ;;  %v4264_v23 = vpack.c.bf16 %v3326_v18, %v3325_v17 }
 0x28c   : > { %4325 = vst [vmem:[%s5668_s5 + $0x78] sm:$0xff] %v4309_v20   ;;  %v4304_v24 = vpack.c.bf16 %v3342_v21, %v3341_v19 }
 0x28d   : > { %4316 = vst [vmem:[%s5668_s5 + $0x30] sm:$0xff] %v4264_v23  }
 0x28e   : > { %4324 = vst [vmem:[%s5668_s5 + $0x70] sm:$0xff] %v4304_v24  }
 0x28f   : > { %4840 = shalt.err (!%p4837_p5)
}
 0x290   : > { %s4841_s26 = scalar_lea.hbm %s5724_s11, 2048  ;;  %s4845_s29 = scalar_lea.hbm %s5783_s3, 4096 }
 0x291   : > { %p4842_p6 = scmp.ne.s32.totalorder %s5724_s11, %s4841_s26  ;;  %p4846_p10 = scmp.lt.u32.totalorder %s5724_s11, %s5783_s3 }
 0x292   : > { %p4847_p11 = scmp.lt.u32.totalorder %s4845_s29, %s4841_s26  ;;  %p4849_p13 = scmp.lt.u32.totalorder %s4841_s26, %s5724_s11 }
 0x293   : > { %p4843_p7 = pnand %p4842_p6, %p4977_p4 }
 0x294   : > { %p4848_p12 = por %p4847_p11, %p4846_p10 }
 0x295   : > { %p4844_p9 = pneg %p4843_p7 }
 0x296   : > { %p4850_p0 = por %p4849_p13, %p4848_p12 }
 0x298   : > { %p4851_p1 = pnand %p4850_p0, %p4844_p9 }
 0x29a   : > { %4854 = shalt.err (!%p4851_p1)
}
 0x29b   : > { %s4916_s5 = smov 64  }
 0x29c   : > { %4392 = dma.vmem_to_hbm [thread:$0]  (%p4977_p4), %s5727_s8, 2048, %s5724_s11, %s5733_s15, %s4916_s5, %s4916_s5, %s4909_s6  }
 0x29d PF: > { %p4398_p2 = scmp.ge.s32.totalorder %s4905_s17, 2  ;;  %s3536_s7 = sand.u32 1, %s4885_s12  }
 0x29e   : > { %s3537_s9 = scalar_lea.sflag [#allocation4], %s3536_s7 }
 0x29f   : > { %p4395_p3 = pnand %p4398_p2, %p4984_p8 }
 0x2a1   : > { %4880 = dma.done.wait (!%p4395_p3), %s3537_s9, 2048  }
 0x2a2   : > { %4882 = vsyncadd (!%p4395_p3), %s3537_s9, 4294965248  ;;  %s16_s17 = sadd.s32 1, %s4905_s17   ;;  %s5786_s12 = smov %s4889_s13 }
 0x2a3   : > { %p13_p5 = scmp.ge.s32.totalorder %s16_s17, 4   ;;  %s5787_s13 = smov %s4893_s14 }
 0x2a4   : > { %s5788_s14 = smov %s4990_s25  ;;  %s5789_s15 = smov %s4901_s16 }
 0x2a5   : > { %s5790_s16 = smov %s5792_s20  ;;  %15 = sbr.rel (!%p13_p5) target bundleno = 4 (0x4), region = 70 }
 0x2ac   :  { %3542 = vsyncpa [#allocation4], 1 }
 0x2ad   :  { %3544 = vsyncpa [#allocation4 + $0x1], 1 }

// kernel: tpu_custom_call.1
= control target key start
LH: loop header
LB: loop body
LE: loop exit
PB: predicated region body
PF: predicated region fallthrough
CT: control target
= control target key end

     0   :  { %8 = vsyncpa [#allocation4], 0  ;;  %s5778_s0 = inlined_call_operand.vmem [shape: bf16[2,18,18,4], index: 0, kind: input, shape index: {}]   ;;  %s5779_s1 = inlined_call_operand.vmem [shape: bf16[36,128], index: 1, kind: input, shape index: {}]   ;;  %s5780_s2 = inlined_call_operand.vmem [shape: f32[1,128], index: 2, kind: input, shape index: {}]   ;;  %s5781_s3 = inlined_call_operand.hbm [shape: bf16[2,256,128], index: 3, kind: output, shape index: {}]  }
   0x1   :  { %10 = vsyncpa [#allocation4 + $0x1], 0  ;;  %s4935_s12 = smov 0   ;;  %s4937_s13 = smov 0  }
   0x2   :  { %s4939_s14 = smov 0   ;;  %s4941_s15 = smov 0  }
   0x3   :  { %s4943_s16 = smov 0   ;;  %s4945_s17 = smov 0  }
   0x4 LB: > { %s3604_s18 = sadd.s32 4294967295, %s4903_s17   ;;  %s3605_s19 = sadd.s32 4294967294, %s4903_s17   ;;  %s4903_s17 = sphi %s4945_s17, %s16_s17   ;;  %s4899_s16 = sphi %s4943_s16, %s5788_s16   ;;  %s4895_s15 = sphi %s4941_s15, %s5787_s15   ;;  %s4891_s14 = sphi %s4939_s14, %s5786_s14   ;;  %s4887_s13 = sphi %s4937_s13, %s5785_s13   ;;  %s4883_s12 = sphi %s4935_s12, %s5784_s12  }
   0x5   : > { %s28_s20 = sadd.s32 1, %s4899_s16  ;;  %s105_s21 = sadd.s32 1, %s4891_s14 }
   0x6   : > { %p30_p0 = scmp.ge.s32.totalorder %s28_s20, 2  ;;  %p115_p1 = scmp.ne.s32.totalorder %s4891_s14, %s4887_s13 }
   0x7   : > { %p116_p2 = scmp.eq.s32.totalorder %s3604_s18, 1  ;;  %p121_p3 = scmp.ne.s32.totalorder %s4887_s13, %s4883_s12 }
   0x8   : > { %s5790_s20 = smov (%p30_p0, %s28_s20), 0  ;;  %p122_p5 = scmp.eq.s32.totalorder %s3605_s19, 1 }
   0x9   : > { %p4975_p4 = por %p116_p2, %p115_p1  ;;  %s100_s23 = ssub.s32 %s4899_s16, %s5790_s20 }
   0xa   : > { %p3608_p6 = scmp.ge.s32.totalorder %s4903_s17, 1  ;;  %p103_p7 = scmp.eq.s32.totalorder %s100_s23, 0 }
   0xb   : > { %p4982_p8 = por %p122_p5, %p121_p3  ;;  %p154_p9 = scmp.lt.s32.totalorder %s4903_s17, 3 }
   0xc   : > { %s4988_s25 = scalar_select %p103_p7, %s4891_s14, %s105_s21  }
   0xd   : > { %p155_p10 = pnand %p3608_p6, %p154_p9 }
   0xe   : > { %p178_p11 = scmp.lt.s32.totalorder (!%p155_p10), %s4895_s15, 1  ;;  %vm944_vm0 = vcmask (!%p155_p10), 1046528   ;;  %s4905_s4 = smov (!%p155_p10), 12   ;;  %vm510_vm1 = vsmask.f32 (!%p155_p10), 7424  ;;  %vm317_vm2 = vcmask (!%p155_p10), 31744  }
   0xf   : > { %158 = sbr.rel (%p155_p10) target bundleno = 669 (0x29d), region = 32  ;;  %s4906_s5 = smov (!%p155_p10), 8   ;;  %vm751_vm3 = vcmask (!%p155_p10), 64544   ;;  %vm1041_vm4 = vcmask (!%p155_p10), 97344   ;;  %vm1222_vm5 = vcmask (!%p155_p10), 130144   ;;  %vm1655_vm6 = vcmask (!%p155_p10), 162944  }
  0x10   : > { %s4907_s6 = smov (!%p155_p10), 4   ;;  %s4908_s7 = smov (!%p155_p10), 16   ;;  %vm1944_vm7 = vcmask (!%p155_p10), 195744   ;;  %vm2125_vm8 = vcmask (!%p155_p10), 228544   ;;  %vm2558_vm9 = vcmask (!%p155_p10), 261344   ;;  %vm2847_vm10 = vcmask (!%p155_p10), 294144  }
  0x11   : > { %s4909_s8 = smov (!%p155_p10), 20   ;;  %s4910_s9 = smov (!%p155_p10), 24   ;;  %vm2907_vm11 = vcmask (!%p155_p10), 293888   ;;  %vm2956_vm12 = vcmask (!%p155_p10), 1041408  }
  0x12   : > { %s4911_s10 = smov (!%p155_p10), 28   ;;  %s4912_s11 = smov (!%p155_p10), 32  }
  0x13   : > { %s4913_s19 = smov (!%p155_p10), [#allocation3]  }
  0x14   : > { %s4829_s21 = sshll.u32 (!%p155_p10), %s4913_s19, 4  ;;  %s4830_s21 = int_to_ptr.vmem [resolvable:$false] %s4829_s21 }
  0x15   : > { %s4831_s23 = scalar_lea.vmem (!%p155_p10), %s4830_s21, 4096 }
  0x16   : > { %s179_s26 = scalar_select %p178_p11, %s4895_s15, 1 }
  0x18   : > { %s4389_s27 = smul.u32 216, %s179_s26 }
  0x1a   : > { %s4995_s30 = scalar_lea.vmem %s5778_s0, %s4389_s27 }
  0x1b   : > { %v4454_v0 = vld [vmem:[%s4995_s30 + $0x6c] sm:$0xff]   ;;  %v4456_v2 = vld [vmem:[%s4995_s30 + $0x60] sm:$0xfe]   ;;  %v4457_v3 = vld [vmem:[%s4995_s30 + $0x68] ss:$0 sps:$4 sm:$0x11]  }
  0x1c   : > { %v4455_v1 = vld [vmem:[%s4995_s30 + $0xc] sm:$0xff]   ;;  %1190 = vrot.lane.b32.xlu1 %v4454_v0, %s4905_s4  ;;  %v969_v5 = vrot.slane %v4456_v2, 1  ;;  %v970_v6 = vrot.slane %v4457_v3, 1  ;;  %v4458_v7 = vld [vmem:[%s4995_s30] sm:$0xfe]   ;;  %v4472_v58 = vld [vmem:[%s4995_s30 + $0x78] sm:$0xff]  }
  0x1d   : > { %1174 = vrot.lane.b32.xlu0 %v4455_v1, %s4905_s4  ;;  %v4464_v4 = vld [vmem:[%s4995_s30 + $0xc] sm:$0xff]   ;;  %v4459_v8 = vld [vmem:[%s4995_s30 + $0x8] ss:$0 sps:$4 sm:$0x11]   ;;  %v945_v11 = vrot.slane %v4458_v7, 1  ;;  %v4466_v26 = vld [vmem:[%s4995_s30] sm:$0xff]  }
  0x1e   : > { %v524_v9 = vshrl.u32 %v4464_v4, 16  ;;  %v971_v10 = vsel %vm944_vm0, %v969_v5, %v970_v6  ;;  %v4460_v12 = vld [vmem:[%s4995_s30 + $0x6c] sm:$0xfe]   ;;  %v526_v13 = vshll.u32 %v4464_v4, 16  ;;  %v946_v14 = vrot.slane %v4459_v8, 1  ;;  %v4470_v38 = vld [vmem:[%s4995_s30 + $0x60] sm:$0xff]  }
  0x1f   : > { %v4461_v15 = vld [vmem:[%s4995_s30 + $0x74] ss:$0 sps:$4 sm:$0x11]   ;;  %v972_v16 = vrot.slane %v4460_v12, 1  ;;  %v4462_v20 = vld [vmem:[%s4995_s30 + $0xc] sm:$0xfe]  }
  0x20   : > { %1009 = vrot.lane.b32.xlu1 %v971_v10, %s4906_s5  ;;  %v528_v17 = vrot.slane %v526_v13, 1  ;;  %v947_v18 = vsel %vm944_vm0, %v945_v11, %v946_v14  ;;  %v973_v19 = vrot.slane %v4461_v15, 1  ;;  %v4463_v21 = vld [vmem:[%s4995_s30 + $0x14] ss:$0 sps:$4 sm:$0x11]   ;;  %v948_v23 = vrot.slane %v4462_v20, 1 }
  0x21   : > { %993 = vrot.lane.b32.xlu0 %v947_v18, %s4906_s5  ;;  %v949_v24 = vrot.slane %v4463_v21, 1  ;;  %v4465_v25 = vld [vmem:[%s4995_s30 + $0x14] ss:$0 sps:$4 sm:$0x11]   ;;  %v512_v31 = vshrl.u32 %v4466_v26, 16  ;;  %v514_v32 = vshll.u32 %v4466_v26, 16 }
  0x22   : > { %v974_v22 = vsel %vm944_vm0, %v972_v16, %v973_v19  ;;  %v529_v27 = vor.u32 %v528_v17, %v524_v9  ;;  %v531_v29 = vshll.u32 %v4465_v25, 16  ;;  %v4467_v30 = vld [vmem:[%s4995_s30 + $0x8] ss:$0 sps:$4 sm:$0x11]   ;;  %v4468_v36 = vld [vmem:[%s4995_s30 + $0x6c] sm:$0xff]   ;;  %v608_v47 = vshrl.u32 %v4470_v38, 16 }
  0x23   : > { %v950_v28 = vsel %vm944_vm0, %v948_v23, %v949_v24  ;;  %v516_v34 = vrot.slane %v514_v32, 1  ;;  %v519_v35 = vshll.u32 %v4467_v30, 16  ;;  %v4469_v37 = vld [vmem:[%s4995_s30 + $0x74] ss:$0 sps:$4 sm:$0x11]   ;;  %v620_v42 = vshrl.u32 %v4468_v36, 16 }
  0x24   : > { %1011 = vrot.lane.b32.xlu1 %v974_v22, %s4906_s5  ;;  %v533_v33 = vrot.slane %v531_v29, 1  ;;  %v622_v43 = vshll.u32 %v4468_v36, 16  ;;  %v627_v44 = vshll.u32 %v4469_v37, 16  ;;  %v4471_v45 = vld [vmem:[%s4995_s30 + $0x68] ss:$0 sps:$4 sm:$0x11]  }
  0x25   : > { %995 = vrot.lane.b32.xlu0 %v950_v28, %s4906_s5  ;;  %v517_v40 = vor.u32 %v516_v34, %v512_v31  ;;  %v521_v41 = vrot.slane %v519_v35, 1  ;;  %v610_v48 = vshll.u32 %v4470_v38, 16  ;;  %v615_v51 = vshll.u32 %v4471_v45, 16  ;;  %v4474_v53 = vld [vmem:[%s4995_s30 + $0x6c] sm:$0xff]   ;;  %v4473_v62 = vld [vmem:[%s4995_s30 + $0x18] sm:$0xff]  }
  0x26   : > { %v534_v39 = vsel %vm510_vm1, %v529_v27, %v533_v33  ;;  %v624_v49 = vrot.slane %v622_v43, 1  ;;  %v629_v50 = vrot.slane %v627_v44, 1  ;;  %v4475_v56 = vld [vmem:[%s4995_s30 + $0x74] ss:$0 sps:$4 sm:$0x11]   ;;  %v1512_v59 = vshrl.u32 %v4474_v53, 16 }
  0x27   : > { %v522_v46 = vsel %vm510_vm1, %v517_v40, %v521_v41  ;;  %v612_v52 = vrot.slane %v610_v48, 1  ;;  %v617_v55 = vrot.slane %v615_v51, 1  ;;  %v1514_v60 = vshll.u32 %v4474_v53, 16  ;;  %v4476_v0 = vld [vmem:[%s4995_s30 + $0xc] sm:$0xff]   ;;  %v4478_v7 = vld [vmem:[%s4995_s30 + $0x78] sm:$0xff]  }
  0x28   : > { %705 = vrot.lane.b32.xlu1 %v534_v39, %s4907_s6  ;;  %v625_v54 = vor.u32 %v624_v49, %v620_v42  ;;  %v1519_v63 = vshll.u32 %v4475_v56, 16  ;;  %v4477_v3 = vld [vmem:[%s4995_s30 + $0x14] ss:$0 sps:$4 sm:$0x11]   ;;  %v1416_v5 = vshrl.u32 %v4476_v0, 16  ;;  %v1418_v6 = vshll.u32 %v4476_v0, 16 }
  0x29   : > { %703 = vrot.lane.b32.xlu0 %v522_v46, %s4907_s6  ;;  %v613_v57 = vor.u32 %v612_v52, %v608_v47  ;;  %v1516_v2 = vrot.slane %v1514_v60, 1  ;;  %v1423_v9 = vshll.u32 %v4477_v3, 16  ;;  %v4479_v10 = vld [vmem:[%s4995_s30 + $0x80] ss:$0 sps:$4 sm:$0x11]   ;;  %v1524_v12 = vshrl.u32 %v4478_v7, 16 }
  0x2a   : > { %v630_v61 = vsel %vm510_vm1, %v625_v54, %v629_v50  ;;  %v1521_v4 = vrot.slane %v1519_v63, 1  ;;  %v1420_v11 = vrot.slane %v1418_v6, 1  ;;  %v1526_v13 = vshll.u32 %v4478_v7, 16  ;;  %v4480_v14 = vld [vmem:[%s4995_s30 + $0x18] sm:$0xff]   ;;  %v4482_v28 = vld [vmem:[%s4995_s30 + $0x6c] sm:$0xfe]  }
  0x2b   : > { %v618_v1 = vsel %vm510_vm1, %v613_v57, %v617_v55  ;;  %v1517_v8 = vor.u32 %v1516_v2, %v1512_v59  ;;  %v1425_v16 = vrot.slane %v1423_v9, 1  ;;  %v1531_v17 = vshll.u32 %v4479_v10, 16  ;;  %v4481_v20 = vld [vmem:[%s4995_s30 + $0x20] ss:$0 sps:$4 sm:$0x11]   ;;  %v4494_v49 = vld [vmem:[%s4995_s30 + $0x78] sm:$0xff]  }
  0x2c   : > { %721 = vrot.lane.b32.xlu1 %v630_v61, %s4907_s6  ;;  %v1421_v18 = vor.u32 %v1420_v11, %v1416_v5  ;;  %v1528_v19 = vrot.slane %v1526_v13, 1  ;;  %v1428_v21 = vshrl.u32 %v4480_v14, 16  ;;  %v1430_v22 = vshll.u32 %v4480_v14, 16  ;;  %v4483_v29 = vld [vmem:[%s4995_s30 + $0x74] ss:$0 sps:$4 sm:$0x11]  }
  0x2d   : > { %719 = vrot.lane.b32.xlu0 %v618_v1, %s4907_s6  ;;  %v1522_v15 = vsel %vm510_vm1, %v1517_v8, %v1521_v4  ;;  %v1533_v23 = vrot.slane %v1531_v17, 1  ;;  %v1435_v27 = vshll.u32 %v4481_v20, 16  ;;  %v1872_v33 = vrot.slane %v4482_v28, 1  ;;  %v4484_v34 = vld [vmem:[%s4995_s30 + $0xc] sm:$0xfe]   ;;  %v4496_v52 = vld [vmem:[%s4995_s30 + $0x18] sm:$0xff]  }
  0x2e   : > { %v1426_v24 = vsel %vm510_vm1, %v1421_v18, %v1425_v16  ;;  %v1529_v25 = vor.u32 %v1528_v19, %v1524_v12  ;;  %v1432_v26 = vrot.slane %v1430_v22, 1  ;;  %v1873_v35 = vrot.slane %v4483_v29, 1  ;;  %v4485_v36 = vld [vmem:[%s4995_s30 + $0x14] ss:$0 sps:$4 sm:$0x11]   ;;  %v4490_v53 = vld [vmem:[%s4995_s30 + $0x78] sm:$0xff]  }
  0x2f   : > { %v1437_v32 = vrot.slane %v1435_v27, 1  ;;  %v1848_v38 = vrot.slane %v4484_v34, 1  ;;  %v1849_v39 = vrot.slane %v4485_v36, 1  ;;  %v4486_v40 = vld [vmem:[%s4995_s30 + $0x78] sm:$0xfe]   ;;  %v2415_v56 = vshrl.u32 %v4494_v49, 16 }
  0x30   : > { %1192 = vrot.lane.b32.xlu1 %v4472_v58, %s4905_s4  ;;  %v1534_v30 = vsel %vm510_vm1, %v1529_v25, %v1533_v23  ;;  %v1433_v31 = vor.u32 %v1432_v26, %v1428_v21  ;;  %v4487_v41 = vld [vmem:[%s4995_s30 + $0x80] ss:$0 sps:$4 sm:$0x11]   ;;  %v1874_v42 = vsel %vm944_vm0, %v1872_v33, %v1873_v35  ;;  %v1875_v44 = vrot.slane %v4486_v40, 1  ;;  %v4488_v46 = vld [vmem:[%s4995_s30 + $0x18] sm:$0xfe]  }
  0x31   : > { %1176 = vrot.lane.b32.xlu0 %v4473_v62, %s4905_s4  ;;  %v1850_v43 = vsel %vm944_vm0, %v1848_v38, %v1849_v39  ;;  %v1876_v45 = vrot.slane %v4487_v41, 1  ;;  %v4489_v47 = vld [vmem:[%s4995_s30 + $0x20] ss:$0 sps:$4 sm:$0x11]   ;;  %v1851_v48 = vrot.slane %v4488_v46, 1  ;;  %v4491_v55 = vld [vmem:[%s4995_s30 + $0x18] sm:$0xff]  }
  0x32   : > { %v1438_v37 = vsel %vm510_vm1, %v1433_v31, %v1437_v32  ;;  %v1852_v51 = vrot.slane %v4489_v47, 1  ;;  %v2417_v57 = vshll.u32 %v4494_v49, 16  ;;  %v4495_v58 = vld [vmem:[%s4995_s30 + $0x80] ss:$0 sps:$4 sm:$0x11]   ;;  %v2319_v59 = vshrl.u32 %v4496_v52, 16 }
  0x33   : > { %v1877_v50 = vsel %vm944_vm0, %v1875_v44, %v1876_v45  ;;  %v2321_v61 = vshll.u32 %v4496_v52, 16  ;;  %v4492_v62 = vld [vmem:[%s4995_s30 + $0x84] sm:$0xff]   ;;  %v2422_v63 = vshll.u32 %v4495_v58, 16  ;;  %v4497_v0 = vld [vmem:[%s4995_s30 + $0x20] ss:$0 sps:$4 sm:$0x11]  }
  0x34   : > { %1623 = vrot.lane.b32.xlu1 %v1522_v15, %s4908_s7  ;;  %v1853_v54 = vsel %vm944_vm0, %v1851_v48, %v1852_v51  ;;  %v2419_v60 = vrot.slane %v2417_v57, 1  ;;  %v4493_v1 = vld [vmem:[%s4995_s30 + $0x24] sm:$0xff]   ;;  %v2326_v5 = vshll.u32 %v4497_v0, 16  ;;  %v4499_v6 = vld [vmem:[%s4995_s30 + $0x8c] ss:$0 sps:$4 sm:$0x11]  }
  0x35   : > { %1607 = vrot.lane.b32.xlu0 %v1426_v24, %s4908_s7  ;;  %v2323_v2 = vrot.slane %v2321_v61, 1  ;;  %v4498_v3 = vld [vmem:[%s4995_s30 + $0x84] sm:$0xff]   ;;  %v2424_v4 = vrot.slane %v2422_v63, 1  ;;  %v2434_v13 = vshll.u32 %v4499_v6, 16  ;;  %v4506_v14 = vld [vmem:[%s4995_s30 + $0x78] sm:$0xff]  }
  0x36   : > { %v4500_v7 = vld [vmem:[%s4995_s30 + $0x24] sm:$0xff]   ;;  %v2420_v8 = vor.u32 %v2419_v60, %v2415_v56  ;;  %v2427_v9 = vshrl.u32 %v4498_v3, 16  ;;  %v2429_v10 = vshll.u32 %v4498_v3, 16  ;;  %v2328_v12 = vrot.slane %v2326_v5, 1  ;;  %v4502_v25 = vld [vmem:[%s4995_s30 + $0x78] sm:$0xfe]  }
  0x37   : > { %v2324_v11 = vor.u32 %v2323_v2, %v2319_v59  ;;  %v4501_v16 = vld [vmem:[%s4995_s30 + $0x2c] ss:$0 sps:$4 sm:$0x11]   ;;  %v2331_v17 = vshrl.u32 %v4500_v7, 16  ;;  %v2333_v18 = vshll.u32 %v4500_v7, 16  ;;  %v2436_v19 = vrot.slane %v2434_v13, 1 }
  0x38   : > { %1625 = vrot.lane.b32.xlu1 %v1534_v30, %s4908_s7  ;;  %v2431_v15 = vrot.slane %v2429_v10, 1  ;;  %v632_v20 = vshrl.u32 %v4506_v14, 16  ;;  %v2425_v21 = vsel %vm510_vm1, %v2420_v8, %v2424_v4  ;;  %v2338_v24 = vshll.u32 %v4501_v16, 16  ;;  %v4503_v27 = vld [vmem:[%s4995_s30 + $0x80] ss:$0 sps:$4 sm:$0x11]  }
  0x39   : > { %1609 = vrot.lane.b32.xlu0 %v1438_v37, %s4908_s7  ;;  %v2335_v23 = vrot.slane %v2333_v18, 1  ;;  %v2329_v26 = vsel %vm510_vm1, %v2324_v11, %v2328_v12  ;;  %v634_v28 = vshll.u32 %v4506_v14, 16  ;;  %v2775_v31 = vrot.slane %v4502_v25, 1  ;;  %v4508_v32 = vld [vmem:[%s4995_s30 + $0x18] sm:$0xff]   ;;  %v4510_v51 = vld [vmem:[%s4995_s30 + $0x84] sm:$0xfe]  }
  0x3a   : > { %v2432_v22 = vor.u32 %v2431_v15, %v2427_v9  ;;  %v2340_v30 = vrot.slane %v2338_v24, 1  ;;  %v2776_v33 = vrot.slane %v4503_v27, 1  ;;  %v4504_v34 = vld [vmem:[%s4995_s30 + $0x18] sm:$0xfe]   ;;  %v536_v46 = vshrl.u32 %v4508_v32, 16  ;;  %v4514_v52 = vld [vmem:[%s4995_s30 + $0x84] sm:$0xff]  }
  0x3b   : > { %v2336_v29 = vor.u32 %v2335_v23, %v2331_v17  ;;  %v4505_v35 = vld [vmem:[%s4995_s30 + $0x20] ss:$0 sps:$4 sm:$0x11]   ;;  %v2751_v38 = vrot.slane %v4504_v34, 1  ;;  %v636_v41 = vrot.slane %v634_v28, 1  ;;  %v538_v47 = vshll.u32 %v4508_v32, 16 }
  0x3c   : > { %1912 = vrot.lane.b32.xlu1 %v1874_v42, %s4909_s8  ;;  %v2437_v36 = vsel %vm510_vm1, %v2432_v22, %v2436_v19  ;;  %v2752_v39 = vrot.slane %v4505_v35, 1  ;;  %v4507_v40 = vld [vmem:[%s4995_s30 + $0x80] ss:$0 sps:$4 sm:$0x11]   ;;  %v2777_v44 = vsel %vm944_vm0, %v2775_v31, %v2776_v33  ;;  %v2778_v56 = vrot.slane %v4510_v51, 1  ;;  %v4516_v57 = vld [vmem:[%s4995_s30 + $0x24] sm:$0xff]  }
  0x3d   : > { %1896 = vrot.lane.b32.xlu0 %v1850_v43, %s4909_s8  ;;  %v2341_v37 = vsel %vm510_vm1, %v2336_v29, %v2340_v30  ;;  %v639_v42 = vshll.u32 %v4507_v40, 16  ;;  %v4509_v43 = vld [vmem:[%s4995_s30 + $0x20] ss:$0 sps:$4 sm:$0x11]   ;;  %v637_v45 = vor.u32 %v636_v41, %v632_v20  ;;  %v4512_v61 = vld [vmem:[%s4995_s30 + $0x24] sm:$0xfe]  }
  0x3e   : > { %v2753_v48 = vsel %vm944_vm0, %v2751_v38, %v2752_v39  ;;  %v2754_v0 = vrot.slane %v4512_v61, 1  ;;  %v4515_v2 = vld [vmem:[%s4995_s30 + $0x8c] ss:$0 sps:$4 sm:$0x11]   ;;  %v644_v3 = vshrl.u32 %v4514_v52, 16  ;;  %v646_v4 = vshll.u32 %v4514_v52, 16 }
  0x3f   : > { %v641_v49 = vrot.slane %v639_v42, 1  ;;  %v651_v6 = vshll.u32 %v4515_v2, 16  ;;  %v4517_v7 = vld [vmem:[%s4995_s30 + $0x2c] ss:$0 sps:$4 sm:$0x11]   ;;  %v548_v10 = vshrl.u32 %v4516_v57, 16 }
  0x40   : > { %1914 = vrot.lane.b32.xlu1 %v1877_v50, %s4909_s8  ;;  %v543_v50 = vshll.u32 %v4509_v43, 16  ;;  %v648_v9 = vrot.slane %v646_v4, 1  ;;  %v550_v11 = vshll.u32 %v4516_v57, 16  ;;  %v555_v13 = vshll.u32 %v4517_v7, 16  ;;  %v4518_v16 = vld [vmem:[%s4995_s30 + $0x78] sm:$0xfe]  }
  0x41   : > { %1898 = vrot.lane.b32.xlu0 %v1853_v54, %s4909_s8  ;;  %v4511_v54 = vld [vmem:[%s4995_s30 + $0x8c] ss:$0 sps:$4 sm:$0x11]   ;;  %v642_v58 = vsel %vm510_vm1, %v637_v45, %v641_v49  ;;  %v653_v12 = vrot.slane %v651_v6, 1  ;;  %v4520_v23 = vld [vmem:[%s4995_s30 + $0x18] sm:$0xfe]  }
  0x42   : > { %v2779_v60 = vrot.slane %v4511_v54, 1  ;;  %v649_v14 = vor.u32 %v648_v9, %v644_v3  ;;  %v552_v15 = vrot.slane %v550_v11, 1  ;;  %v4519_v17 = vld [vmem:[%s4995_s30 + $0x80] ss:$0 sps:$4 sm:$0x11]   ;;  %v557_v18 = vrot.slane %v555_v13, 1 }
  0x43   : > { %v976_v22 = vrot.slane %v4519_v17, 1  ;;  %v4521_v24 = vld [vmem:[%s4995_s30 + $0x20] ss:$0 sps:$4 sm:$0x11]   ;;  %v4530_v27 = vld [vmem:[%s4995_s30 + $0x84] sm:$0xff]   ;;  %v4529_v51 = vld [vmem:[%s4995_s30 + $0x30] sm:$0xff]  }
  0x44   : > { %2093 = vrot.lane.b32.xlu1 %v4490_v53, %s4910_s9  ;;  %v540_v53 = vrot.slane %v538_v47, 1  ;;  %v2780_v5 = vsel %vm944_vm0, %v2778_v56, %v2779_v60  ;;  %v654_v19 = vsel %vm510_vm1, %v649_v14, %v653_v12  ;;  %v553_v20 = vor.u32 %v552_v15, %v548_v10  ;;  %v4522_v30 = vld [vmem:[%s4995_s30 + $0x84] sm:$0xfe]   ;;  %v4523_v31 = vld [vmem:[%s4995_s30 + $0x8c] ss:$0 sps:$4 sm:$0x11]  }
  0x45   : > { %2077 = vrot.lane.b32.xlu0 %v4491_v55, %s4910_s9  ;;  %v545_v55 = vrot.slane %v543_v50, 1  ;;  %v952_v29 = vrot.slane %v4521_v24, 1  ;;  %v978_v33 = vrot.slane %v4522_v30, 1  ;;  %v979_v34 = vrot.slane %v4523_v31, 1  ;;  %v4524_v35 = vld [vmem:[%s4995_s30 + $0x24] sm:$0xfe]  }
  0x46   : > { %v541_v59 = vor.u32 %v540_v53, %v536_v46  ;;  %v558_v25 = vsel %vm510_vm1, %v553_v20, %v557_v18  ;;  %v954_v39 = vrot.slane %v4524_v35, 1  ;;  %v1538_v40 = vshll.u32 %v4530_v27, 16  ;;  %v4526_v42 = vld [vmem:[%s4995_s30 + $0x84] sm:$0xff]   ;;  %v4528_v50 = vld [vmem:[%s4995_s30 + $0x90] sm:$0xff]  }
  0x47   : > { %v980_v38 = vsel %vm944_vm0, %v978_v33, %v979_v34  ;;  %v4532_v43 = vld [vmem:[%s4995_s30 + $0x24] sm:$0xff]   ;;  %v4533_v53 = vld [vmem:[%s4995_s30 + $0x2c] ss:$0 sps:$4 sm:$0x11]   ;;  %v4544_v30 = vld [vmem:[%s4995_s30 + $0x30] sm:$0xfe]  }
  0x48   : > { %2095 = vrot.lane.b32.xlu1 %v4492_v62, %s4910_s9  ;;  %v4513_v62 = vld [vmem:[%s4995_s30 + $0x2c] ss:$0 sps:$4 sm:$0x11]   ;;  %v546_v63 = vsel %vm510_vm1, %v541_v59, %v545_v55  ;;  %v1540_v46 = vrot.slane %v1538_v40, 1  ;;  %v1440_v47 = vshrl.u32 %v4532_v43, 16  ;;  %v1442_v49 = vshll.u32 %v4532_v43, 16 }
  0x49   : > { %2079 = vrot.lane.b32.xlu0 %v4493_v1, %s4910_s9  ;;  %v2755_v1 = vrot.slane %v4513_v62, 1  ;;  %v4534_v55 = vld [vmem:[%s4995_s30 + $0x90] sm:$0xff]   ;;  %v4535_v59 = vld [vmem:[%s4995_s30 + $0x98] ss:$0 sps:$4 sm:$0x11]   ;;  %v1857_v34 = vrot.slane %v4544_v30, 1 }
  0x4a   : > { %v1444_v54 = vrot.slane %v1442_v49, 1  ;;  %v1548_v60 = vshrl.u32 %v4534_v55, 16  ;;  %v1550_v62 = vshll.u32 %v4534_v55, 16  ;;  %v4537_v2 = vld [vmem:[%s4995_s30 + $0x38] ss:$0 sps:$4 sm:$0x11]  }
  0x4b   : > { %v2756_v8 = vsel %vm944_vm0, %v2754_v0, %v2755_v1  ;;  %v1555_v1 = vshll.u32 %v4535_v59, 16  ;;  %v4538_v12 = vld [vmem:[%s4995_s30 + $0x84] sm:$0xfe]   ;;  %v4539_v13 = vld [vmem:[%s4995_s30 + $0x8c] ss:$0 sps:$4 sm:$0x11]  }
  0x4c   : > { %2526 = vrot.lane.b32.xlu1 %v2425_v21, %s4911_s10  ;;  %v975_v21 = vrot.slane %v4518_v16, 1  ;;  %v1445_v61 = vor.u32 %v1444_v54, %v1440_v47  ;;  %v1552_v3 = vrot.slane %v1550_v62, 1  ;;  %v1878_v16 = vrot.slane %v4538_v12, 1  ;;  %v4540_v17 = vld [vmem:[%s4995_s30 + $0x24] sm:$0xfe]   ;;  %v4546_v40 = vld [vmem:[%s4995_s30 + $0x90] sm:$0xff]  }
  0x4d   : > { %2510 = vrot.lane.b32.xlu0 %v2329_v26, %s4911_s10  ;;  %v951_v26 = vrot.slane %v4520_v23, 1  ;;  %v1557_v7 = vrot.slane %v1555_v1, 1  ;;  %v4541_v20 = vld [vmem:[%s4995_s30 + $0x2c] ss:$0 sps:$4 sm:$0x11]   ;;  %v4550_v23 = vld [vmem:[%s4995_s30 + $0x90] sm:$0xff]  }
  0x4e   : > { %v977_v28 = vsel %vm944_vm0, %v975_v21, %v976_v22  ;;  %v1553_v10 = vor.u32 %v1552_v3, %v1548_v60  ;;  %v1854_v22 = vrot.slane %v4540_v17, 1  ;;  %v1855_v24 = vrot.slane %v4541_v20, 1  ;;  %v4547_v43 = vld [vmem:[%s4995_s30 + $0x30] sm:$0xff]   ;;  %v4553_v47 = vld [vmem:[%s4995_s30 + $0x38] ss:$0 sps:$4 sm:$0x11]  }
  0x4f   : > { %v953_v32 = vsel %vm944_vm0, %v951_v26, %v952_v29  ;;  %v4543_v26 = vld [vmem:[%s4995_s30 + $0x98] ss:$0 sps:$4 sm:$0x11]   ;;  %v2439_v33 = vshrl.u32 %v4550_v23, 16  ;;  %v2441_v35 = vshll.u32 %v4550_v23, 16  ;;  %v4554_v49 = vld [vmem:[%s4995_s30 + $0x9c] sm:$0xff]  }
  0x50   : > { %2528 = vrot.lane.b32.xlu1 %v2437_v36, %s4911_s10  ;;  %v4525_v36 = vld [vmem:[%s4995_s30 + $0x2c] ss:$0 sps:$4 sm:$0x11]   ;;  %v1558_v18 = vsel %vm510_vm1, %v1553_v10, %v1557_v7  ;;  %v1882_v29 = vrot.slane %v4543_v26, 1  ;;  %v1856_v31 = vsel %vm944_vm0, %v1854_v22, %v1855_v24  ;;  %v2453_v55 = vshll.u32 %v4554_v49, 16  ;;  %v4562_v3 = vld [vmem:[%s4995_s30 + $0x90] sm:$0xff]  }
  0x51   : > { %2512 = vrot.lane.b32.xlu0 %v2341_v37, %s4911_s10  ;;  %v1536_v37 = vshrl.u32 %v4530_v27, 16  ;;  %v955_v41 = vrot.slane %v4525_v36, 1  ;;  %v4555_v54 = vld [vmem:[%s4995_s30 + $0xa4] ss:$0 sps:$4 sm:$0x11]   ;;  %v2451_v59 = vshrl.u32 %v4554_v49, 16 }
  0x52   : > { %v2458_v60 = vshll.u32 %v4555_v54, 16  ;;  %v4561_v20 = vld [vmem:[%s4995_s30 + $0x38] ss:$0 sps:$4 sm:$0x11]   ;;  %v4573_v49 = vld [vmem:[%s4995_s30 + $0x60] sm:$0xff]  }
  0x53   : > { %v956_v45 = vsel %vm944_vm0, %v954_v39, %v955_v41  ;;  %v1541_v56 = vor.u32 %v1540_v46, %v1536_v37  ;;  %v4552_v37 = vld [vmem:[%s4995_s30 + $0x30] sm:$0xff]   ;;  %v2443_v41 = vrot.slane %v2441_v35, 1  ;;  %v2758_v26 = vrot.slane %v4561_v20, 1  ;;  %326 = vst.msk [vmem:[#allocation2 + $0x40] sm:$0xff] %vm317_vm2, %v4573_v49  ;;  %v4592_v49 = vld [vmem:[%s4995_s30 + $0x3c] sm:$0xff]  }
  0x54   : > { %2815 = vrot.lane.b32.xlu1 %v2777_v44, %s4912_s11  ;;  %v4527_v44 = vld [vmem:[%s4995_s30 + $0x24] sm:$0xff]   ;;  %v4566_v35 = vld [vmem:[%s4995_s30 + $0xc] sm:$0xff]  }
  0x55   : > { %2799 = vrot.lane.b32.xlu0 %v2753_v48, %s4912_s11  ;;  %v4531_v48 = vld [vmem:[%s4995_s30 + $0x8c] ss:$0 sps:$4 sm:$0x11]   ;;  %319 = vst.msk [vmem:[#allocation2 + $0x8] sm:$0xff] %vm317_vm2, %v4566_v35 }
  0x56   : > { %v1543_v52 = vshll.u32 %v4531_v48, 16 }
  0x58   : > { %723 = vrot.lane.b32.xlu1 %v642_v58, %s4907_s6  ;;  %v1545_v57 = vrot.slane %v1543_v52, 1  ;;  %v1447_v58 = vshll.u32 %v4533_v53, 16  ;;  %v2350_v53 = vshll.u32 %v4553_v47, 16  ;;  %v4572_v47 = vld [vmem:[%s4995_s30 + $0x6c] sm:$0xff]  }
  0x59   : > { %707 = vrot.lane.b32.xlu0 %v546_v63, %s4907_s6  ;;  %v4536_v63 = vld [vmem:[%s4995_s30 + $0x30] sm:$0xff]   ;;  %327 = vst.msk [vmem:[#allocation2 + $0x48] sm:$0xff] %vm317_vm2, %v4572_v47  ;;  %v4590_v47 = vld [vmem:[%s4995_s30 + $0x9c] sm:$0xff]  }
  0x5a   : > { %v1449_v0 = vrot.slane %v1447_v58, 1  ;;  %v1452_v4 = vshrl.u32 %v4536_v63, 16  ;;  %v1546_v6 = vsel %vm510_vm1, %v1541_v56, %v1545_v57  ;;  %v4556_v56 = vld [vmem:[%s4995_s30 + $0x3c] sm:$0xff]   ;;  %v2444_v57 = vor.u32 %v2443_v41, %v2439_v33  ;;  %v4565_v33 = vld [vmem:[%s4995_s30 + $0x38] ss:$0 sps:$4 sm:$0x11]  }
  0x5b   : > { %v2352_v58 = vrot.slane %v2350_v53, 1  ;;  %v2355_v1 = vshrl.u32 %v4556_v56, 16  ;;  %v4567_v41 = vld [vmem:[%s4995_s30] sm:$0xff]  }
  0x5c   : > { %2817 = vrot.lane.b32.xlu1 %v2780_v5, %s4912_s11  ;;  %v1454_v5 = vshll.u32 %v4536_v63, 16  ;;  %v1450_v9 = vsel %vm510_vm1, %v1445_v61, %v1449_v0  ;;  %v4557_v61 = vld [vmem:[%s4995_s30 + $0x44] ss:$0 sps:$4 sm:$0x11]   ;;  %v2455_v0 = vrot.slane %v2453_v55, 1  ;;  %318 = vst.msk [vmem:[#allocation2] sm:$0xff] %vm317_vm2, %v4567_v41 }
  0x5d   : > { %2801 = vrot.lane.b32.xlu0 %v2756_v8, %s4912_s11  ;;  %v1459_v8 = vshll.u32 %v4537_v2, 16  ;;  %v2357_v2 = vshll.u32 %v4556_v56, 16  ;;  %v4570_v55 = vld [vmem:[%s4995_s30 + $0x3c] sm:$0xfe]  }
  0x5e   : > { %v1456_v11 = vrot.slane %v1454_v5, 1  ;;  %v2362_v5 = vshll.u32 %v4557_v61, 16  ;;  %v2456_v12 = vor.u32 %v2455_v0, %v2451_v59  ;;  %v4571_v56 = vld [vmem:[%s4995_s30 + $0x44] ss:$0 sps:$4 sm:$0x11]  }
  0x5f   : > { %v1461_v14 = vrot.slane %v1459_v8, 1  ;;  %v2359_v7 = vrot.slane %v2357_v2, 1  ;;  %v4558_v8 = vld [vmem:[%s4995_s30 + $0x90] sm:$0xfe]   ;;  %v2761_v59 = vrot.slane %v4571_v56, 1  ;;  %v1464_v56 = vshrl.u32 %v4592_v49, 16 }
  0x60   : > { %725 = vrot.lane.b32.xlu1 %v654_v19, %s4907_s6  ;;  %v1457_v15 = vor.u32 %v1456_v11, %v1452_v4  ;;  %v1879_v19 = vrot.slane %v4539_v13, 1  ;;  %v2460_v4 = vrot.slane %v2458_v60, 1  ;;  %v2364_v13 = vrot.slane %v2362_v5, 1  ;;  %v4575_v2 = vld [vmem:[%s4995_s30 + $0xa4] ss:$0 sps:$4 sm:$0x11]  }
  0x61   : > { %709 = vrot.lane.b32.xlu0 %v558_v25, %s4907_s6  ;;  %v4542_v25 = vld [vmem:[%s4995_s30 + $0x90] sm:$0xfe]   ;;  %v2781_v17 = vrot.slane %v4558_v8, 1  ;;  %v675_v5 = vshll.u32 %v4575_v2, 16 }
  0x62   : > { %v1462_v21 = vsel %vm510_vm1, %v1457_v15, %v1461_v14  ;;  %v1880_v27 = vsel %vm944_vm0, %v1878_v16, %v1879_v19  ;;  %v656_v14 = vshrl.u32 %v4562_v3, 16  ;;  %v2360_v16 = vor.u32 %v2359_v7, %v2355_v1  ;;  %v4560_v19 = vld [vmem:[%s4995_s30 + $0x30] sm:$0xfe]  }
  0x63   : > { %v2757_v23 = vrot.slane %v4560_v19, 1 }
  0x64   : > { %1013 = vrot.lane.b32.xlu1 %v977_v28, %s4906_s5  ;;  %v1881_v28 = vrot.slane %v4542_v25, 1  ;;  %v2461_v25 = vsel %vm510_vm1, %v2456_v12, %v2460_v4  ;;  %v2365_v30 = vsel %vm510_vm1, %v2360_v16, %v2364_v13  ;;  %v677_v12 = vrot.slane %v675_v5, 1 }
  0x65   : > { %997 = vrot.lane.b32.xlu0 %v953_v32, %s4906_s5  ;;  %v4545_v32 = vld [vmem:[%s4995_s30 + $0x38] ss:$0 sps:$4 sm:$0x11]  }
  0x66   : > { %v1858_v36 = vrot.slane %v4545_v32, 1 }
  0x68   : > { %1015 = vrot.lane.b32.xlu1 %v980_v38, %s4906_s5  ;;  %v1883_v38 = vsel %vm944_vm0, %v1881_v28, %v1882_v29  ;;  %v1859_v39 = vsel %vm944_vm0, %v1857_v34, %v1858_v36 }
  0x69   : > { %999 = vrot.lane.b32.xlu0 %v956_v45, %s4906_s5  ;;  %v2345_v45 = vshll.u32 %v4552_v37, 16 }
  0x6b   : > { %v2347_v48 = vrot.slane %v2345_v45, 1 }
  0x6c   : > { %1194 = vrot.lane.b32.xlu1 %v4526_v42, %s4905_s4  ;;  %v2343_v42 = vshrl.u32 %v4552_v37, 16 }
  0x6d   : > { %1178 = vrot.lane.b32.xlu0 %v4527_v44, %s4905_s4  ;;  %v4551_v44 = vld [vmem:[%s4995_s30 + $0x98] ss:$0 sps:$4 sm:$0x11]  }
  0x6e   : > { %v2446_v46 = vshll.u32 %v4551_v44, 16  ;;  %v2348_v62 = vor.u32 %v2347_v48, %v2343_v42  ;;  %v2759_v42 = vsel %vm944_vm0, %v2757_v23, %v2758_v26  ;;  %v4569_v48 = vld [vmem:[%s4995_s30 + $0xa4] ss:$0 sps:$4 sm:$0x11]   ;;  %v4580_v23 = vld [vmem:[%s4995_s30 + $0x30] sm:$0xfe]  }
  0x6f   : > { %v2785_v54 = vrot.slane %v4569_v48, 1  ;;  %v4591_v48 = vld [vmem:[%s4995_s30 + $0xa4] ss:$0 sps:$4 sm:$0x11]  }
  0x70   : > { %1196 = vrot.lane.b32.xlu1 %v4528_v50, %s4905_s4  ;;  %v4548_v50 = vld [vmem:[%s4995_s30 + $0x9c] sm:$0xff]   ;;  %v2448_v52 = vrot.slane %v2446_v46, 1  ;;  %v2353_v15 = vsel %vm510_vm1, %v2348_v62, %v2352_v58  ;;  %v2760_v58 = vrot.slane %v4570_v55, 1 }
  0x71   : > { %1180 = vrot.lane.b32.xlu0 %v4529_v51, %s4905_s4  ;;  %v4549_v51 = vld [vmem:[%s4995_s30 + $0x3c] sm:$0xff]  }
  0x72   : > { %v2449_v10 = vsel %vm510_vm1, %v2444_v57, %v2448_v52  ;;  %v4568_v46 = vld [vmem:[%s4995_s30 + $0x9c] sm:$0xfe]   ;;  %v2762_v1 = vsel %vm944_vm0, %v2760_v58, %v2761_v59 }
  0x73   : > { %v4574_v52 = vld [vmem:[%s4995_s30 + $0x9c] sm:$0xff]  }
  0x74   : > { %1627 = vrot.lane.b32.xlu1 %v1546_v6, %s4908_s7  ;;  %v4564_v6 = vld [vmem:[%s4995_s30 + $0x30] sm:$0xff]   ;;  %v668_v62 = vshrl.u32 %v4574_v52, 16  ;;  %v670_v0 = vshll.u32 %v4574_v52, 16  ;;  %v1562_v52 = vshll.u32 %v4590_v47, 16 }
  0x75   : > { %1611 = vrot.lane.b32.xlu0 %v1450_v9, %s4908_s7  ;;  %v4559_v9 = vld [vmem:[%s4995_s30 + $0x98] ss:$0 sps:$4 sm:$0x11]   ;;  %v560_v24 = vshrl.u32 %v4564_v6, 16  ;;  %v562_v29 = vshll.u32 %v4564_v6, 16 }
  0x76   : > { %v672_v4 = vrot.slane %v670_v0, 1  ;;  %v4577_v6 = vld [vmem:[%s4995_s30 + $0x44] ss:$0 sps:$4 sm:$0x11]   ;;  %v1564_v59 = vrot.slane %v1562_v52, 1  ;;  %v4607_v52 = vld [vmem:[%s4995_s30 + $0x48] sm:$0xff]  }
  0x77   : > { %v564_v34 = vrot.slane %v562_v29, 1 }
  0x78   : > { %1629 = vrot.lane.b32.xlu1 %v1558_v18, %s4908_s7  ;;  %v2782_v18 = vrot.slane %v4559_v9, 1  ;;  %v673_v9 = vor.u32 %v672_v4, %v668_v62  ;;  %v4594_v62 = vld [vmem:[%s4995_s30 + $0xa8] sm:$0xff]  }
  0x79   : > { %1613 = vrot.lane.b32.xlu0 %v1462_v21, %s4908_s7  ;;  %v658_v21 = vshll.u32 %v4562_v3, 16  ;;  %v4576_v3 = vld [vmem:[%s4995_s30 + $0x3c] sm:$0xff]   ;;  %v1572_v4 = vshrl.u32 %v4594_v62, 16  ;;  %v1574_v5 = vshll.u32 %v4594_v62, 16 }
  0x7a   : > { %v2783_v36 = vsel %vm944_vm0, %v2781_v17, %v2782_v18  ;;  %v572_v7 = vshrl.u32 %v4576_v3, 16  ;;  %v574_v8 = vshll.u32 %v4576_v3, 16  ;;  %v4579_v17 = vld [vmem:[%s4995_s30 + $0x98] ss:$0 sps:$4 sm:$0x11]  }
  0x7b   : > { %v660_v28 = vrot.slane %v658_v21, 1  ;;  %v982_v21 = vrot.slane %v4579_v17, 1 }
  0x7c   : > { %1916 = vrot.lane.b32.xlu1 %v1880_v27, %s4909_s8  ;;  %v4563_v27 = vld [vmem:[%s4995_s30 + $0x98] ss:$0 sps:$4 sm:$0x11]   ;;  %v576_v13 = vrot.slane %v574_v8, 1 }
  0x7d   : > { %1900 = vrot.lane.b32.xlu0 %v1856_v31, %s4909_s8  ;;  %v663_v32 = vshll.u32 %v4563_v27, 16 }
  0x7e   : > { %v577_v18 = vor.u32 %v576_v13, %v572_v7 }
  0x80   : > { %1918 = vrot.lane.b32.xlu1 %v1883_v38, %s4909_s8  ;;  %v661_v38 = vor.u32 %v660_v28, %v656_v14  ;;  %v579_v14 = vshll.u32 %v4577_v6, 16  ;;  %v957_v28 = vrot.slane %v4580_v23, 1  ;;  %v4596_v6 = vld [vmem:[%s4995_s30 + $0x48] sm:$0xff]   ;;  %v4599_v23 = vld [vmem:[%s4995_s30 + $0xa4] ss:$0 sps:$4 sm:$0x11]  }
  0x81   : > { %1902 = vrot.lane.b32.xlu0 %v1859_v39, %s4909_s8  ;;  %v665_v39 = vrot.slane %v663_v32, 1 }
  0x82   : > { %v581_v19 = vrot.slane %v579_v14, 1  ;;  %v1576_v14 = vrot.slane %v1574_v5, 1 }
  0x84   : > { %2097 = vrot.lane.b32.xlu1 %v4546_v40, %s4910_s9  ;;  %v567_v40 = vshll.u32 %v4565_v33, 16  ;;  %v4584_v33 = vld [vmem:[%s4995_s30 + $0x3c] sm:$0xfe]  }
  0x85   : > { %2081 = vrot.lane.b32.xlu0 %v4547_v43, %s4910_s9  ;;  %v565_v43 = vor.u32 %v564_v34, %v560_v24  ;;  %v4581_v24 = vld [vmem:[%s4995_s30 + $0x38] ss:$0 sps:$4 sm:$0x11]  }
  0x86   : > { %v569_v45 = vrot.slane %v567_v40, 1  ;;  %v958_v29 = vrot.slane %v4581_v24, 1 }
  0x88   : > { %2099 = vrot.lane.b32.xlu1 %v4548_v50, %s4910_s9  ;;  %v666_v50 = vsel %vm510_vm1, %v661_v38, %v665_v39  ;;  %v570_v53 = vsel %vm510_vm1, %v565_v43, %v569_v45  ;;  %v960_v38 = vrot.slane %v4584_v33, 1  ;;  %v4586_v39 = vld [vmem:[%s4995_s30 + $0x9c] sm:$0xff]  }
  0x89   : > { %2083 = vrot.lane.b32.xlu0 %v4549_v51, %s4910_s9  ;;  %v2784_v51 = vrot.slane %v4568_v46, 1  ;;  %v4588_v46 = vld [vmem:[%s4995_s30 + $0xa8] sm:$0xff]  }
  0x8b   : > { %v2786_v61 = vsel %vm944_vm0, %v2784_v51, %v2785_v54  ;;  %v1560_v51 = vshrl.u32 %v4590_v47, 16  ;;  %v4593_v54 = vld [vmem:[%s4995_s30 + $0x44] ss:$0 sps:$4 sm:$0x11]  }
  0x8c   : > { %2530 = vrot.lane.b32.xlu1 %v2449_v10, %s4911_s10 }
  0x8d   : > { %2514 = vrot.lane.b32.xlu0 %v2353_v15, %s4911_s10  ;;  %v4578_v15 = vld [vmem:[%s4995_s30 + $0x90] sm:$0xfe]   ;;  %v1565_v2 = vor.u32 %v1564_v59, %v1560_v51  ;;  %v4614_v59 = vld [vmem:[%s4995_s30 + $0xb0] ss:$0 sps:$4 sm:$0x11]  }
  0x8e   : > { %v5195_v63 = vpop.permute.xlu1 %1190  ;;  %v981_v20 = vrot.slane %v4578_v15, 1  ;;  %v1476_v15 = vshrl.u32 %v4596_v6, 16 }
  0x8f   : > { %v5204_v11 = vpop.permute.xlu0 %1174 }
  0x90   : > { %2532 = vrot.lane.b32.xlu1 %v2461_v25, %s4911_s10  ;;  %v582_v25 = vsel %vm510_vm1, %v577_v18, %v581_v19  ;;  %v1577_v19 = vor.u32 %v1576_v14, %v1572_v4 }
  0x91   : > { %2516 = vrot.lane.b32.xlu0 %v2365_v30, %s4911_s10  ;;  %v4582_v30 = vld [vmem:[%s4995_s30 + $0x9c] sm:$0xfe]  }
  0x92   : > { %v5210_v22 = vpop.permute.xlu1 %1009  ;;  %v984_v32 = vrot.slane %v4582_v30, 1  ;;  %v4600_v30 = vld [vmem:[%s4995_s30 + $0x3c] sm:$0xfe]  }
  0x93   : > { %v994_v31 = vpop.permute.xlu0 %993 }
  0x94   : > { %2819 = vrot.lane.b32.xlu1 %v2783_v36, %s4912_s11  ;;  %v4585_v36 = vld [vmem:[%s4995_s30 + $0x44] ss:$0 sps:$4 sm:$0x11]  }
  0x95   : > { %2803 = vrot.lane.b32.xlu0 %v2759_v42, %s4912_s11  ;;  %v961_v41 = vrot.slane %v4585_v36, 1  ;;  %v4587_v42 = vld [vmem:[%s4995_s30 + $0x3c] sm:$0xff]   ;;  %v4602_v36 = vld [vmem:[%s4995_s30 + $0xa8] sm:$0xfe]  }
  0x96   : > { %v1012_v37 = vpop.permute.xlu1 %1011 }
  0x97   : > { %v996_v44 = vpop.permute.xlu0 %995  ;;  %v962_v43 = vsel %vm944_vm0, %v960_v38, %v961_v41 }
  0x98   : > { %727 = vrot.lane.b32.xlu1 %v666_v50, %s4907_s6  ;;  %v4589_v50 = vld [vmem:[%s4995_s30 + $0x48] sm:$0xff]  }
  0x99   : > { %711 = vrot.lane.b32.xlu0 %v570_v53, %s4907_s6  ;;  %v1567_v53 = vshll.u32 %v4591_v48, 16 }
  0x9a   : > { %v706_v57 = vpop.permute.xlu1 %705 }
  0x9b   : > { %753 = vst.msk [vmem:[#allocation2 + $0x8] sm:$0xff] %vm751_vm3, %v706_v57  ;;  %v704_v60 = vpop.permute.xlu0 %703  ;;  %v1466_v57 = vshll.u32 %v4592_v49, 16  ;;  %v4606_v49 = vld [vmem:[%s4995_s30 + $0xa8] sm:$0xff]  }
  0x9c   : > { %1043 = vst.msk [vmem:[#allocation2 + $0x8] sm:$0xff] %vm1041_vm4, %v996_v44  ;;  %2821 = vrot.lane.b32.xlu1 %v2786_v61, %s4912_s11  ;;  %v1471_v61 = vshll.u32 %v4593_v54, 16  ;;  %v4611_v54 = vld [vmem:[%s4995_s30 + $0x18] sm:$0xff]  }
  0x9d   : > { %752 = vst.msk [vmem:[#allocation2] sm:$0xff] %vm751_vm3, %v704_v60  ;;  %2805 = vrot.lane.b32.xlu0 %v2762_v1, %s4912_s11  ;;  %v1569_v60 = vrot.slane %v1567_v53, 1  ;;  %v1468_v0 = vrot.slane %v1466_v57, 1  ;;  %v4595_v1 = vld [vmem:[%s4995_s30 + $0xb0] ss:$0 sps:$4 sm:$0x11]  }
  0x9e   : > { %1042 = vst.msk [vmem:[#allocation2] sm:$0xff] %vm1041_vm4, %v994_v31  ;;  %v722_v10 = vpop.permute.xlu1 %721  ;;  %v4583_v31 = vld [vmem:[%s4995_s30 + $0xa4] ss:$0 sps:$4 sm:$0x11]   ;;  %v1473_v3 = vrot.slane %v1471_v61, 1  ;;  %v4608_v57 = vld [vmem:[%s4995_s30 + $0xb4] sm:$0xff]  }
  0x9f   : > { %1223 = vst.msk [vmem:[#allocation2] sm:$0xff] %vm1222_vm5, %v5204_v11  ;;  %v720_v16 = vpop.permute.xlu0 %719  ;;  %v678_v11 = vsel %vm510_vm1, %v673_v9, %v677_v12  ;;  %v985_v35 = vrot.slane %v4583_v31, 1  ;;  %v1469_v8 = vor.u32 %v1468_v0, %v1464_v56  ;;  %v1579_v9 = vshll.u32 %v4595_v1, 16  ;;  %v4601_v31 = vld [vmem:[%s4995_s30 + $0x44] ss:$0 sps:$4 sm:$0x11]  }
  0xa0   : > { %761 = vst.msk [vmem:[#allocation2 + $0x48] sm:$0xff] %vm751_vm3, %v722_v10  ;;  %760 = vst.msk [vmem:[#allocation2 + $0x40] sm:$0xff] %vm751_vm3, %v720_v16  ;;  %729 = vrot.lane.b32.xlu1 %v678_v11, %s4907_s6  ;;  %v4597_v10 = vld [vmem:[%s4995_s30 + $0x50] ss:$0 sps:$4 sm:$0x11]   ;;  %v1570_v13 = vsel %vm510_vm1, %v1565_v2, %v1569_v60  ;;  %v1478_v16 = vshll.u32 %v4596_v6, 16 }
  0xa1   : > { %1051 = vst.msk [vmem:[#allocation2 + $0x48] sm:$0xff] %vm1041_vm4, %v1012_v37  ;;  %1050 = vst.msk [vmem:[#allocation2 + $0x40] sm:$0xff] %vm1041_vm4, %v5210_v22  ;;  %713 = vrot.lane.b32.xlu0 %v582_v25, %s4907_s6  ;;  %v983_v22 = vsel %vm944_vm0, %v981_v20, %v982_v21  ;;  %v986_v40 = vsel %vm944_vm0, %v984_v32, %v985_v35  ;;  %v1474_v17 = vsel %vm510_vm1, %v1469_v8, %v1473_v3  ;;  %v4598_v21 = vld [vmem:[%s4995_s30 + $0x9c] sm:$0xfe]   ;;  %v4615_v60 = vld [vmem:[%s4995_s30 + $0x48] sm:$0xff]  }
  0xa2   : > { %v1193_v26 = vpop.permute.xlu1 %1192  ;;  %1231 = vst.msk [vmem:[#allocation2 + $0x40] sm:$0xff] %vm1222_vm5, %v5195_v63  ;;  %v959_v63 = vsel %vm944_vm0, %v957_v28, %v958_v29  ;;  %v1581_v11 = vrot.slane %v1579_v9, 1  ;;  %v1483_v18 = vshll.u32 %v4597_v10, 16  ;;  %v1480_v20 = vrot.slane %v1478_v16, 1  ;;  %v4609_v61 = vld [vmem:[%s4995_s30 + $0x54] sm:$0xff]   ;;  %v4617_v8 = vld [vmem:[%s5779_s1 + $0x8] sm:$0xff]  }
  0xa3   : > { %1232 = vst.msk [vmem:[#allocation2 + $0x48] sm:$0xff] %vm1222_vm5, %v1193_v26  ;;  %v1177_v27 = vpop.permute.xlu0 %1176  ;;  %v1884_v28 = vrot.slane %v4598_v21, 1  ;;  %v1885_v29 = vrot.slane %v4599_v23, 1  ;;  %v1860_v32 = vrot.slane %v4600_v30, 1  ;;  %v1861_v35 = vrot.slane %v4601_v31, 1  ;;  %v4620_v16 = vld [vmem:[%s4995_s30 + $0x54] sm:$0xff]  }
  0xa4   : > { %1224 = vst.msk [vmem:[#allocation2 + $0x8] sm:$0xff] %vm1222_vm5, %v1177_v27  ;;  %1017 = vrot.lane.b32.xlu1 %v983_v22, %s4906_s5  ;;  %v1485_v25 = vrot.slane %v1483_v18, 1  ;;  %v1582_v27 = vsel %vm510_vm1, %v1577_v19, %v1581_v11  ;;  %v1481_v22 = vor.u32 %v1480_v20, %v1476_v15  ;;  %v2470_v2 = vshll.u32 %v4614_v59, 16  ;;  %v4616_v3 = vld [vmem:[%s4995_s30 + $0x50] ss:$0 sps:$4 sm:$0x11]  }
  0xa5   : > { %1001 = vrot.lane.b32.xlu0 %v959_v63, %s4906_s5  ;;  %320 = vst.msk [vmem:[#allocation2 + $0x10] sm:$0xff] %vm317_vm2, %v4611_v54  ;;  %v2367_v4 = vshrl.u32 %v4615_v60, 16  ;;  %v2369_v5 = vshll.u32 %v4615_v60, 16  ;;  %v4619_v15 = vld [vmem:[%s4995_s30 + $0xbc] ss:$0 sps:$4 sm:$0x11]  }
  0xa6   : > { %v1624_v34 = vpop.permute.xlu1 %1623  ;;  %v1486_v63 = vsel %vm510_vm1, %v1481_v22, %v1485_v25  ;;  %v2472_v9 = vrot.slane %v2470_v2, 1  ;;  %v4622_v21 = vld [vmem:[%s4995_s30 + $0x84] sm:$0xff]   ;;  %v2482_v25 = vshll.u32 %v4619_v15, 16 }
  0xa7   : > { %1664 = vst.msk [vmem:[#allocation2 + $0x40] sm:$0xff] %vm1655_vm6, %v1624_v34  ;;  %v1608_v37 = vpop.permute.xlu0 %1607  ;;  %v1886_v34 = vsel %vm944_vm0, %v1884_v28, %v1885_v29  ;;  %v2371_v10 = vrot.slane %v2369_v5, 1  ;;  %v2379_v28 = vshrl.u32 %v4620_v16, 16  ;;  %v2381_v29 = vshll.u32 %v4620_v16, 16  ;;  %v4623_v30 = vld [vmem:[%s4995_s30 + $0x24] sm:$0xff]   ;;  %v4637_v5 = vld [vmem:[%s4995_s30 + $0xb4] sm:$0xff]  }
  0xa8   : > { %1656 = vst.msk [vmem:[#allocation2] sm:$0xff] %vm1655_vm6, %v1608_v37  ;;  %1019 = vrot.lane.b32.xlu1 %v986_v40, %s4906_s5  ;;  %v4603_v37 = vld [vmem:[%s4995_s30 + $0xb0] ss:$0 sps:$4 sm:$0x11]   ;;  %v1887_v40 = vrot.slane %v4602_v36, 1  ;;  %v2484_v31 = vrot.slane %v2482_v25, 1 }
  0xa9   : > { %1003 = vrot.lane.b32.xlu0 %v962_v43, %s4906_s5  ;;  %v1888_v41 = vrot.slane %v4603_v37, 1  ;;  %v4605_v43 = vld [vmem:[%s4995_s30 + $0x50] ss:$0 sps:$4 sm:$0x11]   ;;  %v2372_v11 = vor.u32 %v2371_v10, %v2367_v4  ;;  %329 = vst.msk [vmem:[#allocation2 + $0x58] sm:$0xff] %vm317_vm2, %v4622_v21  ;;  %321 = vst.msk [vmem:[#allocation2 + $0x18] sm:$0xff] %vm317_vm2, %v4623_v30 }
  0xaa   : > { %v1626_v44 = vpop.permute.xlu1 %1625  ;;  %v1864_v48 = vrot.slane %v4605_v43, 1  ;;  %v4625_v43 = vld [vmem:[%s4995_s30 + $0xa8] sm:$0xfe]   ;;  %v4632_v4 = vld [vmem:[%s4995_s30 + $0x50] ss:$0 sps:$4 sm:$0x11]  }
  0xab   : > { %1665 = vst.msk [vmem:[#allocation2 + $0x48] sm:$0xff] %vm1655_vm6, %v1626_v44  ;;  %v1610_v45 = vpop.permute.xlu0 %1609  ;;  %v591_v10 = vshll.u32 %v4632_v4, 16  ;;  %v4636_v25 = vld [vmem:[%s4995_s30 + $0x5c] ss:$0 sps:$4 sm:$0x11]  }
  0xac   : > { %1657 = vst.msk [vmem:[#allocation2 + $0x8] sm:$0xff] %vm1655_vm6, %v1610_v45  ;;  %1198 = vrot.lane.b32.xlu1 %v4586_v39, %s4905_s4  ;;  %v1862_v39 = vsel %vm944_vm0, %v1860_v32, %v1861_v35  ;;  %v1889_v45 = vsel %vm944_vm0, %v1887_v40, %v1888_v41  ;;  %v2383_v35 = vrot.slane %v2381_v29, 1  ;;  %v4629_v40 = vld [vmem:[%s4995_s30 + $0xa8] sm:$0xff]   ;;  %v2767_v29 = vrot.slane %v4636_v25, 1  ;;  %v4652_v25 = vld [vmem:[%s4995_s30 + $0x60] sm:$0xff]  }
  0xad   : > { %1182 = vrot.lane.b32.xlu0 %v4587_v42, %s4905_s4  ;;  %v4604_v42 = vld [vmem:[%s4995_s30 + $0x48] sm:$0xfe]  }
  0xae   : > { %v1913_v55 = vpop.permute.xlu1 %1912 }
  0xaf   : > { %1953 = vst.msk [vmem:[#allocation2 + $0x40] sm:$0xff] %vm1944_vm7, %v1913_v55  ;;  %v1897_v58 = vpop.permute.xlu0 %1896  ;;  %v4612_v55 = vld [vmem:[%s5779_s1] sm:$0xff]  }
  0xb0   : > { %1945 = vst.msk [vmem:[#allocation2] sm:$0xff] %vm1944_vm7, %v1897_v58  ;;  %1200 = vrot.lane.b32.xlu1 %v4588_v46, %s4905_s4  ;;  %v1863_v46 = vrot.slane %v4604_v42, 1  ;;  %v4613_v58 = vld [vmem:[%s4995_s30 + $0xa8] sm:$0xff]   ;;  %4343 = vmatprep.subr.bf16.mxu0 %v4612_v55  ;;  %v2384_v42 = vor.u32 %v2383_v35, %v2379_v28  ;;  %v4640_v35 = vld [vmem:[%s4995_s30 + $0x5c] ss:$0 sps:$4 sm:$0x11]  }
  0xb1   : > { %1184 = vrot.lane.b32.xlu0 %v4589_v50, %s4905_s4  ;;  %v4610_v50 = vld [vmem:[%s4995_s30 + $0x78] sm:$0xff]   ;;  %4381 = vmatprep.subr.bf16.mxu1 %v4612_v55  ;;  %v2463_v62 = vshrl.u32 %v4613_v58, 16  ;;  %v2465_v0 = vshll.u32 %v4613_v58, 16  ;;  %v682_v58 = vshll.u32 %v4629_v40, 16 }
  0xb2   : > { %v1915_v7 = vpop.permute.xlu1 %1914  ;;  %v1865_v51 = vsel %vm944_vm0, %v1863_v46, %v1864_v48  ;;  %328 = vst.msk [vmem:[#allocation2 + $0x50] sm:$0xff] %vm317_vm2, %v4610_v50  ;;  %4344 = vmatpush3.bf16.msra.mxu0 %v4612_v55  ;;  %4384 = vmatpush3.bf16.msra.mxu1 %v4612_v55  ;;  %v2787_v48 = vrot.slane %v4625_v43, 1 }
  0xb3   : > { %1954 = vst.msk [vmem:[#allocation2 + $0x48] sm:$0xff] %vm1944_vm7, %v1915_v7  ;;  %v1899_v12 = vpop.permute.xlu0 %1898  ;;  %v2467_v7 = vrot.slane %v2465_v0, 1  ;;  %4345 = vmatprep.subr.bf16.mxu0 %v4617_v8  ;;  %4382 = vmatprep.subr.bf16.mxu1 %v4617_v8 }
  0xb4   : > { %1946 = vst.msk [vmem:[#allocation2 + $0x8] sm:$0xff] %vm1944_vm7, %v1899_v12  ;;  %1631 = vrot.lane.b32.xlu1 %v1570_v13, %s4908_s7  ;;  %v2374_v12 = vshll.u32 %v4616_v3, 16  ;;  %v4618_v13 = vld [vmem:[%s4995_s30 + $0xb4] sm:$0xff]   ;;  %v4631_v3 = vld [vmem:[%s4995_s30 + $0x48] sm:$0xff]  }
  0xb5   : > { %1615 = vrot.lane.b32.xlu0 %v1474_v17, %s4908_s7  ;;  %v2468_v14 = vor.u32 %v2467_v7, %v2463_v62  ;;  %v2475_v19 = vshrl.u32 %v4618_v13, 16  ;;  %v2477_v20 = vshll.u32 %v4618_v13, 16  ;;  %v4633_v13 = vld [vmem:[%s4995_s30 + $0xb4] sm:$0xfe]  }
  0xb6   : > { %v2094_v24 = vpop.permute.xlu1 %2093  ;;  %v2376_v18 = vrot.slane %v2374_v12, 1  ;;  %4346 = vmatpush3.bf16.msra.mxu0 %v4617_v8  ;;  %4385 = vmatpush3.bf16.msra.mxu1 %v4617_v8  ;;  %v584_v8 = vshrl.u32 %v4631_v3, 16 }
  0xb7   : > { %2134 = vst.msk [vmem:[#allocation2 + $0x40] sm:$0xff] %vm2125_vm8, %v2094_v24  ;;  %v2078_v26 = vpop.permute.xlu0 %2077  ;;  %v2473_v24 = vsel %vm510_vm1, %v2468_v14, %v2472_v9  ;;  %v2479_v22 = vrot.slane %v2477_v20, 1  ;;  %v586_v9 = vshll.u32 %v4631_v3, 16  ;;  %v692_v14 = vshrl.u32 %v4637_v5, 16  ;;  %v4639_v20 = vld [vmem:[%s4995_s30 + $0x54] sm:$0xff]  }
  0xb8   : > { %2126 = vst.msk [vmem:[#allocation2] sm:$0xff] %vm2125_vm8, %v2078_v26  ;;  %1633 = vrot.lane.b32.xlu1 %v1582_v27, %s4908_s7  ;;  %v4621_v26 = vld [vmem:[%s4995_s30 + $0x5c] ss:$0 sps:$4 sm:$0x11]   ;;  %v2377_v27 = vsel %vm510_vm1, %v2372_v11, %v2376_v18  ;;  %v593_v18 = vrot.slane %v591_v10, 1 }
  0xb9   : > { %1617 = vrot.lane.b32.xlu0 %v1486_v63, %s4908_s7  ;;  %v2386_v63 = vshll.u32 %v4621_v26, 16  ;;  %v588_v16 = vrot.slane %v586_v9, 1  ;;  %v4634_v11 = vld [vmem:[%s4995_s30 + $0xbc] ss:$0 sps:$4 sm:$0x11]   ;;  %v4653_v9 = vld [vmem:[%s4995_s30 + $0xb4] sm:$0xff]  }
  0xba   : > { %v2096_v33 = vpop.permute.xlu1 %2095  ;;  %v4648_v3 = vld [vmem:[%s4995_s30 + $0x5c] ss:$0 sps:$4 sm:$0x11]  }
  0xbb   : > { %2135 = vst.msk [vmem:[#allocation2 + $0x48] sm:$0xff] %vm2125_vm8, %v2096_v33  ;;  %v2080_v38 = vpop.permute.xlu0 %2079  ;;  %v589_v21 = vor.u32 %v588_v16, %v584_v8  ;;  %v4649_v8 = vld [vmem:[%s4995_s30 + $0xb4] sm:$0xff]   ;;  %v1584_v16 = vshrl.u32 %v4653_v9, 16 }
  0xbc   : > { %2127 = vst.msk [vmem:[#allocation2 + $0x8] sm:$0xff] %vm2125_vm8, %v2080_v38  ;;  %1920 = vrot.lane.b32.xlu1 %v1886_v34, %s4909_s8  ;;  %v2480_v34 = vor.u32 %v2479_v22, %v2475_v19  ;;  %v2388_v38 = vrot.slane %v2386_v63, 1  ;;  %v2790_v19 = vrot.slane %v4633_v13, 1  ;;  %v694_v63 = vshll.u32 %v4637_v5, 16  ;;  %v4650_v13 = vld [vmem:[%s4995_s30 + $0x54] sm:$0xff]  }
  0xbd   : > { %1904 = vrot.lane.b32.xlu0 %v1862_v39, %s4909_s8  ;;  %v4624_v39 = vld [vmem:[%s5779_s1 + $0x10] ss:$0 sps:$4 sm:$0x33]  }
  0xbe   : > { %v2527_v44 = vpop.permute.xlu1 %2526  ;;  %v2485_v41 = vsel %vm510_vm1, %v2480_v34, %v2484_v31  ;;  %4387 = vmatprep.subr.msk.bf16.mxu0 %vm2956_vm12, %v4624_v39  ;;  %v2389_v46 = vsel %vm510_vm1, %v2384_v42, %v2388_v38  ;;  %4388 = vmatprep.subr.msk.bf16.mxu1 %vm2956_vm12, %v4624_v39  ;;  %v4638_v31 = vld [vmem:[%s4995_s30 + $0xbc] ss:$0 sps:$4 sm:$0x11]   ;;  %v4641_v42 = vld [vmem:[%s4995_s30 + $0xa8] sm:$0xfe]  }
  0xbf   : > { %2567 = vst.msk [vmem:[#allocation2 + $0x40] sm:$0xff] %vm2558_vm9, %v2527_v44  ;;  %v2511_v47 = vpop.permute.xlu0 %2510  ;;  %v2958_v44 = vsel %vm2956_vm12, %v4624_v39, 0  ;;  %v699_v34 = vshll.u32 %v4638_v31, 16 }
  0xc0   : > { %2559 = vst.msk [vmem:[#allocation2] sm:$0xff] %vm2558_vm9, %v2511_v47  ;;  %1922 = vrot.lane.b32.xlu1 %v1889_v45, %s4909_s8  ;;  %v4626_v45 = vld [vmem:[%s4995_s30 + $0xb0] ss:$0 sps:$4 sm:$0x11]   ;;  %4348 = vmatpush3.bf16.msra.mxu0 %v2958_v44 }
  0xc1   : > { %1906 = vrot.lane.b32.xlu0 %v1865_v51, %s4909_s8  ;;  %4386 = vmatpush3.bf16.msra.mxu1 %v2958_v44  ;;  %v2788_v51 = vrot.slane %v4626_v45, 1  ;;  %v701_v39 = vrot.slane %v699_v34, 1  ;;  %v4642_v45 = vld [vmem:[%s4995_s30 + $0xb0] ss:$0 sps:$4 sm:$0x11]  }
  0xc2   : > { %v2529_v53 = vpop.permute.xlu1 %2528 }
  0xc3   : > { %2568 = vst.msk [vmem:[#allocation2 + $0x48] sm:$0xff] %vm2558_vm9, %v2529_v53  ;;  %v2513_v56 = vpop.permute.xlu0 %2512  ;;  %v4628_v53 = vld [vmem:[%s4995_s30 + $0x50] ss:$0 sps:$4 sm:$0x11]   ;;  %v2789_v54 = vsel %vm944_vm0, %v2787_v48, %v2788_v51  ;;  %v4643_v51 = vld [vmem:[%s4995_s30 + $0x48] sm:$0xfe]  }
  0xc4   : > { %2560 = vst.msk [vmem:[#allocation2 + $0x8] sm:$0xff] %vm2558_vm9, %v2513_v56  ;;  %2101 = vrot.lane.b32.xlu1 %v4606_v49, %s4910_s9  ;;  %v680_v49 = vshrl.u32 %v4629_v40, 16  ;;  %v2764_v56 = vrot.slane %v4628_v53, 1  ;;  %v603_v40 = vshll.u32 %v4640_v35, 16 }
  0xc5   : > { %2085 = vrot.lane.b32.xlu0 %v4607_v52, %s4910_s9  ;;  %v4627_v52 = vld [vmem:[%s4995_s30 + $0x48] sm:$0xfe]  }
  0xc6   : > { %v2816_v1 = vpop.permute.xlu1 %2815  ;;  %v2763_v55 = vrot.slane %v4627_v52, 1  ;;  %v4644_v52 = vld [vmem:[%s4995_s30 + $0x50] ss:$0 sps:$4 sm:$0x11]  }
  0xc7   : > { %2856 = vst.msk [vmem:[#allocation2 + $0x40] sm:$0xff] %vm2847_vm10, %v2816_v1  ;;  %v2800_v6 = vpop.permute.xlu0 %2799  ;;  %v684_v1 = vrot.slane %v682_v58, 1  ;;  %v964_v58 = vrot.slane %v4644_v52, 1  ;;  %v4662_v52 = vld [vmem:[%s4995_s30 + $0xbc] ss:$0 sps:$4 sm:$0x11]  }
  0xc8   : > { %2848 = vst.msk [vmem:[#allocation2] sm:$0xff] %vm2847_vm10, %v2800_v6  ;;  %2103 = vrot.lane.b32.xlu1 %v4608_v57, %s4910_s9  ;;  %v4630_v57 = vld [vmem:[%s4995_s30 + $0xb0] ss:$0 sps:$4 sm:$0x11]  }
  0xc9   : > { %2087 = vrot.lane.b32.xlu0 %v4609_v61, %s4910_s9  ;;  %v2765_v61 = vsel %vm944_vm0, %v2763_v55, %v2764_v56  ;;  %v687_v2 = vshll.u32 %v4630_v57, 16  ;;  %v685_v6 = vor.u32 %v684_v1, %v680_v49  ;;  %v963_v57 = vrot.slane %v4643_v51, 1 }
  0xca   : > { %v724_v17 = vpop.permute.xlu1 %723 }
  0xcb   : > { %762 = vst.msk [vmem:[#allocation2 + $0x50] sm:$0xff] %vm751_vm3, %v724_v17  ;;  %v708_v23 = vpop.permute.xlu0 %707  ;;  %v689_v7 = vrot.slane %v687_v2, 1 }
  0xcc   : > { %754 = vst.msk [vmem:[#allocation2 + $0x10] sm:$0xff] %vm751_vm3, %v708_v23  ;;  %2534 = vrot.lane.b32.xlu1 %v2473_v24, %s4911_s10  ;;  %v2791_v23 = vrot.slane %v4634_v11, 1  ;;  %v4635_v24 = vld [vmem:[%s4995_s30 + $0x54] sm:$0xfe]  }
  0xcd   : > { %2518 = vrot.lane.b32.xlu0 %v2377_v27, %s4911_s10  ;;  %v690_v15 = vsel %vm510_vm1, %v685_v6, %v689_v7  ;;  %v594_v27 = vsel %vm510_vm1, %v589_v21, %v593_v18  ;;  %v2766_v28 = vrot.slane %v4635_v24, 1  ;;  %v967_v7 = vrot.slane %v4648_v3, 1  ;;  %v4655_v11 = vld [vmem:[%s4995_s30 + $0x54] sm:$0xff]   ;;  %v4651_v18 = vld [vmem:[%s4995_s30 + $0xc0] sm:$0xff]  }
  0xce   : > { %v2818_v32 = vpop.permute.xlu1 %2817  ;;  %v2872_v33 = vld [vmem:[#allocation2 + $0x40] sm:$0xff]  ;;  %v2792_v22 = vsel %vm944_vm0, %v2790_v19, %v2791_v23  ;;  %v4656_v23 = vld [vmem:[%s4995_s30 + $0x5c] ss:$0 sps:$4 sm:$0x11]   ;;  %v1488_v24 = vshrl.u32 %v4655_v11, 16 }
  0xcf   : > { %2857 = vst.msk [vmem:[#allocation2 + $0x48] sm:$0xff] %vm2847_vm10, %v2818_v32  ;;  %v2802_v36 = vpop.permute.xlu0 %2801  ;;  %v2864_v37 = vld [vmem:[#allocation2] sm:$0xff]  ;;  %4365 = vmatprep.mubr.msk.bf16.mxu1 %vm2907_vm11, %v2872_v33  ;;  %v596_v32 = vshrl.u32 %v4639_v20, 16  ;;  %v2768_v33 = vsel %vm944_vm0, %v2766_v28, %v2767_v29 }
  0xd0   : > { %2849 = vst.msk [vmem:[#allocation2 + $0x8] sm:$0xff] %vm2847_vm10, %v2802_v36  ;;  %4349 = vmatprep.mubr.msk.bf16.mxu0 %vm2907_vm11, %v2864_v37  ;;  %2536 = vrot.lane.b32.xlu1 %v2485_v41, %s4911_s10  ;;  %v696_v36 = vrot.slane %v694_v63, 1  ;;  %v598_v37 = vshll.u32 %v4639_v20, 16  ;;  %v4658_v63 = vld [vmem:[%s4995_s30 + $0xc8] ss:$0 sps:$4 sm:$0x11]  }
  0xd1   : > { %2520 = vrot.lane.b32.xlu0 %v2389_v46, %s4911_s10  ;;  %v605_v46 = vrot.slane %v603_v40, 1  ;;  %v1603_v40 = vshll.u32 %v4658_v63, 16 }
  0xd2   : > { %v726_v47 = vpop.permute.xlu1 %725  ;;  %v697_v43 = vor.u32 %v696_v36, %v692_v14  ;;  %v600_v44 = vrot.slane %v598_v37, 1  ;;  %v4659_v36 = vld [vmem:[%s4995_s30 + $0x60] sm:$0xff]  }
  0xd3   : > { %763 = vst.msk [vmem:[#allocation2 + $0x58] sm:$0xff] %vm751_vm3, %v726_v47  ;;  %v710_v50 = vpop.permute.xlu0 %709  ;;  %v987_v47 = vrot.slane %v4641_v42, 1 }
  0xd4   : > { %755 = vst.msk [vmem:[#allocation2 + $0x18] sm:$0xff] %vm751_vm3, %v710_v50  ;;  %2823 = vrot.lane.b32.xlu1 %v2789_v54, %s4912_s11  ;;  %v702_v48 = vsel %vm510_vm1, %v697_v43, %v701_v39  ;;  %v601_v49 = vor.u32 %v600_v44, %v596_v32  ;;  %v988_v50 = vrot.slane %v4642_v45, 1  ;;  %v1500_v43 = vshrl.u32 %v4659_v36, 16 }
  0xd5   : > { %2807 = vrot.lane.b32.xlu0 %v2765_v61, %s4912_s11  ;;  %v965_v61 = vsel %vm944_vm0, %v963_v57, %v964_v58  ;;  %v1502_v44 = vshll.u32 %v4659_v36, 16  ;;  %v1891_v58 = vrot.slane %v4662_v52, 1  ;;  %v4679_v36 = vld [vmem:[%s4995_s30 + $0xcc] sm:$0xff]  }
  0xd6   : > { %v1014_v59 = vpop.permute.xlu1 %1013  ;;  %v2873_v60 = vld [vmem:[#allocation2 + $0x48] sm:$0xff]  ;;  %v606_v55 = vsel %vm510_vm1, %v601_v49, %v605_v46  ;;  %v989_v56 = vsel %vm944_vm0, %v987_v47, %v988_v50  ;;  %v1605_v46 = vrot.slane %v1603_v40, 1  ;;  %v4681_v40 = vld [vmem:[%s4995_s30 + $0x6c] sm:$0xff]  }
  0xd7   : > { %1052 = vst.msk [vmem:[#allocation2 + $0x50] sm:$0xff] %vm1041_vm4, %v1014_v59  ;;  %v998_v62 = vpop.permute.xlu0 %997  ;;  %v2865_v0 = vld [vmem:[#allocation2 + $0x8] sm:$0xff]  ;;  %4366 = vmatmul.mubr.msk.bf16.vlgmr.msra.gmra.mrb[0].mxu1 %vm2907_vm11, %v2873_v60  ;;  %v1504_v50 = vrot.slane %v1502_v44, 1  ;;  %v2501_v44 = vshll.u32 %v4679_v36, 16 }
  0xd8   : > { %1044 = vst.msk [vmem:[#allocation2 + $0x10] sm:$0xff] %vm1041_vm4, %v998_v62  ;;  %4350 = vmatmul.mubr.msk.bf16.vlgmr.msra.gmra.mrb[0].mxu0 %vm2907_vm11, %v2865_v0  ;;  %731 = vrot.lane.b32.xlu1 %v690_v15, %s4907_s6  ;;  %v4645_v59 = vld [vmem:[%s4995_s30 + $0xb4] sm:$0xfe]   ;;  %v4646_v60 = vld [vmem:[%s4995_s30 + $0xbc] ss:$0 sps:$4 sm:$0x11]  }
  0xd9   : > { %715 = vrot.lane.b32.xlu0 %v594_v27, %s4907_s6  ;;  %v990_v62 = vrot.slane %v4645_v59, 1  ;;  %v4647_v0 = vld [vmem:[%s4995_s30 + $0x54] sm:$0xfe]   ;;  %v991_v2 = vrot.slane %v4646_v60, 1  ;;  %v1490_v27 = vshll.u32 %v4655_v11, 16  ;;  %v1505_v57 = vor.u32 %v1504_v50, %v1500_v43  ;;  %v4669_v11 = vld [vmem:[%s4995_s30 + $0xc0] sm:$0xff]  }
  0xda   : > { %v1016_v12 = vpop.permute.xlu1 %1015  ;;  %v966_v5 = vrot.slane %v4647_v0, 1  ;;  %v4654_v15 = vld [vmem:[%s4995_s30 + $0xbc] ss:$0 sps:$4 sm:$0x11]   ;;  %v4663_v59 = vld [vmem:[%s4995_s30 + $0x54] sm:$0xfe]  }
  0xdb   : > { %1053 = vst.msk [vmem:[#allocation2 + $0x58] sm:$0xff] %vm1041_vm4, %v1016_v12  ;;  %v1000_v17 = vpop.permute.xlu0 %999  ;;  %v992_v6 = vsel %vm944_vm0, %v990_v62, %v991_v2  ;;  %v1591_v21 = vshll.u32 %v4654_v15, 16  ;;  %v1492_v31 = vrot.slane %v1490_v27, 1  ;;  %v4664_v60 = vld [vmem:[%s4995_s30 + $0x5c] ss:$0 sps:$4 sm:$0x11]  }
  0xdc   : > { %1045 = vst.msk [vmem:[#allocation2 + $0x18] sm:$0xff] %vm1041_vm4, %v1000_v17  ;;  %2825 = vrot.lane.b32.xlu1 %v2792_v22, %s4912_s11  ;;  %v968_v12 = vsel %vm944_vm0, %v966_v5, %v967_v7  ;;  %v1586_v17 = vshll.u32 %v4653_v9, 16  ;;  %v4657_v22 = vld [vmem:[%s4995_s30 + $0xc0] sm:$0xff]   ;;  %v1866_v62 = vrot.slane %v4663_v59, 1  ;;  %v1867_v0 = vrot.slane %v4664_v60, 1  ;;  %v4671_v27 = vld [vmem:[%s4995_s30 + $0xcc] sm:$0xff]  }
  0xdd   : > { %2809 = vrot.lane.b32.xlu0 %v2768_v33, %s4912_s11  ;;  %v1593_v29 = vrot.slane %v1591_v21, 1  ;;  %v1596_v32 = vshrl.u32 %v4657_v22, 16  ;;  %v1598_v33 = vshll.u32 %v4657_v22, 16  ;;  %v1493_v37 = vor.u32 %v1492_v31, %v1488_v24  ;;  %v4665_v2 = vld [vmem:[%s4995_s30 + $0xc0] sm:$0xfe]  }
  0xde   : > { %v1195_v26 = vpop.permute.xlu1 %1194  ;;  %v1588_v20 = vrot.slane %v1586_v17, 1  ;;  %v4667_v7 = vld [vmem:[%s4995_s30 + $0x60] sm:$0xfe]   ;;  %v4668_v9 = vld [vmem:[%s4995_s30 + $0x68] ss:$0 sps:$4 sm:$0x11]  }
  0xdf   : > { %1233 = vst.msk [vmem:[#allocation2 + $0x50] sm:$0xff] %vm1222_vm5, %v1195_v26  ;;  %v1179_v30 = vpop.permute.xlu0 %1178  ;;  %v1600_v39 = vrot.slane %v1598_v33, 1  ;;  %v4670_v21 = vld [vmem:[%s4995_s30 + $0x60] sm:$0xff]   ;;  %v4678_v31 = vld [vmem:[%s4995_s30 + $0x68] ss:$0 sps:$4 sm:$0x11]  }
  0xe0   : > { %1225 = vst.msk [vmem:[#allocation2 + $0x10] sm:$0xff] %vm1222_vm5, %v1179_v30  ;;  %733 = vrot.lane.b32.xlu1 %v702_v48, %s4907_s6  ;;  %v1589_v28 = vor.u32 %v1588_v20, %v1584_v16  ;;  %v1495_v30 = vshll.u32 %v4656_v23, 16  ;;  %v4661_v48 = vld [vmem:[%s4995_s30 + $0xb4] sm:$0xfe]   ;;  %v4675_v24 = vld [vmem:[%s4995_s30 + $0xc0] sm:$0xff]   ;;  %v4672_v33 = vld [vmem:[%s4995_s30 + $0x6c] sm:$0xff]  }
  0xe1   : > { %717 = vrot.lane.b32.xlu0 %v606_v55, %s4907_s6  ;;  %v1601_v45 = vor.u32 %v1600_v39, %v1596_v32  ;;  %v1890_v55 = vrot.slane %v4661_v48, 1  ;;  %v4673_v16 = vld [vmem:[%s4995_s30 + $0x90] sm:$0xff]   ;;  %v2487_v22 = vshrl.u32 %v4675_v24, 16  ;;  %v2398_v39 = vshll.u32 %v4678_v31, 16  ;;  %v4684_v60 = vld [vmem:[%s4995_s30 + $0x3c] sm:$0xff]  }
  0xe2   : > { %v1197_v38 = vpop.permute.xlu1 %1196  ;;  %v1497_v34 = vrot.slane %v1495_v30, 1  ;;  %v1594_v42 = vsel %vm510_vm1, %v1589_v28, %v1593_v29  ;;  %330 = vst.msk [vmem:[#allocation2 + $0x60] sm:$0xff] %vm317_vm2, %v4673_v16  ;;  %v4674_v20 = vld [vmem:[%s4995_s30 + $0x30] sm:$0xff]   ;;  %v2489_v28 = vshll.u32 %v4675_v24, 16  ;;  %v2499_v43 = vshrl.u32 %v4679_v36, 16  ;;  %323 = vst.msk [vmem:[#allocation2 + $0x28] sm:$0xff] %vm317_vm2, %v4684_v60 }
  0xe3   : > { %1234 = vst.msk [vmem:[#allocation2 + $0x58] sm:$0xff] %vm1222_vm5, %v1197_v38  ;;  %v1181_v41 = vpop.permute.xlu0 %1180  ;;  %v1892_v5 = vsel %vm944_vm0, %v1890_v55, %v1891_v58  ;;  %v2503_v52 = vrot.slane %v2501_v44, 1  ;;  %v4694_v24 = vld [vmem:[%s4995_s30 + $0x48] sm:$0xff]  }
  0xe4   : > { %1226 = vst.msk [vmem:[#allocation2 + $0x18] sm:$0xff] %vm1222_vm5, %v1181_v41  ;;  %1021 = vrot.lane.b32.xlu1 %v989_v56, %s4906_s5  ;;  %v4660_v41 = vld [vmem:[%s4995_s30 + $0x68] ss:$0 sps:$4 sm:$0x11]   ;;  %v1498_v49 = vsel %vm510_vm1, %v1493_v37, %v1497_v34  ;;  %v1606_v56 = vsel %vm510_vm1, %v1601_v45, %v1605_v46  ;;  %v4683_v45 = vld [vmem:[%s4995_s30 + $0x9c] sm:$0xff]  }
  0xe5   : > { %1005 = vrot.lane.b32.xlu0 %v965_v61, %s4906_s5  ;;  %v1507_v47 = vshll.u32 %v4660_v41, 16  ;;  %322 = vst.msk [vmem:[#allocation2 + $0x20] sm:$0xff] %vm317_vm2, %v4674_v20  ;;  %331 = vst.msk [vmem:[#allocation2 + $0x68] sm:$0xff] %vm317_vm2, %v4683_v45  ;;  %v2504_v58 = vor.u32 %v2503_v52, %v2499_v43 }
  0xe6   : > { %v1628_v53 = vpop.permute.xlu1 %1627  ;;  %324 = vst.msk [vmem:[#allocation2 + $0x30] sm:$0xff] %vm317_vm2, %v4694_v24 }
  0xe7   : > { %1666 = vst.msk [vmem:[#allocation2 + $0x50] sm:$0xff] %vm1655_vm6, %v1628_v53  ;;  %v1612_v54 = vpop.permute.xlu0 %1611  ;;  %v1509_v53 = vrot.slane %v1507_v47, 1  ;;  %v2400_v47 = vrot.slane %v2398_v39, 1 }
  0xe8   : > { %1658 = vst.msk [vmem:[#allocation2 + $0x10] sm:$0xff] %vm1655_vm6, %v1612_v54  ;;  %1023 = vrot.lane.b32.xlu1 %v992_v6, %s4906_s5  ;;  %v1893_v6 = vrot.slane %v4665_v2, 1  ;;  %v4685_v2 = vld [vmem:[%s4995_s30 + $0xc0] sm:$0xfe]  }
  0xe9   : > { %1007 = vrot.lane.b32.xlu0 %v968_v12, %s4906_s5  ;;  %v1510_v61 = vsel %vm510_vm1, %v1505_v57, %v1509_v53  ;;  %v1869_v12 = vrot.slane %v4667_v7, 1  ;;  %v2405_v57 = vshll.u32 %v4681_v40, 16 }
  0xea   : > { %v1630_v1 = vpop.permute.xlu1 %1629 }
  0xeb   : > { %1667 = vst.msk [vmem:[#allocation2 + $0x58] sm:$0xff] %vm1655_vm6, %v1630_v1  ;;  %v1614_v4 = vpop.permute.xlu0 %1613 }
  0xec   : > { %1659 = vst.msk [vmem:[#allocation2 + $0x18] sm:$0xff] %vm1655_vm6, %v1614_v4  ;;  %1202 = vrot.lane.b32.xlu1 %v4649_v8, %s4905_s4  ;;  %v4666_v4 = vld [vmem:[%s4995_s30 + $0xc8] ss:$0 sps:$4 sm:$0x11]  }
  0xed   : > { %1186 = vrot.lane.b32.xlu0 %v4650_v13, %s4905_s4  ;;  %v1894_v8 = vrot.slane %v4666_v4, 1 }
  0xee   : > { %v1917_v10 = vpop.permute.xlu1 %1916 }
  0xef   : > { %1955 = vst.msk [vmem:[#allocation2 + $0x50] sm:$0xff] %vm1944_vm7, %v1917_v10  ;;  %v1901_v14 = vpop.permute.xlu0 %1900  ;;  %v1868_v10 = vsel %vm944_vm0, %v1866_v62, %v1867_v0  ;;  %v1895_v17 = vsel %vm944_vm0, %v1893_v6, %v1894_v8  ;;  %v2407_v62 = vrot.slane %v2405_v57, 1  ;;  %v4686_v6 = vld [vmem:[%s4995_s30 + $0xc8] ss:$0 sps:$4 sm:$0x11]   ;;  %v2793_v8 = vrot.slane %v4685_v2, 1 }
  0xf0   : > { %1947 = vst.msk [vmem:[#allocation2 + $0x10] sm:$0xff] %vm1944_vm7, %v1901_v14  ;;  %1204 = vrot.lane.b32.xlu1 %v4651_v18, %s4905_s4  ;;  %v1870_v14 = vrot.slane %v4668_v9, 1  ;;  %v4693_v9 = vld [vmem:[%s4995_s30 + $0xa8] sm:$0xff]  }
  0xf1   : > { %1188 = vrot.lane.b32.xlu0 %v4652_v25, %s4905_s4  ;;  %v4676_v25 = vld [vmem:[%s4995_s30 + $0xc8] ss:$0 sps:$4 sm:$0x11]   ;;  %332 = vst.msk [vmem:[#allocation2 + $0x70] sm:$0xff] %vm317_vm2, %v4693_v9 }
  0xf2   : > { %v1919_v19 = vpop.permute.xlu1 %1918  ;;  %v1871_v18 = vsel %vm944_vm0, %v1869_v12, %v1870_v14  ;;  %v2494_v30 = vshll.u32 %v4676_v25, 16  ;;  %v2794_v12 = vrot.slane %v4686_v6, 1  ;;  %v4688_v14 = vld [vmem:[%s4995_s30 + $0x68] ss:$0 sps:$4 sm:$0x11]  }
  0xf3   : > { %1956 = vst.msk [vmem:[#allocation2 + $0x58] sm:$0xff] %vm1944_vm7, %v1919_v19  ;;  %v1903_v26 = vpop.permute.xlu0 %1902 }
  0xf4   : > { %1948 = vst.msk [vmem:[#allocation2 + $0x18] sm:$0xff] %vm1944_vm7, %v1903_v26  ;;  %1635 = vrot.lane.b32.xlu1 %v1594_v42, %s4908_s7  ;;  %v4677_v26 = vld [vmem:[%s4995_s30 + $0x60] sm:$0xff]   ;;  %v2496_v37 = vrot.slane %v2494_v30, 1  ;;  %v4680_v42 = vld [vmem:[%s4995_s30 + $0xd4] ss:$0 sps:$4 sm:$0x11]  }
  0xf5   : > { %1619 = vrot.lane.b32.xlu0 %v1498_v49, %s4908_s7  ;;  %v2391_v63 = vshrl.u32 %v4677_v26, 16  ;;  %v2393_v32 = vshll.u32 %v4677_v26, 16  ;;  %v2506_v53 = vshll.u32 %v4680_v42, 16  ;;  %v4695_v30 = vld [vmem:[%s4995_s30 + $0xb4] sm:$0xff]  }
  0xf6   : > { %v2098_v35 = vpop.permute.xlu1 %2097  ;;  %333 = vst.msk [vmem:[#allocation2 + $0x78] sm:$0xff] %vm317_vm2, %v4695_v30 }
  0xf7   : > { %2136 = vst.msk [vmem:[#allocation2 + $0x50] sm:$0xff] %vm2125_vm8, %v2098_v35  ;;  %v2082_v38 = vpop.permute.xlu0 %2081  ;;  %v2491_v35 = vrot.slane %v2489_v28, 1  ;;  %v2508_v59 = vrot.slane %v2506_v53, 1 }
  0xf8   : > { %2128 = vst.msk [vmem:[#allocation2 + $0x10] sm:$0xff] %vm2125_vm8, %v2082_v38  ;;  %1637 = vrot.lane.b32.xlu1 %v1606_v56, %s4908_s7  ;;  %v2395_v38 = vrot.slane %v2393_v32, 1  ;;  %v4682_v56 = vld [vmem:[%s4995_s30 + $0x74] ss:$0 sps:$4 sm:$0x11]  }
  0xf9   : > { %1621 = vrot.lane.b32.xlu0 %v1510_v61, %s4908_s7  ;;  %v2492_v41 = vor.u32 %v2491_v35, %v2487_v22  ;;  %v2410_v0 = vshll.u32 %v4682_v56, 16  ;;  %v4691_v22 = vld [vmem:[%s4995_s30 + $0x6c] sm:$0xfe]   ;;  %s4228_s7 = sshll.u32 %s4895_s15, 11 }
  0xfa   : > { %v2100_v51 = vpop.permute.xlu1 %2099  ;;  %v2396_v46 = vor.u32 %v2395_v38, %v2391_v63  ;;  %v2772_v63 = vrot.slane %v4691_v22, 1 }
  0xfb   : > { %2137 = vst.msk [vmem:[#allocation2 + $0x58] sm:$0xff] %vm2125_vm8, %v2100_v51  ;;  %v2084_v54 = vpop.permute.xlu0 %2083  ;;  %v2497_v55 = vsel %vm510_vm1, %v2492_v41, %v2496_v37 }
  0xfc   : > { %2129 = vst.msk [vmem:[#allocation2 + $0x18] sm:$0xff] %vm2125_vm8, %v2084_v54  ;;  %1924 = vrot.lane.b32.xlu1 %v1892_v5, %s4909_s8  ;;  %v2403_v54 = vshrl.u32 %v4681_v40, 16  ;;  %v2401_v61 = vsel %vm510_vm1, %v2396_v46, %v2400_v47  ;;  %v2412_v5 = vrot.slane %v2410_v0, 1 }
  0xfd   : > { %1908 = vrot.lane.b32.xlu0 %v1868_v10, %s4909_s8 }
  0xfe   : > { %v2531_v1 = vpop.permute.xlu1 %2530  ;;  %v2408_v4 = vor.u32 %v2407_v62, %v2403_v54 }
  0xff   : > { %2569 = vst.msk [vmem:[#allocation2 + $0x50] sm:$0xff] %vm2558_vm9, %v2531_v1  ;;  %v2515_v3 = vpop.permute.xlu0 %2514 }
 0x100   : > { %2561 = vst.msk [vmem:[#allocation2 + $0x10] sm:$0xff] %vm2558_vm9, %v2515_v3  ;;  %1926 = vrot.lane.b32.xlu1 %v1895_v17, %s4909_s8  ;;  %v2509_v3 = vsel %vm510_vm1, %v2504_v58, %v2508_v59  ;;  %v2413_v10 = vsel %vm510_vm1, %v2408_v4, %v2412_v5 }
 0x101   : > { %1910 = vrot.lane.b32.xlu0 %v1871_v18, %s4909_s8 }
 0x102   : > { %v2533_v13 = vpop.permute.xlu1 %2532 }
 0x103   : > { %2570 = vst.msk [vmem:[#allocation2 + $0x58] sm:$0xff] %vm2558_vm9, %v2533_v13  ;;  %v2517_v15 = vpop.permute.xlu0 %2516  ;;  %v4687_v13 = vld [vmem:[%s4995_s30 + $0x60] sm:$0xfe]  }
 0x104   : > { %2562 = vst.msk [vmem:[#allocation2 + $0x18] sm:$0xff] %vm2558_vm9, %v2517_v15  ;;  %2105 = vrot.lane.b32.xlu1 %v4669_v11, %s4910_s9  ;;  %v2795_v11 = vsel %vm944_vm0, %v2793_v8, %v2794_v12  ;;  %v2769_v18 = vrot.slane %v4687_v13, 1 }
 0x105   : > { %2089 = vrot.lane.b32.xlu0 %v4670_v21, %s4910_s9  ;;  %v4689_v21 = vld [vmem:[%s4995_s30 + $0xcc] sm:$0xfe]  }
 0x106   : > { %v2820_v19 = vpop.permute.xlu1 %2819  ;;  %v2796_v26 = vrot.slane %v4689_v21, 1 }
 0x107   : > { %2858 = vst.msk [vmem:[#allocation2 + $0x50] sm:$0xff] %vm2847_vm10, %v2820_v19  ;;  %v2804_v23 = vpop.permute.xlu0 %2803  ;;  %v2770_v19 = vrot.slane %v4688_v14, 1 }
 0x108   : > { %2850 = vst.msk [vmem:[#allocation2 + $0x10] sm:$0xff] %vm2847_vm10, %v2804_v23  ;;  %2107 = vrot.lane.b32.xlu1 %v4671_v27, %s4910_s9  ;;  %v4690_v23 = vld [vmem:[%s4995_s30 + $0xd4] ss:$0 sps:$4 sm:$0x11]  }
 0x109   : > { %2091 = vrot.lane.b32.xlu0 %v4672_v33, %s4910_s9  ;;  %v2771_v25 = vsel %vm944_vm0, %v2769_v18, %v2770_v19  ;;  %v2797_v27 = vrot.slane %v4690_v23, 1  ;;  %v4696_v33 = vld [vmem:[%s4995_s30 + $0x54] sm:$0xff]  }
 0x10a   : > { %v728_v29 = vpop.permute.xlu1 %727  ;;  %325 = vst.msk [vmem:[#allocation2 + $0x38] sm:$0xff] %vm317_vm2, %v4696_v33 }
 0x10b   : > { %764 = vst.msk [vmem:[#allocation2 + $0x60] sm:$0xff] %vm751_vm3, %v728_v29  ;;  %v712_v34 = vpop.permute.xlu0 %711  ;;  %v4692_v29 = vld [vmem:[%s4995_s30 + $0x74] ss:$0 sps:$4 sm:$0x11]   ;;  %v2798_v31 = vsel %vm944_vm0, %v2796_v26, %v2797_v27  ;;  %s175_s30 = sand.u32 1, %s4887_s13  }
 0x10c   : > { %756 = vst.msk [vmem:[#allocation2 + $0x20] sm:$0xff] %vm751_vm3, %v712_v34  ;;  %2538 = vrot.lane.b32.xlu1 %v2497_v55, %s4911_s10  ;;  %v2773_v34 = vrot.slane %v4692_v29, 1  ;;  %s3609_s4 = sshll.u32 %s175_s30, 7  ;;  %s5731_s15 = scalar_lea.sflag [#allocation4], %s175_s30 }
 0x10d   : > { %2522 = vrot.lane.b32.xlu0 %v2401_v61, %s4911_s10  ;;  %s5666_s5 = scalar_lea.vmem [#allocation3], %s3609_s4 }
 0x10e   : > { %v2822_v48 = vpop.permute.xlu1 %2821  ;;  %v2874_v49 = vld [vmem:[#allocation2 + $0x50] sm:$0xff]  ;;  %v2774_v36 = vsel %vm944_vm0, %v2772_v63, %v2773_v34  ;;  %s3521_s8 = sshll.u32 %s5666_s5, 4  ;;  %s5725_s8 = int_to_ptr.vmem [resolvable:$true] %s3521_s8 }
 0x10f   : > { %2859 = vst.msk [vmem:[#allocation2 + $0x58] sm:$0xff] %vm2847_vm10, %v2822_v48  ;;  %v2806_v50 = vpop.permute.xlu0 %2805  ;;  %v2866_v51 = vld [vmem:[#allocation2 + $0x10] sm:$0xff]  ;;  %4369 = vmatprep.mubr.msk.bf16.mxu1 %vm2907_vm11, %v2874_v49  ;;  %s4825_s18 = scalar_lea.vmem %s5725_s8, 2048  ;;  %p4832_p1 = scmp.lt.s32.totalorder %s5725_s8, %s4830_s21 }
 0x110   : > { %2851 = vst.msk [vmem:[#allocation2 + $0x18] sm:$0xff] %vm2847_vm10, %v2806_v50  ;;  %4353 = vmatprep.mubr.msk.bf16.mxu0 %vm2907_vm11, %v2866_v51  ;;  %2540 = vrot.lane.b32.xlu1 %v2509_v3, %s4911_s10  ;;  %p4826_p12 = scmp.ne.s32.totalorder %s5725_s8, %s4825_s18  ;;  %p4833_p2 = scmp.lt.s32.totalorder %s4831_s23, %s4825_s18 }
 0x111   : > { %2524 = vrot.lane.b32.xlu0 %v2413_v10, %s4911_s10 }
 0x112   : > { %v730_v1 = vpop.permute.xlu1 %729  ;;  %p4827_p13 = pnand %p4826_p12, %p4975_p4  ;;  %p4834_p3 = por %p4833_p2, %p4832_p1 }
 0x113   : > { %765 = vst.msk [vmem:[#allocation2 + $0x68] sm:$0xff] %vm751_vm3, %v730_v1  ;;  %v714_v7 = vpop.permute.xlu0 %713 }
 0x114   : > { %757 = vst.msk [vmem:[#allocation2 + $0x28] sm:$0xff] %vm751_vm3, %v714_v7  ;;  %2827 = vrot.lane.b32.xlu1 %v2795_v11, %s4912_s11  ;;  %p4828_p0 = pneg %p4827_p13 }
 0x115   : > { %2811 = vrot.lane.b32.xlu0 %v2771_v25, %s4912_s11 }
 0x116   : > { %v1018_v15 = vpop.permute.xlu1 %1017  ;;  %v2875_v17 = vld [vmem:[#allocation2 + $0x58] sm:$0xff]  ;;  %p4835_p5 = pnand %p4834_p3, %p4828_p0 }
 0x117   : > { %v2867_v16 = vld [vmem:[#allocation2 + $0x18] sm:$0xff]  ;;  %1054 = vst.msk [vmem:[#allocation2 + $0x60] sm:$0xff] %vm1041_vm4, %v1018_v15  ;;  %4370 = vmatmul.mubr.msk.bf16.gmra.mrb[4].mxu1 %vm2907_vm11, %v2875_v17  ;;  %v1002_v20 = vpop.permute.xlu0 %1001 }
 0x118   : > { %4354 = vmatmul.mubr.msk.bf16.gmra.mrb[4].mxu0 %vm2907_vm11, %v2867_v16  ;;  %1046 = vst.msk [vmem:[#allocation2 + $0x20] sm:$0xff] %vm1041_vm4, %v1002_v20  ;;  %2829 = vrot.lane.b32.xlu1 %v2798_v31, %s4912_s11 }
 0x119   : > { %2813 = vrot.lane.b32.xlu0 %v2774_v36, %s4912_s11  ;;  %v5645_v36 = vld [vmem:[%s5780_s2] ss:$0 sm:$0xff]  ;;  %s5722_s11 = scalar_lea.hbm %s5781_s3, %s4228_s7 }
 0x11a   : > { %v1020_v28 = vpop.permute.xlu1 %1019 }
 0x11b   : > { %1055 = vst.msk [vmem:[#allocation2 + $0x68] sm:$0xff] %vm1041_vm4, %v1020_v28  ;;  %v1004_v32 = vpop.permute.xlu0 %1003 }
 0x11c   : > { %1047 = vst.msk [vmem:[#allocation2 + $0x28] sm:$0xff] %vm1041_vm4, %v1004_v32 }
 0x11e   : > { %v1199_v35 = vpop.permute.xlu1 %1198 }
 0x11f   : > { %1235 = vst.msk [vmem:[#allocation2 + $0x60] sm:$0xff] %vm1222_vm5, %v1199_v35  ;;  %v1183_v37 = vpop.permute.xlu0 %1182 }
 0x120   : > { %1227 = vst.msk [vmem:[#allocation2 + $0x20] sm:$0xff] %vm1222_vm5, %v1183_v37 }
 0x122   : > { %v1201_v38 = vpop.permute.xlu1 %1200 }
 0x123   : > { %1236 = vst.msk [vmem:[#allocation2 + $0x68] sm:$0xff] %vm1222_vm5, %v1201_v38  ;;  %v1185_v39 = vpop.permute.xlu0 %1184 }
 0x124   : > { %1228 = vst.msk [vmem:[#allocation2 + $0x28] sm:$0xff] %vm1222_vm5, %v1185_v39 }
 0x126   : > { %v1632_v40 = vpop.permute.xlu1 %1631 }
 0x127   : > { %1668 = vst.msk [vmem:[#allocation2 + $0x60] sm:$0xff] %vm1655_vm6, %v1632_v40  ;;  %v1616_v41 = vpop.permute.xlu0 %1615 }
 0x128   : > { %1660 = vst.msk [vmem:[#allocation2 + $0x20] sm:$0xff] %vm1655_vm6, %v1616_v41 }
 0x12a   : > { %v1634_v42 = vpop.permute.xlu1 %1633 }
 0x12b   : > { %1669 = vst.msk [vmem:[#allocation2 + $0x68] sm:$0xff] %vm1655_vm6, %v1634_v42  ;;  %v1618_v43 = vpop.permute.xlu0 %1617 }
 0x12c   : > { %1661 = vst.msk [vmem:[#allocation2 + $0x28] sm:$0xff] %vm1655_vm6, %v1618_v43 }
 0x12e   : > { %v1921_v44 = vpop.permute.xlu1 %1920 }
 0x12f   : > { %1957 = vst.msk [vmem:[#allocation2 + $0x60] sm:$0xff] %vm1944_vm7, %v1921_v44  ;;  %v1905_v45 = vpop.permute.xlu0 %1904 }
 0x130   : > { %1949 = vst.msk [vmem:[#allocation2 + $0x20] sm:$0xff] %vm1944_vm7, %v1905_v45 }
 0x132   : > { %v1923_v46 = vpop.permute.xlu1 %1922 }
 0x133   : > { %1958 = vst.msk [vmem:[#allocation2 + $0x68] sm:$0xff] %vm1944_vm7, %v1923_v46  ;;  %v1907_v47 = vpop.permute.xlu0 %1906 }
 0x134   : > { %1950 = vst.msk [vmem:[#allocation2 + $0x28] sm:$0xff] %vm1944_vm7, %v1907_v47 }
 0x136   : > { %v2102_v48 = vpop.permute.xlu1 %2101 }
 0x137   : > { %2138 = vst.msk [vmem:[#allocation2 + $0x60] sm:$0xff] %vm2125_vm8, %v2102_v48  ;;  %v2086_v49 = vpop.permute.xlu0 %2085 }
 0x138   : > { %2130 = vst.msk [vmem:[#allocation2 + $0x20] sm:$0xff] %vm2125_vm8, %v2086_v49 }
 0x13a   : > { %v2104_v50 = vpop.permute.xlu1 %2103 }
 0x13b   : > { %2139 = vst.msk [vmem:[#allocation2 + $0x68] sm:$0xff] %vm2125_vm8, %v2104_v50  ;;  %v2088_v51 = vpop.permute.xlu0 %2087 }
 0x13c   : > { %2131 = vst.msk [vmem:[#allocation2 + $0x28] sm:$0xff] %vm2125_vm8, %v2088_v51 }
 0x13e   : > { %v2535_v52 = vpop.permute.xlu1 %2534 }
 0x13f   : > { %2571 = vst.msk [vmem:[#allocation2 + $0x60] sm:$0xff] %vm2558_vm9, %v2535_v52  ;;  %v2519_v53 = vpop.permute.xlu0 %2518 }
 0x140   : > { %2563 = vst.msk [vmem:[#allocation2 + $0x20] sm:$0xff] %vm2558_vm9, %v2519_v53 }
 0x142   : > { %v2537_v54 = vpop.permute.xlu1 %2536 }
 0x143   : > { %2572 = vst.msk [vmem:[#allocation2 + $0x68] sm:$0xff] %vm2558_vm9, %v2537_v54  ;;  %v2521_v55 = vpop.permute.xlu0 %2520 }
 0x144   : > { %2564 = vst.msk [vmem:[#allocation2 + $0x28] sm:$0xff] %vm2558_vm9, %v2521_v55 }
 0x146   : > { %v2824_v56 = vpop.permute.xlu1 %2823 }
 0x147   : > { %2860 = vst.msk [vmem:[#allocation2 + $0x60] sm:$0xff] %vm2847_vm10, %v2824_v56  ;;  %v2808_v57 = vpop.permute.xlu0 %2807 }
 0x148   : > { %2852 = vst.msk [vmem:[#allocation2 + $0x20] sm:$0xff] %vm2847_vm10, %v2808_v57 }
 0x14a   : > { %v732_v58 = vpop.permute.xlu1 %731 }
 0x14b   : > { %766 = vst.msk [vmem:[#allocation2 + $0x70] sm:$0xff] %vm751_vm3, %v732_v58  ;;  %v716_v60 = vpop.permute.xlu0 %715 }
 0x14c   : > { %758 = vst.msk [vmem:[#allocation2 + $0x30] sm:$0xff] %vm751_vm3, %v716_v60 }
 0x14e   : > { %v2876_v59 = vld [vmem:[#allocation2 + $0x60] sm:$0xff]  ;;  %v2826_v61 = vpop.permute.xlu1 %2825 }
 0x14f   : > { %4373 = vmatprep.mubr.msk.bf16.mxu1 %vm2907_vm11, %v2876_v59  ;;  %v2868_v62 = vld [vmem:[#allocation2 + $0x20] sm:$0xff]  ;;  %2861 = vst.msk [vmem:[#allocation2 + $0x68] sm:$0xff] %vm2847_vm10, %v2826_v61  ;;  %v2810_v0 = vpop.permute.xlu0 %2809 }
 0x150   : > { %4357 = vmatprep.mubr.msk.bf16.mxu0 %vm2907_vm11, %v2868_v62  ;;  %2853 = vst.msk [vmem:[#allocation2 + $0x28] sm:$0xff] %vm2847_vm10, %v2810_v0 }
 0x152   : > { %v734_v1 = vpop.permute.xlu1 %733 }
 0x153   : > { %767 = vst.msk [vmem:[#allocation2 + $0x78] sm:$0xff] %vm751_vm3, %v734_v1  ;;  %v718_v3 = vpop.permute.xlu0 %717 }
 0x154   : > { %759 = vst.msk [vmem:[#allocation2 + $0x38] sm:$0xff] %vm751_vm3, %v718_v3 }
 0x156   : > { %v2877_v2 = vld [vmem:[#allocation2 + $0x68] sm:$0xff]  ;;  %v1022_v4 = vpop.permute.xlu1 %1021 }
 0x157   : > { %4374 = vmatmul.mubr.msk.bf16.gmra.mrb[8].mxu1 %vm2907_vm11, %v2877_v2  ;;  %1056 = vst.msk [vmem:[#allocation2 + $0x70] sm:$0xff] %vm1041_vm4, %v1022_v4  ;;  %v2869_v5 = vld [vmem:[#allocation2 + $0x28] sm:$0xff]  ;;  %v1006_v6 = vpop.permute.xlu0 %1005 }
 0x158   : > { %4358 = vmatmul.mubr.msk.bf16.gmra.mrb[8].mxu0 %vm2907_vm11, %v2869_v5  ;;  %1048 = vst.msk [vmem:[#allocation2 + $0x30] sm:$0xff] %vm1041_vm4, %v1006_v6 }
 0x15a   : > { %v1024_v7 = vpop.permute.xlu1 %1023 }
 0x15b   : > { %1057 = vst.msk [vmem:[#allocation2 + $0x78] sm:$0xff] %vm1041_vm4, %v1024_v7  ;;  %v1008_v8 = vpop.permute.xlu0 %1007 }
 0x15c   : > { %1049 = vst.msk [vmem:[#allocation2 + $0x38] sm:$0xff] %vm1041_vm4, %v1008_v8 }
 0x15e   : > { %v1203_v9 = vpop.permute.xlu1 %1202 }
 0x15f   : > { %1237 = vst.msk [vmem:[#allocation2 + $0x70] sm:$0xff] %vm1222_vm5, %v1203_v9  ;;  %v1187_v10 = vpop.permute.xlu0 %1186 }
 0x160   : > { %1229 = vst.msk [vmem:[#allocation2 + $0x30] sm:$0xff] %vm1222_vm5, %v1187_v10 }
 0x162   : > { %v1205_v12 = vpop.permute.xlu1 %1204 }
 0x163   : > { %1238 = vst.msk [vmem:[#allocation2 + $0x78] sm:$0xff] %vm1222_vm5, %v1205_v12  ;;  %v1189_v13 = vpop.permute.xlu0 %1188 }
 0x164   : > { %1230 = vst.msk [vmem:[#allocation2 + $0x38] sm:$0xff] %vm1222_vm5, %v1189_v13 }
 0x166   : > { %v1636_v14 = vpop.permute.xlu1 %1635 }
 0x167   : > { %1670 = vst.msk [vmem:[#allocation2 + $0x70] sm:$0xff] %vm1655_vm6, %v1636_v14  ;;  %v1620_v15 = vpop.permute.xlu0 %1619 }
 0x168   : > { %1662 = vst.msk [vmem:[#allocation2 + $0x30] sm:$0xff] %vm1655_vm6, %v1620_v15 }
 0x16a   : > { %v1638_v16 = vpop.permute.xlu1 %1637 }
 0x16b   : > { %1671 = vst.msk [vmem:[#allocation2 + $0x78] sm:$0xff] %vm1655_vm6, %v1638_v16  ;;  %v1622_v17 = vpop.permute.xlu0 %1621 }
 0x16c   : > { %1663 = vst.msk [vmem:[#allocation2 + $0x38] sm:$0xff] %vm1655_vm6, %v1622_v17 }
 0x16e   : > { %v1925_v11 = vpop.permute.xlu1 %1924 }
 0x16f   : > { %1959 = vst.msk [vmem:[#allocation2 + $0x70] sm:$0xff] %vm1944_vm7, %v1925_v11  ;;  %v1909_v18 = vpop.permute.xlu0 %1908 }
 0x170   : > { %1951 = vst.msk [vmem:[#allocation2 + $0x30] sm:$0xff] %vm1944_vm7, %v1909_v18 }
 0x172   : > { %v1927_v19 = vpop.permute.xlu1 %1926 }
 0x173   : > { %1960 = vst.msk [vmem:[#allocation2 + $0x78] sm:$0xff] %vm1944_vm7, %v1927_v19  ;;  %v1911_v20 = vpop.permute.xlu0 %1910 }
 0x174   : > { %1952 = vst.msk [vmem:[#allocation2 + $0x38] sm:$0xff] %vm1944_vm7, %v1911_v20 }
 0x176   : > { %v2106_v21 = vpop.permute.xlu1 %2105 }
 0x177   : > { %2140 = vst.msk [vmem:[#allocation2 + $0x70] sm:$0xff] %vm2125_vm8, %v2106_v21  ;;  %v2090_v23 = vpop.permute.xlu0 %2089 }
 0x178   : > { %2132 = vst.msk [vmem:[#allocation2 + $0x30] sm:$0xff] %vm2125_vm8, %v2090_v23 }
 0x17a   : > { %v2108_v24 = vpop.permute.xlu1 %2107 }
 0x17b   : > { %2141 = vst.msk [vmem:[#allocation2 + $0x78] sm:$0xff] %vm2125_vm8, %v2108_v24  ;;  %v2092_v25 = vpop.permute.xlu0 %2091 }
 0x17c   : > { %2133 = vst.msk [vmem:[#allocation2 + $0x38] sm:$0xff] %vm2125_vm8, %v2092_v25 }
 0x17e   : > { %v2539_v26 = vpop.permute.xlu1 %2538 }
 0x17f   : > { %2573 = vst.msk [vmem:[#allocation2 + $0x70] sm:$0xff] %vm2558_vm9, %v2539_v26  ;;  %v2523_v27 = vpop.permute.xlu0 %2522 }
 0x180   : > { %2565 = vst.msk [vmem:[#allocation2 + $0x30] sm:$0xff] %vm2558_vm9, %v2523_v27 }
 0x182   : > { %v2541_v22 = vpop.permute.xlu1 %2540 }
 0x183   : > { %2574 = vst.msk [vmem:[#allocation2 + $0x78] sm:$0xff] %vm2558_vm9, %v2541_v22  ;;  %v2525_v28 = vpop.permute.xlu0 %2524 }
 0x184   : > { %2566 = vst.msk [vmem:[#allocation2 + $0x38] sm:$0xff] %vm2558_vm9, %v2525_v28 }
 0x186   : > { %v2828_v29 = vpop.permute.xlu1 %2827 }
 0x187   : > { %2862 = vst.msk [vmem:[#allocation2 + $0x70] sm:$0xff] %vm2847_vm10, %v2828_v29  ;;  %v2812_v30 = vpop.permute.xlu0 %2811 }
 0x188   : > { %2854 = vst.msk [vmem:[#allocation2 + $0x30] sm:$0xff] %vm2847_vm10, %v2812_v30 }
 0x18a   : > { %v2830_v31 = vpop.permute.xlu1 %2829 }
 0x18b   : > { %2863 = vst.msk [vmem:[#allocation2 + $0x78] sm:$0xff] %vm2847_vm10, %v2830_v31  ;;  %v2814_v63 = vpop.permute.xlu0 %2813 }
 0x18c   : > { %2855 = vst.msk [vmem:[#allocation2 + $0x38] sm:$0xff] %vm2847_vm10, %v2814_v63 }
 0x18e   : > { %v2878_v32 = vld [vmem:[#allocation2 + $0x70] sm:$0xff] }
 0x18f   : > { %4377 = vmatprep.mubr.msk.bf16.mxu1 %vm2907_vm11, %v2878_v32  ;;  %v2870_v33 = vld [vmem:[#allocation2 + $0x30] sm:$0xff] }
 0x190   : > { %4361 = vmatprep.mubr.msk.bf16.mxu0 %vm2907_vm11, %v2870_v33 }
 0x192   : > { %v2879_v34 = vld [vmem:[#allocation2 + $0x78] sm:$0xff] }
 0x193   : > { %4378 = vmatmul.mubr.msk.bf16.gmra.mrb[12].mxu1 %vm2907_vm11, %v2879_v34  ;;  %v2871_v35 = vld [vmem:[#allocation2 + $0x38] sm:$0xff] }
 0x194   : > { %4362 = vmatmul.mubr.msk.bf16.gmra.mrb[12].mxu0 %vm2907_vm11, %v2871_v35 }
 0x1aa   : > { %v4367_v37 = vpop.f32.mrb[0].mxu1 }
 0x1ab   : > { %v4351_v38 = vpop.f32.mrb[0].mxu0  ;;  %v5648_v39 = vadd.f32 %v4367_v37, %v5645_v36  ;;  %v3058_v40 = vpop.f32.mrb[1].mxu1 }
 0x1ac   : > { %v3003_v41 = vadd.f32 %v4351_v38, %v5645_v36  ;;  %v2994_v42 = vpop.f32.mrb[1].mxu0  ;;  %v5652_v43 = vadd.f32 %v5645_v36, %v3058_v40  ;;  %v4368_v44 = vpop.f32.mrb[2].mxu1 }
 0x1ad   : > { %v4145_v45 = vmul.f32 -1.442695, %v5648_v39  ;;  %v2995_v46 = vadd.f32 %v5645_v36, %v2994_v42  ;;  %v4352_v47 = vpop.f32.mrb[2].mxu0  ;;  %v3070_v48 = vadd.f32 %v4368_v44, %v5645_v36  ;;  %v3061_v49 = vpop.f32.mrb[3].mxu1 }
 0x1ae   : > { %v4129_v50 = vmul.f32 -1.442695, %v3003_v41  ;;  %v4143_v51 = vmul.f32 -1.442695, %v5652_v43  ;;  %v3006_v52 = vadd.f32 %v4352_v47, %v5645_v36  ;;  %v2997_v53 = vpop.f32.mrb[3].mxu0  ;;  %v3062_v54 = vadd.f32 %v5645_v36, %v3061_v49 }
 0x1af   : > { %4697 = vpow2.f32 %v4145_v45  ;;  %v4127_v55 = vmul.f32 -1.442695, %v2995_v46  ;;  %v2998_v56 = vadd.f32 %v5645_v36, %v2997_v53  ;;  %v4146_v58 = vmul.f32 -1.442695, %v3070_v48 }
 0x1b0   : > { %4699 = vpow2.f32 %v4129_v50  ;;  %v4130_v57 = vmul.f32 -1.442695, %v3006_v52  ;;  %v4144_v60 = vmul.f32 -1.442695, %v3062_v54 }
 0x1b1   : > { %4701 = vpow2.f32 %v4127_v55  ;;  %v4128_v59 = vmul.f32 -1.442695, %v2998_v56 }
 0x1b2   : > { %4703 = vpow2.f32 %v4143_v51 }
 0x1b3   : > { %4705 = vpow2.f32 %v4130_v57 }
 0x1b4   : > { %4707 = vpow2.f32 %v4146_v58 }
 0x1b5   : > { %4709 = vpow2.f32 %v4128_v59 }
 0x1b6   : > { %4711 = vpow2.f32 %v4144_v60 }
 0x1b9   : > { %v4698_v61 = vpop.eup %4697 }
 0x1ba   : > { %v4700_v62 = vpop.eup %4699  ;;  %v3235_v0 = vadd.f32 1.0, %v4698_v61 }
 0x1bb   : > { %v4702_v1 = vpop.eup %4701  ;;  %v3219_v2 = vadd.f32 1.0, %v4700_v62 }
 0x1bc   : > { %v4704_v3 = vpop.eup %4703  ;;  %4713 = vrcp.f32 %v3235_v0  ;;  %v3217_v4 = vadd.f32 1.0, %v4702_v1 }
 0x1bd   : > { %v4706_v5 = vpop.eup %4705  ;;  %4715 = vrcp.f32 %v3219_v2  ;;  %v3233_v6 = vadd.f32 1.0, %v4704_v3 }
 0x1be   : > { %v4708_v7 = vpop.eup %4707  ;;  %4717 = vrcp.f32 %v3217_v4  ;;  %v3220_v8 = vadd.f32 1.0, %v4706_v5 }
 0x1bf   : > { %v4710_v9 = vpop.eup %4709  ;;  %4719 = vrcp.f32 %v3233_v6  ;;  %v3236_v10 = vadd.f32 1.0, %v4708_v7 }
 0x1c0   : > { %v4712_v12 = vpop.eup %4711  ;;  %4721 = vrcp.f32 %v3220_v8  ;;  %v3218_v13 = vadd.f32 1.0, %v4710_v9 }
 0x1c1   : > { %4723 = vrcp.f32 %v3236_v10  ;;  %v3234_v14 = vadd.f32 1.0, %v4712_v12 }
 0x1c2   : > { %4725 = vrcp.f32 %v3218_v13 }
 0x1c3   : > { %4727 = vrcp.f32 %v3234_v14 }
 0x1c6   : > { %v4714_v15 = vpop.eup %4713 }
 0x1c7   : > { %v4716_v16 = vpop.eup %4715  ;;  %v3331_v24 = vmul.f32 %v4714_v15, %v5648_v39 }
 0x1c8   : > { %v4718_v17 = vpop.eup %4717  ;;  %v3315_v20 = vmul.f32 %v4716_v16, %v3003_v41 }
 0x1c9   : > { %v4720_v11 = vpop.eup %4719  ;;  %v3313_v27 = vmul.f32 %v4718_v17, %v2995_v46 }
 0x1ca   : > { %v4722_v18 = vpop.eup %4721  ;;  %v3329_v29 = vmul.f32 %v4720_v11, %v5652_v43 }
 0x1cb   : > { %v4724_v19 = vpop.eup %4723  ;;  %v3316_v21 = vmul.f32 %v4722_v18, %v3006_v52 }
 0x1cc   : > { %v4726_v23 = vpop.eup %4725  ;;  %v3332_v25 = vmul.f32 %v4724_v19, %v3070_v48 }
 0x1cd   : > { %v4728_v26 = vpop.eup %4727  ;;  %v4237_v22 = vpack.c.bf16 %v3316_v21, %v3315_v20  ;;  %v3314_v28 = vmul.f32 %v4726_v23, %v2998_v56 }
 0x1ce   : > { %v4277_v30 = vpack.c.bf16 %v3332_v25, %v3331_v24  ;;  %v3330_v31 = vmul.f32 %v4728_v26, %v3062_v54 }
 0x1cf   : > { %4309 = vst [vmem:[%s5666_s5 + $0x8] sm:$0xff] %v4237_v22   ;;  %v4232_v63 = vpack.c.bf16 %v3314_v28, %v3313_v27 }
 0x1d0   : > { %4317 = vst [vmem:[%s5666_s5 + $0x48] sm:$0xff] %v4277_v30   ;;  %v4272_v32 = vpack.c.bf16 %v3330_v31, %v3329_v29 }
 0x1d1   : > { %4233 = vst [vmem:[%s5666_s5] sm:$0xff] %v4232_v63  }
 0x1d2   : > { %4316 = vst [vmem:[%s5666_s5 + $0x40] sm:$0xff] %v4272_v32  }
 0x1ea   : > { %v4371_v34 = vpop.f32.mrb[4].mxu1 }
 0x1eb   : > { %v4355_v33 = vpop.f32.mrb[4].mxu0  ;;  %v3083_v37 = vadd.f32 %v4371_v34, %v5645_v36  ;;  %v3074_v39 = vpop.f32.mrb[5].mxu1 }
 0x1ec   : > { %v3019_v35 = vadd.f32 %v4355_v33, %v5645_v36  ;;  %v3010_v38 = vpop.f32.mrb[5].mxu0  ;;  %v5676_v41 = vadd.f32 %v5645_v36, %v3074_v39  ;;  %v4372_v43 = vpop.f32.mrb[6].mxu1 }
 0x1ed   : > { %v3011_v40 = vadd.f32 %v5645_v36, %v3010_v38  ;;  %v4356_v42 = vpop.f32.mrb[6].mxu0  ;;  %v4149_v45 = vmul.f32 -1.442695, %v3083_v37  ;;  %v3086_v47 = vadd.f32 %v4372_v43, %v5645_v36  ;;  %v3077_v49 = vpop.f32.mrb[7].mxu1 }
 0x1ee   : > { %v4133_v44 = vmul.f32 -1.442695, %v3019_v35  ;;  %v3022_v46 = vadd.f32 %v4356_v42, %v5645_v36  ;;  %v3013_v48 = vpop.f32.mrb[7].mxu0  ;;  %v4147_v51 = vmul.f32 -1.442695, %v5676_v41  ;;  %v3078_v53 = vadd.f32 %v5645_v36, %v3077_v49 }
 0x1ef   : > { %v4131_v50 = vmul.f32 -1.442695, %v3011_v40  ;;  %v3014_v52 = vadd.f32 %v5645_v36, %v3013_v48  ;;  %v4150_v55 = vmul.f32 -1.442695, %v3086_v47 }
 0x1f0   : > { %4729 = vpow2.f32 %v4133_v44  ;;  %v4134_v54 = vmul.f32 -1.442695, %v3022_v46  ;;  %v4148_v57 = vmul.f32 -1.442695, %v3078_v53 }
 0x1f1   : > { %4731 = vpow2.f32 %v4149_v45  ;;  %v4132_v56 = vmul.f32 -1.442695, %v3014_v52 }
 0x1f2   : > { %4733 = vpow2.f32 %v4131_v50 }
 0x1f3   : > { %4735 = vpow2.f32 %v4147_v51 }
 0x1f4   : > { %4737 = vpow2.f32 %v4134_v54 }
 0x1f5   : > { %4739 = vpow2.f32 %v4150_v55 }
 0x1f6   : > { %4741 = vpow2.f32 %v4132_v56 }
 0x1f7   : > { %4743 = vpow2.f32 %v4148_v57 }
 0x1fa   : > { %v4730_v58 = vpop.eup %4729 }
 0x1fb   : > { %v4732_v59 = vpop.eup %4731  ;;  %v3223_v60 = vadd.f32 1.0, %v4730_v58 }
 0x1fc   : > { %v4734_v61 = vpop.eup %4733  ;;  %v3239_v62 = vadd.f32 1.0, %v4732_v59 }
 0x1fd   : > { %v4736_v0 = vpop.eup %4735  ;;  %4745 = vrcp.f32 %v3223_v60  ;;  %v3221_v1 = vadd.f32 1.0, %v4734_v61 }
 0x1fe   : > { %v4738_v2 = vpop.eup %4737  ;;  %4747 = vrcp.f32 %v3239_v62  ;;  %v3237_v3 = vadd.f32 1.0, %v4736_v0 }
 0x1ff   : > { %v4740_v4 = vpop.eup %4739  ;;  %4749 = vrcp.f32 %v3221_v1  ;;  %v3224_v5 = vadd.f32 1.0, %v4738_v2 }
 0x200   : > { %v4742_v6 = vpop.eup %4741  ;;  %4751 = vrcp.f32 %v3237_v3  ;;  %v3240_v7 = vadd.f32 1.0, %v4740_v4 }
 0x201   : > { %v4744_v8 = vpop.eup %4743  ;;  %4753 = vrcp.f32 %v3224_v5  ;;  %v3222_v9 = vadd.f32 1.0, %v4742_v6 }
 0x202   : > { %4755 = vrcp.f32 %v3240_v7  ;;  %v3238_v10 = vadd.f32 1.0, %v4744_v8 }
 0x203   : > { %4757 = vrcp.f32 %v3222_v9 }
 0x204   : > { %4759 = vrcp.f32 %v3238_v10 }
 0x207   : > { %v4746_v12 = vpop.eup %4745 }
 0x208   : > { %v4748_v13 = vpop.eup %4747  ;;  %v3319_v11 = vmul.f32 %v4746_v12, %v3019_v35 }
 0x209   : > { %v4750_v14 = vpop.eup %4749  ;;  %v3335_v20 = vmul.f32 %v4748_v13, %v3083_v37 }
 0x20a   : > { %v4752_v15 = vpop.eup %4751  ;;  %v3317_v24 = vmul.f32 %v4750_v14, %v3011_v40 }
 0x20b   : > { %v4754_v16 = vpop.eup %4753  ;;  %v3333_v27 = vmul.f32 %v4752_v15, %v5676_v41 }
 0x20c   : > { %v4756_v17 = vpop.eup %4755  ;;  %v3320_v18 = vmul.f32 %v4754_v16, %v3022_v46 }
 0x20d   : > { %v4758_v19 = vpop.eup %4757  ;;  %v3336_v21 = vmul.f32 %v4756_v17, %v3086_v47 }
 0x20e   : > { %v4760_v23 = vpop.eup %4759  ;;  %v4247_v25 = vpack.c.bf16 %v3320_v18, %v3319_v11  ;;  %v3318_v26 = vmul.f32 %v4758_v19, %v3014_v52 }
 0x20f   : > { %v4287_v22 = vpack.c.bf16 %v3336_v21, %v3335_v20  ;;  %v3334_v28 = vmul.f32 %v4760_v23, %v3078_v53 }
 0x210   : > { %4311 = vst [vmem:[%s5666_s5 + $0x18] sm:$0xff] %v4247_v25   ;;  %v4242_v29 = vpack.c.bf16 %v3318_v26, %v3317_v24 }
 0x211   : > { %4319 = vst [vmem:[%s5666_s5 + $0x58] sm:$0xff] %v4287_v22   ;;  %v4282_v30 = vpack.c.bf16 %v3334_v28, %v3333_v27 }
 0x212   : > { %4310 = vst [vmem:[%s5666_s5 + $0x10] sm:$0xff] %v4242_v29  }
 0x213   : > { %4318 = vst [vmem:[%s5666_s5 + $0x50] sm:$0xff] %v4282_v30  }
 0x22a   : > { %v4375_v31 = vpop.f32.mrb[8].mxu1 }
 0x22b   : > { %v3099_v63 = vadd.f32 %v4375_v31, %v5645_v36  ;;  %v3090_v32 = vpop.f32.mrb[9].mxu1  ;;  %v4359_v39 = vpop.f32.mrb[8].mxu0 }
 0x22c   : > { %v3091_v33 = vadd.f32 %v5645_v36, %v3090_v32  ;;  %v4376_v34 = vpop.f32.mrb[10].mxu1  ;;  %v3035_v42 = vadd.f32 %v4359_v39, %v5645_v36  ;;  %v3026_v43 = vpop.f32.mrb[9].mxu0 }
 0x22d   : > { %v4153_v35 = vmul.f32 -1.442695, %v3099_v63  ;;  %v3102_v37 = vadd.f32 %v4376_v34, %v5645_v36  ;;  %v3093_v38 = vpop.f32.mrb[11].mxu1  ;;  %v3027_v45 = vadd.f32 %v5645_v36, %v3026_v43  ;;  %v4360_v46 = vpop.f32.mrb[10].mxu0 }
 0x22e   : > { %v4151_v40 = vmul.f32 -1.442695, %v3091_v33  ;;  %v3094_v41 = vadd.f32 %v5645_v36, %v3093_v38  ;;  %v4137_v48 = vmul.f32 -1.442695, %v3035_v42  ;;  %v3038_v49 = vadd.f32 %v4360_v46, %v5645_v36  ;;  %v3029_v50 = vpop.f32.mrb[11].mxu0 }
 0x22f   : > { %4761 = vpow2.f32 %v4153_v35  ;;  %v4154_v44 = vmul.f32 -1.442695, %v3102_v37  ;;  %v4135_v51 = vmul.f32 -1.442695, %v3027_v45  ;;  %v3030_v52 = vadd.f32 %v5645_v36, %v3029_v50 }
 0x230   : > { %4763 = vpow2.f32 %v4151_v40  ;;  %v4152_v47 = vmul.f32 -1.442695, %v3094_v41  ;;  %v4138_v53 = vmul.f32 -1.442695, %v3038_v49 }
 0x231   : > { %4765 = vpow2.f32 %v4154_v44  ;;  %v4136_v54 = vmul.f32 -1.442695, %v3030_v52 }
 0x232   : > { %4767 = vpow2.f32 %v4152_v47 }
 0x233   : > { %4769 = vpow2.f32 %v4137_v48 }
 0x234   : > { %4771 = vpow2.f32 %v4135_v51 }
 0x235   : > { %4773 = vpow2.f32 %v4138_v53 }
 0x236   : > { %4775 = vpow2.f32 %v4136_v54 }
 0x239   : > { %v4762_v55 = vpop.eup %4761 }
 0x23a   : > { %v4764_v56 = vpop.eup %4763  ;;  %v3243_v57 = vadd.f32 1.0, %v4762_v55 }
 0x23b   : > { %v4766_v58 = vpop.eup %4765  ;;  %v3241_v59 = vadd.f32 1.0, %v4764_v56 }
 0x23c   : > { %v4768_v60 = vpop.eup %4767  ;;  %4777 = vrcp.f32 %v3243_v57  ;;  %v3244_v61 = vadd.f32 1.0, %v4766_v58 }
 0x23d   : > { %v4770_v62 = vpop.eup %4769  ;;  %4779 = vrcp.f32 %v3241_v59  ;;  %v3242_v0 = vadd.f32 1.0, %v4768_v60 }
 0x23e   : > { %v4772_v1 = vpop.eup %4771  ;;  %v3227_v2 = vadd.f32 1.0, %v4770_v62  ;;  %4781 = vrcp.f32 %v3244_v61 }
 0x23f   : > { %v4774_v3 = vpop.eup %4773  ;;  %v3225_v4 = vadd.f32 1.0, %v4772_v1  ;;  %4783 = vrcp.f32 %v3242_v0 }
 0x240   : > { %v4776_v5 = vpop.eup %4775  ;;  %4785 = vrcp.f32 %v3227_v2  ;;  %v3228_v6 = vadd.f32 1.0, %v4774_v3 }
 0x241   : > { %4787 = vrcp.f32 %v3225_v4  ;;  %v3226_v7 = vadd.f32 1.0, %v4776_v5 }
 0x242   : > { %4789 = vrcp.f32 %v3228_v6 }
 0x243   : > { %4791 = vrcp.f32 %v3226_v7 }
 0x246   : > { %v4778_v8 = vpop.eup %4777 }
 0x247   : > { %v4780_v9 = vpop.eup %4779  ;;  %v3339_v13 = vmul.f32 %v4778_v8, %v3099_v63 }
 0x248   : > { %v4782_v10 = vpop.eup %4781  ;;  %v3337_v16 = vmul.f32 %v4780_v9, %v3091_v33 }
 0x249   : > { %v4784_v12 = vpop.eup %4783  ;;  %v3340_v14 = vmul.f32 %v4782_v10, %v3102_v37 }
 0x24a   : > { %v4786_v15 = vpop.eup %4785  ;;  %v3338_v17 = vmul.f32 %v4784_v12, %v3094_v41 }
 0x24b   : > { %v4788_v11 = vpop.eup %4787  ;;  %v4297_v18 = vpack.c.bf16 %v3340_v14, %v3339_v13  ;;  %v3323_v23 = vmul.f32 %v4786_v15, %v3035_v42 }
 0x24c   : > { %v4790_v19 = vpop.eup %4789  ;;  %v4292_v20 = vpack.c.bf16 %v3338_v17, %v3337_v16  ;;  %v3321_v25 = vmul.f32 %v4788_v11, %v3027_v45 }
 0x24d   : > { %v4792_v21 = vpop.eup %4791  ;;  %v3324_v24 = vmul.f32 %v4790_v19, %v3038_v49  ;;  %4321 = vst [vmem:[%s5666_s5 + $0x68] sm:$0xff] %v4297_v18  }
 0x24e   : > { %v3322_v26 = vmul.f32 %v4792_v21, %v3030_v52  ;;  %4320 = vst [vmem:[%s5666_s5 + $0x60] sm:$0xff] %v4292_v20  }
 0x24f   : > { %v4257_v27 = vpack.c.bf16 %v3324_v24, %v3323_v23 }
 0x250   : > { %v4252_v22 = vpack.c.bf16 %v3322_v26, %v3321_v25 }
 0x251   : > { %4313 = vst [vmem:[%s5666_s5 + $0x28] sm:$0xff] %v4257_v27  }
 0x252   : > { %4312 = vst [vmem:[%s5666_s5 + $0x20] sm:$0xff] %v4252_v22  }
 0x266   : > { %v4379_v28 = vpop.f32.mrb[12].mxu1 }
 0x267   : > { %v5701_v29 = vadd.f32 %v4379_v28, %v5645_v36  ;;  %v3106_v30 = vpop.f32.mrb[13].mxu1  ;;  %v4363_v31 = vpop.f32.mrb[12].mxu0 }
 0x268   : > { %v5704_v63 = vadd.f32 %v5645_v36, %v3106_v30  ;;  %v4380_v32 = vpop.f32.mrb[14].mxu1  ;;  %v3051_v33 = vadd.f32 %v4363_v31, %v5645_v36  ;;  %v3042_v35 = vpop.f32.mrb[13].mxu0 }
 0x269   : > { %v4157_v34 = vmul.f32 -1.442695, %v5701_v29  ;;  %v3118_v37 = vadd.f32 %v4380_v32, %v5645_v36  ;;  %v3109_v38 = vpop.f32.mrb[15].mxu1  ;;  %v3043_v39 = vadd.f32 %v5645_v36, %v3042_v35  ;;  %v4364_v41 = vpop.f32.mrb[14].mxu0 }
 0x26a   : > { %v4155_v40 = vmul.f32 -1.442695, %v5704_v63  ;;  %v3110_v42 = vadd.f32 %v5645_v36, %v3109_v38  ;;  %v4141_v43 = vmul.f32 -1.442695, %v3051_v33  ;;  %v3054_v44 = vadd.f32 %v4364_v41, %v5645_v36  ;;  %v3045_v45 = vpop.f32.mrb[15].mxu0 }
 0x26b   : > { %4793 = vpow2.f32 %v4157_v34  ;;  %v4139_v46 = vmul.f32 -1.442695, %v3043_v39  ;;  %v4158_v47 = vmul.f32 -1.442695, %v3118_v37  ;;  %v3046_v48 = vadd.f32 %v5645_v36, %v3045_v45 }
 0x26c   : > { %4795 = vpow2.f32 %v4155_v40  ;;  %v4142_v49 = vmul.f32 -1.442695, %v3054_v44  ;;  %v4156_v51 = vmul.f32 -1.442695, %v3110_v42 }
 0x26d   : > { %4797 = vpow2.f32 %v4141_v43  ;;  %v4140_v50 = vmul.f32 -1.442695, %v3046_v48 }
 0x26e   : > { %4799 = vpow2.f32 %v4139_v46 }
 0x26f   : > { %4801 = vpow2.f32 %v4142_v49 }
 0x270   : > { %4803 = vpow2.f32 %v4158_v47 }
 0x271   : > { %4805 = vpow2.f32 %v4140_v50 }
 0x272   : > { %4807 = vpow2.f32 %v4156_v51 }
 0x275   : > { %v4794_v52 = vpop.eup %4793 }
 0x276   : > { %v4796_v53 = vpop.eup %4795  ;;  %v3247_v54 = vadd.f32 1.0, %v4794_v52 }
 0x277   : > { %v4798_v55 = vpop.eup %4797  ;;  %v3245_v56 = vadd.f32 1.0, %v4796_v53 }
 0x278   : > { %v4800_v57 = vpop.eup %4799  ;;  %v3231_v58 = vadd.f32 1.0, %v4798_v55  ;;  %4809 = vrcp.f32 %v3247_v54 }
 0x279   : > { %v4802_v59 = vpop.eup %4801  ;;  %v3229_v60 = vadd.f32 1.0, %v4800_v57  ;;  %4811 = vrcp.f32 %v3245_v56 }
 0x27a   : > { %v4804_v36 = vpop.eup %4803  ;;  %4813 = vrcp.f32 %v3231_v58  ;;  %v3232_v61 = vadd.f32 1.0, %v4802_v59 }
 0x27b   : > { %v4806_v62 = vpop.eup %4805  ;;  %4815 = vrcp.f32 %v3229_v60  ;;  %v3248_v0 = vadd.f32 1.0, %v4804_v36 }
 0x27c   : > { %v4808_v1 = vpop.eup %4807  ;;  %4817 = vrcp.f32 %v3232_v61  ;;  %v3230_v2 = vadd.f32 1.0, %v4806_v62 }
 0x27d   : > { %4819 = vrcp.f32 %v3248_v0  ;;  %v3246_v3 = vadd.f32 1.0, %v4808_v1 }
 0x27e   : > { %4821 = vrcp.f32 %v3230_v2 }
 0x27f   : > { %4823 = vrcp.f32 %v3246_v3 }
 0x282   : > { %v4810_v4 = vpop.eup %4809 }
 0x283   : > { %v4812_v5 = vpop.eup %4811  ;;  %v3343_v14 = vmul.f32 %v4810_v4, %v5701_v29 }
 0x284   : > { %v4814_v6 = vpop.eup %4813  ;;  %v3341_v19 = vmul.f32 %v4812_v5, %v5704_v63 }
 0x285   : > { %v4816_v7 = vpop.eup %4815  ;;  %v3327_v10 = vmul.f32 %v4814_v6, %v3051_v33 }
 0x286   : > { %v4818_v8 = vpop.eup %4817  ;;  %v3325_v17 = vmul.f32 %v4816_v7, %v3043_v39 }
 0x287   : > { %v4820_v9 = vpop.eup %4819  ;;  %v3328_v12 = vmul.f32 %v4818_v8, %v3054_v44 }
 0x288   : > { %v4822_v13 = vpop.eup %4821  ;;  %v3344_v15 = vmul.f32 %v4820_v9, %v3118_v37 }
 0x289   : > { %v4824_v16 = vpop.eup %4823  ;;  %v4267_v11 = vpack.c.bf16 %v3328_v12, %v3327_v10  ;;  %v3326_v18 = vmul.f32 %v4822_v13, %v3046_v48 }
 0x28a   : > { %v4307_v20 = vpack.c.bf16 %v3344_v15, %v3343_v14  ;;  %v3342_v21 = vmul.f32 %v4824_v16, %v3110_v42 }
 0x28b   : > { %4315 = vst [vmem:[%s5666_s5 + $0x38] sm:$0xff] %v4267_v11   ;;  %v4262_v23 = vpack.c.bf16 %v3326_v18, %v3325_v17 }
 0x28c   : > { %4323 = vst [vmem:[%s5666_s5 + $0x78] sm:$0xff] %v4307_v20   ;;  %v4302_v24 = vpack.c.bf16 %v3342_v21, %v3341_v19 }
 0x28d   : > { %4314 = vst [vmem:[%s5666_s5 + $0x30] sm:$0xff] %v4262_v23  }
 0x28e   : > { %4322 = vst [vmem:[%s5666_s5 + $0x70] sm:$0xff] %v4302_v24  }
 0x28f   : > { %4838 = shalt.err (!%p4835_p5)
}
 0x290   : > { %s4839_s26 = scalar_lea.hbm %s5722_s11, 2048  ;;  %s4843_s29 = scalar_lea.hbm %s5781_s3, 4096 }
 0x291   : > { %p4840_p6 = scmp.ne.s32.totalorder %s5722_s11, %s4839_s26  ;;  %p4844_p10 = scmp.lt.u32.totalorder %s5722_s11, %s5781_s3 }
 0x292   : > { %p4845_p11 = scmp.lt.u32.totalorder %s4843_s29, %s4839_s26  ;;  %p4847_p13 = scmp.lt.u32.totalorder %s4839_s26, %s5722_s11 }
 0x293   : > { %p4841_p7 = pnand %p4840_p6, %p4975_p4 }
 0x294   : > { %p4846_p12 = por %p4845_p11, %p4844_p10 }
 0x295   : > { %p4842_p9 = pneg %p4841_p7 }
 0x296   : > { %p4848_p0 = por %p4847_p13, %p4846_p12 }
 0x298   : > { %p4849_p1 = pnand %p4848_p0, %p4842_p9 }
 0x29a   : > { %4852 = shalt.err (!%p4849_p1)
}
 0x29b   : > { %s4914_s5 = smov 64  }
 0x29c   : > { %4390 = dma.vmem_to_hbm [thread:$0]  (%p4975_p4), %s5725_s8, 2048, %s5722_s11, %s5731_s15, %s4914_s5, %s4914_s5, %s4907_s6  }
 0x29d PF: > { %p4396_p2 = scmp.ge.s32.totalorder %s4903_s17, 2  ;;  %s3536_s7 = sand.u32 1, %s4883_s12  }
 0x29e   : > { %s3537_s9 = scalar_lea.sflag [#allocation4], %s3536_s7 }
 0x29f   : > { %p4393_p3 = pnand %p4396_p2, %p4982_p8 }
 0x2a1   : > { %4878 = dma.done.wait (!%p4393_p3), %s3537_s9, 2048  }
 0x2a2   : > { %4880 = vsyncadd (!%p4393_p3), %s3537_s9, 4294965248  ;;  %s16_s17 = sadd.s32 1, %s4903_s17   ;;  %s5784_s12 = smov %s4887_s13 }
 0x2a3   : > { %p13_p5 = scmp.ge.s32.totalorder %s16_s17, 4   ;;  %s5785_s13 = smov %s4891_s14 }
 0x2a4   : > { %s5786_s14 = smov %s4988_s25  ;;  %s5787_s15 = smov %s4899_s16 }
 0x2a5   : > { %s5788_s16 = smov %s5790_s20  ;;  %15 = sbr.rel (!%p13_p5) target bundleno = 4 (0x4), region = 70 }
 0x2ac   :  { %3542 = vsyncpa [#allocation4], 1 }
 0x2ad   :  { %3544 = vsyncpa [#allocation4 + $0x1], 1 }

// kernel: tpu_custom_call.1
= control target key start
LH: loop header
LB: loop body
LE: loop exit
PB: predicated region body
PF: predicated region fallthrough
CT: control target
= control target key end

     0   :  { %8 = vsyncpa [#allocation3], 0  ;;  %s9205_s0 = inlined_call_operand.vmem [shape: bf16[2,18,18,4], index: 0, kind: input, shape index: {}]   ;;  %s9206_s1 = inlined_call_operand.vmem [shape: bf16[36,128], index: 1, kind: input, shape index: {}]   ;;  %s9207_s2 = inlined_call_operand.vmem [shape: f32[1,128], index: 2, kind: input, shape index: {}]   ;;  %s9208_s3 = inlined_call_operand.hbm [shape: bf16[2,256,128], index: 3, kind: output, shape index: {}]  }
   0x1   :  { %10 = vsyncpa [#allocation3 + $0x1], 0  ;;  %s7145_s12 = smov 0   ;;  %s7147_s13 = smov 0  }
   0x2   :  { %s7149_s14 = smov 0   ;;  %s7151_s15 = smov 0  }
   0x3   :  { %s7153_s16 = smov 0   ;;  %s7155_s17 = smov 0  }
   0x4 LB: > { %s5284_s18 = sadd.s32 4294967295, %s7120_s17   ;;  %s5285_s19 = sadd.s32 4294967294, %s7120_s17   ;;  %s7120_s17 = sphi %s7155_s17, %s16_s17   ;;  %s7116_s16 = sphi %s7153_s16, %s9286_s16   ;;  %s7112_s15 = sphi %s7151_s15, %s9285_s15   ;;  %s7108_s14 = sphi %s7149_s14, %s9284_s14   ;;  %s7104_s13 = sphi %s7147_s13, %s9283_s13   ;;  %s7100_s12 = sphi %s7145_s12, %s9282_s12  }
   0x5   : > { %s28_s20 = sadd.s32 1, %s7116_s16  ;;  %s105_s21 = sadd.s32 1, %s7108_s14 }
   0x6   : > { %p30_p0 = scmp.ge.s32.totalorder %s28_s20, 2  ;;  %p115_p1 = scmp.ne.s32.totalorder %s7108_s14, %s7104_s13 }
   0x7   : > { %p116_p2 = scmp.eq.s32.totalorder %s5284_s18, 1  ;;  %p121_p3 = scmp.ne.s32.totalorder %s7104_s13, %s7100_s12 }
   0x8   : > { %s9288_s20 = smov (%p30_p0, %s28_s20), 0  ;;  %p122_p5 = scmp.eq.s32.totalorder %s5285_s19, 1 }
   0x9   : > { %p7185_p4 = por %p116_p2, %p115_p1  ;;  %s100_s23 = ssub.s32 %s7116_s16, %s9288_s20 }
   0xa   : > { %p5288_p6 = scmp.ge.s32.totalorder %s7120_s17, 1  ;;  %p103_p7 = scmp.eq.s32.totalorder %s100_s23, 0 }
   0xb   : > { %p7192_p8 = por %p122_p5, %p121_p3  ;;  %p154_p9 = scmp.lt.s32.totalorder %s7120_s17, 3 }
   0xc   : > { %s7198_s25 = scalar_select %p103_p7, %s7108_s14, %s105_s21  }
   0xd   : > { %p155_p10 = pnand %p5288_p6, %p154_p9 }
   0xf   : > { %158 = sbr.rel (%p155_p10) target bundleno = 644 (0x284), region = 32 }
  0x16   : > { %v6806_v0 = vld [vmem:[%s9206_s1] ss:$0 sps:$4 sm:$0xcc]   ;;  %vm727_vm0 = vcmask 1041408   ;;  %v2437_v1 = vld [vmem:[%s9206_s1 + $0x8] sm:$0x3] }
  0x17   : > { %p178_p11 = scmp.lt.s32.totalorder %s7112_s15, 1  ;;  %v677_v2 = vrot.slane %v6806_v0, 2  ;;  %6742 = vmatprep.subr.msk.bf16.mxu0 %vm727_vm0, %v2437_v1  ;;  %v7209_v3 = vsel %vm727_vm0, %v2437_v1, 0  ;;  %v221_v4 = vld [vmem:[%s9206_s1] sm:$0x3]  ;;  %vm678_vm3 = vcmask 31744  }
  0x18   : > { %9226 = vst [vmem:[#allocation5_spill] sm:$0xff] %v7209_v3  ;;  %6311 = vmatpush3.bf16.msra.mxu0 %v7209_v3  ;;  %v6807_v5 = vld [vmem:[%s9206_s1 + $0x8] ss:$0 sps:$4 sm:$0xcc]   ;;  %vm238_vm1 = vsmask.f32 3328 }
  0x19   : > { %s179_s5 = scalar_select %p178_p11, %s7112_s15, 1  ;;  %6738 = vmatprep.subr.msk.bf16.mxu1 %vm727_vm0, %v677_v2  ;;  %v729_v6 = vsel %vm727_vm0, %v677_v2, 0  ;;  %v2958_v7 = vrot.slane %v6807_v5, 2  ;;  %vm239_vm2 = vsmask.f32 7440  ;;  %v7239_v19 = vsel %vm727_vm0, %v221_v4, 0 }
  0x1a   : > { %6175 = vmatpush3.bf16.msra.mxu1 %v729_v6  ;;  %v7244_v24 = vld [vmem:[%s9206_s1 + $0xc] sm:$0x3]  ;;  %vm7252_vm4 = vmor %vm238_vm1, %vm239_vm2  ;;  %vm1232_vm5 = vcmask 1042432   ;;  %vm1233_vm6 = vcmask 1046532   ;;  %s5925_s21 = sshll.u32 %s7112_s15, 11  ;;  %s7122_s30 = smov [#allocation2]  }
  0x1b   : > { %s6748_s8 = smul.u32 216, %s179_s5  ;;  %6739 = vmatprep.subr.msk.bf16.mxu1 %vm727_vm0, %v221_v4  ;;  %6744 = vmatprep.subr.msk.bf16.mxu0 %vm727_vm0, %v2958_v7  ;;  %v7259_v39 = vsel %vm727_vm0, %v7244_v24, 0  ;;  %v7262_v43 = vsel %vm727_vm0, %v2958_v7, 0  ;;  %vm7478_vm7 = vmor %vm1232_vm5, %vm1233_vm6  ;;  %s9151_s28 = scalar_lea.hbm %s9208_s3, %s5925_s21 }
  0x1c   : > { %s7046_s4 = sshll.u32 %s7122_s30, 4  ;;  %s7047_s4 = int_to_ptr.vmem [resolvable:$false] %s7046_s4 }
  0x1d   : > { %s7225_s11 = scalar_lea.vmem %s9205_s0, %s6748_s8  ;;  %s7048_s5 = scalar_lea.vmem %s7047_s4, 4096 }
  0x1e   : > { %v189_v8 = vld [vmem:[%s7225_s11] sm:$0xf]  ;;  %v190_v9 = vld [vmem:[%s7225_s11 + $0x4] sm:$0xf]  ;;  %v222_v10 = vld [vmem:[%s7225_s11 + $0x8] sm:$0x1] }
  0x1f   : > { %v242_v11 = vshrl.u32 %v189_v8, 16  ;;  %v245_v12 = vshll.u32 %v189_v8, 16  ;;  %v251_v13 = vshll.u32 %v190_v9, 16  ;;  %v255_v14 = vshrl.u32 %v190_v9, 16  ;;  %v5469_v15 = vld [vmem:[%s7225_s11 + $0xc] sm:$0xf] }
  0x20   : > { %v261_v16 = vshll.u32 %v222_v10, 16  ;;  %v7233_v17 = vld [vmem:[%s7225_s11 + $0x10] sm:$0xf]  ;;  %v7236_v18 = vld [vmem:[%s7225_s11 + $0x14] sm:$0x1]  ;;  %v2054_v26 = vshrl.u32 %v5469_v15, 16 }
  0x21   : > { %v244_v20 = vrot.slane %v242_v11, 4  ;;  %v247_v21 = vrot.slane %v245_v12, 5  ;;  %v253_v22 = vrot.slane %v251_v13, 5  ;;  %v257_v23 = vrot.slane %v255_v14, 4  ;;  %v191_v33 = vld [vmem:[%s7225_s11 + $0xc] sm:$0xf] }
  0x22   : > { %v263_v25 = vrot.slane %v261_v16, 5  ;;  %v2057_v27 = vshll.u32 %v5469_v15, 16  ;;  %v2063_v28 = vshll.u32 %v7233_v17, 16  ;;  %v2067_v31 = vshrl.u32 %v7233_v17, 16  ;;  %v192_v38 = vld [vmem:[%s7225_s11 + $0x10] sm:$0xf] }
  0x23   : > { %v248_v29 = vor.u32 %v247_v21, %v244_v20  ;;  %v258_v30 = vor.u32 %v257_v23, %v253_v22  ;;  %v2073_v32 = vshll.u32 %v7236_v18, 16  ;;  %v2056_v35 = vrot.slane %v2054_v26, 4  ;;  %v223_v46 = vld [vmem:[%s7225_s11 + $0x14] sm:$0x1]  ;;  %v5472_v57 = vld [vmem:[%s7225_s11 + $0x18] sm:$0xf] }
  0x24   : > { %v2059_v36 = vrot.slane %v2057_v27, 5  ;;  %v2065_v37 = vrot.slane %v2063_v28, 5  ;;  %v2069_v42 = vrot.slane %v2067_v31, 4  ;;  %v266_v47 = vshrl.u32 %v191_v33, 16  ;;  %v7271_v62 = vld [vmem:[%s7225_s11 + $0x1c] sm:$0xf] }
  0x25   : > { %v249_v40 = vrot.slane %v248_v29, 4  ;;  %v259_v41 = vrot.slane %v258_v30, 4  ;;  %v2075_v45 = vrot.slane %v2073_v32, 5  ;;  %v269_v48 = vshll.u32 %v191_v33, 16  ;;  %v7279_v4 = vld [vmem:[%s7225_s11 + $0x20] sm:$0x1] }
  0x26   : > { %v2060_v44 = vor.u32 %v2059_v36, %v2056_v35  ;;  %v2070_v51 = vor.u32 %v2069_v42, %v2065_v37  ;;  %v275_v52 = vshll.u32 %v192_v38, 16  ;;  %v268_v55 = vrot.slane %v266_v47, 4  ;;  %v193_v20 = vld [vmem:[%s7225_s11 + $0x18] sm:$0xf]  ;;  %v194_v26 = vld [vmem:[%s7225_s11 + $0x1c] sm:$0xf] }
  0x27   : > { %v254_v49 = vsel %vm7252_vm4, %v249_v40, %v253_v22  ;;  %v264_v50 = vsel %vm7252_vm4, %v259_v41, %v263_v25  ;;  %v271_v56 = vrot.slane %v269_v48, 5  ;;  %v279_v60 = vshrl.u32 %v192_v38, 16  ;;  %v224_v33 = vld [vmem:[%s7225_s11 + $0x20] sm:$0x1]  ;;  %v5475_v42 = vld [vmem:[%s7225_s11 + $0x24] sm:$0xf] }
  0x28   : > { %v5291_v53 = vcombine.low %v254_v49, %v264_v50  ;;  %v2061_v54 = vrot.slane %v2060_v44, 4  ;;  %v2071_v58 = vrot.slane %v2070_v51, 4  ;;  %v277_v59 = vrot.slane %v275_v52, 5  ;;  %v7302_v48 = vld [vmem:[%s7225_s11 + $0x28] sm:$0xf] }
  0x29   : > { %v285_v61 = vshll.u32 %v223_v46, 16  ;;  %v2796_v0 = vrot.slane %v7233_v17, 5  ;;  %v2799_v1 = vrot.slane %v7236_v18, 5  ;;  %v272_v2 = vor.u32 %v271_v56, %v268_v55  ;;  %v7311_v56 = vld [vmem:[%s7225_s11 + $0x2c] sm:$0x1] }
  0x2a   : > { %6176 = vmatprep.mubr.msk.bf16.mxu1 %vm678_vm3, %v5291_v53  ;;  %v2066_v63 = vsel %vm7252_vm4, %v2061_v54, %v2065_v37  ;;  %v2076_v5 = vsel %vm7252_vm4, %v2071_v58, %v2075_v45  ;;  %v281_v6 = vrot.slane %v279_v60, 4  ;;  %v2078_v8 = vshrl.u32 %v5472_v57, 16  ;;  %v1347_v53 = vld [vmem:[%s9206_s1 + $0x4] sm:$0x3]  ;;  %v7511_v18 = vld [vmem:[%s7225_s11 + $0x7c] sm:$0xf] }
  0x2b   : > { %v287_v7 = vrot.slane %v285_v61, 5  ;;  %v5517_v9 = vcombine.low %v2066_v63, %v2076_v5  ;;  %v273_v10 = vrot.slane %v272_v2, 4  ;;  %v2081_v11 = vshll.u32 %v5472_v57, 16  ;;  %v195_v2 = vld [vmem:[%s7225_s11 + $0x24] sm:$0xf] }
  0x2c   : > { %v2087_v12 = vshll.u32 %v7271_v62, 16  ;;  %v282_v13 = vor.u32 %v281_v6, %v277_v59  ;;  %v2080_v14 = vrot.slane %v2078_v8, 4  ;;  %v2091_v15 = vshrl.u32 %v7271_v62, 16 }
  0x2d   : > { %v2097_v16 = vshll.u32 %v7279_v4, 16  ;;  %6312 = vmatprep.mubr.msk.bf16.mxu0 %vm678_vm3, %v5517_v9  ;;  %v278_v21 = vsel %vm7252_vm4, %v273_v10, %v277_v59  ;;  %v2083_v22 = vrot.slane %v2081_v11, 5  ;;  %v2803_v25 = vrot.slane %v7271_v62, 5  ;;  %v196_v9 = vld [vmem:[%s7225_s11 + $0x28] sm:$0xf] }
  0x2e   : > { %v2089_v23 = vrot.slane %v2087_v12, 5  ;;  %v283_v27 = vrot.slane %v282_v13, 4  ;;  %v2093_v28 = vrot.slane %v2091_v15, 4  ;;  %v2806_v30 = vrot.slane %v7279_v4, 5  ;;  %v225_v15 = vld [vmem:[%s7225_s11 + $0x2c] sm:$0x1] }
  0x2f   : > { %v2099_v29 = vrot.slane %v2097_v16, 5  ;;  %v2084_v31 = vor.u32 %v2083_v22, %v2080_v14  ;;  %v7295_v32 = vrot.slane %v2803_v25, 4  ;;  %v290_v35 = vshrl.u32 %v193_v20, 16 }
  0x30   : > { %v293_v36 = vshll.u32 %v193_v20, 16  ;;  %v288_v37 = vsel %vm7252_vm4, %v283_v27, %v287_v7  ;;  %v2094_v38 = vor.u32 %v2093_v28, %v2089_v23  ;;  %v299_v40 = vshll.u32 %v194_v26, 16  ;;  %v5478_v27 = vld [vmem:[%s7225_s11 + $0x30] sm:$0xf] }
  0x31   : > { %v303_v41 = vshrl.u32 %v194_v26, 16  ;;  %v5292_v44 = vcombine.low %v278_v21, %v288_v37  ;;  %v2085_v45 = vrot.slane %v2084_v31, 4  ;;  %v292_v46 = vrot.slane %v290_v35, 4  ;;  %v7331_v35 = vld [vmem:[%s7225_s11 + $0x34] sm:$0xf] }
  0x32   : > { %v295_v47 = vrot.slane %v293_v36, 5  ;;  %v2095_v49 = vrot.slane %v2094_v38, 4  ;;  %v301_v50 = vrot.slane %v299_v40, 5  ;;  %v309_v52 = vshll.u32 %v224_v33, 16 }
  0x33   : > { %v305_v51 = vrot.slane %v303_v41, 4  ;;  %6177 = vmatmul.mubr.msk.bf16.vlgmr.msra.gmra.mrb[0].mxu1 %vm678_vm3, %v5292_v44  ;;  %v2090_v54 = vsel %vm7252_vm4, %v2085_v45, %v2089_v23  ;;  %v2102_v57 = vshrl.u32 %v5475_v42, 16  ;;  %v2105_v58 = vshll.u32 %v5475_v42, 16  ;;  %v7339_v42 = vld [vmem:[%s7225_s11 + $0x38] sm:$0x1] }
  0x34   : > { %v296_v55 = vor.u32 %v295_v47, %v292_v46  ;;  %6209 = vmatpush3.bf16.msra.mxu1 %v7239_v19  ;;  %v2100_v59 = vsel %vm7252_vm4, %v2095_v49, %v2099_v29  ;;  %v311_v61 = vrot.slane %v309_v52, 5  ;;  %v2111_v63 = vshll.u32 %v7302_v48, 16 }
  0x35   : > { %v306_v60 = vor.u32 %v305_v51, %v301_v50  ;;  %v5518_v5 = vcombine.low %v2090_v54, %v2100_v59  ;;  %v2104_v7 = vrot.slane %v2102_v57, 4  ;;  %v2107_v8 = vrot.slane %v2105_v58, 5  ;;  %6740 = vmatprep.subr.msk.bf16.mxu1 %vm727_vm0, %v1347_v53  ;;  %v197_v54 = vld [vmem:[%s7225_s11 + $0x30] sm:$0xf] }
  0x36   : > { %v297_v6 = vrot.slane %v296_v55, 4  ;;  %v2113_v11 = vrot.slane %v2111_v63, 5  ;;  %v2115_v19 = vshrl.u32 %v7302_v48, 16  ;;  %v2121_v12 = vshll.u32 %v7311_v56, 16 }
  0x37   : > { %v307_v10 = vrot.slane %v306_v60, 4  ;;  %6313 = vmatmul.mubr.msk.bf16.vlgmr.msra.gmra.mrb[0].mxu0 %vm678_vm3, %v5518_v5  ;;  %v2108_v14 = vor.u32 %v2107_v8, %v2104_v7  ;;  %v314_v16 = vshrl.u32 %v195_v2, 16  ;;  %v317_v20 = vshll.u32 %v195_v2, 16  ;;  %v198_v60 = vld [vmem:[%s7225_s11 + $0x34] sm:$0xf] }
  0x38   : > { %v302_v13 = vsel %vm7252_vm4, %v297_v6, %v301_v50  ;;  %6345 = vmatpush3.bf16.msra.mxu0 %v7262_v43  ;;  %v2117_v22 = vrot.slane %v2115_v19, 4  ;;  %v2123_v23 = vrot.slane %v2121_v12, 5  ;;  %v323_v26 = vshll.u32 %v196_v9, 16  ;;  %v226_v6 = vld [vmem:[%s7225_s11 + $0x38] sm:$0x1] }
  0x39   : > { %v312_v21 = vsel %vm7252_vm4, %v307_v10, %v311_v61  ;;  %v2109_v29 = vrot.slane %v2108_v14, 4  ;;  %v316_v31 = vrot.slane %v314_v16, 4  ;;  %v319_v33 = vrot.slane %v317_v20, 5  ;;  %6745 = vmatprep.subr.msk.bf16.mxu0 %vm727_vm0, %v7244_v24  ;;  %v5481_v14 = vld [vmem:[%s7225_s11 + $0x3c] sm:$0xf] }
  0x3a   : > { %v5293_v28 = vcombine.low %v302_v13, %v312_v21  ;;  %v2118_v36 = vor.u32 %v2117_v22, %v2113_v11  ;;  %v325_v37 = vrot.slane %v323_v26, 5  ;;  %v327_v43 = vshrl.u32 %v196_v9, 16  ;;  %v7356_v22 = vld [vmem:[%s7225_s11 + $0x40] sm:$0xf] }
  0x3b   : > { %v333_v38 = vshll.u32 %v225_v15, 16  ;;  %v2114_v40 = vsel %vm7252_vm4, %v2109_v29, %v2113_v11  ;;  %v320_v41 = vor.u32 %v319_v33, %v316_v31  ;;  %v2126_v44 = vshrl.u32 %v5478_v27, 16 }
  0x3c   : > { %6180 = vmatprep.mubr.msk.bf16.mxu1 %vm678_vm3, %v5293_v28  ;;  %v2129_v45 = vshll.u32 %v5478_v27, 16  ;;  %v2119_v46 = vrot.slane %v2118_v36, 4  ;;  %v329_v47 = vrot.slane %v327_v43, 4  ;;  %v2135_v24 = vshll.u32 %v7331_v35, 16  ;;  %v7361_v36 = vld [vmem:[%s7225_s11 + $0x44] sm:$0x1] }
  0x3d   : > { %v335_v49 = vrot.slane %v333_v38, 5  ;;  %v321_v50 = vrot.slane %v320_v41, 4  ;;  %v2128_v51 = vrot.slane %v2126_v44, 4  ;;  %v2139_v53 = vshrl.u32 %v7331_v35, 16  ;;  %v199_v44 = vld [vmem:[%s7225_s11 + $0x3c] sm:$0xf] }
  0x3e   : > { %v2131_v52 = vrot.slane %v2129_v45, 5  ;;  %v2124_v55 = vsel %vm7252_vm4, %v2119_v46, %v2123_v23  ;;  %v330_v57 = vor.u32 %v329_v47, %v325_v37  ;;  %v2137_v58 = vrot.slane %v2135_v24, 5  ;;  %v200_v24 = vld [vmem:[%s7225_s11 + $0x40] sm:$0xf] }
  0x3f   : > { %v2145_v59 = vshll.u32 %v7339_v42, 16  ;;  %v5519_v61 = vcombine.low %v2114_v40, %v2124_v55  ;;  %v326_v63 = vsel %vm7252_vm4, %v321_v50, %v325_v37  ;;  %v2141_v5 = vrot.slane %v2139_v53, 4 }
  0x40   : > { %v2132_v2 = vor.u32 %v2131_v52, %v2128_v51  ;;  %v331_v7 = vrot.slane %v330_v57, 4  ;;  %v338_v9 = vshrl.u32 %v197_v54, 16  ;;  %v341_v10 = vshll.u32 %v197_v54, 16 }
  0x41   : > { %v2147_v8 = vrot.slane %v2145_v59, 5  ;;  %6316 = vmatprep.mubr.msk.bf16.mxu0 %vm678_vm3, %v5519_v61  ;;  %v2142_v19 = vor.u32 %v2141_v5, %v2137_v58  ;;  %v347_v12 = vshll.u32 %v198_v60, 16  ;;  %v351_v13 = vshrl.u32 %v198_v60, 16  ;;  %v5484_v5 = vld [vmem:[%s7225_s11 + $0x48] sm:$0xf] }
  0x42   : > { %v2133_v11 = vrot.slane %v2132_v2, 4  ;;  %v336_v15 = vsel %vm7252_vm4, %v331_v7, %v335_v49  ;;  %v340_v16 = vrot.slane %v338_v9, 4  ;;  %v343_v20 = vrot.slane %v341_v10, 5  ;;  %v7379_v10 = vld [vmem:[%s7225_s11 + $0x4c] sm:$0xf] }
  0x43   : > { %v357_v21 = vshll.u32 %v226_v6, 16  ;;  %v5294_v23 = vcombine.low %v326_v63, %v336_v15  ;;  %v2143_v27 = vrot.slane %v2142_v19, 4  ;;  %v349_v28 = vrot.slane %v347_v12, 5  ;;  %v227_v63 = vld [vmem:[%s7225_s11 + $0x44] sm:$0x1] }
  0x44   : > { %v2138_v26 = vsel %vm7252_vm4, %v2133_v11, %v2137_v58  ;;  %v344_v29 = vor.u32 %v343_v20, %v340_v16  ;;  %v353_v31 = vrot.slane %v351_v13, 4  ;;  %v2150_v37 = vshrl.u32 %v5481_v14, 16 }
  0x45   : > { %v359_v33 = vrot.slane %v357_v21, 5  ;;  %6181 = vmatmul.mubr.msk.bf16.gmra.mrb[4].mxu1 %vm678_vm3, %v5294_v23  ;;  %v2148_v43 = vsel %vm7252_vm4, %v2143_v27, %v2147_v8  ;;  %v2153_v38 = vshll.u32 %v5481_v14, 16  ;;  %v2159_v40 = vshll.u32 %v7356_v22, 16 }
  0x46   : > { %v2163_v41 = vshrl.u32 %v7356_v22, 16  ;;  %v5520_v45 = vcombine.low %v2138_v26, %v2148_v43  ;;  %v345_v46 = vrot.slane %v344_v29, 4  ;;  %v354_v47 = vor.u32 %v353_v31, %v349_v28  ;;  %v7387_v26 = vld [vmem:[%s7225_s11 + $0x50] sm:$0x1]  ;;  %v7391_v29 = vld [vmem:[%s7225_s11 + $0x48] sm:$0xf] }
  0x47   : > { %v2152_v49 = vrot.slane %v2150_v37, 4  ;;  %v2155_v50 = vrot.slane %v2153_v38, 5  ;;  %v2161_v51 = vrot.slane %v2159_v40, 5  ;;  %v2169_v53 = vshll.u32 %v7361_v36, 16  ;;  %v7394_v38 = vld [vmem:[%s7225_s11 + $0x4c] sm:$0xf] }
  0x48   : > { %v2165_v52 = vrot.slane %v2163_v41, 4  ;;  %6317 = vmatmul.mubr.msk.bf16.gmra.mrb[4].mxu0 %vm678_vm3, %v5520_v45  ;;  %v350_v54 = vsel %vm7252_vm4, %v345_v46, %v349_v28  ;;  %v355_v55 = vrot.slane %v354_v47, 4  ;;  %v362_v57 = vshrl.u32 %v199_v44, 16 }
  0x49   : > { %v365_v58 = vshll.u32 %v199_v44, 16  ;;  %v2156_v59 = vor.u32 %v2155_v50, %v2152_v49  ;;  %v2171_v61 = vrot.slane %v2169_v53, 5  ;;  %v371_v2 = vshll.u32 %v200_v24, 16 }
  0x4a   : > { %v2166_v60 = vor.u32 %v2165_v52, %v2161_v51  ;;  %v360_v6 = vsel %vm7252_vm4, %v355_v55, %v359_v33  ;;  %v364_v7 = vrot.slane %v362_v57, 4  ;;  %v375_v9 = vshrl.u32 %v200_v24, 16  ;;  %v228_v24 = vld [vmem:[%s7225_s11 + $0x50] sm:$0x1]  ;;  %v5487_v55 = vld [vmem:[%s7225_s11 + $0x54] sm:$0xf] }
  0x4b   : > { %v367_v8 = vrot.slane %v365_v58, 5  ;;  %v5295_v11 = vcombine.low %v350_v54, %v360_v6  ;;  %v2157_v19 = vrot.slane %v2156_v59, 4  ;;  %v373_v13 = vrot.slane %v371_v2, 5  ;;  %v7410_v6 = vld [vmem:[%s7225_s11 + $0x58] sm:$0xf] }
  0x4c   : > { %v2167_v12 = vrot.slane %v2166_v60, 4  ;;  %v377_v15 = vrot.slane %v375_v9, 4  ;;  %v381_v16 = vshll.u32 %v227_v63, 16  ;;  %v2174_v20 = vshrl.u32 %v5484_v5, 16 }
  0x4d   : > { %v368_v14 = vor.u32 %v367_v8, %v364_v7  ;;  %6184 = vmatprep.mubr.msk.bf16.mxu1 %vm678_vm3, %v5295_v11  ;;  %v2162_v21 = vsel %vm7252_vm4, %v2157_v19, %v2161_v51  ;;  %v2177_v27 = vshll.u32 %v5484_v5, 16  ;;  %v2183_v28 = vshll.u32 %v7379_v10, 16 }
  0x4e   : > { %v2172_v23 = vsel %vm7252_vm4, %v2167_v12, %v2171_v61  ;;  %v378_v37 = vor.u32 %v377_v15, %v373_v13  ;;  %v383_v43 = vrot.slane %v381_v16, 5  ;;  %v2176_v40 = vrot.slane %v2174_v20, 4 }
  0x4f   : > { %v5521_v31 = vcombine.low %v2162_v21, %v2172_v23  ;;  %v369_v33 = vrot.slane %v368_v14, 4  ;;  %v2179_v41 = vrot.slane %v2177_v27, 5  ;;  %v2185_v44 = vrot.slane %v2183_v28, 5  ;;  %v7416_v14 = vld [vmem:[%s7225_s11 + $0x5c] sm:$0x1] }
  0x50   : > { %v2187_v45 = vshrl.u32 %v7379_v10, 16  ;;  %v379_v47 = vrot.slane %v378_v37, 4  ;;  %v2193_v49 = vshll.u32 %v7387_v26, 16  ;;  %v386_v50 = vshrl.u32 %v7391_v29, 16  ;;  %v7420_v27 = vld [vmem:[%s7225_s11 + $0x54] sm:$0xf] }
  0x51   : > { %6320 = vmatprep.mubr.msk.bf16.mxu0 %vm678_vm3, %v5521_v31  ;;  %v374_v46 = vsel %vm7252_vm4, %v369_v33, %v373_v13  ;;  %v2180_v51 = vor.u32 %v2179_v41, %v2176_v40  ;;  %v389_v53 = vshll.u32 %v7391_v29, 16  ;;  %v395_v54 = vshll.u32 %v7394_v38, 16 }
  0x52   : > { %v2189_v52 = vrot.slane %v2187_v45, 4  ;;  %v384_v57 = vsel %vm7252_vm4, %v379_v47, %v383_v43  ;;  %v2195_v58 = vrot.slane %v2193_v49, 5  ;;  %v388_v59 = vrot.slane %v386_v50, 4  ;;  %v7426_v43 = vld [vmem:[%s7225_s11 + $0x58] sm:$0xf] }
  0x53   : > { %v399_v60 = vshrl.u32 %v7394_v38, 16  ;;  %v5296_v61 = vcombine.low %v374_v46, %v384_v57  ;;  %v2181_v63 = vrot.slane %v2180_v51, 4  ;;  %v391_v5 = vrot.slane %v389_v53, 5 }
  0x54   : > { %v2190_v2 = vor.u32 %v2189_v52, %v2185_v44  ;;  %v397_v7 = vrot.slane %v395_v54, 5  ;;  %v405_v9 = vshll.u32 %v228_v24, 16  ;;  %v2198_v11 = vshrl.u32 %v5487_v55, 16  ;;  %v229_v24 = vld [vmem:[%s7225_s11 + $0x5c] sm:$0x1] }
  0x55   : > { %v401_v8 = vrot.slane %v399_v60, 4  ;;  %6185 = vmatmul.mubr.msk.bf16.gmra.mrb[8].mxu1 %vm678_vm3, %v5296_v61  ;;  %v2186_v19 = vsel %vm7252_vm4, %v2181_v63, %v2185_v44  ;;  %v392_v13 = vor.u32 %v391_v5, %v388_v59  ;;  %v2201_v15 = vshll.u32 %v5487_v55, 16  ;;  %v5490_v55 = vld [vmem:[%s7225_s11 + $0x60] sm:$0xf]  ;;  %v7440_v61 = vld [vmem:[%s7225_s11 + $0x64] sm:$0xf] }
  0x56   : > { %v2191_v12 = vrot.slane %v2190_v2, 4  ;;  %v407_v20 = vrot.slane %v405_v9, 5  ;;  %v2200_v21 = vrot.slane %v2198_v11, 4  ;;  %v2207_v23 = vshll.u32 %v7410_v6, 16  ;;  %v7447_v11 = vld [vmem:[%s7225_s11 + $0x68] sm:$0x1] }
  0x57   : > { %v402_v16 = vor.u32 %v401_v8, %v397_v7  ;;  %v393_v31 = vrot.slane %v392_v13, 4  ;;  %v2203_v33 = vrot.slane %v2201_v15, 5  ;;  %v2211_v37 = vshrl.u32 %v7410_v6, 16 }
  0x58   : > { %v2196_v28 = vsel %vm7252_vm4, %v2191_v12, %v2195_v58  ;;  %v2209_v44 = vrot.slane %v2207_v23, 5  ;;  %v2217_v45 = vshll.u32 %v7416_v14, 16  ;;  %v410_v50 = vshrl.u32 %v7420_v27, 16 }
  0x59   : > { %v5522_v40 = vcombine.low %v2186_v19, %v2196_v28  ;;  %v403_v41 = vrot.slane %v402_v16, 4  ;;  %v398_v46 = vsel %vm7252_vm4, %v393_v31, %v397_v7  ;;  %v2204_v47 = vor.u32 %v2203_v33, %v2200_v21  ;;  %v7451_v21 = vld [vmem:[%s7225_s11 + $0x60] sm:$0xf] }
  0x5a   : > { %v2213_v49 = vrot.slane %v2211_v37, 4  ;;  %v2219_v52 = vrot.slane %v2217_v45, 5  ;;  %v413_v53 = vshll.u32 %v7420_v27, 16  ;;  %v419_v54 = vshll.u32 %v7426_v43, 16  ;;  %v7457_v37 = vld [vmem:[%s7225_s11 + $0x64] sm:$0xf] }
  0x5b   : > { %6321 = vmatmul.mubr.msk.bf16.gmra.mrb[8].mxu0 %vm678_vm3, %v5522_v40  ;;  %v408_v51 = vsel %vm7252_vm4, %v403_v41, %v407_v20  ;;  %v2205_v58 = vrot.slane %v2204_v47, 4  ;;  %v412_v60 = vrot.slane %v410_v50, 4  ;;  %v423_v5 = vshrl.u32 %v7426_v43, 16 }
  0x5c   : > { %v5297_v57 = vcombine.low %v398_v46, %v408_v51  ;;  %v2214_v59 = vor.u32 %v2213_v49, %v2209_v44  ;;  %v415_v63 = vrot.slane %v413_v53, 5  ;;  %v421_v2 = vrot.slane %v419_v54, 5 }
  0x5d   : > { %v429_v7 = vshll.u32 %v229_v24, 16  ;;  %v2210_v8 = vsel %vm7252_vm4, %v2205_v58, %v2209_v44  ;;  %v2222_v19 = vshrl.u32 %v5490_v55, 16  ;;  %v2225_v12 = vshll.u32 %v5490_v55, 16 }
  0x5e   : > { %6188 = vmatprep.mubr.msk.bf16.mxu1 %vm678_vm3, %v5297_v57  ;;  %v2215_v9 = vrot.slane %v2214_v59, 4  ;;  %v416_v13 = vor.u32 %v415_v63, %v412_v60  ;;  %v425_v15 = vrot.slane %v423_v5, 4  ;;  %v2231_v20 = vshll.u32 %v7440_v61, 16  ;;  %v5549_v60 = vld [vmem:[%s7225_s11 + $0xc] sm:$0xe] }
  0x5f   : > { %v431_v16 = vrot.slane %v429_v7, 5  ;;  %v2224_v28 = vrot.slane %v2222_v19, 4  ;;  %v2227_v31 = vrot.slane %v2225_v12, 5  ;;  %v2235_v33 = vshrl.u32 %v7440_v61, 16 }
  0x60   : > { %v2220_v23 = vsel %vm7252_vm4, %v2215_v9, %v2219_v52  ;;  %v417_v41 = vrot.slane %v416_v13, 4  ;;  %v426_v44 = vor.u32 %v425_v15, %v421_v2  ;;  %v2233_v45 = vrot.slane %v2231_v20, 5  ;;  %v230_v52 = vld [vmem:[%s7225_s11 + $0x68] sm:$0x1] }
  0x61   : > { %v5523_v40 = vcombine.low %v2210_v8, %v2220_v23  ;;  %v2228_v46 = vor.u32 %v2227_v31, %v2224_v28  ;;  %v2237_v47 = vrot.slane %v2235_v33, 4  ;;  %v2241_v49 = vshll.u32 %v7447_v11, 16  ;;  %v7485_v31 = vld [vmem:[%s7225_s11 + $0x70] sm:$0xf] }
  0x62   : > { %v434_v24 = vshrl.u32 %v7451_v21, 16  ;;  %v422_v50 = vsel %vm7252_vm4, %v417_v41, %v421_v2  ;;  %v427_v51 = vrot.slane %v426_v44, 4  ;;  %v437_v53 = vshll.u32 %v7451_v21, 16  ;;  %v7472_v2 = vld [vmem:[%s7225_s11 + $0x6c] sm:$0xf] }
  0x63   : > { %6324 = vmatprep.mubr.msk.bf16.mxu0 %vm678_vm3, %v5523_v40  ;;  %v443_v54 = vshll.u32 %v7457_v37, 16  ;;  %v2229_v55 = vrot.slane %v2228_v46, 4  ;;  %v2238_v57 = vor.u32 %v2237_v47, %v2233_v45  ;;  %v2243_v58 = vrot.slane %v2241_v49, 5 }
  0x64   : > { %v436_v59 = vrot.slane %v434_v24, 4  ;;  %v432_v63 = vsel %vm7252_vm4, %v427_v51, %v431_v16  ;;  %v439_v5 = vrot.slane %v437_v53, 5  ;;  %v447_v8 = vshrl.u32 %v7457_v37, 16  ;;  %v231_v24 = vld [vmem:[%s7225_s11 + $0x74] sm:$0x1] }
  0x65   : > { %v445_v7 = vrot.slane %v443_v54, 5  ;;  %v5298_v9 = vcombine.low %v422_v50, %v432_v63  ;;  %v2234_v19 = vsel %vm7252_vm4, %v2229_v55, %v2233_v45  ;;  %v2239_v12 = vrot.slane %v2238_v57, 4  ;;  %v5550_v50 = vld [vmem:[%s7225_s11 + $0x18] sm:$0xe] }
  0x66   : > { %v453_v13 = vshll.u32 %v230_v52, 16  ;;  %v440_v16 = vor.u32 %v439_v5, %v436_v59  ;;  %v449_v20 = vrot.slane %v447_v8, 4  ;;  %v5565_v23 = vrot.slane %v5549_v60, 9  ;;  %v7504_v55 = vld [vmem:[%s7225_s11 + $0x78] sm:$0xf] }
  0x67   : > { %v2798_v28 = vrot.slane %v2796_v0, 4  ;;  %6189 = vmatmul.mubr.msk.bf16.gmra.mrb[12].mxu1 %vm678_vm3, %v5298_v9  ;;  %v2244_v33 = vsel %vm7252_vm4, %v2239_v12, %v2243_v58  ;;  %v458_v41 = vshrl.u32 %v7472_v2, 16  ;;  %v461_v44 = vshll.u32 %v7472_v2, 16  ;;  %v232_v59 = vld [vmem:[%s7225_s11 + $0x80] sm:$0x1] }
  0x68   : > { %v455_v40 = vrot.slane %v453_v13, 5  ;;  %v5524_v45 = vcombine.low %v2234_v19, %v2244_v33  ;;  %v441_v46 = vrot.slane %v440_v16, 4  ;;  %v450_v47 = vor.u32 %v449_v20, %v445_v7 }
  0x69   : > { %v2797_v49 = vsel %vm7478_vm7, %v5565_v23, %v2796_v0  ;;  %v2800_v51 = vsel %vm7478_vm7, %v2798_v28, %v2799_v1  ;;  %v460_v52 = vrot.slane %v458_v41, 4  ;;  %v463_v53 = vrot.slane %v461_v44, 5  ;;  %v5551_v23 = vld [vmem:[%s7225_s11 + $0x24] sm:$0xe] }
  0x6a   : > { %v467_v54 = vshll.u32 %v7485_v31, 16  ;;  %6325 = vmatmul.mubr.msk.bf16.gmra.mrb[12].mxu0 %vm678_vm3, %v5524_v45  ;;  %v446_v17 = vsel %vm7252_vm4, %v441_v46, %v445_v7  ;;  %v451_v57 = vrot.slane %v450_v47, 4  ;;  %v5581_v0 = vcombine.low %v2797_v49, %v2800_v51  ;;  %v7530_v41 = vld [vmem:[%s7225_s11 + $0x84] sm:$0xf] }
  0x6b   : > { %v471_v58 = vshrl.u32 %v7485_v31, 16  ;;  %v464_v1 = vor.u32 %v463_v53, %v460_v52  ;;  %v477_v63 = vshll.u32 %v231_v24, 16  ;;  %v5566_v5 = vrot.slane %v5550_v50, 9  ;;  %v233_v53 = vld [vmem:[%s7225_s11 + $0x8c] sm:$0x1] }
  0x6c   : > { %v469_v60 = vrot.slane %v467_v54, 5  ;;  %v456_v8 = vsel %vm7252_vm4, %v451_v57, %v455_v40  ;;  %6346 = vmatprep.mubr.msk.bf16.mxu0 %vm678_vm3, %v5581_v0  ;;  %v2807_v7 = vsel %vm7478_vm7, %v7295_v32, %v2806_v30  ;;  %v482_v19 = vshrl.u32 %v7504_v55, 16 }
  0x6d   : > { %v473_v9 = vrot.slane %v471_v58, 4  ;;  %v5299_v12 = vcombine.low %v446_v17, %v456_v8  ;;  %v465_v13 = vrot.slane %v464_v1, 4  ;;  %v479_v16 = vrot.slane %v477_v63, 5  ;;  %v5552_v58 = vld [vmem:[%s7225_s11 + $0x30] sm:$0xe] }
  0x6e   : > { %v2804_v20 = vsel %vm7478_vm7, %v5566_v5, %v2803_v25  ;;  %v484_v40 = vrot.slane %v482_v19, 4  ;;  %v485_v4 = vshll.u32 %v7504_v55, 16  ;;  %v491_v32 = vshll.u32 %v7511_v18, 16  ;;  %v7538_v25 = vld [vmem:[%s7225_s11 + $0x88] sm:$0xf] }
  0x6f   : > { %v474_v28 = vor.u32 %v473_v9, %v469_v60  ;;  %v5582_v33 = vcombine.low %v2804_v20, %v2807_v7  ;;  %6192 = vmatprep.mubr.msk.bf16.mxu1 %vm678_vm3, %v5299_v12  ;;  %v470_v30 = vsel %vm7252_vm4, %v465_v13, %v469_v60  ;;  %v495_v62 = vshrl.u32 %v7511_v18, 16  ;;  %v7557_v9 = vld [vmem:[%s7225_s11 + $0x90] sm:$0xf] }
  0x70   : > { %v501_v44 = vshll.u32 %v232_v59, 16  ;;  %v487_v46 = vrot.slane %v485_v4, 5  ;;  %v5567_v47 = vrot.slane %v5551_v23, 9  ;;  %v2810_v49 = vrot.slane %v7302_v48, 5 }
  0x71   : > { %v475_v45 = vrot.slane %v474_v28, 4  ;;  %v493_v24 = vrot.slane %v491_v32, 5  ;;  %v497_v50 = vrot.slane %v495_v62, 4  ;;  %v2813_v52 = vrot.slane %v7311_v56, 5 }
  0x72   : > { %v503_v51 = vrot.slane %v501_v44, 5  ;;  %6347 = vmatmul.mubr.msk.bf16.vlgmr.msra.gmra.mrb[0].mxu0 %vm678_vm3, %v5582_v33  ;;  %v488_v17 = vor.u32 %v487_v46, %v484_v40  ;;  %v2811_v57 = vsel %vm7478_vm7, %v5567_v47, %v2810_v49  ;;  %v2812_v0 = vrot.slane %v2810_v49, 4  ;;  %v234_v46 = vld [vmem:[%s7225_s11 + $0x98] sm:$0x1]  ;;  %v5553_v47 = vld [vmem:[%s7225_s11 + $0x3c] sm:$0xe] }
  0x73   : > { %v480_v54 = vsel %vm7252_vm4, %v475_v45, %v479_v16  ;;  %6379 = vmatpush3.bf16.msra.mxu0 %v7259_v39  ;;  %v498_v48 = vor.u32 %v497_v50, %v493_v24  ;;  %v506_v1 = vshrl.u32 %v7530_v41, 16  ;;  %v509_v56 = vshll.u32 %v7530_v41, 16 }
  0x74   : > { %v5300_v59 = vcombine.low %v470_v30, %v480_v54  ;;  %v489_v60 = vrot.slane %v488_v17, 4  ;;  %v2814_v63 = vsel %vm7478_vm7, %v2812_v0, %v2813_v52  ;;  %v515_v5 = vshll.u32 %v7538_v25, 16  ;;  %v7567_v30 = vld [vmem:[%s7225_s11 + $0x94] sm:$0xf] }
  0x75   : > { %v519_v8 = vshrl.u32 %v7538_v25, 16  ;;  %v499_v7 = vrot.slane %v498_v48, 4  ;;  %v5583_v39 = vcombine.low %v2811_v57, %v2814_v63  ;;  %v508_v19 = vrot.slane %v506_v1, 4 }
  0x76   : > { %6193 = vmatmul.mubr.msk.bf16.gmra.mrb[16].mxu1 %vm678_vm3, %v5300_v59  ;;  %v511_v12 = vrot.slane %v509_v56, 5  ;;  %v494_v13 = vsel %vm7252_vm4, %v489_v60, %v493_v24  ;;  %v517_v16 = vrot.slane %v515_v5, 5  ;;  %v525_v23 = vshll.u32 %v233_v53, 16  ;;  %v7589_v60 = vld [vmem:[%s7225_s11 + $0xa0] sm:$0xf] }
  0x77   : > { %v521_v20 = vrot.slane %v519_v8, 4  ;;  %v504_v28 = vsel %vm7252_vm4, %v499_v7, %v503_v51  ;;  %6350 = vmatprep.mubr.msk.bf16.mxu0 %vm678_vm3, %v5583_v39  ;;  %v5568_v40 = vrot.slane %v5552_v58, 9  ;;  %v2817_v4 = vrot.slane %v7331_v35, 5  ;;  %v7584_v58 = vld [vmem:[%s7225_s11 + $0x9c] sm:$0xf] }
  0x78   : > { %v512_v33 = vor.u32 %v511_v12, %v508_v19  ;;  %v5301_v32 = vcombine.low %v494_v13, %v504_v28  ;;  %v527_v44 = vrot.slane %v525_v23, 5  ;;  %v2820_v45 = vrot.slane %v7339_v42, 5  ;;  %v235_v39 = vld [vmem:[%s7225_s11 + $0xa4] sm:$0x1] }
  0x79   : > { %v522_v62 = vor.u32 %v521_v20, %v517_v16  ;;  %v2818_v24 = vsel %vm7478_vm7, %v5568_v40, %v2817_v4  ;;  %v2819_v50 = vrot.slane %v2817_v4, 4  ;;  %v530_v51 = vshrl.u32 %v7557_v9, 16  ;;  %v5554_v40 = vld [vmem:[%s7225_s11 + $0x48] sm:$0xe] }
  0x7a   : > { %v513_v49 = vrot.slane %v512_v33, 4  ;;  %6196 = vmatprep.mubr.msk.bf16.mxu1 %vm678_vm3, %v5301_v32  ;;  %v533_v52 = vshll.u32 %v7557_v9, 16  ;;  %v539_v53 = vshll.u32 %v7567_v30, 16  ;;  %v543_v42 = vshrl.u32 %v7567_v30, 16 }
  0x7b   : > { %v523_v35 = vrot.slane %v522_v62, 4  ;;  %v2821_v17 = vsel %vm7478_vm7, %v2819_v50, %v2820_v45  ;;  %v532_v57 = vrot.slane %v530_v51, 4  ;;  %v549_v0 = vshll.u32 %v234_v46, 16  ;;  %v7608_v51 = vld [vmem:[%s7225_s11 + $0xa8] sm:$0xf] }
  0x7c   : > { %v518_v54 = vsel %vm7252_vm4, %v513_v49, %v517_v16  ;;  %v5584_v48 = vcombine.low %v2818_v24, %v2821_v17  ;;  %v535_v1 = vrot.slane %v533_v52, 5  ;;  %v541_v56 = vrot.slane %v539_v53, 5 }
  0x7d   : > { %v528_v59 = vsel %vm7252_vm4, %v523_v35, %v527_v44  ;;  %v545_v5 = vrot.slane %v543_v42, 4  ;;  %v551_v8 = vrot.slane %v549_v0, 5  ;;  %v5569_v7 = vrot.slane %v5553_v47, 9 }
  0x7e   : > { %v5302_v63 = vcombine.low %v518_v54, %v528_v59  ;;  %6351 = vmatmul.mubr.msk.bf16.gmra.mrb[4].mxu0 %vm678_vm3, %v5584_v48  ;;  %v536_v19 = vor.u32 %v535_v1, %v532_v57  ;;  %v2824_v12 = vrot.slane %v7356_v22, 5  ;;  %v2827_v13 = vrot.slane %v7361_v36, 5  ;;  %v7613_v54 = vld [vmem:[%s7225_s11 + $0xac] sm:$0xf]  ;;  %v7618_v48 = vld [vmem:[%s7225_s11 + $0xb0] sm:$0x1] }
  0x7f   : > { %v554_v16 = vshrl.u32 %v7584_v58, 16  ;;  %v546_v20 = vor.u32 %v545_v5, %v541_v56  ;;  %v557_v23 = vshll.u32 %v7584_v58, 16  ;;  %v563_v28 = vshll.u32 %v7589_v60, 16  ;;  %v5555_v1 = vld [vmem:[%s7225_s11 + $0x54] sm:$0xe] }
  0x80   : > { %6197 = vmatmul.mubr.msk.bf16.gmra.mrb[20].mxu1 %vm678_vm3, %v5302_v63  ;;  %v567_v33 = vshrl.u32 %v7589_v60, 16  ;;  %v537_v4 = vrot.slane %v536_v19, 4  ;;  %v2825_v32 = vsel %vm7478_vm7, %v5569_v7, %v2824_v12  ;;  %v2826_v22 = vrot.slane %v2824_v12, 4  ;;  %v7625_v7 = vld [vmem:[%s7225_s11 + $0xb4] sm:$0xf] }
  0x81   : > { %v556_v36 = vrot.slane %v554_v16, 4  ;;  %v547_v62 = vrot.slane %v546_v20, 4  ;;  %v559_v44 = vrot.slane %v557_v23, 5  ;;  %v565_v45 = vrot.slane %v563_v28, 5  ;;  %v7637_v23 = vld [vmem:[%s7225_s11 + $0xb8] sm:$0xf] }
  0x82   : > { %v569_v46 = vrot.slane %v567_v33, 4  ;;  %v542_v47 = vsel %vm7252_vm4, %v537_v4, %v541_v56  ;;  %v2828_v49 = vsel %vm7478_vm7, %v2826_v22, %v2827_v13  ;;  %v573_v24 = vshll.u32 %v235_v39, 16 }
  0x83   : > { %v5570_v50 = vrot.slane %v5554_v40, 9  ;;  %v552_v35 = vsel %vm7252_vm4, %v547_v62, %v551_v8  ;;  %v5585_v52 = vcombine.low %v2825_v32, %v2828_v49  ;;  %v560_v53 = vor.u32 %v559_v44, %v556_v36 }
  0x84   : > { %v570_v42 = vor.u32 %v569_v46, %v565_v45  ;;  %v5303_v17 = vcombine.low %v542_v47, %v552_v35  ;;  %v575_v57 = vrot.slane %v573_v24, 5  ;;  %v2831_v0 = vrot.slane %v7379_v10, 5  ;;  %v237_v47 = vld [vmem:[%s7225_s11 + $0xbc] sm:$0x1] }
  0x85   : > { %v2834_v59 = vrot.slane %v7387_v26, 5  ;;  %6354 = vmatprep.mubr.msk.bf16.mxu0 %vm678_vm3, %v5585_v52  ;;  %v561_v56 = vrot.slane %v560_v53, 4  ;;  %v578_v5 = vshrl.u32 %v7608_v51, 16  ;;  %v581_v8 = vshll.u32 %v7608_v51, 16  ;;  %v5556_v53 = vld [vmem:[%s7225_s11 + $0x60] sm:$0xe] }
  0x86   : > { %v571_v63 = vrot.slane %v570_v42, 4  ;;  %6200 = vmatprep.mubr.msk.bf16.mxu1 %vm678_vm3, %v5303_v17  ;;  %v2832_v10 = vsel %vm7478_vm7, %v5570_v50, %v2831_v0  ;;  %v2833_v26 = vrot.slane %v2831_v0, 4  ;;  %v587_v39 = vshll.u32 %v7613_v54, 16 }
  0x87   : > { %v591_v19 = vshrl.u32 %v7613_v54, 16  ;;  %v566_v12 = vsel %vm7252_vm4, %v561_v56, %v565_v45  ;;  %v580_v16 = vrot.slane %v578_v5, 4  ;;  %v583_v20 = vrot.slane %v581_v8, 5  ;;  %v5557_v56 = vld [vmem:[%s7225_s11 + $0x6c] sm:$0xe] }
  0x88   : > { %v576_v13 = vsel %vm7252_vm4, %v571_v63, %v575_v57  ;;  %v2835_v33 = vsel %vm7478_vm7, %v2833_v26, %v2834_v59  ;;  %v589_v40 = vrot.slane %v587_v39, 5  ;;  %v597_v36 = vshll.u32 %v7618_v48, 16  ;;  %v5494_v26 = vld [vmem:[%s7225_s11 + $0x70] sm:$0xf]  ;;  %v5495_v39 = vld [vmem:[%s7225_s11 + $0x74] sm:$0x1] }
  0x89   : > { %v5304_v28 = vcombine.low %v566_v12, %v576_v13  ;;  %v593_v4 = vrot.slane %v591_v19, 4  ;;  %v5586_v32 = vcombine.low %v2832_v10, %v2835_v33  ;;  %v584_v22 = vor.u32 %v583_v20, %v580_v16 }
  0x8a   : > { %v5571_v62 = vrot.slane %v5555_v1, 9  ;;  %v2838_v45 = vrot.slane %v7410_v6, 5  ;;  %v2841_v46 = vrot.slane %v7416_v14, 5  ;;  %v602_v49 = vshrl.u32 %v7625_v7, 16 }
  0x8b   : > { %6201 = vmatmul.mubr.msk.bf16.gmra.mrb[24].mxu1 %vm678_vm3, %v5304_v28  ;;  %v594_v44 = vor.u32 %v593_v4, %v589_v40  ;;  %6355 = vmatmul.mubr.msk.bf16.gmra.mrb[8].mxu0 %vm678_vm3, %v5586_v32  ;;  %v585_v24 = vrot.slane %v584_v22, 4  ;;  %v599_v50 = vrot.slane %v597_v36, 5  ;;  %v605_v35 = vshll.u32 %v7625_v7, 16 }
  0x8c   : > { %v611_v52 = vshll.u32 %v7637_v23, 16  ;;  %v2839_v6 = vsel %vm7478_vm7, %v5571_v62, %v2838_v45  ;;  %v2840_v14 = vrot.slane %v2838_v45, 4  ;;  %v604_v17 = vrot.slane %v602_v49, 4 }
  0x8d   : > { %v595_v42 = vrot.slane %v594_v44, 4  ;;  %v590_v57 = vsel %vm7252_vm4, %v585_v24, %v589_v40  ;;  %v607_v0 = vrot.slane %v605_v35, 5  ;;  %v615_v1 = vshrl.u32 %v7637_v23, 16  ;;  %v5558_v44 = vld [vmem:[%s7225_s11 + $0x78] sm:$0xe] }
  0x8e   : > { %v613_v59 = vrot.slane %v611_v52, 5  ;;  %v2842_v5 = vsel %vm7478_vm7, %v2840_v14, %v2841_v46  ;;  %v621_v8 = vshll.u32 %v237_v47, 16  ;;  %v5572_v10 = vrot.slane %v5556_v53, 9  ;;  %v6986_v24 = vld [vmem:[%s7225_s11] sm:$0xf] }
  0x8f   : > { %v600_v63 = vsel %vm7252_vm4, %v595_v42, %v599_v50  ;;  %v5587_v12 = vcombine.low %v2839_v6, %v2842_v5  ;;  %v608_v13 = vor.u32 %v607_v0, %v604_v17  ;;  %v617_v16 = vrot.slane %v615_v1, 4  ;;  %v7678_v50 = vld [vmem:[%s7225_s11 + $0x4] sm:$0xf]  ;;  %v7682_v52 = vld [vmem:[%s7225_s11 + $0x7c] sm:$0xf] }
  0x90   : > { %v5305_v19 = vcombine.low %v590_v57, %v600_v63  ;;  %v623_v20 = vrot.slane %v621_v8, 5  ;;  %v2845_v28 = vrot.slane %v7440_v61, 5  ;;  %v2848_v33 = vrot.slane %v7447_v11, 5  ;;  %v7685_v53 = vld [vmem:[%s7225_s11 + $0x80] sm:$0x1] }
  0x91   : > { %v5573_v40 = vrot.slane %v5557_v56, 9  ;;  %6358 = vmatprep.mubr.msk.bf16.mxu0 %vm678_vm3, %v5587_v12  ;;  %v609_v4 = vrot.slane %v608_v13, 4  ;;  %v618_v32 = vor.u32 %v617_v16, %v613_v59  ;;  %v2852_v22 = vrot.slane %v5494_v26, 5  ;;  %v5500_v42 = vld [vmem:[%s7225_s11 + $0x88] sm:$0xf] }
  0x92   : > { %6204 = vmatprep.mubr.msk.bf16.mxu1 %vm678_vm3, %v5305_v19  ;;  %v2855_v36 = vrot.slane %v5495_v39, 5  ;;  %v2846_v62 = vsel %vm7478_vm7, %v5572_v10, %v2845_v28  ;;  %v2847_v61 = vrot.slane %v2845_v28, 4  ;;  %v5324_v35 = vcombine.low %v6986_v24, %v7678_v50  ;;  %v5501_v0 = vld [vmem:[%s7225_s11 + $0x8c] sm:$0x1]  ;;  %v5503_v8 = vld [vmem:[%s7225_s11 + $0x94] sm:$0xf] }
  0x93   : > { %v614_v11 = vsel %vm7252_vm4, %v609_v4, %v613_v59  ;;  %v619_v45 = vrot.slane %v618_v32, 4  ;;  %v2853_v46 = vsel %vm7478_vm7, %v5573_v40, %v2852_v22  ;;  %v2854_v47 = vrot.slane %v2852_v22, 4  ;;  %v5559_v59 = vld [vmem:[%s7225_s11 + $0x84] sm:$0xe]  ;;  %v5560_v19 = vld [vmem:[%s7225_s11 + $0x90] sm:$0xe] }
  0x94   : > { %v2849_v49 = vsel %vm7478_vm7, %v2847_v61, %v2848_v33  ;;  %v5574_v57 = vrot.slane %v5558_v44, 9  ;;  %v2859_v63 = vrot.slane %v7682_v52, 5  ;;  %v2862_v5 = vrot.slane %v7685_v53, 5  ;;  %v5504_v16 = vld [vmem:[%s7225_s11 + $0x98] sm:$0x1] }
  0x95   : > { %v624_v6 = vsel %vm7252_vm4, %v619_v45, %v623_v20  ;;  %v5588_v14 = vcombine.low %v2846_v62, %v2849_v49  ;;  %v2856_v17 = vsel %vm7478_vm7, %v2854_v47, %v2855_v36  ;;  %v5575_v10 = vrot.slane %v5559_v59, 9  ;;  %v5506_v20 = vld [vmem:[%s7225_s11 + $0xa0] sm:$0xf]  ;;  %v5507_v4 = vld [vmem:[%s7225_s11 + $0xa4] sm:$0x1] }
  0x96   : > { %v5306_v1 = vcombine.low %v614_v11, %v624_v6  ;;  %v5589_v56 = vcombine.low %v2853_v46, %v2856_v17  ;;  %v2866_v26 = vrot.slane %v5500_v42, 5  ;;  %v2869_v39 = vrot.slane %v5501_v0, 5  ;;  %v5561_v32 = vld [vmem:[%s7225_s11 + $0x9c] sm:$0xe]  ;;  %v6988_v22 = vld [vmem:[%s7225_s11 + $0xc] sm:$0xf] }
  0x97   : > { %6359 = vmatmul.mubr.msk.bf16.gmra.mrb[12].mxu0 %vm678_vm3, %v5588_v14  ;;  %v2860_v12 = vsel %vm7478_vm7, %v5574_v57, %v2859_v63  ;;  %v2861_v13 = vrot.slane %v2859_v63, 4  ;;  %v2873_v40 = vrot.slane %v5503_v8, 5  ;;  %v7712_v36 = vld [vmem:[%s7225_s11 + $0x10] sm:$0xf]  ;;  %v6990_v44 = vld [vmem:[%s7225_s11 + $0x18] sm:$0xf] }
  0x98   : > { %6205 = vmatmul.mubr.msk.bf16.gmra.mrb[28].mxu1 %vm678_vm3, %v5306_v1  ;;  %6362 = vmatprep.mubr.msk.bf16.mxu0 %vm678_vm3, %v5589_v56  ;;  %v2867_v28 = vsel %vm7478_vm7, %v5575_v10, %v2866_v26  ;;  %v2868_v33 = vrot.slane %v2866_v26, 4  ;;  %v5325_v62 = vcombine.low %v6988_v22, %v7712_v36  ;;  %v7719_v11 = vld [vmem:[%s7225_s11 + $0x1c] sm:$0xf]  ;;  %v5576_v46 = vrot.slane %v5560_v19, 9  ;;  %v5509_v57 = vld [vmem:[%s7225_s11 + $0xac] sm:$0xf] }
  0x99   : > { %6210 = vmatprep.mubr.msk.bf16.mxu1 %vm678_vm3, %v5324_v35  ;;  %v2863_v61 = vsel %vm7478_vm7, %v2861_v13, %v2862_v5  ;;  %v5326_v45 = vcombine.low %v6990_v44, %v7719_v11  ;;  %v2875_v24 = vrot.slane %v2873_v40, 4  ;;  %v2876_v35 = vrot.slane %v5504_v16, 5  ;;  %v6992_v0 = vld [vmem:[%s9206_s1 + $0x4] sm:$0x3]  ;;  %v5512_v1 = vld [vmem:[%s7225_s11 + $0xb8] sm:$0xf] }
  0x9a   : > { %v5590_v47 = vcombine.low %v2860_v12, %v2863_v61  ;;  %v2870_v49 = vsel %vm7478_vm7, %v2868_v33, %v2869_v39  ;;  %v5577_v6 = vrot.slane %v5561_v32, 9  ;;  %v2880_v14 = vrot.slane %v5506_v20, 5  ;;  %v5562_v8 = vld [vmem:[%s7225_s11 + $0xa8] sm:$0xe]  ;;  %v5510_v12 = vld [vmem:[%s7225_s11 + $0xb0] sm:$0x1] }
  0x9b   : > { %v5591_v42 = vcombine.low %v2867_v28, %v2870_v49  ;;  %v2883_v17 = vrot.slane %v5507_v4, 5  ;;  %v1445_v59 = vsel %vm727_vm0, %v6992_v0, 0  ;;  %v2874_v63 = vsel %vm7478_vm7, %v5576_v46, %v2873_v40  ;;  %v7741_v26 = vld [vmem:[%s9206_s1 + $0xc] ss:$0 sps:$4 sm:$0xcc]  }
  0x9c   : > { %v2882_v56 = vrot.slane %v2880_v14, 4  ;;  %v2877_v5 = vsel %vm7478_vm7, %v2875_v24, %v2876_v35  ;;  %v2887_v10 = vrot.slane %v5509_v57, 5  ;;  %v2881_v39 = vsel %vm7478_vm7, %v5577_v6, %v2880_v14  ;;  %v5513_v13 = vld [vmem:[%s7225_s11 + $0xbc] sm:$0x1]  ;;  %v5563_v20 = vld [vmem:[%s7225_s11 + $0xb4] sm:$0xe] }
  0x9d   : > { %v2894_v16 = vrot.slane %v5512_v1, 5  ;;  %v6993_v28 = vld [vmem:[%s7225_s11 + $0x24] sm:$0xf]  ;;  %v7753_v33 = vld [vmem:[%s7225_s11 + $0x28] sm:$0xf]  ;;  %v5592_v4 = vcombine.low %v2874_v63, %v2877_v5  ;;  %v5578_v32 = vrot.slane %v5562_v8, 9 }
  0x9e   : > { %v2884_v19 = vsel %vm7478_vm7, %v2882_v56, %v2883_v17  ;;  %v5327_v40 = vcombine.low %v6993_v28, %v7753_v33  ;;  %v5515_v22 = vld [vmem:[%s7225_s11 + $0xc4] sm:$0xf]  ;;  %v2889_v44 = vrot.slane %v2887_v10, 4  ;;  %v4048_v46 = vrot.slane %v7741_v26, 2  ;;  %v7765_v49 = vld [vmem:[%s7225_s11 + $0x34] sm:$0xf] }
  0x9f   : > { %6363 = vmatmul.mubr.msk.bf16.gmra.mrb[16].mxu0 %vm678_vm3, %v5590_v47  ;;  %v5593_v61 = vcombine.low %v2881_v39, %v2884_v19  ;;  %v6995_v47 = vld [vmem:[%s7225_s11 + $0x30] sm:$0xf]  ;;  %v5579_v35 = vrot.slane %v5563_v20, 9  ;;  %v2897_v6 = vrot.slane %v5513_v13, 5  ;;  %v2888_v14 = vsel %vm7478_vm7, %v5578_v32, %v2887_v10  ;;  %v5516_v56 = vld [vmem:[%s7225_s11 + $0xc8] sm:$0x1] }
  0xa0   : > { %6211 = vmatmul.mubr.msk.bf16.vlgmr.msra.gmra.mrb[0].mxu1 %vm678_vm3, %v5325_v62  ;;  %6366 = vmatprep.mubr.msk.bf16.mxu0 %vm678_vm3, %v5591_v42  ;;  %v7760_v62 = vld [vmem:[%s9206_s1 + $0x4] ss:$0 sps:$4 sm:$0xcc]   ;;  %v5328_v24 = vcombine.low %v6995_v47, %v7765_v49  ;;  %v2896_v42 = vrot.slane %v2894_v16, 4  ;;  %v2901_v57 = vrot.slane %v5515_v22, 5  ;;  %v5330_v20 = vcombine.low %v7391_v29, %v7394_v38 }
  0xa1   : > { %6243 = vmatpush3.bf16.msra.mxu1 %v1445_v59  ;;  %6214 = vmatprep.mubr.msk.bf16.mxu1 %vm678_vm3, %v5326_v45  ;;  %v2890_v45 = vrot.slane %v5510_v12, 5  ;;  %v1760_v0 = vrot.slane %v7760_v62, 2  ;;  %v2895_v59 = vsel %vm7478_vm7, %v5579_v35, %v2894_v16  ;;  %v5564_v63 = vld [vmem:[%s7225_s11 + $0xc0] sm:$0xe]  ;;  %v6997_v5 = vld [vmem:[%s7225_s11 + $0x3c] sm:$0xf]  ;;  %v5331_v22 = vcombine.low %v7420_v27, %v7426_v43 }
  0xa2   : > { %6746 = vmatprep.subr.msk.bf16.mxu0 %vm727_vm0, %v4048_v46  ;;  %v2898_v1 = vsel %vm7478_vm7, %v2896_v42, %v2897_v6  ;;  %v7791_v8 = vld [vmem:[%s7225_s11 + $0x40] sm:$0xf]  ;;  %v5580_v12 = vrot.slane %v5564_v63, 9  ;;  %v2903_v13 = vrot.slane %v2901_v57, 4  ;;  %v2904_v16 = vrot.slane %v5516_v56, 5  ;;  %v6820_v63 = vld [vmem:[%s7225_s11 + $0x24] sm:$0xff]  }
  0xa3   : > { %v2891_v17 = vsel %vm7478_vm7, %v2889_v44, %v2890_v45  ;;  %6741 = vmatprep.subr.msk.bf16.mxu1 %vm727_vm0, %v1760_v0  ;;  %v5329_v10 = vcombine.low %v6997_v5, %v7791_v8  ;;  %v5595_v19 = vcombine.low %v2895_v59, %v2898_v1  ;;  %v2279_v28 = vshll.u32 %v7682_v52, 16  ;;  %v1185_v42 = vld [vmem:[%s7225_s11 + $0xc] sm:$0xe]  ;;  %v6999_v43 = vld [vmem:[%s7225_s11 + $0x8] sm:$0x1] }
  0xa4   : > { %v5594_v39 = vcombine.low %v2888_v14, %v2891_v17  ;;  %v2905_v32 = vsel %vm7478_vm7, %v2903_v13, %v2904_v16  ;;  %v1244_v44 = vrot.slane %v7712_v36, 5  ;;  %v5332_v45 = vcombine.low %v7451_v21, %v7457_v37  ;;  %v1186_v14 = vld [vmem:[%s7225_s11 + $0x18] sm:$0xe]  ;;  %v7000_v36 = vld [vmem:[%s7225_s11 + $0x14] sm:$0x1] }
  0xa5   : > { %v7806_v29 = vrot.slane %v2279_v28, 5  ;;  %v2289_v47 = vshll.u32 %v7685_v53, 16  ;;  %v1237_v35 = vrot.slane %v7678_v50, 5  ;;  %v1251_v27 = vrot.slane %v7719_v11, 5  ;;  %v7827_v53 = vld [vmem:[%s7225_s11 + $0x24] sm:$0xe] }
  0xa6   : > { %v1240_v21 = vrot.slane %v6999_v43, 5  ;;  %v5357_v50 = vrot.slane %v1185_v42, 9  ;;  %v1247_v17 = vrot.slane %v7000_v36, 5  ;;  %v1246_v1 = vrot.slane %v1244_v44, 4  ;;  %v7001_v13 = vld [vmem:[%s7225_s11 + $0x20] sm:$0x1] }
  0xa7   : > { %6367 = vmatmul.mubr.msk.bf16.gmra.mrb[20].mxu0 %vm678_vm3, %v5592_v4  ;;  %v2902_v4 = vsel %vm7478_vm7, %v5580_v12, %v2901_v57  ;;  %9231 = vst [vmem:[#allocation6_spill] sm:$0xff] %v7806_v29  ;;  %v7830_v57 = vrot.slane %v2289_v47, 5  ;;  %v1239_v59 = vrot.slane %v1237_v35, 4  ;;  %v5333_v11 = vcombine.low %v7472_v2, %v7485_v31  ;;  %v1188_v28 = vld [vmem:[%s7225_s11 + $0x30] sm:$0xe] }
  0xa8   : > { %6215 = vmatmul.mubr.msk.bf16.gmra.mrb[4].mxu1 %vm678_vm3, %v5327_v40  ;;  %6370 = vmatprep.mubr.msk.bf16.mxu0 %vm678_vm3, %v5593_v61  ;;  %v2283_v40 = vshrl.u32 %v7682_v52, 16  ;;  %v5596_v52 = vcombine.low %v2902_v4, %v2905_v32  ;;  %v6817_v61 = vld [vmem:[%s7225_s11 + $0x18] sm:$0xff]   ;;  %v5334_v5 = vcombine.low %v7504_v55, %v7511_v18  ;;  %v1253_v12 = vrot.slane %v1251_v27, 4  ;;  %v7002_v4 = vld [vmem:[%s7225_s11 + $0x2c] sm:$0x1] }
  0xa9   : > { %6218 = vmatprep.mubr.msk.bf16.mxu1 %vm678_vm3, %v5328_v24  ;;  %v1184_v24 = vld [vmem:[%s7225_s11] sm:$0xe]  ;;  %9232 = vst [vmem:[#allocation7_spill] sm:$0xff] %v7830_v57  ;;  %v1254_v16 = vrot.slane %v7001_v13, 5  ;;  %v4098_v2 = vsel %vm727_vm0, %v4048_v46, 0  ;;  %v7854_v55 = vsel %vm7478_vm7, %v5357_v50, %v1244_v44  ;;  %v5359_v18 = vrot.slane %v7827_v53, 9 }
  0xaa   : > { %v2285_v38 = vrot.slane %v2283_v40, 4  ;;  %v5356_v37 = vrot.slane %v1184_v24, 9  ;;  %v7858_v40 = vld [vmem:[%s7225_s11 + $0x3c] sm:$0xe]  ;;  %v7867_v26 = vsel %vm7478_vm7, %v1239_v59, %v1240_v21  ;;  %v7871_v46 = vsel %vm7478_vm7, %v1246_v1, %v1247_v17  ;;  %v5678_v24 = vld [vmem:[%s7225_s11 + $0x18] sm:$0xf] }
  0xab   : > { %v1261_v32 = vrot.slane %v7002_v4, 5  ;;  %v5338_v44 = vcombine.low %v7608_v51, %v7613_v54  ;;  %v1272_v47 = vrot.slane %v7791_v8, 5  ;;  %v5339_v42 = vcombine.low %v7625_v7, %v7637_v23  ;;  %v5681_v43 = vld [vmem:[%s7225_s11 + $0x24] sm:$0xf]  ;;  %v6826_v21 = vld [vmem:[%s7225_s11 + $0x48] sm:$0xff]  }
  0xac   : > { %v2286_v6 = vor.u32 %v2285_v38, %v7806_v29  ;;  %v7850_v31 = vsel %vm7478_vm7, %v5356_v37, %v1237_v35  ;;  %v1265_v38 = vrot.slane %v7765_v49, 5  ;;  %v7890_v49 = vsel %vm7478_vm7, %v1253_v12, %v1254_v16  ;;  %v6824_v35 = vld [vmem:[%s7225_s11 + $0x3c] sm:$0xff]   ;;  %v7003_v50 = vld [vmem:[%s7225_s11 + $0x38] sm:$0x1]  ;;  %v7004_v17 = vld [vmem:[%s7225_s11 + $0x44] sm:$0x1] }
  0xad   : > { %v7906_v8 = vsel %vm727_vm0, %v1760_v0, 0  ;;  %v1268_v53 = vrot.slane %v7003_v50, 5  ;;  %v5361_v36 = vrot.slane %v7858_v40, 9  ;;  %v1275_v59 = vrot.slane %v7004_v17, 5  ;;  %v5682_v62 = vld [vmem:[%s7225_s11 + $0x28] sm:$0xf] }
  0xae   : > { %v7832_v56 = vrot.slane %v2286_v6, 4  ;;  %v1267_v37 = vrot.slane %v1265_v38, 4  ;;  %v1274_v13 = vrot.slane %v1272_v47, 4  ;;  %v7006_v16 = vld [vmem:[%s7225_s11 + $0x50] sm:$0x1]  ;;  %v3637_v4 = vshrl.u32 %v5681_v43, 16 }
  0xaf   : > { %6371 = vmatmul.mubr.msk.bf16.gmra.mrb[24].mxu0 %vm678_vm3, %v5594_v39  ;;  %v6822_v39 = vld [vmem:[%s7225_s11 + $0x30] sm:$0xff]   ;;  %v3646_v50 = vshll.u32 %v5682_v62, 16  ;;  %v3650_v17 = vshrl.u32 %v5682_v62, 16  ;;  %v6834_v6 = vld [vmem:[%s7225_s11 + $0x78] sm:$0xff]   ;;  %v6835_v7 = vld [vmem:[%s7225_s11 + $0x84] sm:$0xff]  }
  0xb0   : > { %6219 = vmatmul.mubr.msk.bf16.gmra.mrb[8].mxu1 %vm678_vm3, %v5329_v10  ;;  %6374 = vmatprep.mubr.msk.bf16.mxu0 %vm678_vm3, %v5595_v19  ;;  %9233 = vst [vmem:[#allocation8_spill] sm:$0xff] %v7832_v56  ;;  %v5358_v10 = vrot.slane %v1186_v14, 9  ;;  %v5335_v19 = vcombine.low %v7530_v41, %v7538_v25  ;;  %v7963_v25 = vld [vmem:[%s7225_s11 + $0x60] sm:$0xe]  ;;  %v5684_v0 = vld [vmem:[%s7225_s11 + $0x30] sm:$0xf] }
  0xb1   : > { %6222 = vmatprep.mubr.msk.bf16.mxu1 %vm678_vm3, %v5330_v20  ;;  %v1258_v20 = vrot.slane %v7753_v33, 5  ;;  %v7863_v33 = vld [vmem:[%s9206_s1 + $0x10] sm:$0x3]  ;;  %v7969_v62 = vrot.slane %v3646_v50, 5  ;;  %v7010_v50 = vld [vmem:[%s7225_s11 + $0x68] sm:$0x1] }
  0xb2   : > { %v7020_v56 = vld [vmem:[%s7225_s11 + $0xa0] sm:$0xf] }
  0xb3   : > { %v7921_v1 = vsel %vm7478_vm7, %v5359_v18, %v1258_v20  ;;  %v1328_v57 = vrot.slane %v7020_v56, 5 }
  0xb7   : > { %6375 = vmatmul.mubr.msk.bf16.gmra.mrb[28].mxu0 %vm678_vm3, %v5596_v52  ;;  %v1190_v52 = vld [vmem:[%s7225_s11 + $0x48] sm:$0xe] }
  0xb8   : > { %6223 = vmatmul.mubr.msk.bf16.gmra.mrb[12].mxu1 %vm678_vm3, %v5331_v22  ;;  %6380 = vmatprep.mubr.msk.bf16.mxu0 %vm678_vm3, %v6817_v61  ;;  %v5336_v22 = vcombine.low %v7557_v9, %v7567_v30  ;;  %v5337_v61 = vcombine.low %v7584_v58, %v7589_v60  ;;  %v1260_v9 = vrot.slane %v1258_v20, 4  ;;  %v5360_v30 = vrot.slane %v1188_v28, 9 }
  0xb9   : > { %6226 = vmatprep.mubr.msk.bf16.mxu1 %vm678_vm3, %v5332_v45  ;;  %v7885_v45 = vsel %vm7478_vm7, %v5358_v10, %v1251_v27  ;;  %v5679_v27 = vld [vmem:[%s7225_s11 + $0x1c] sm:$0xf]  ;;  %v7925_v10 = vld [vmem:[%s7225_s11 + $0x54] sm:$0xe]  ;;  %v1282_v28 = vrot.slane %v7006_v16, 5  ;;  %v3616_v20 = vshll.u32 %v5678_v24, 16 }
  0xba   : > { %v7933_v12 = vsel %vm7478_vm7, %v5360_v30, %v1265_v38  ;;  %v3622_v18 = vshll.u32 %v5679_v27, 16  ;;  %v3626_v40 = vshrl.u32 %v5679_v27, 16  ;;  %v7941_v38 = vsel %vm7478_vm7, %v1267_v37, %v1268_v53  ;;  %v7007_v30 = vld [vmem:[%s7225_s11 + $0x58] sm:$0xf]  ;;  %v7009_v16 = vld [vmem:[%s7225_s11 + $0x64] sm:$0xf] }
  0xbb   : > { %v7955_v27 = vsel %vm7478_vm7, %v1274_v13, %v1275_v59  ;;  %v5363_v41 = vrot.slane %v7925_v10, 9  ;;  %v7008_v10 = vld [vmem:[%s7225_s11 + $0x5c] sm:$0x1] }
  0xbc   : > { %v7967_v37 = vrot.slane %v3622_v18, 5  ;;  %v3628_v53 = vrot.slane %v3626_v40, 4  ;;  %v1289_v13 = vrot.slane %v7008_v10, 5  ;;  %v6830_v18 = vld [vmem:[%s7225_s11 + $0x60] sm:$0xff]   ;;  %v1193_v10 = vld [vmem:[%s7225_s11 + $0x6c] sm:$0xe] }
  0xbf   : > { %6381 = vmatmul.mubr.msk.bf16.vlgmr.msra.gmra.mrb[0].mxu0 %vm678_vm3, %v6820_v63  ;;  %v7005_v63 = vld [vmem:[%s7225_s11 + $0x4c] sm:$0xf] }
  0xc0   : > { %6227 = vmatmul.mubr.msk.bf16.gmra.mrb[16].mxu1 %vm678_vm3, %v5333_v11  ;;  %6413 = vmatpush3.bf16.msra.mxu0 %v4098_v2  ;;  %v5362_v11 = vrot.slane %v1190_v52, 9  ;;  %v3613_v2 = vshrl.u32 %v5678_v24, 16  ;;  %v3640_v52 = vshll.u32 %v5681_v43, 16  ;;  %v1286_v24 = vrot.slane %v7007_v30, 5 }
  0xc1   : > { %6230 = vmatprep.mubr.msk.bf16.mxu1 %vm678_vm3, %v5334_v5  ;;  %6384 = vmatprep.mubr.msk.bf16.mxu0 %vm678_vm3, %v6822_v39  ;;  %v1279_v5 = vrot.slane %v7005_v63, 5  ;;  %v7929_v39 = vsel %vm7478_vm7, %v1260_v9, %v1261_v32  ;;  %v6828_v63 = vld [vmem:[%s7225_s11 + $0x54] sm:$0xff]   ;;  %v3629_v30 = vor.u32 %v3628_v53, %v7967_v37 }
  0xc2   : > { %6747 = vmatprep.subr.msk.bf16.mxu0 %vm727_vm0, %v7863_v33  ;;  %v3642_v59 = vrot.slane %v3640_v52, 5  ;;  %v5364_v52 = vrot.slane %v7963_v25, 9  ;;  %v1194_v53 = vld [vmem:[%s7225_s11 + $0x78] sm:$0xe]  ;;  %v9246_v56 = vcombine.low %v7921_v1, %v7929_v39  ;;  %v7021_v1 = vld [vmem:[%s7225_s11 + $0xa4] sm:$0x1] }
  0xc3   : > { %v1281_v9 = vrot.slane %v1279_v5, 4  ;;  %v7959_v43 = vsel %vm7478_vm7, %v5362_v11, %v1279_v5  ;;  %v3652_v11 = vrot.slane %v3650_v17, 4  ;;  %v1296_v17 = vrot.slane %v7010_v50, 5  ;;  %v7012_v50 = vld [vmem:[%s7225_s11 + $0x7c] sm:$0xf] }
  0xc4   : > { %v3630_v58 = vrot.slane %v3629_v30, 4  ;;  %v1331_v39 = vrot.slane %v7021_v1, 5 }
  0xc5   : > { %v7974_v5 = vsel %vm7478_vm7, %v1281_v9, %v1282_v28 }
  0xc7   : > { %6385 = vmatmul.mubr.msk.bf16.gmra.mrb[4].mxu0 %vm678_vm3, %v6824_v35  ;;  %v7951_v35 = vsel %vm7478_vm7, %v5361_v36, %v1272_v47  ;;  %v3615_v47 = vrot.slane %v3613_v2, 4  ;;  %v3639_v36 = vrot.slane %v3637_v4, 4  ;;  %v1293_v2 = vrot.slane %v7009_v16, 5  ;;  %v7011_v16 = vld [vmem:[%s7225_s11 + $0x70] sm:$0xf] }
  0xc8   : > { %6231 = vmatmul.mubr.msk.bf16.gmra.mrb[20].mxu1 %vm678_vm3, %v5335_v19  ;;  %6388 = vmatprep.mubr.msk.bf16.mxu0 %vm678_vm3, %v6826_v21  ;;  %v5680_v19 = vld [vmem:[%s7225_s11 + $0x20] sm:$0x1]  ;;  %v3618_v21 = vrot.slane %v3616_v20, 5  ;;  %v5683_v20 = vld [vmem:[%s7225_s11 + $0x2c] sm:$0x1]  ;;  %v1300_v32 = vrot.slane %v7011_v16, 5  ;;  %v3653_v4 = vor.u32 %v3652_v11, %v7969_v62 }
  0xc9   : > { %6234 = vmatprep.mubr.msk.bf16.mxu1 %vm678_vm3, %v5336_v22  ;;  %v1288_v22 = vrot.slane %v1286_v24, 4  ;;  %v3632_v28 = vshll.u32 %v5680_v19, 16  ;;  %v3643_v14 = vor.u32 %v3642_v59, %v3639_v36  ;;  %v3656_v25 = vshll.u32 %v5683_v20, 16 }
  0xca   : > { %v3619_v9 = vor.u32 %v3618_v21, %v3615_v47  ;;  %v7996_v19 = vsel %vm7478_vm7, %v5363_v41, %v1286_v24  ;;  %v1295_v21 = vrot.slane %v1293_v2, 4  ;;  %v1307_v16 = vrot.slane %v7012_v50, 5  ;;  %v8010_v41 = vld [vmem:[%s7225_s11 + $0x34] sm:$0xf] }
  0xcb   : > { %v8000_v47 = vsel %vm7478_vm7, %v1288_v22, %v1289_v13  ;;  %v3634_v36 = vrot.slane %v3632_v28, 5  ;;  %v5365_v24 = vrot.slane %v1193_v10, 9  ;;  %9234 = vst [vmem:[#allocation9_spill] sm:$0xff] %v8010_v41  ;;  %v3661_v59 = vshrl.u32 %v5684_v0, 16  ;;  %v6832_v10 = vld [vmem:[%s7225_s11 + $0x6c] sm:$0xff]  }
  0xcc   : > { %v3664_v11 = vshll.u32 %v5684_v0, 16  ;;  %v1302_v60 = vrot.slane %v1300_v32, 4  ;;  %v3644_v13 = vrot.slane %v3643_v14, 4  ;;  %v3654_v20 = vrot.slane %v3653_v4, 4  ;;  %v7014_v0 = vld [vmem:[%s7225_s11 + $0x80] sm:$0x1] }
  0xcd   : > { %v5366_v28 = vrot.slane %v1194_v53, 9  ;;  %v1309_v50 = vrot.slane %v1307_v16, 4  ;;  %v1310_v40 = vrot.slane %v7014_v0, 5  ;;  %v3670_v51 = vshll.u32 %v8010_v41, 16  ;;  %v8029_v14 = vld [vmem:[%s7225_s11 + $0x38] sm:$0x1] }
  0xce   : > { %v8026_v30 = vsel %vm7478_vm7, %v5364_v52, %v1293_v2  ;;  %9235 = vst [vmem:[#allocation10_spill] sm:$0xff] %v8029_v14  ;;  %v3663_v4 = vrot.slane %v3661_v59, 4  ;;  %v8033_v53 = vsel %vm7478_vm7, %v1295_v21, %v1296_v17  ;;  %v8040_v0 = vsel %vm7478_vm7, %v5365_v24, %v1300_v32  ;;  %v5687_v52 = vld [vmem:[%s7225_s11 + $0x3c] sm:$0xf] }
  0xcf   : > { %6389 = vmatmul.mubr.msk.bf16.gmra.mrb[8].mxu0 %vm678_vm3, %v6828_v63  ;;  %v3620_v63 = vrot.slane %v3619_v9, 4  ;;  %v3635_v59 = vsel %vm7252_vm4, %v3630_v58, %v3634_v36  ;;  %v3649_v17 = vsel %vm7252_vm4, %v3644_v13, %v7969_v62  ;;  %v8056_v32 = vsel %vm7478_vm7, %v5366_v28, %v1307_v16  ;;  %v8067_v62 = vld [vmem:[%s7225_s11 + $0x40] sm:$0xf] }
  0xd0   : > { %6235 = vmatmul.mubr.msk.bf16.gmra.mrb[24].mxu1 %vm678_vm3, %v5337_v61  ;;  %6392 = vmatprep.mubr.msk.bf16.mxu0 %vm678_vm3, %v6830_v18  ;;  %v7013_v61 = vld [vmem:[%s7225_s11 + $0x74] sm:$0x1]  ;;  %v3658_v18 = vrot.slane %v3656_v25, 5  ;;  %v3666_v25 = vrot.slane %v3664_v11, 5  ;;  %v8061_v21 = vsel %vm7478_vm7, %v1309_v50, %v1310_v40  ;;  %v8063_v24 = vrot.slane %v3670_v51, 5  ;;  %9236 = vst [vmem:[#allocation11_spill] sm:$0xff] %v8067_v62 }
  0xd1   : > { %6238 = vmatprep.mubr.msk.bf16.mxu1 %vm678_vm3, %v5338_v44  ;;  %v1303_v22 = vrot.slane %v7013_v61, 5  ;;  %v3674_v44 = vshrl.u32 %v8010_v41, 16  ;;  %v3625_v61 = vsel %vm7252_vm4, %v3620_v63, %v7967_v37  ;;  %v3680_v11 = vshll.u32 %v8029_v14, 16  ;;  %v1195_v63 = vld [vmem:[%s7225_s11 + $0x84] sm:$0xe] }
  0xd2   : > { %v3659_v37 = vsel %vm7252_vm4, %v3654_v20, %v3658_v18  ;;  %v3667_v16 = vor.u32 %v3666_v25, %v3663_v4  ;;  %v7015_v40 = vld [vmem:[%s7225_s11 + $0x88] sm:$0xf]  ;;  %v9237_v13 = vcombine.low %v7850_v31, %v7867_v26  ;;  %v8089_v20 = vsel %vm727_vm0, %v7863_v33, 0  ;;  %v8096_v26 = vld [vmem:[%s7225_s11 + $0x44] sm:$0x1] }
  0xd3   : > { %v8044_v2 = vsel %vm7478_vm7, %v1302_v60, %v1303_v22  ;;  %v3676_v36 = vrot.slane %v3674_v44, 4  ;;  %v1314_v58 = vrot.slane %v7015_v40, 5  ;;  %v3685_v60 = vshrl.u32 %v5687_v52, 16  ;;  %9238 = vst [vmem:[#allocation12_spill] sm:$0xff] %v8096_v26  ;;  %v5690_v50 = vld [vmem:[%s7225_s11 + $0x48] sm:$0xf] }
  0xd4   : > { %v3688_v22 = vshll.u32 %v5687_v52, 16  ;;  %v8091_v18 = vcombine.low %v3649_v17, %v3659_v37  ;;  %v3694_v28 = vshll.u32 %v8067_v62, 16  ;;  %v8102_v51 = vld [vmem:[%s7225_s11 + $0x4c] sm:$0xf]  ;;  %v6836_v44 = vld [vmem:[%s7225_s11 + $0x90] sm:$0xff]   ;;  %v8106_v33 = vrot.slane %v3680_v11, 5 }
  0xd5   : > { %9239 = vst [vmem:[#allocation13_spill] sm:$0xff] %v8102_v51  ;;  %v3677_v4 = vor.u32 %v3676_v36, %v8063_v24  ;;  %v5367_v25 = vrot.slane %v1195_v63, 9  ;;  %v8110_v17 = vrot.slane %v3667_v16, 4  ;;  %v1316_v37 = vrot.slane %v1314_v58, 4  ;;  %v8113_v31 = vld [vmem:[%s7225_s11 + $0x58] sm:$0xf] }
  0xd6   : > { %v3687_v40 = vrot.slane %v3685_v60, 4  ;;  %9240 = vst [vmem:[#allocation14_spill] sm:$0xff] %v8113_v31  ;;  %v3712_v23 = vshll.u32 %v5690_v50, 16  ;;  %v3718_v9 = vshll.u32 %v8102_v51, 16  ;;  %v8117_v36 = vrot.slane %v3694_v28, 5 }
  0xd7   : > { %6393 = vmatmul.mubr.msk.bf16.gmra.mrb[12].mxu0 %vm678_vm3, %v6832_v10  ;;  %v3698_v10 = vshrl.u32 %v8067_v62, 16  ;;  %v3722_v62 = vshrl.u32 %v8102_v51, 16  ;;  %v8122_v16 = vsel %vm7478_vm7, %v5367_v25, %v1314_v58  ;;  %v3704_v60 = vshll.u32 %v8096_v26, 16  ;;  %v7017_v26 = vld [vmem:[%s7225_s11 + $0x94] sm:$0xf] }
  0xd8   : > { %6239 = vmatmul.mubr.msk.bf16.gmra.mrb[28].mxu1 %vm678_vm3, %v5339_v42  ;;  %6396 = vmatprep.mubr.msk.bf16.mxu0 %vm678_vm3, %v6834_v6  ;;  %v8083_v42 = vcombine.low %v3625_v61, %v3635_v59  ;;  %v7016_v61 = vld [vmem:[%s7225_s11 + $0x8c] sm:$0x1]  ;;  %v5693_v59 = vld [vmem:[%s7225_s11 + $0x54] sm:$0xf]  ;;  %v3709_v6 = vshrl.u32 %v5690_v50, 16  ;;  %v3746_v50 = vshrl.u32 %v8113_v31, 16  ;;  %v9241_v28 = vcombine.low %v7854_v55, %v7871_v46 }
  0xd9   : > { %6244 = vmatprep.mubr.msk.bf16.mxu1 %vm678_vm3, %v9237_v13  ;;  %v1317_v52 = vrot.slane %v7016_v61, 5  ;;  %v3690_v13 = vrot.slane %v3688_v22, 5  ;;  %v3700_v11 = vrot.slane %v3698_v10, 4  ;;  %v3733_v63 = vshrl.u32 %v5693_v59, 16  ;;  %v8143_v55 = vld [vmem:[%s7225_s11 + $0x90] sm:$0xe] }
  0xda   : > { %v3736_v61 = vshll.u32 %v5693_v59, 16  ;;  %v3742_v22 = vshll.u32 %v8113_v31, 16  ;;  %v8146_v46 = vld [vmem:[%s7225_s11 + $0x50] sm:$0x1]  ;;  %v3711_v59 = vrot.slane %v3709_v6, 4  ;;  %v3724_v58 = vrot.slane %v3722_v62, 4 }
  0xdb   : > { %v8140_v10 = vsel %vm7478_vm7, %v1316_v37, %v1317_v52  ;;  %v3691_v25 = vor.u32 %v3690_v13, %v3687_v40  ;;  %9242 = vst [vmem:[#allocation15_spill] sm:$0xff] %v8146_v46  ;;  %v5696_v52 = vld [vmem:[%s7225_s11 + $0x60] sm:$0xf]  ;;  %v6838_v40 = vld [vmem:[%s7225_s11 + $0xa8] sm:$0xff]   ;;  %v3701_v13 = vor.u32 %v3700_v11, %v8117_v36  ;;  %v3735_v14 = vrot.slane %v3733_v63, 4 }
  0xdc   : > { %v6837_v37 = vld [vmem:[%s7225_s11 + $0x9c] sm:$0xff]   ;;  %v3738_v41 = vrot.slane %v3736_v61, 5  ;;  %v3748_v6 = vrot.slane %v3746_v50, 4  ;;  %v3728_v63 = vshll.u32 %v8146_v46, 16  ;;  %v8175_v61 = vld [vmem:[%s7225_s11 + $0x64] sm:$0xf] }
  0xdd   : > { %v8168_v62 = vld [vmem:[%s7225_s11 + $0x5c] sm:$0x1]  ;;  %9245 = vst [vmem:[#allocation17_spill] sm:$0xff] %v8175_v61  ;;  %v3760_v29 = vshll.u32 %v5696_v52, 16  ;;  %v1198_v51 = vld [vmem:[%s7225_s11 + $0xa8] sm:$0xe] }
  0xde   : > { %9244 = vst [vmem:[#allocation16_spill] sm:$0xff] %v8168_v62  ;;  %v3739_v50 = vor.u32 %v3738_v41, %v3735_v14  ;;  %v3730_v41 = vrot.slane %v3728_v63, 5  ;;  %v6839_v63 = vld [vmem:[%s7225_s11 + $0xb4] sm:$0xff]  }
  0xdf   : > { %6397 = vmatmul.mubr.msk.bf16.gmra.mrb[16].mxu0 %vm678_vm3, %v6835_v7  ;;  %v8136_v7 = vrot.slane %v3677_v4, 4  ;;  %v3714_v4 = vrot.slane %v3712_v23, 5  ;;  %v8170_v23 = vrot.slane %v3742_v22, 5  ;;  %v3702_v22 = vrot.slane %v3701_v13, 4 }
  0xe0   : > { %6245 = vmatmul.mubr.msk.bf16.vlgmr.msra.gmra.mrb[0].mxu1 %vm678_vm3, %v9241_v28  ;;  %6400 = vmatprep.mubr.msk.bf16.mxu0 %vm678_vm3, %v6836_v44  ;;  %v9243_v44 = vcombine.low %v7885_v45, %v7890_v49  ;;  %v8153_v28 = vrot.slane %v3718_v9, 5  ;;  %v7018_v45 = vld [vmem:[%s9206_s1 + $0x8] sm:$0x3]  ;;  %v8164_v49 = vrot.slane %v3704_v60, 5  ;;  %v5368_v9 = vrot.slane %v8143_v55, 9 }
  0xe1   : > { %6277 = vmatpush3.bf16.msra.mxu1 %v7906_v8  ;;  %v1321_v8 = vrot.slane %v7017_v26, 5  ;;  %v7019_v26 = vld [vmem:[%s7225_s11 + $0x98] sm:$0x1]  ;;  %v3715_v60 = vor.u32 %v3714_v4, %v3711_v59  ;;  %v1197_v55 = vld [vmem:[%s7225_s11 + $0x9c] sm:$0xe]  ;;  %v3749_v46 = vor.u32 %v3748_v6, %v8170_v23  ;;  %v3766_v59 = vshll.u32 %v8175_v61, 16 }
  0xe2   : > { %6248 = vmatprep.mubr.msk.bf16.mxu1 %vm678_vm3, %v9243_v44  ;;  %6743 = vmatprep.subr.msk.bf16.mxu1 %vm727_vm0, %v7018_v45  ;;  %v1324_v11 = vrot.slane %v7019_v26, 5  ;;  %v3757_v44 = vshrl.u32 %v5696_v52, 16  ;;  %v8177_v45 = vrot.slane %v3691_v25, 4  ;;  %v3725_v3 = vor.u32 %v3724_v58, %v8153_v28 }
  0xe3   : > { %v1323_v31 = vrot.slane %v1321_v8, 4  ;;  %v3752_v26 = vshll.u32 %v8168_v62, 16  ;;  %v1335_v25 = vrot.slane %v7613_v54, 5  ;;  %v3770_v58 = vshrl.u32 %v8175_v61, 16 }
  0xe4   : > { %v5369_v14 = vrot.slane %v1197_v55, 9  ;;  %v3759_v4 = vrot.slane %v3757_v44, 4  ;;  %v3762_v52 = vrot.slane %v3760_v29, 5  ;;  %v3716_v54 = vrot.slane %v3715_v60, 4 }
  0xe5   : > { %v3726_v13 = vrot.slane %v3725_v3, 4  ;;  %v1330_v6 = vrot.slane %v1328_v57, 4  ;;  %v3754_v61 = vrot.slane %v3752_v26, 5  ;;  %v5370_v62 = vrot.slane %v1198_v51, 9 }
  0xe6   : > { %v3750_v29 = vrot.slane %v3749_v46, 4  ;;  %v1337_v44 = vrot.slane %v1335_v25, 4  ;;  %v8201_v55 = vrot.slane %v3766_v59, 5  ;;  %v3683_v3 = vsel %vm7252_vm4, %v8136_v7, %v8106_v33  ;;  %v8217_v46 = vld [vmem:[%s7225_s11 + $0x68] sm:$0x1] }
  0xe7   : > { %6401 = vmatmul.mubr.msk.bf16.gmra.mrb[20].mxu0 %vm678_vm3, %v6837_v37  ;;  %v9247_v37 = vcombine.low %v7933_v12, %v7941_v38  ;;  %v3772_v12 = vrot.slane %v3770_v58, 4  ;;  %v6840_v38 = vld [vmem:[%s7225_s11 + $0xc0] sm:$0xff]   ;;  %v3697_v51 = vsel %vm7252_vm4, %v8177_v45, %v8117_v36  ;;  %v3763_v60 = vor.u32 %v3762_v52, %v3759_v4  ;;  %v1199_v7 = vld [vmem:[%s7225_s11 + $0xb4] sm:$0xe]  ;;  %v7022_v59 = vld [vmem:[%s7225_s11 + $0xb8] sm:$0xf] }
  0xe8   : > { %6249 = vmatmul.mubr.msk.bf16.gmra.mrb[4].mxu1 %vm678_vm3, %v9246_v56  ;;  %6404 = vmatprep.mubr.msk.bf16.mxu0 %vm678_vm3, %v6838_v40  ;;  %v3740_v56 = vrot.slane %v3739_v50, 4  ;;  %v1338_v40 = vrot.slane %v7618_v48, 5  ;;  %v8214_v48 = vsel %vm7478_vm7, %v5368_v9, %v1321_v8  ;;  %v3707_v50 = vsel %vm7252_vm4, %v3702_v22, %v8164_v49  ;;  %v5699_v9 = vld [vmem:[%s7225_s11 + $0x6c] sm:$0xf]  ;;  %v8283_v52 = vld [vmem:[%s7225_s11 + $0x70] sm:$0xf] }
  0xe9   : > { %6252 = vmatprep.mubr.msk.bf16.mxu1 %vm678_vm3, %v9247_v37  ;;  %v8224_v26 = vsel %vm7478_vm7, %v1323_v31, %v1324_v11  ;;  %v3721_v33 = vsel %vm7252_vm4, %v3716_v54, %v8153_v28  ;;  %v8231_v36 = vsel %vm7478_vm7, %v5369_v14, %v1328_v57  ;;  %v3731_v8 = vsel %vm7252_vm4, %v3726_v13, %v3730_v41  ;;  %v5702_v13 = vld [vmem:[%s7225_s11 + $0x78] sm:$0xf] }
  0xea   : > { %v8238_v49 = vsel %vm7478_vm7, %v1330_v6, %v1331_v39  ;;  %v3745_v31 = vsel %vm7252_vm4, %v3740_v56, %v8170_v23  ;;  %v8245_v28 = vsel %vm7478_vm7, %v5370_v62, %v1335_v25  ;;  %v3755_v57 = vsel %vm7252_vm4, %v3750_v29, %v3754_v61  ;;  %v8296_v6 = vld [vmem:[%s7225_s11 + $0x7c] sm:$0xf]  ;;  %v5705_v29 = vld [vmem:[%s7225_s11 + $0x84] sm:$0xf] }
  0xeb   : > { %v8253_v11 = vsel %vm7478_vm7, %v1337_v44, %v1338_v40  ;;  %v3773_v45 = vor.u32 %v3772_v12, %v8201_v55  ;;  %v3776_v23 = vshll.u32 %v8217_v46, 16  ;;  %v9248_v62 = vcombine.low %v7951_v35, %v7955_v27  ;;  %9251 = vst [vmem:[#allocation18_spill] sm:$0xff] %v8296_v6  ;;  %v8303_v56 = vld [vmem:[%s7225_s11 + $0xbc] sm:$0x1]  ;;  %v8358_v44 = vld [vmem:[%s7225_s11 + $0x8c] sm:$0x1] }
  0xec   : > { %v8264_v61 = vrot.slane %v3763_v60, 4  ;;  %v5371_v25 = vrot.slane %v1199_v7, 9  ;;  %v1342_v58 = vrot.slane %v7022_v59, 5  ;;  %v9249_v41 = vcombine.low %v7959_v43, %v7974_v5  ;;  %v6841_v43 = vld [vmem:[%s7225_s11 + $0xcc] sm:$0xff]  }
  0xed   : > { %v9250_v35 = vsel %vm7252_vm4, %v8110_v17, %v8063_v24  ;;  %v8278_v14 = vcombine.low %v3697_v51, %v3707_v50  ;;  %v3781_v37 = vshrl.u32 %v5699_v9, 16  ;;  %v8286_v5 = vcombine.low %v3721_v33, %v3731_v8  ;;  %v8319_v51 = vld [vmem:[%s7225_s11 + $0x88] sm:$0xf]  ;;  %v5708_v60 = vld [vmem:[%s7225_s11 + $0x90] sm:$0xf] }
  0xee   : > { %v8276_v27 = vcombine.low %v9250_v35, %v3683_v3  ;;  %v8290_v24 = vcombine.low %v3745_v31, %v3755_v57  ;;  %v8298_v1 = vrot.slane %v3773_v45, 4  ;;  %v8300_v39 = vrot.slane %v3776_v23, 5  ;;  %9252 = vst [vmem:[#allocation19_spill] sm:$0xff] %v8319_v51  ;;  %v8326_v31 = vld [vmem:[%s7225_s11 + $0x94] sm:$0xf] }
  0xef   : > { %6405 = vmatmul.mubr.msk.bf16.gmra.mrb[24].mxu0 %vm678_vm3, %v6839_v63  ;;  %v3784_v63 = vshll.u32 %v5699_v9, 16  ;;  %v8313_v12 = vsel %vm7478_vm7, %v5371_v25, %v1342_v58  ;;  %v3790_v3 = vshll.u32 %v8283_v52, 16  ;;  %v8322_v50 = vrot.slane %v3781_v37, 4  ;;  %9253 = vst [vmem:[#allocation20_spill] sm:$0xff] %v8326_v31  ;;  %v8329_v9 = vld [vmem:[%s7225_s11 + $0x74] sm:$0x1] }
  0xf0   : > { %6253 = vmatmul.mubr.msk.bf16.gmra.mrb[8].mxu1 %vm678_vm3, %v9248_v62  ;;  %6408 = vmatprep.mubr.msk.bf16.mxu0 %vm678_vm3, %v6840_v38  ;;  %v8315_v38 = vrot.slane %v1342_v58, 4  ;;  %v3794_v33 = vshrl.u32 %v8283_v52, 16  ;;  %v3805_v7 = vshrl.u32 %v5702_v13, 16  ;;  %v3808_v8 = vshll.u32 %v5702_v13, 16 }
  0xf1   : > { %6256 = vmatprep.mubr.msk.bf16.mxu1 %vm678_vm3, %v9249_v41  ;;  %v3814_v57 = vshll.u32 %v8296_v6, 16  ;;  %v3818_v45 = vshrl.u32 %v8296_v6, 16  ;;  %v3829_v23 = vshrl.u32 %v5705_v29, 16  ;;  %v3832_v62 = vshll.u32 %v5705_v29, 16 }
  0xf2   : > { %v3838_v25 = vshll.u32 %v8319_v51, 16  ;;  %v3842_v59 = vshrl.u32 %v8319_v51, 16  ;;  %v3853_v58 = vshrl.u32 %v5708_v60, 16  ;;  %v3856_v41 = vshll.u32 %v5708_v60, 16 }
  0xf3   : > { %v9254_v35 = vcombine.low %v7996_v19, %v8000_v47  ;;  %v3786_v37 = vrot.slane %v3784_v63, 5  ;;  %v8342_v13 = vrot.slane %v3790_v3, 5  ;;  %v3862_v29 = vshll.u32 %v8326_v31, 16  ;;  %v5711_v3 = vld [vmem:[%s7225_s11 + $0x9c] sm:$0xf] }
  0xf4   : > { %v3866_v17 = vshrl.u32 %v8326_v31, 16  ;;  %v9255_v60 = vcombine.low %v8026_v30, %v8033_v53  ;;  %v3796_v19 = vrot.slane %v3794_v33, 4  ;;  %v3800_v47 = vshll.u32 %v8329_v9, 16  ;;  %v8363_v30 = vld [vmem:[%s7225_s11 + $0x98] sm:$0x1] }
  0xf5   : > { %v3810_v63 = vrot.slane %v3808_v8, 5  ;;  %v3820_v54 = vrot.slane %v3818_v45, 4  ;;  %v3831_v4 = vrot.slane %v3829_v23, 4  ;;  %v3834_v22 = vrot.slane %v3832_v62, 5 }
  0xf6   : > { %v8360_v40 = vrot.slane %v3838_v25, 5  ;;  %v3844_v31 = vrot.slane %v3842_v59, 4  ;;  %v3855_v53 = vrot.slane %v3853_v58, 4  ;;  %v3858_v33 = vrot.slane %v3856_v41, 5 }
  0xf7   : > { %6409 = vmatmul.mubr.msk.bf16.gmra.mrb[28].mxu0 %vm678_vm3, %v6841_v43  ;;  %v8345_v43 = vld [vmem:[%s7225_s11 + $0x80] sm:$0x1]  ;;  %v3868_v51 = vrot.slane %v3866_v17, 4  ;;  %v3877_v8 = vshrl.u32 %v5711_v3, 16  ;;  %v3787_v45 = vor.u32 %v3786_v37, %v8322_v50  ;;  %v3797_v23 = vor.u32 %v3796_v19, %v8342_v13  ;;  %v5714_v37 = vld [vmem:[%s7225_s11 + $0xa8] sm:$0xf] }
  0xf8   : > { %6257 = vmatmul.mubr.msk.bf16.gmra.mrb[12].mxu1 %vm678_vm3, %v9254_v35  ;;  %6414 = vmatprep.mubr.msk.bf16.mxu0 %vm678_vm3, %v8083_v42  ;;  %v3807_v42 = vrot.slane %v3805_v7, 4  ;;  %v8355_v35 = vrot.slane %v3814_v57, 5  ;;  %v8368_v7 = vld [vmem:[%s7225_s11 + $0xa0] sm:$0xf]  ;;  %v3880_v57 = vshll.u32 %v5711_v3, 16  ;;  %v3824_v25 = vshll.u32 %v8345_v43, 16 }
  0xf9   : > { %6260 = vmatprep.mubr.msk.bf16.mxu1 %vm678_vm3, %v9255_v60  ;;  %v8365_v60 = vrot.slane %v3862_v29, 5  ;;  %9256 = vst [vmem:[#allocation21_spill] sm:$0xff] %v8368_v7  ;;  %v3802_v59 = vrot.slane %v3800_v47, 5  ;;  %v3835_v58 = vor.u32 %v3834_v22, %v3831_v4  ;;  %v3848_v41 = vshll.u32 %v8358_v44, 16 }
  0xfa   : > { %v3811_v62 = vor.u32 %v3810_v63, %v3807_v42  ;;  %v3821_v6 = vor.u32 %v3820_v54, %v8355_v35  ;;  %v3845_v17 = vor.u32 %v3844_v31, %v8360_v40  ;;  %v3859_v29 = vor.u32 %v3858_v33, %v3855_v53 }
  0xfb   : > { %v3872_v3 = vshll.u32 %v8363_v30, 16  ;;  %v3886_v50 = vshll.u32 %v8368_v7, 16  ;;  %v9257_v19 = vcombine.low %v8040_v0, %v8044_v2  ;;  %v3869_v22 = vor.u32 %v3868_v51, %v8365_v60 }
  0xfc   : > { %v3879_v4 = vrot.slane %v3877_v8, 4  ;;  %v3882_v54 = vrot.slane %v3880_v57, 5  ;;  %v9258_v31 = vcombine.low %v8056_v32, %v8061_v21  ;;  %v3788_v0 = vrot.slane %v3787_v45, 4  ;;  %v8395_v21 = vld [vmem:[%s7225_s11 + $0xa4] sm:$0x1] }
  0xfd   : > { %v3798_v2 = vrot.slane %v3797_v23, 4  ;;  %v3812_v47 = vrot.slane %v3811_v62, 4  ;;  %v3826_v42 = vrot.slane %v3824_v25, 5  ;;  %v3850_v63 = vrot.slane %v3848_v41, 5 }
  0xfe   : > { %v3901_v51 = vshrl.u32 %v5714_v37, 16  ;;  %v3904_v53 = vshll.u32 %v5714_v37, 16  ;;  %v3836_v33 = vrot.slane %v3835_v58, 4  ;;  %v3846_v8 = vrot.slane %v3845_v17, 4  ;;  %v8416_v58 = vld [vmem:[%s7225_s11 + $0xac] sm:$0xf] }
  0xff   : > { %6415 = vmatmul.mubr.msk.bf16.vlgmr.msra.gmra.mrb[0].mxu0 %vm678_vm3, %v8091_v18  ;;  %v3890_v18 = vshrl.u32 %v8368_v7, 16  ;;  %v3860_v57 = vrot.slane %v3859_v29, 4  ;;  %v3870_v32 = vrot.slane %v3869_v22, 4  ;;  %v8397_v7 = vrot.slane %v3886_v50, 5  ;;  %v8435_v17 = vld [vmem:[%s7225_s11 + $0xb0] sm:$0x1] }
 0x100   : > { %6261 = vmatmul.mubr.msk.bf16.gmra.mrb[16].mxu1 %vm678_vm3, %v9257_v19  ;;  %6447 = vmatpush3.bf16.msra.mxu0 %v8089_v20  ;;  %v3822_v20 = vrot.slane %v3821_v6, 4  ;;  %v3874_v19 = vrot.slane %v3872_v3, 5  ;;  %v3779_v6 = vsel %vm7252_vm4, %v8298_v1, %v8300_v39  ;;  %v9259_v45 = vrot.slane %v8303_v56, 5  ;;  %v5717_v29 = vld [vmem:[%s7225_s11 + $0xb4] sm:$0xf] }
 0x101   : > { %6264 = vmatprep.mubr.msk.bf16.mxu1 %vm678_vm3, %v9258_v31  ;;  %6418 = vmatprep.mubr.msk.bf16.mxu0 %vm678_vm3, %v8276_v27  ;;  %v3883_v31 = vor.u32 %v3882_v54, %v3879_v4  ;;  %v3892_v27 = vrot.slane %v3890_v18, 4  ;;  %v3793_v62 = vsel %vm7252_vm4, %v3788_v0, %v8342_v13  ;;  %v3803_v25 = vsel %vm7252_vm4, %v3798_v2, %v3802_v59  ;;  %v8465_v54 = vld [vmem:[%s7225_s11 + $0xb8] sm:$0xf]  ;;  %v5763_v2 = vld [vmem:[%s7225_s11 + $0x48] sm:$0xe] }
 0x102   : > { %v8408_v23 = vsel %vm7478_vm7, %v8315_v38, %v9259_v45  ;;  %v3817_v1 = vsel %vm7252_vm4, %v3812_v47, %v8355_v35  ;;  %v3827_v39 = vsel %vm7252_vm4, %v3822_v20, %v3826_v42  ;;  %v3903_v56 = vrot.slane %v3901_v51, 4  ;;  %v5764_v20 = vld [vmem:[%s7225_s11 + $0x54] sm:$0xe] }
 0x103   : > { %v3906_v41 = vrot.slane %v3904_v53, 5  ;;  %v3841_v38 = vsel %vm7252_vm4, %v3836_v33, %v8360_v40  ;;  %v3851_v13 = vsel %vm7252_vm4, %v3846_v8, %v3850_v63  ;;  %v3865_v35 = vsel %vm7252_vm4, %v3860_v57, %v8365_v60 }
 0x104   : > { %v3896_v59 = vshll.u32 %v8395_v21, 16  ;;  %v3875_v40 = vsel %vm7252_vm4, %v3870_v32, %v3874_v19  ;;  %v8446_v3 = vrot.slane %v3883_v31, 4  ;;  %v3893_v60 = vor.u32 %v3892_v27, %v8397_v7  ;;  %v9263_v19 = vld [vmem:[#allocation13_spill] sm:$0xff]  ;;  %v9264_v31 = vld [vmem:[#allocation15_spill] sm:$0xff] }
 0x105   : > { %v3910_v50 = vshll.u32 %v8416_v58, 16  ;;  %v9261_v37 = vcombine.low %v8214_v48, %v8224_v26  ;;  %v8461_v22 = vcombine.low %v3793_v62, %v3803_v25  ;;  %v3914_v4 = vshrl.u32 %v8416_v58, 16 }
 0x106   : > { %v8467_v18 = vcombine.low %v3817_v1, %v3827_v39  ;;  %v3907_v48 = vor.u32 %v3906_v41, %v3903_v56  ;;  %v3920_v26 = vshll.u32 %v8435_v17, 16  ;;  %v3925_v0 = vshrl.u32 %v5717_v29, 16  ;;  %v9265_v41 = vld [vmem:[#allocation14_spill] sm:$0xff] }
 0x107   : > { %6419 = vmatmul.mubr.msk.bf16.gmra.mrb[4].mxu0 %vm678_vm3, %v8278_v14  ;;  %v9260_v14 = vcombine.low %v8122_v16, %v8140_v10  ;;  %v9262_v16 = vsel %vm7252_vm4, %v8264_v61, %v8201_v55  ;;  %v8471_v47 = vcombine.low %v3841_v38, %v3851_v13  ;;  %v8473_v55 = vcombine.low %v3865_v35, %v3875_v40  ;;  %v9267_v35 = vld [vmem:[#allocation16_spill] sm:$0xff] }
 0x108   : > { %6422 = vmatprep.mubr.msk.bf16.mxu0 %vm678_vm3, %v8286_v5  ;;  %v5732_v10 = vcombine.low %v9262_v16, %v3779_v6  ;;  %v5387_v5 = vcombine.low %v8313_v12, %v8408_v23  ;;  %v3898_v61 = vrot.slane %v3896_v59, 5  ;;  %v3928_v42 = vshll.u32 %v5717_v29, 16  ;;  %v5765_v6 = vld [vmem:[%s7225_s11 + $0x60] sm:$0xe]  ;;  %v8527_v16 = vld [vmem:[%s7225_s11 + $0xbc] sm:$0x1] }
 0x109   : > { %6265 = vmatmul.mubr.msk.bf16.gmra.mrb[20].mxu1 %vm678_vm3, %v9260_v14  ;;  %v3889_v63 = vsel %vm7252_vm4, %v8446_v3, %v8397_v7  ;;  %v3894_v51 = vrot.slane %v3893_v60, 4  ;;  %v8480_v53 = vrot.slane %v3910_v50, 5  ;;  %v3934_v33 = vshll.u32 %v8465_v54, 16  ;;  %v9268_v14 = vld [vmem:[#allocation17_spill] sm:$0xff]  ;;  %v5766_v3 = vld [vmem:[%s7225_s11 + $0x6c] sm:$0xe] }
 0x10a   : > { %6268 = vmatprep.mubr.msk.bf16.mxu1 %vm678_vm3, %v9261_v37  ;;  %v8483_v8 = vrot.slane %v3914_v4, 4  ;;  %v5779_v57 = vrot.slane %v5763_v2, 9  ;;  %v4387_v32 = vrot.slane %v9263_v19, 5  ;;  %v4390_v27 = vrot.slane %v9264_v31, 5  ;;  %v6842_v19 = vld [vmem:[%s7225_s11 + $0xc] sm:$0xff]  }
 0x10b   : > { %v8488_v45 = vrot.slane %v3907_v48, 4  ;;  %v8490_v62 = vrot.slane %v3920_v26, 5  ;;  %v8492_v25 = vrot.slane %v3925_v0, 4  ;;  %v5780_v7 = vrot.slane %v5764_v20, 9  ;;  %v5720_v48 = vld [vmem:[%s7225_s11 + $0xc0] sm:$0xf] }
 0x10c   : > { %v8496_v1 = vrot.slane %v3928_v42, 5  ;;  %v8500_v39 = vsel %vm7478_vm7, %v5779_v57, %v4387_v32  ;;  %v4389_v56 = vrot.slane %v4387_v32, 4  ;;  %v4394_v38 = vrot.slane %v9265_v41, 5  ;;  %v5767_v57 = vld [vmem:[%s7225_s11 + $0x78] sm:$0xe] }
 0x10d   : > { %v9266_v13 = vcombine.low %v8231_v36, %v8238_v49  ;;  %v4397_v59 = vrot.slane %v9267_v35, 5  ;;  %v5781_v29 = vrot.slane %v5765_v6, 9  ;;  %v4401_v40 = vrot.slane %v9268_v14, 5  ;;  %v5768_v14 = vld [vmem:[%s7225_s11 + $0x84] sm:$0xe] }
 0x10e   : > { %v9269_v60 = vcombine.low %v8245_v28, %v8253_v11  ;;  %v3899_v36 = vsel %vm7252_vm4, %v3894_v51, %v3898_v61  ;;  %v8520_v49 = vsel %vm7478_vm7, %v4389_v56, %v4390_v27  ;;  %v8524_v50 = vsel %vm7478_vm7, %v5780_v7, %v4394_v38  ;;  %v5496_v56 = vld [vmem:[%s7225_s11 + $0x78] sm:$0xf] }
 0x10f   : > { %6423 = vmatmul.mubr.msk.bf16.gmra.mrb[8].mxu0 %vm678_vm3, %v8290_v24  ;;  %v3938_v24 = vshrl.u32 %v8465_v54, 16  ;;  %v4396_v37 = vrot.slane %v4394_v38, 4  ;;  %v5795_v28 = vcombine.low %v8500_v39, %v8520_v49  ;;  %v8533_v11 = vsel %vm7478_vm7, %v5781_v29, %v4401_v40 }
 0x110   : > { %6426 = vmatprep.mubr.msk.bf16.mxu0 %vm678_vm3, %v5732_v10  ;;  %v4403_v10 = vrot.slane %v4401_v40, 4  ;;  %v4404_v4 = vrot.slane %v8217_v46, 5  ;;  %v5782_v0 = vrot.slane %v5766_v3, 9  ;;  %v4408_v2 = vrot.slane %v8283_v52, 5  ;;  %v8557_v52 = vld [vmem:[%s7225_s11 + $0xc4] sm:$0xf] }
 0x111   : > { %6269 = vmatmul.mubr.msk.bf16.gmra.mrb[24].mxu1 %vm678_vm3, %v9266_v13  ;;  %v8539_v26 = vsel %vm7478_vm7, %v4396_v37, %v4397_v59  ;;  %v4411_v61 = vrot.slane %v8329_v9, 5  ;;  %v3917_v42 = vor.u32 %v8483_v8, %v8480_v53  ;;  %v8545_v20 = vrot.slane %v3934_v33, 5  ;;  %v9270_v13 = vld [vmem:[#allocation18_spill] sm:$0xff]  ;;  %v9272_v37 = vld [vmem:[#allocation8_spill] sm:$0xff] }
 0x112   : > { %6272 = vmatprep.mubr.msk.bf16.mxu1 %vm678_vm3, %v9269_v60  ;;  %v5796_v51 = vcombine.low %v8524_v50, %v8539_v26  ;;  %v8551_v46 = vsel %vm7478_vm7, %v4403_v10, %v4404_v4  ;;  %v3944_v32 = vshll.u32 %v8527_v16, 16  ;;  %v8563_v33 = vsel %vm7478_vm7, %v5782_v0, %v4408_v2  ;;  %v8605_v4 = vld [vmem:[%s7225_s11 + $0xc8] sm:$0x1]  ;;  %v7033_v26 = vld [vmem:[%s7225_s11 + $0x8c] sm:$0x1] }
 0x113   : > { %v5797_v9 = vcombine.low %v8533_v11, %v8551_v46  ;;  %v4410_v8 = vrot.slane %v4408_v2, 4  ;;  %v8565_v31 = vcombine.low %v3889_v63, %v3899_v36  ;;  %v3913_v27 = vsel %vm7252_vm4, %v8488_v45, %v8480_v53  ;;  %v9271_v36 = vld [vmem:[#allocation7_spill] sm:$0xff]  ;;  %v8668_v53 = vld [vmem:[%s7225_s11 + $0xd4] sm:$0x1] }
 0x114   : > { %v3931_v6 = vor.u32 %v8496_v1, %v8492_v25  ;;  %v3949_v7 = vshrl.u32 %v5720_v48, 16  ;;  %v8576_v41 = vrot.slane %v3938_v24, 4  ;;  %v5783_v38 = vrot.slane %v5767_v57, 9  ;;  %v6843_v57 = vld [vmem:[%s7225_s11 + $0x18] sm:$0xff]  }
 0x115   : > { %v8580_v63 = vsel %vm7478_vm7, %v4410_v8, %v4411_v61  ;;  %v4415_v35 = vrot.slane %v9270_v13, 5  ;;  %v3952_v59 = vshll.u32 %v5720_v48, 16  ;;  %v3962_v24 = vshrl.u32 %v8557_v52, 16  ;;  %v5723_v8 = vld [vmem:[%s7225_s11 + $0xcc] sm:$0xf] }
 0x116   : > { %v5798_v29 = vcombine.low %v8563_v33, %v8580_v63  ;;  %v3918_v40 = vrot.slane %v3917_v42, 4  ;;  %v3951_v3 = vrot.slane %v3949_v7, 4  ;;  %v2273_v60 = vshll.u32 %v5496_v56, 16  ;;  %v7036_v63 = vld [vmem:[%s7225_s11 + $0xac] sm:$0xf] }
 0x117   : > { %6427 = vmatmul.mubr.msk.bf16.gmra.mrb[12].mxu0 %vm678_vm3, %v8461_v22  ;;  %v3958_v22 = vshll.u32 %v8557_v52, 16  ;;  %v8597_v12 = vsel %vm7478_vm7, %v5783_v38, %v4415_v35  ;;  %v4417_v23 = vrot.slane %v4415_v35, 4  ;;  %v2292_v10 = vsel %vm7252_vm4, %v9272_v37, %v9271_v36  ;;  %v6844_v38 = vld [vmem:[%s7225_s11 + $0x24] sm:$0xff]   ;;  %v8620_v35 = vld [vmem:[%s7225_s11 + $0xd0] sm:$0xf] }
 0x118   : > { %6430 = vmatprep.mubr.msk.bf16.mxu0 %vm678_vm3, %v8467_v18  ;;  %v2270_v18 = vshrl.u32 %v5496_v56, 16  ;;  %v5784_v2 = vrot.slane %v5768_v14, 9  ;;  %v3954_v42 = vrot.slane %v3952_v59, 5  ;;  %v2275_v56 = vrot.slane %v2273_v60, 5  ;;  %v5769_v36 = vld [vmem:[%s7225_s11 + $0x90] sm:$0xe] }
 0x119   : > { %6273 = vmatmul.mubr.msk.bf16.gmra.mrb[28].mxu1 %vm678_vm3, %v5387_v5  ;;  %v4418_v5 = vrot.slane %v8345_v43, 5  ;;  %v9273_v43 = vld [vmem:[#allocation19_spill] sm:$0xff]  ;;  %v3964_v13 = vrot.slane %v3962_v24, 4  ;;  %v3923_v59 = vsel %vm7252_vm4, %v3918_v40, %v8490_v62  ;;  %v3968_v24 = vshll.u32 %v8605_v4, 16  ;;  %v9274_v40 = vld [vmem:[#allocation5_spill] sm:$0xff] }
 0x11a   : > { %6278 = vmatprep.mubr.msk.bf16.mxu1 %vm678_vm3, %v6842_v19  ;;  %v2272_v0 = vrot.slane %v2270_v18, 4  ;;  %v4422_v61 = vrot.slane %v9273_v43, 5  ;;  %v8613_v19 = vrot.slane %v3958_v22, 5  ;;  %v3941_v22 = vor.u32 %v8576_v41, %v8545_v20 }
 0x11b   : > { %v8609_v48 = vsel %vm7478_vm7, %v4417_v23, %v4418_v5  ;;  %v4425_v5 = vrot.slane %v8358_v44, 5  ;;  %v3946_v18 = vrot.slane %v3944_v32, 5  ;;  %v3973_v37 = vshrl.u32 %v5723_v8, 16 }
 0x11c   : > { %v5799_v7 = vcombine.low %v8597_v12, %v8609_v48  ;;  %v8624_v23 = vsel %vm7478_vm7, %v5784_v2, %v4422_v61  ;;  %v4424_v14 = vrot.slane %v4422_v61, 4  ;;  %v2276_v60 = vor.u32 %v2275_v56, %v2272_v0  ;;  %v7037_v48 = vld [vmem:[%s7225_s11 + $0xb8] sm:$0xf] }
 0x11d   : > { %v3976_v2 = vshll.u32 %v5723_v8, 16  ;;  %v3982_v62 = vshll.u32 %v8620_v35, 16  ;;  %v3986_v32 = vshrl.u32 %v8620_v35, 16  ;;  %v3955_v0 = vor.u32 %v3954_v42, %v3951_v3 }
 0x11e   : > { %v8638_v44 = vsel %vm7478_vm7, %v4424_v14, %v4425_v5  ;;  %v2277_v41 = vrot.slane %v2276_v60, 4  ;;  %v3965_v43 = vor.u32 %v3964_v13, %v8613_v19  ;;  %v5785_v61 = vrot.slane %v5769_v36, 9  ;;  %v9276_v14 = vld [vmem:[#allocation6_spill] sm:$0xff] }
 0x11f   : > { %6431 = vmatmul.mubr.msk.bf16.gmra.mrb[16].mxu0 %vm678_vm3, %v8471_v47  ;;  %v5800_v47 = vcombine.low %v8624_v23, %v8638_v44  ;;  %v5738_v8 = vcombine.low %v3913_v27, %v3923_v59  ;;  %v3932_v56 = vrot.slane %v3931_v6, 4  ;;  %v4432_v42 = vrot.slane %v8363_v30, 5  ;;  %v5770_v36 = vld [vmem:[%s7225_s11 + $0x9c] sm:$0xe] }
 0x120   : > { %6434 = vmatprep.mubr.msk.bf16.mxu0 %vm678_vm3, %v8473_v55  ;;  %v9275_v55 = vld [vmem:[#allocation20_spill] sm:$0xff]  ;;  %v2282_v3 = vsel %vm7252_vm4, %v2277_v41, %v9276_v14  ;;  %v3975_v13 = vrot.slane %v3973_v37, 4  ;;  %v3978_v5 = vrot.slane %v3976_v2, 5  ;;  %v8670_v45 = vrot.slane %v3982_v62, 5  ;;  %v6846_v6 = vld [vmem:[%s7225_s11 + $0x3c] sm:$0xff]  }
 0x121   : > { %6279 = vmatmul.mubr.msk.bf16.vlgmr.msra.gmra.mrb[0].mxu1 %vm678_vm3, %v6843_v57  ;;  %v4429_v57 = vrot.slane %v9275_v55, 5  ;;  %v8663_v60 = vcombine.low %v2282_v3, %v2292_v10  ;;  %v3988_v27 = vrot.slane %v3986_v32, 4  ;;  %v3956_v59 = vrot.slane %v3955_v0, 4  ;;  %v9277_v0 = vld [vmem:[#allocation21_spill] sm:$0xff]  ;;  %v7024_v55 = vld [vmem:[%s7225_s11 + $0x1c] sm:$0xf] }
 0x122   : > { %6481 = vmatpush3.bf16.msra.mxu1 %v9274_v40  ;;  %6282 = vmatprep.mubr.msk.bf16.mxu1 %vm678_vm3, %v6844_v38  ;;  %v3942_v38 = vrot.slane %v3941_v22, 4  ;;  %v6845_v40 = vld [vmem:[%s7225_s11 + $0x30] sm:$0xff]   ;;  %v3966_v30 = vrot.slane %v3965_v43, 4  ;;  %v3970_v22 = vrot.slane %v3968_v24, 5  ;;  %v5786_v37 = vrot.slane %v5770_v36, 9 }
 0x123   : > { %v8674_v25 = vsel %vm7478_vm7, %v5785_v61, %v4429_v57  ;;  %v4431_v1 = vrot.slane %v4429_v57, 4  ;;  %v3937_v2 = vsel %vm7252_vm4, %v3932_v56, %v8545_v20  ;;  %v3992_v62 = vshll.u32 %v8668_v53, 16 }
 0x124   : > { %v3947_v24 = vsel %vm7252_vm4, %v3942_v38, %v3946_v18  ;;  %v3989_v41 = vor.u32 %v3988_v27, %v8670_v45  ;;  %v4436_v43 = vrot.slane %v9277_v0, 5  ;;  %v3961_v20 = vsel %vm7252_vm4, %v3956_v59, %v8613_v19  ;;  %v5771_v38 = vld [vmem:[%s7225_s11 + $0xa8] sm:$0xe]  ;;  %v6848_v27 = vld [vmem:[%s7225_s11 + $0x54] sm:$0xff]  }
 0x125   : > { %v8679_v10 = vsel %vm7478_vm7, %v4431_v1, %v4432_v42  ;;  %v3971_v61 = vsel %vm7252_vm4, %v3966_v30, %v3970_v22  ;;  %v4359_v57 = vrot.slane %v7024_v55, 5  ;;  %v4439_v18 = vrot.slane %v8395_v21, 5  ;;  %v6847_v19 = vld [vmem:[%s7225_s11 + $0x48] sm:$0xff]  }
 0x126   : > { %v5801_v32 = vcombine.low %v8674_v25, %v8679_v10  ;;  %v8706_v56 = vsel %vm7478_vm7, %v5786_v37, %v4436_v43  ;;  %v4438_v14 = vrot.slane %v4436_v43, 4  ;;  %v5739_v3 = vcombine.low %v3937_v2, %v3947_v24  ;;  %v7026_v2 = vld [vmem:[%s7225_s11 + $0x28] sm:$0xf] }
 0x127   : > { %6435 = vmatmul.mubr.msk.bf16.gmra.mrb[20].mxu0 %vm678_vm3, %v8565_v31  ;;  %v3979_v31 = vor.u32 %v3978_v5, %v3975_v13  ;;  %v3994_v42 = vrot.slane %v3992_v62, 5  ;;  %v5740_v13 = vcombine.low %v3961_v20, %v3971_v61  ;;  %v3990_v36 = vrot.slane %v3989_v41, 4  ;;  %v9278_v61 = vld [vmem:[#allocation9_spill] sm:$0xff] }
 0x128   : > { %6438 = vmatprep.mubr.msk.bf16.mxu0 %vm678_vm3, %v5738_v8  ;;  %v5759_v8 = vld [vmem:[%s7225_s11 + $0x18] sm:$0xe]  ;;  %v4361_v1 = vrot.slane %v4359_v57, 4  ;;  %v5787_v22 = vrot.slane %v5771_v38, 9  ;;  %v4443_v37 = vrot.slane %v8416_v58, 5  ;;  %v4366_v62 = vrot.slane %v7026_v2, 5 }
 0x129   : > { %6283 = vmatmul.mubr.msk.bf16.gmra.mrb[4].mxu1 %vm678_vm3, %v6845_v40  ;;  %v3980_v5 = vrot.slane %v3979_v31, 4  ;;  %v8712_v40 = vsel %vm7478_vm7, %v4438_v14, %v4439_v18  ;;  %v5775_v21 = vrot.slane %v5759_v8, 9  ;;  %v4446_v24 = vrot.slane %v8435_v17, 5  ;;  %v5760_v58 = vld [vmem:[%s7225_s11 + $0x24] sm:$0xe] }
 0x12a   : > { %6286 = vmatprep.mubr.msk.bf16.mxu1 %vm678_vm3, %v6846_v6  ;;  %v7025_v6 = vld [vmem:[%s7225_s11 + $0x20] sm:$0x1]  ;;  %v5802_v30 = vcombine.low %v8706_v56, %v8712_v40  ;;  %v3995_v41 = vsel %vm7252_vm4, %v3990_v36, %v3994_v42  ;;  %v8732_v0 = vsel %vm7478_vm7, %v5787_v22, %v4443_v37  ;;  %v4445_v43 = vrot.slane %v4443_v37, 4  ;;  %v5772_v17 = vld [vmem:[%s7225_s11 + $0xb4] sm:$0xe] }
 0x12b   : > { %v4362_v59 = vrot.slane %v7025_v6, 5  ;;  %v3985_v31 = vsel %vm7252_vm4, %v3980_v5, %v8670_v45  ;;  %v4360_v20 = vsel %vm7478_vm7, %v5775_v21, %v4359_v57  ;;  %v4373_v55 = vrot.slane %v9278_v61, 5  ;;  %v5761_v18 = vld [vmem:[%s7225_s11 + $0x30] sm:$0xe]  ;;  %v7027_v5 = vld [vmem:[%s7225_s11 + $0x2c] sm:$0x1] }
 0x12c   : > { %v8744_v8 = vsel %vm7478_vm7, %v4445_v43, %v4446_v24  ;;  %v5741_v14 = vcombine.low %v3985_v31, %v3995_v41  ;;  %v5788_v38 = vrot.slane %v5772_v17, 9  ;;  %v4369_v36 = vrot.slane %v7027_v5, 5  ;;  %v6850_v21 = vld [vmem:[%s7225_s11 + $0x6c] sm:$0xff]   ;;  %v5762_v31 = vld [vmem:[%s7225_s11 + $0x3c] sm:$0xe]  ;;  %v9280_v41 = vld [vmem:[#allocation11_spill] sm:$0xff] }
 0x12d   : > { %v4363_v45 = vsel %vm7478_vm7, %v4361_v1, %v4362_v59  ;;  %v5803_v42 = vcombine.low %v8732_v0, %v8744_v8  ;;  %v5777_v1 = vrot.slane %v5761_v18, 9  ;;  %v4375_v6 = vrot.slane %v4373_v55, 4  ;;  %v9279_v59 = vld [vmem:[#allocation10_spill] sm:$0xff]  ;;  %v5773_v43 = vld [vmem:[%s7225_s11 + $0xc0] sm:$0xe] }
 0x12e   : > { %v5791_v57 = vcombine.low %v4360_v20, %v4363_v45  ;;  %v4376_v22 = vrot.slane %v9279_v59, 5  ;;  %v4453_v37 = vrot.slane %v8527_v16, 5  ;;  %v5778_v61 = vrot.slane %v5762_v31, 9  ;;  %v6851_v5 = vld [vmem:[%s7225_s11 + $0x78] sm:$0xff]   ;;  %v7041_v56 = vld [vmem:[%s7225_s11 + $0xc8] sm:$0x1] }
 0x12f   : > { %6439 = vmatmul.mubr.msk.bf16.gmra.mrb[24].mxu0 %vm678_vm3, %v5739_v3  ;;  %v5776_v3 = vrot.slane %v5760_v58, 9  ;;  %v4380_v58 = vrot.slane %v9280_v41, 5  ;;  %v4374_v20 = vsel %vm7478_vm7, %v5777_v1, %v4373_v55  ;;  %v5789_v18 = vrot.slane %v5773_v43, 9  ;;  %v5493_v55 = vld [vmem:[%s7225_s11 + $0x6c] sm:$0xf] }
 0x130   : > { %6442 = vmatprep.mubr.msk.bf16.mxu0 %vm678_vm3, %v5740_v13  ;;  %v4368_v13 = vrot.slane %v4366_v62, 4  ;;  %v4377_v45 = vsel %vm7478_vm7, %v4375_v6, %v4376_v22  ;;  %v5774_v1 = vld [vmem:[%s7225_s11 + $0xcc] sm:$0xe]  ;;  %v6852_v6 = vld [vmem:[%s7225_s11 + $0x84] sm:$0xff]   ;;  %v2246_v22 = vshrl.u32 %v5493_v55, 16  ;;  %v2249_v31 = vshll.u32 %v5493_v55, 16 }
 0x131   : > { %6287 = vmatmul.mubr.msk.bf16.gmra.mrb[8].mxu1 %vm678_vm3, %v6847_v19  ;;  %v6849_v19 = vld [vmem:[%s7225_s11 + $0x60] sm:$0xff]   ;;  %v7028_v41 = vld [vmem:[%s7225_s11 + $0x70] sm:$0xf]  ;;  %v2433_v40 = vshll.u32 %v7041_v56, 16 }
 0x132   : > { %6290 = vmatprep.mubr.msk.bf16.mxu1 %vm678_vm3, %v6848_v27  ;;  %v4450_v27 = vrot.slane %v8465_v54, 5  ;;  %v4367_v54 = vsel %vm7478_vm7, %v5776_v3, %v4366_v62  ;;  %v4370_v16 = vsel %vm7478_vm7, %v4368_v13, %v4369_v36  ;;  %v4460_v13 = vrot.slane %v8605_v4, 5 }
 0x133   : > { %v5792_v3 = vcombine.low %v4367_v54, %v4370_v16  ;;  %v5793_v36 = vcombine.low %v4374_v20, %v4377_v45  ;;  %v2259_v43 = vshrl.u32 %v7028_v41, 16  ;;  %v4464_v54 = vrot.slane %v8620_v35, 5 }
 0x134   : > { %v8756_v2 = vsel %vm7478_vm7, %v5788_v38, %v4450_v27  ;;  %v4452_v24 = vrot.slane %v4450_v27, 4  ;;  %v4382_v38 = vrot.slane %v4380_v58, 4  ;;  %v4467_v16 = vrot.slane %v8668_v53, 5 }
 0x135   : > { %v4466_v45 = vrot.slane %v4464_v54, 4 }
 0x136   : > { %v8770_v17 = vsel %vm7478_vm7, %v4452_v24, %v4453_v37  ;;  %v5790_v24 = vrot.slane %v5774_v1, 9 }
 0x137   : > { %6443 = vmatmul.mubr.msk.bf16.gmra.mrb[28].mxu0 %vm678_vm3, %v5741_v14  ;;  %v5804_v62 = vcombine.low %v8756_v2, %v8770_v17  ;;  %v4457_v14 = vrot.slane %v8557_v52, 5  ;;  %v4381_v52 = vsel %vm7478_vm7, %v5778_v61, %v4380_v58  ;;  %v2255_v58 = vshll.u32 %v7028_v41, 16 }
 0x138   : > { %6448 = vmatprep.mubr.msk.bf16.mxu0 %vm678_vm3, %v5791_v57  ;;  %v8809_v20 = vsel %vm7478_vm7, %v5790_v24, %v4464_v54  ;;  %v8814_v35 = vsel %vm7478_vm7, %v4466_v45, %v4467_v16  ;;  %v6855_v24 = vld [vmem:[%s7225_s11 + $0xa8] sm:$0xff]  }
 0x139   : > { %6291 = vmatmul.mubr.msk.bf16.gmra.mrb[12].mxu1 %vm678_vm3, %v6849_v19  ;;  %v9281_v19 = vld [vmem:[#allocation12_spill] sm:$0xff]  ;;  %v8786_v27 = vsel %vm7478_vm7, %v5789_v18, %v4457_v14  ;;  %v2248_v18 = vrot.slane %v2246_v22, 4  ;;  %v5806_v53 = vcombine.low %v8809_v20, %v8814_v35  ;;  %v5502_v22 = vld [vmem:[%s7225_s11 + $0x90] sm:$0xf] }
 0x13a   : > { %6294 = vmatprep.mubr.msk.bf16.mxu1 %vm678_vm3, %v6850_v21  ;;  %v4383_v57 = vrot.slane %v9281_v19, 5  ;;  %v4459_v21 = vrot.slane %v4457_v14, 4  ;;  %v6853_v14 = vld [vmem:[%s7225_s11 + $0x90] sm:$0xff]   ;;  %v2261_v19 = vrot.slane %v2259_v43, 4  ;;  %v2318_v45 = vshrl.u32 %v5502_v22, 16 }
 0x13b   : > { %v6856_v43 = vld [vmem:[%s7225_s11 + $0xb4] sm:$0xff]  }
 0x13c   : > { %v8794_v59 = vsel %vm7478_vm7, %v4459_v21, %v4460_v13  ;;  %v4384_v4 = vsel %vm7478_vm7, %v4382_v38, %v4383_v57  ;;  %v2257_v38 = vrot.slane %v2255_v58, 5  ;;  %v6854_v57 = vld [vmem:[%s7225_s11 + $0x9c] sm:$0xff]   ;;  %v5499_v13 = vld [vmem:[%s7225_s11 + $0x84] sm:$0xf] }
 0x13d   : > { %v5805_v37 = vcombine.low %v8786_v27, %v8794_v59  ;;  %v5794_v61 = vcombine.low %v4381_v52, %v4384_v4  ;;  %v2294_v21 = vshrl.u32 %v5499_v13, 16  ;;  %v2297_v1 = vshll.u32 %v5499_v13, 16  ;;  %v5505_v58 = vld [vmem:[%s7225_s11 + $0x9c] sm:$0xf]  ;;  %v7032_v13 = vld [vmem:[%s7225_s11 + $0xa0] sm:$0xf] }
 0x13e   : > { %v2262_v55 = vor.u32 %v2261_v19, %v2257_v38  ;;  %v2342_v19 = vshrl.u32 %v5505_v58, 16 }
 0x13f   : > { %6449 = vmatmul.mubr.msk.bf16.vlgmr.msra.gmra.mrb[0].mxu0 %vm678_vm3, %v5792_v3  ;;  %v2251_v3 = vrot.slane %v2249_v31, 5  ;;  %v2296_v49 = vrot.slane %v2294_v21, 4 }
 0x140   : > { %6452 = vmatprep.mubr.msk.bf16.mxu0 %vm678_vm3, %v5793_v36  ;;  %v2263_v39 = vrot.slane %v2262_v55, 4 }
 0x141   : > { %6295 = vmatmul.mubr.msk.bf16.gmra.mrb[16].mxu1 %vm678_vm3, %v6851_v5  ;;  %v7029_v5 = vld [vmem:[%s7225_s11 + $0x74] sm:$0x1]  ;;  %v2252_v15 = vor.u32 %v2251_v3, %v2248_v18 }
 0x142   : > { %6298 = vmatprep.mubr.msk.bf16.mxu1 %vm678_vm3, %v6852_v6  ;;  %v2265_v36 = vshll.u32 %v7029_v5, 16  ;;  %v7030_v6 = vld [vmem:[%s7225_s11 + $0x88] sm:$0xf]  ;;  %v7031_v18 = vld [vmem:[%s7225_s11 + $0x94] sm:$0xf]  ;;  %v2351_v5 = vshll.u32 %v7032_v13, 16 }
 0x143   : > { %v2303_v52 = vshll.u32 %v7030_v6, 16  ;;  %v2307_v4 = vshrl.u32 %v7030_v6, 16  ;;  %v2253_v41 = vrot.slane %v2252_v15, 4  ;;  %v2331_v3 = vshrl.u32 %v7031_v18, 16 }
 0x144   : > { %v2267_v31 = vrot.slane %v2265_v36, 5  ;;  %v2355_v36 = vshrl.u32 %v7032_v13, 16  ;;  %v2344_v6 = vrot.slane %v2342_v19, 4 }
 0x145   : > { %v8833_v54 = vrot.slane %v2303_v52, 5  ;;  %v2309_v16 = vrot.slane %v2307_v4, 4  ;;  %v2258_v15 = vsel %vm7252_vm4, %v2253_v41, %v2257_v38  ;;  %v8855_v38 = vrot.slane %v2351_v5, 5 }
 0x146   : > { %v2268_v50 = vsel %vm7252_vm4, %v2263_v39, %v2267_v31  ;;  %v2357_v4 = vrot.slane %v2355_v36, 4 }
 0x147   : > { %6453 = vmatmul.mubr.msk.bf16.gmra.mrb[4].mxu0 %vm678_vm3, %v5794_v61  ;;  %v2321_v61 = vshll.u32 %v5502_v22, 16  ;;  %v2310_v21 = vor.u32 %v2309_v16, %v8833_v54  ;;  %v6857_v22 = vld [vmem:[%s7225_s11 + $0xc0] sm:$0xff]  }
 0x148   : > { %6456 = vmatprep.mubr.msk.bf16.mxu0 %vm678_vm3, %v5795_v28  ;;  %v2299_v28 = vrot.slane %v2297_v1, 5  ;;  %v2320_v1 = vrot.slane %v2318_v45, 4 }
 0x149   : > { %6299 = vmatmul.mubr.msk.bf16.gmra.mrb[20].mxu1 %vm678_vm3, %v6853_v14  ;;  %v2327_v14 = vshll.u32 %v7031_v18, 16  ;;  %v2323_v11 = vrot.slane %v2321_v61, 5  ;;  %v2311_v39 = vrot.slane %v2310_v21, 4  ;;  %v2358_v61 = vor.u32 %v2357_v4, %v8855_v38  ;;  %v7035_v18 = vld [vmem:[%s7225_s11 + $0xa4] sm:$0x1] }
 0x14a   : > { %6302 = vmatprep.mubr.msk.bf16.mxu1 %vm678_vm3, %v6854_v57  ;;  %v2345_v57 = vshll.u32 %v5505_v58, 16  ;;  %v2300_v55 = vor.u32 %v2299_v28, %v2296_v49  ;;  %v7034_v28 = vld [vmem:[%s7225_s11 + $0x98] sm:$0x1] }
 0x14b   : > { %v8853_v46 = vrot.slane %v2327_v14, 5  ;;  %v2324_v49 = vor.u32 %v2323_v11, %v2320_v1  ;;  %v2337_v58 = vshll.u32 %v7034_v28, 16  ;;  %v2361_v14 = vshll.u32 %v7035_v18, 16 }
 0x14c   : > { %v2347_v52 = vrot.slane %v2345_v57, 5  ;;  %v2301_v41 = vrot.slane %v2300_v55, 4  ;;  %v2379_v57 = vshrl.u32 %v7036_v63, 16  ;;  %v2359_v21 = vrot.slane %v2358_v61, 4 }
 0x14d   : > { %v2325_v36 = vrot.slane %v2324_v49, 4  ;;  %v2363_v1 = vrot.slane %v2361_v14, 5  ;;  %v7040_v14 = vld [vmem:[%s7225_s11 + $0xbc] sm:$0x1] }
 0x14e   : > { %v2348_v45 = vor.u32 %v2347_v52, %v2344_v6  ;;  %v2306_v13 = vsel %vm7252_vm4, %v2301_v41, %v8833_v54  ;;  %v2381_v52 = vrot.slane %v2379_v57, 4  ;;  %v5514_v41 = vld [vmem:[%s7225_s11 + $0xc0] sm:$0xf]  ;;  %v2409_v25 = vshll.u32 %v7040_v14, 16 }
 0x14f   : > { %6457 = vmatmul.mubr.msk.bf16.gmra.mrb[8].mxu0 %vm678_vm3, %v5796_v51  ;;  %v2313_v51 = vshll.u32 %v7033_v26, 16  ;;  %v2403_v26 = vshrl.u32 %v7037_v48, 16  ;;  %v2364_v23 = vsel %vm7252_vm4, %v2359_v21, %v2363_v1 }
 0x150   : > { %6460 = vmatprep.mubr.msk.bf16.mxu0 %vm678_vm3, %v5797_v9  ;;  %v2333_v9 = vrot.slane %v2331_v3, 4  ;;  %v5511_v3 = vld [vmem:[%s7225_s11 + $0xb4] sm:$0xf]  ;;  %v2349_v55 = vrot.slane %v2348_v45, 4 }
 0x151   : > { %6303 = vmatmul.mubr.msk.bf16.gmra.mrb[24].mxu1 %vm678_vm3, %v6855_v24  ;;  %v5525_v24 = vcombine.low %v2258_v15, %v2268_v50  ;;  %v2315_v31 = vrot.slane %v2313_v51, 5  ;;  %v2339_v15 = vrot.slane %v2337_v58, 5  ;;  %v2390_v50 = vshrl.u32 %v5511_v3, 16 }
 0x152   : > { %6306 = vmatprep.mubr.msk.bf16.mxu1 %vm678_vm3, %v6856_v43  ;;  %v5508_v43 = vld [vmem:[%s7225_s11 + $0xa8] sm:$0xf]  ;;  %v2334_v16 = vor.u32 %v2333_v9, %v8853_v46  ;;  %v2393_v12 = vshll.u32 %v5511_v3, 16  ;;  %v2354_v28 = vsel %vm7252_vm4, %v2349_v55, %v8855_v38  ;;  %v2417_v38 = vshll.u32 %v5514_v41, 16 }
 0x153   : > { %v2366_v19 = vshrl.u32 %v5508_v43, 16  ;;  %v2369_v33 = vshll.u32 %v5508_v43, 16  ;;  %v2316_v5 = vsel %vm7252_vm4, %v2311_v39, %v2315_v31  ;;  %v2392_v4 = vrot.slane %v2390_v50, 4 }
 0x154   : > { %v2335_v51 = vrot.slane %v2334_v16, 4  ;;  %v5527_v54 = vcombine.low %v2306_v13, %v2316_v5  ;;  %v2405_v31 = vrot.slane %v2403_v26, 4  ;;  %v2330_v39 = vsel %vm7252_vm4, %v2325_v36, %v8853_v46  ;;  %v7038_v46 = vld [vmem:[%s7225_s11 + $0xb0] sm:$0x1]  ;;  %v7039_v16 = vld [vmem:[%s7225_s11 + $0xc4] sm:$0xf] }
 0x155   : > { %v2368_v11 = vrot.slane %v2366_v19, 4  ;;  %v2371_v9 = vrot.slane %v2369_v33, 5  ;;  %v2385_v58 = vshll.u32 %v7038_v46, 16  ;;  %v2414_v43 = vshrl.u32 %v5514_v41, 16  ;;  %s175_s11 = sand.u32 1, %s7104_s13  }
 0x156   : > { %v2340_v49 = vsel %vm7252_vm4, %v2335_v51, %v2339_v15  ;;  %v2423_v45 = vshll.u32 %v7039_v16, 16  ;;  %v2427_v61 = vshrl.u32 %v7039_v16, 16  ;;  %v2411_v15 = vrot.slane %v2409_v25, 5  ;;  %s9029_s18 = sshll.u32 %s175_s11, 7  ;;  %s9159_s15 = scalar_lea.sflag [#allocation3], %s175_s11 }
 0x157   : > { %6461 = vmatmul.mubr.msk.bf16.gmra.mrb[12].mxu0 %vm678_vm3, %v5798_v29  ;;  %v2375_v29 = vshll.u32 %v7036_v63, 16  ;;  %v2372_v44 = vor.u32 %v2371_v9, %v2368_v11  ;;  %v5528_v10 = vcombine.low %v2330_v39, %v2340_v49  ;;  %v2387_v33 = vrot.slane %v2385_v58, 5  ;;  %s9041_s19 = scalar_lea.vmem [#allocation2], %s9029_s18 }
 0x158   : > { %6464 = vmatprep.mubr.msk.bf16.mxu0 %vm678_vm3, %v5799_v7  ;;  %v2399_v7 = vshll.u32 %v7037_v48, 16  ;;  %v2416_v63 = vrot.slane %v2414_v43, 4  ;;  %v2425_v57 = vrot.slane %v2423_v45, 5  ;;  %v2429_v13 = vrot.slane %v2427_v61, 4  ;;  %s5201_s23 = sshll.u32 %s9041_s19, 4  ;;  %s9153_s23 = int_to_ptr.vmem [resolvable:$true] %s5201_s23 }
 0x159   : > { %6307 = vmatmul.mubr.msk.bf16.gmra.mrb[28].mxu1 %vm678_vm3, %v6857_v22  ;;  %v2377_v6 = vrot.slane %v2375_v29, 5  ;;  %v2395_v22 = vrot.slane %v2393_v12, 5  ;;  %v2373_v3 = vrot.slane %v2372_v44, 4  ;;  %v2419_v29 = vrot.slane %v2417_v38, 5  ;;  %s7042_s29 = scalar_lea.vmem %s9153_s23, 2048  ;;  %p7049_p1 = scmp.lt.s32.totalorder %s9153_s23, %s7047_s4 }
 0x15a   : > { %6328 = vmatprep.mubr.msk.bf16.mxu1 %vm678_vm3, %v5525_v24  ;;  %v2401_v24 = vrot.slane %v2399_v7, 5  ;;  %v2430_v7 = vor.u32 %v2429_v13, %v2425_v57  ;;  %v2435_v55 = vrot.slane %v2433_v40, 5  ;;  %p7043_p12 = scmp.ne.s32.totalorder %s9153_s23, %s7042_s29  ;;  %p7050_p2 = scmp.lt.s32.totalorder %s7048_s5, %s7042_s29 }
 0x15b   : > { %v2378_v50 = vsel %vm7252_vm4, %v2373_v3, %v2377_v6  ;;  %v2420_v48 = vor.u32 %v2419_v29, %v2416_v63 }
 0x15c   : > { %v2406_v18 = vor.u32 %v2405_v31, %v2401_v24  ;;  %v2431_v51 = vrot.slane %v2430_v7, 4  ;;  %v8957_v31 = vld [vmem:[%s9207_s2] ss:$0 sm:$0xff]  ;;  %p7044_p13 = pnand %p7043_p12, %p7185_p4  ;;  %p7051_p3 = por %p7050_p2, %p7049_p1 }
 0x15d   : > { %v2421_v26 = vrot.slane %v2420_v48, 4 }
 0x15e   : > { %v2407_v36 = vrot.slane %v2406_v18, 4  ;;  %v2436_v1 = vsel %vm7252_vm4, %v2431_v51, %v2435_v55  ;;  %p7045_p0 = pneg %p7044_p13 }
 0x15f   : > { %6465 = vmatmul.mubr.msk.bf16.gmra.mrb[16].mxu0 %vm678_vm3, %v5800_v47  ;;  %v2382_v47 = vor.u32 %v2381_v52, %v2377_v6  ;;  %v2426_v21 = vsel %vm7252_vm4, %v2421_v26, %v2425_v57 }
 0x160   : > { %6468 = vmatprep.mubr.msk.bf16.mxu0 %vm678_vm3, %v5801_v32  ;;  %v5529_v32 = vcombine.low %v2354_v28, %v2364_v23  ;;  %v2412_v0 = vsel %vm7252_vm4, %v2407_v36, %v2411_v15  ;;  %v5532_v11 = vcombine.low %v2426_v21, %v2436_v1  ;;  %p7052_p5 = pnand %p7051_p3, %p7045_p0 }
 0x161   : > { %6329 = vmatmul.mubr.msk.bf16.vlgmr.msra.gmra.mrb[16].mxu1 %vm678_vm3, %v8663_v60  ;;  %v2396_v60 = vor.u32 %v2395_v22, %v2392_v4  ;;  %v2383_v19 = vrot.slane %v2382_v47, 4 }
 0x162   : > { %6332 = vmatprep.mubr.msk.bf16.mxu1 %vm678_vm3, %v5527_v54 }
 0x163   : > { %v2397_v5 = vrot.slane %v2396_v60, 4  ;;  %v2388_v12 = vsel %vm7252_vm4, %v2383_v19, %v2387_v33 }
 0x164   : > { %v5530_v8 = vcombine.low %v2378_v50, %v2388_v12 }
 0x167   : > { %6469 = vmatmul.mubr.msk.bf16.gmra.mrb[20].mxu0 %vm678_vm3, %v5802_v30  ;;  %v2402_v30 = vsel %vm7252_vm4, %v2397_v5, %v2401_v24 }
 0x168   : > { %6472 = vmatprep.mubr.msk.bf16.mxu0 %vm678_vm3, %v5803_v42  ;;  %v5531_v42 = vcombine.low %v2402_v30, %v2412_v0 }
 0x169   : > { %6333 = vmatmul.mubr.msk.bf16.gmra.mrb[20].mxu1 %vm678_vm3, %v5528_v10 }
 0x16a   : > { %6336 = vmatprep.mubr.msk.bf16.mxu1 %vm678_vm3, %v5529_v32 }
 0x16f   : > { %6473 = vmatmul.mubr.msk.bf16.gmra.mrb[24].mxu0 %vm678_vm3, %v5804_v62 }
 0x170   : > { %6476 = vmatprep.mubr.msk.bf16.mxu0 %vm678_vm3, %v5805_v37 }
 0x171   : > { %6337 = vmatmul.mubr.msk.bf16.gmra.mrb[24].mxu1 %vm678_vm3, %v5530_v8 }
 0x172   : > { %6340 = vmatprep.mubr.msk.bf16.mxu1 %vm678_vm3, %v5531_v42 }
 0x177   : > { %6477 = vmatmul.mubr.msk.bf16.gmra.mrb[28].mxu0 %vm678_vm3, %v5806_v53 }
 0x179   : > { %6341 = vmatmul.mubr.msk.bf16.gmra.mrb[28].mxu1 %vm678_vm3, %v5532_v11 }
 0x1f4   : > { %v6280_v2 = vpop.f32.mrb[0].mxu1 }
 0x1f5   : > { %v1846_v17 = vpop.f32.mrb[1].mxu1 }
 0x1f6   : > { %v6281_v62 = vpop.f32.mrb[2].mxu1 }
 0x1f7   : > { %v1849_v27 = vpop.f32.mrb[3].mxu1 }
 0x1fc   : > { %v6284_v59 = vpop.f32.mrb[4].mxu1 }
 0x1fd   : > { %v1862_v37 = vpop.f32.mrb[5].mxu1 }
 0x1fe   : > { %v6285_v9 = vpop.f32.mrb[6].mxu1 }
 0x1ff   : > { %v1865_v6 = vpop.f32.mrb[7].mxu1 }
 0x204   : > { %v6288_v52 = vpop.f32.mrb[8].mxu1 }
 0x205   : > { %v1878_v54 = vpop.f32.mrb[9].mxu1 }
 0x206   : > { %v6289_v34 = vpop.f32.mrb[10].mxu1 }
 0x207   : > { %v8944_v4 = vpop.f32.mrb[11].mxu1 }
 0x20c   : > { %v8946_v22 = vpop.f32.mrb[12].mxu1 }
 0x20d   : > { %v8948_v20 = vpop.f32.mrb[13].mxu1 }
 0x20e   : > { %v8950_v35 = vpop.f32.mrb[14].mxu1 }
 0x20f   : > { %v8952_v53 = vpop.f32.mrb[15].mxu1 }
 0x212   : > { %v6450_v24 = vpop.f32.mrb[0].mxu0 }
 0x213   : > { %v6482_v41 = vadd.f32 %v6450_v24, %v6280_v2  ;;  %v4603_v39 = vpop.f32.mrb[1].mxu0 }
 0x214   : > { %v6483_v49 = vadd.f32 %v4603_v39, %v1846_v17  ;;  %v6451_v28 = vpop.f32.mrb[2].mxu0 }
 0x215   : > { %v8960_v23 = vadd.f32 %v6482_v41, %v8957_v31  ;;  %v6484_v44 = vadd.f32 %v6451_v28, %v6281_v62  ;;  %v4606_v47 = vpop.f32.mrb[3].mxu0 }
 0x216   : > { %v8963_v46 = vadd.f32 %v6483_v49, %v8957_v31  ;;  %v6485_v58 = vadd.f32 %v4606_v47, %v1849_v27 }
 0x217   : > { %v5826_v43 = vmul.f32 -1.442695, %v8960_v23  ;;  %v8967_v38 = vadd.f32 %v6484_v44, %v8957_v31 }
 0x218   : > { %v5824_v16 = vmul.f32 -1.442695, %v8963_v46  ;;  %v8971_v45 = vadd.f32 %v6485_v58, %v8957_v31 }
 0x219   : > { %6858 = vpow2.f32 %v5826_v43  ;;  %v5827_v61 = vmul.f32 -1.442695, %v8967_v38 }
 0x21a   : > { %6860 = vpow2.f32 %v5824_v16  ;;  %v5825_v60 = vmul.f32 -1.442695, %v8971_v45  ;;  %v6454_v18 = vpop.f32.mrb[4].mxu0 }
 0x21b   : > { %6862 = vpow2.f32 %v5827_v61  ;;  %v6486_v14 = vadd.f32 %v6454_v18, %v6284_v59  ;;  %v4619_v25 = vpop.f32.mrb[5].mxu0 }
 0x21c   : > { %6864 = vpow2.f32 %v5825_v60  ;;  %v6487_v10 = vadd.f32 %v4619_v25, %v1862_v37  ;;  %v6455_v32 = vpop.f32.mrb[6].mxu0 }
 0x21d   : > { %v8976_v3 = vadd.f32 %v6486_v14, %v8957_v31  ;;  %v6488_v19 = vadd.f32 %v6455_v32, %v6285_v9  ;;  %v4622_v33 = vpop.f32.mrb[7].mxu0 }
 0x21e   : > { %v8979_v63 = vadd.f32 %v6487_v10, %v8957_v31  ;;  %v6489_v29 = vadd.f32 %v4622_v33, %v1865_v6 }
 0x21f   : > { %v5830_v57 = vmul.f32 -1.442695, %v8976_v3  ;;  %v8983_v13 = vadd.f32 %v6488_v19, %v8957_v31 }
 0x220   : > { %v5828_v5 = vmul.f32 -1.442695, %v8979_v63  ;;  %v8987_v36 = vadd.f32 %v6489_v29, %v8957_v31 }
 0x221   : > { %6866 = vpow2.f32 %v5830_v57  ;;  %v5831_v15 = vmul.f32 -1.442695, %v8983_v13 }
 0x222   : > { %6868 = vpow2.f32 %v5828_v5  ;;  %v5829_v50 = vmul.f32 -1.442695, %v8987_v36  ;;  %v6458_v12 = vpop.f32.mrb[8].mxu0 }
 0x223   : > { %v6859_v48 = vpop.eup %6858  ;;  %6870 = vpow2.f32 %v5831_v15  ;;  %v6490_v7 = vadd.f32 %v6458_v12, %v6288_v52  ;;  %v4635_v56 = vpop.f32.mrb[9].mxu0 }
 0x224   : > { %v6861_v40 = vpop.eup %6860  ;;  %v4899_v30 = vadd.f32 1.0, %v6859_v48  ;;  %6872 = vpow2.f32 %v5829_v50  ;;  %v6491_v0 = vadd.f32 %v4635_v56, %v1878_v54  ;;  %v6459_v8 = vpop.f32.mrb[10].mxu0 }
 0x225   : > { %v6863_v42 = vpop.eup %6862  ;;  %v4897_v26 = vadd.f32 1.0, %v6861_v40  ;;  %v8992_v51 = vadd.f32 %v6490_v7, %v8957_v31  ;;  %v6492_v55 = vadd.f32 %v6459_v8, %v6289_v34  ;;  %v4638_v21 = vpop.f32.mrb[11].mxu0 }
 0x226   : > { %v6865_v1 = vpop.eup %6864  ;;  %6874 = vrcp.f32 %v4899_v30  ;;  %v4900_v11 = vadd.f32 1.0, %v6863_v42  ;;  %v8995_v2 = vadd.f32 %v6491_v0, %v8957_v31  ;;  %v6493_v17 = vadd.f32 %v4638_v21, %v8944_v4 }
 0x227   : > { %6876 = vrcp.f32 %v4897_v26  ;;  %v4898_v62 = vadd.f32 1.0, %v6865_v1  ;;  %v5834_v27 = vmul.f32 -1.442695, %v8992_v51  ;;  %v9000_v59 = vadd.f32 %v6492_v55, %v8957_v31 }
 0x228   : > { %6878 = vrcp.f32 %v4900_v11  ;;  %v5832_v37 = vmul.f32 -1.442695, %v8995_v2  ;;  %v9004_v9 = vadd.f32 %v6493_v17, %v8957_v31 }
 0x229   : > { %6880 = vrcp.f32 %v4898_v62  ;;  %v5835_v6 = vmul.f32 -1.442695, %v9000_v59 }
 0x22a   : > { %6882 = vpow2.f32 %v5834_v27  ;;  %v5833_v52 = vmul.f32 -1.442695, %v9004_v9  ;;  %v6462_v54 = vpop.f32.mrb[12].mxu0 }
 0x22b   : > { %v6867_v34 = vpop.eup %6866  ;;  %6884 = vpow2.f32 %v5832_v37  ;;  %v6494_v4 = vadd.f32 %v6462_v54, %v8946_v22  ;;  %v4651_v24 = vpop.f32.mrb[13].mxu0 }
 0x22c   : > { %v6869_v41 = vpop.eup %6868  ;;  %v4903_v39 = vadd.f32 1.0, %v6867_v34  ;;  %6886 = vpow2.f32 %v5835_v6  ;;  %v6495_v49 = vadd.f32 %v4651_v24, %v8948_v20  ;;  %v6463_v28 = vpop.f32.mrb[14].mxu0 }
 0x22d   : > { %v6871_v44 = vpop.eup %6870  ;;  %v4901_v47 = vadd.f32 1.0, %v6869_v41  ;;  %6888 = vpow2.f32 %v5833_v52  ;;  %v9011_v58 = vadd.f32 %v6494_v4, %v8957_v31  ;;  %v6496_v43 = vadd.f32 %v6463_v28, %v8950_v35  ;;  %v4654_v16 = vpop.f32.mrb[15].mxu0 }
 0x22e   : > { %v6873_v61 = vpop.eup %6872  ;;  %6890 = vrcp.f32 %v4903_v39  ;;  %v4904_v22 = vadd.f32 1.0, %v6871_v44  ;;  %v9016_v60 = vadd.f32 %v6495_v49, %v8957_v31  ;;  %v6497_v20 = vadd.f32 %v4654_v16, %v8952_v53 }
 0x22f   : > { %6892 = vrcp.f32 %v4901_v47  ;;  %v4902_v18 = vadd.f32 1.0, %v6873_v61  ;;  %v5838_v14 = vmul.f32 -1.442695, %v9011_v58  ;;  %v9021_v25 = vadd.f32 %v6496_v43, %v8957_v31 }
 0x230   : > { %v6875_v10 = vpop.eup %6874  ;;  %6894 = vrcp.f32 %v4904_v22  ;;  %v5836_v35 = vmul.f32 -1.442695, %v9016_v60  ;;  %v9025_v32 = vadd.f32 %v6497_v20, %v8957_v31 }
 0x231   : > { %v6877_v19 = vpop.eup %6876  ;;  %6896 = vrcp.f32 %v4902_v18  ;;  %v5839_v53 = vmul.f32 -1.442695, %v9021_v25  ;;  %v4995_v15 = vmul.f32 %v6875_v10, %v8960_v23 }
 0x232   : > { %v6879_v33 = vpop.eup %6878  ;;  %6898 = vpow2.f32 %v5838_v14  ;;  %v5837_v29 = vmul.f32 -1.442695, %v9025_v32  ;;  %v6466_v57 = vpop.f32.mrb[16].mxu0  ;;  %v4993_v56 = vmul.f32 %v6877_v19, %v8963_v46 }
 0x233   : > { %v6881_v5 = vpop.eup %6880  ;;  %v4996_v50 = vmul.f32 %v6879_v33, %v8967_v38  ;;  %6900 = vpow2.f32 %v5836_v35  ;;  %v4667_v48 = vpop.f32.mrb[17].mxu0 }
 0x234   : > { %v6330_v12 = vpop.f32.mrb[16].mxu1  ;;  %v6883_v7 = vpop.eup %6882  ;;  %v4994_v40 = vmul.f32 %v6881_v5, %v8971_v45  ;;  %6902 = vpow2.f32 %v5839_v53 }
 0x235   : > { %v6498_v30 = vadd.f32 %v6466_v57, %v6330_v12  ;;  %v2635_v0 = vpop.f32.mrb[17].mxu1  ;;  %v6467_v8 = vpop.f32.mrb[18].mxu0  ;;  %v5934_v26 = vpack.c.bf16 %v4996_v50, %v4995_v15  ;;  %v4907_v55 = vadd.f32 1.0, %v6883_v7  ;;  %6904 = vpow2.f32 %v5837_v29 }
 0x236   : > { %v6885_v42 = vpop.eup %6884  ;;  %v6499_v23 = vadd.f32 %v4667_v48, %v2635_v0  ;;  %v6331_v21 = vpop.f32.mrb[18].mxu1  ;;  %v5929_v11 = vpack.c.bf16 %v4994_v40, %v4993_v56 }
 0x237   : > { %v4670_v38 = vpop.f32.mrb[19].mxu0  ;;  %v6887_v1 = vpop.eup %6886  ;;  %v4905_v17 = vadd.f32 1.0, %v6885_v42  ;;  %v9038_v62 = vadd.f32 %v6498_v30, %v8957_v31  ;;  %v6500_v46 = vadd.f32 %v6467_v8, %v6331_v21  ;;  %6006 = vst [vmem:[%s9041_s19 + $0x8] sm:$0xff] %v5934_v26   ;;  %6906 = vrcp.f32 %v4907_v55 }
 0x238   : > { %v2638_v45 = vpop.f32.mrb[19].mxu1  ;;  %v6889_v27 = vpop.eup %6888  ;;  %v4908_v37 = vadd.f32 1.0, %v6887_v1  ;;  %v9045_v6 = vadd.f32 %v6499_v23, %v8957_v31  ;;  %5930 = vst [vmem:[%s9041_s19] sm:$0xff] %v5929_v11  }
 0x239   : > { %v6501_v52 = vadd.f32 %v4670_v38, %v2638_v45  ;;  %v6891_v54 = vpop.eup %6890  ;;  %6908 = vrcp.f32 %v4905_v17  ;;  %v4906_v34 = vadd.f32 1.0, %v6889_v27  ;;  %v5842_v4 = vmul.f32 -1.442695, %v9038_v62 }
 0x23a   : > { %v9050_v24 = vadd.f32 %v6500_v46, %v8957_v31  ;;  %v6893_v41 = vpop.eup %6892  ;;  %6910 = vrcp.f32 %v4908_v37  ;;  %v5840_v39 = vmul.f32 -1.442695, %v9045_v6  ;;  %v6470_v47 = vpop.f32.mrb[20].mxu0  ;;  %v4999_v16 = vmul.f32 %v6891_v54, %v8976_v3 }
 0x23b   : > { %v9054_v49 = vadd.f32 %v6501_v52, %v8957_v31  ;;  %v6895_v28 = vpop.eup %6894  ;;  %6912 = vrcp.f32 %v4906_v34  ;;  %v4683_v18 = vpop.f32.mrb[21].mxu0  ;;  %v4997_v10 = vmul.f32 %v6893_v41, %v8979_v63 }
 0x23c   : > { %v5843_v44 = vmul.f32 -1.442695, %v9050_v24  ;;  %v6897_v43 = vpop.eup %6896  ;;  %v5000_v61 = vmul.f32 %v6895_v28, %v8983_v13  ;;  %6914 = vpow2.f32 %v5842_v4  ;;  %v6334_v20 = vpop.f32.mrb[20].mxu1 }
 0x23d   : > { %v5841_v22 = vmul.f32 -1.442695, %v9054_v49  ;;  %v6899_v14 = vpop.eup %6898  ;;  %v4998_v35 = vmul.f32 %v6897_v43, %v8987_v36  ;;  %6916 = vpow2.f32 %v5840_v39  ;;  %v6502_v19 = vadd.f32 %v6470_v47, %v6334_v20  ;;  %v2651_v53 = vpop.f32.mrb[21].mxu1 }
 0x23e   : > { %v6471_v33 = vpop.f32.mrb[22].mxu0  ;;  %v6901_v29 = vpop.eup %6900  ;;  %v5944_v57 = vpack.c.bf16 %v5000_v61, %v4999_v16  ;;  %v4911_v3 = vadd.f32 1.0, %v6899_v14  ;;  %6918 = vpow2.f32 %v5843_v44  ;;  %v6503_v13 = vadd.f32 %v4683_v18, %v2651_v53 }
 0x23f   : > { %v6335_v5 = vpop.f32.mrb[22].mxu1  ;;  %v4686_v15 = vpop.f32.mrb[23].mxu0  ;;  %v5939_v12 = vpack.c.bf16 %v4998_v35, %v4997_v10  ;;  %v4909_v48 = vadd.f32 1.0, %v6901_v29  ;;  %6920 = vpow2.f32 %v5841_v22  ;;  %v9063_v63 = vadd.f32 %v6502_v19, %v8957_v31 }
 0x240   : > { %v6903_v50 = vpop.eup %6902  ;;  %v2654_v36 = vpop.f32.mrb[23].mxu1  ;;  %6008 = vst [vmem:[%s9041_s19 + $0x18] sm:$0xff] %v5944_v57   ;;  %6922 = vrcp.f32 %v4911_v3  ;;  %v9067_v40 = vadd.f32 %v6503_v13, %v8957_v31  ;;  %v6504_v30 = vadd.f32 %v6471_v33, %v6335_v5 }
 0x241   : > { %v6905_v7 = vpop.eup %6904  ;;  %v4912_v56 = vadd.f32 1.0, %v6903_v50  ;;  %6007 = vst [vmem:[%s9041_s19 + $0x10] sm:$0xff] %v5939_v12   ;;  %6924 = vrcp.f32 %v4909_v48  ;;  %v5846_v8 = vmul.f32 -1.442695, %v9063_v63  ;;  %v6505_v42 = vadd.f32 %v4686_v15, %v2654_v36 }
 0x242   : > { %v4910_v0 = vadd.f32 1.0, %v6905_v7  ;;  %v6907_v26 = vpop.eup %6906  ;;  %v5844_v55 = vmul.f32 -1.442695, %v9067_v40  ;;  %v9073_v23 = vadd.f32 %v6504_v30, %v8957_v31  ;;  %v6474_v1 = vpop.f32.mrb[24].mxu0 }
 0x243   : > { %6926 = vrcp.f32 %v4912_v56  ;;  %v6909_v21 = vpop.eup %6908  ;;  %v9076_v38 = vadd.f32 %v6505_v42, %v8957_v31  ;;  %v5003_v17 = vmul.f32 %v6907_v26, %v8992_v51  ;;  %v4699_v27 = vpop.f32.mrb[25].mxu0 }
 0x244   : > { %6928 = vrcp.f32 %v4910_v0  ;;  %v6911_v11 = vpop.eup %6910  ;;  %v5847_v46 = vmul.f32 -1.442695, %v9073_v23  ;;  %v6338_v45 = vpop.f32.mrb[24].mxu1  ;;  %v5001_v28 = vmul.f32 %v6909_v21, %v8995_v2 }
 0x245   : > { %6930 = vpow2.f32 %v5846_v8  ;;  %v6913_v37 = vpop.eup %6912  ;;  %v5004_v52 = vmul.f32 %v6911_v11, %v9000_v59  ;;  %v5845_v54 = vmul.f32 -1.442695, %v9076_v38  ;;  %v6506_v34 = vadd.f32 %v6474_v1, %v6338_v45  ;;  %v2667_v4 = vpop.f32.mrb[25].mxu1 }
 0x246   : > { %6932 = vpow2.f32 %v5844_v55  ;;  %v6475_v41 = vpop.f32.mrb[26].mxu0  ;;  %v6915_v39 = vpop.eup %6914  ;;  %v5002_v44 = vmul.f32 %v6913_v37, %v9004_v9  ;;  %v6507_v51 = vadd.f32 %v4699_v27, %v2667_v4 }
 0x247   : > { %6934 = vpow2.f32 %v5847_v46  ;;  %v6339_v47 = vpop.f32.mrb[26].mxu1  ;;  %v4702_v43 = vpop.f32.mrb[27].mxu0  ;;  %v5954_v61 = vpack.c.bf16 %v5004_v52, %v5003_v17  ;;  %v4915_v22 = vadd.f32 1.0, %v6915_v39  ;;  %v9085_v59 = vadd.f32 %v6506_v34, %v8957_v31 }
 0x248   : > { %v6917_v16 = vpop.eup %6916  ;;  %6936 = vpow2.f32 %v5845_v54  ;;  %v2670_v20 = vpop.f32.mrb[27].mxu1  ;;  %v5949_v14 = vpack.c.bf16 %v5002_v44, %v5001_v28  ;;  %v9088_v2 = vadd.f32 %v6507_v51, %v8957_v31  ;;  %v6508_v9 = vadd.f32 %v6475_v41, %v6339_v47 }
 0x249   : > { %v6919_v18 = vpop.eup %6918  ;;  %v4913_v10 = vadd.f32 1.0, %v6917_v16  ;;  %6010 = vst [vmem:[%s9041_s19 + $0x28] sm:$0xff] %v5954_v61   ;;  %6938 = vrcp.f32 %v4915_v22  ;;  %v5850_v53 = vmul.f32 -1.442695, %v9085_v59  ;;  %v6509_v33 = vadd.f32 %v4702_v43, %v2670_v20 }
 0x24a   : > { %v6921_v35 = vpop.eup %6920  ;;  %v4916_v19 = vadd.f32 1.0, %v6919_v18  ;;  %6009 = vst [vmem:[%s9041_s19 + $0x20] sm:$0xff] %v5949_v14   ;;  %v5848_v3 = vmul.f32 -1.442695, %v9088_v2  ;;  %v9095_v13 = vadd.f32 %v6508_v9, %v8957_v31  ;;  %v6478_v50 = vpop.f32.mrb[28].mxu0 }
 0x24b   : > { %v6923_v29 = vpop.eup %6922  ;;  %6940 = vrcp.f32 %v4913_v10  ;;  %v4914_v57 = vadd.f32 1.0, %v6921_v35  ;;  %v9098_v15 = vadd.f32 %v6509_v33, %v8957_v31  ;;  %v4715_v56 = vpop.f32.mrb[29].mxu0 }
 0x24c   : > { %v6925_v5 = vpop.eup %6924  ;;  %6942 = vrcp.f32 %v4916_v19  ;;  %v5007_v48 = vmul.f32 %v6923_v29, %v9011_v58  ;;  %v5851_v36 = vmul.f32 -1.442695, %v9095_v13  ;;  %v6342_v7 = vpop.f32.mrb[28].mxu1 }
 0x24d   : > { %v6927_v12 = vpop.eup %6926  ;;  %6944 = vrcp.f32 %v4914_v57  ;;  %v5849_v8 = vmul.f32 -1.442695, %v9098_v15  ;;  %v6510_v42 = vadd.f32 %v6478_v50, %v6342_v7  ;;  %v2683_v26 = vpop.f32.mrb[29].mxu1  ;;  %v5005_v1 = vmul.f32 %v6925_v5, %v9016_v60 }
 0x24e   : > { %v6929_v30 = vpop.eup %6928  ;;  %v5008_v0 = vmul.f32 %v6927_v12, %v9021_v25  ;;  %6946 = vpow2.f32 %v5850_v53  ;;  %v6479_v55 = vpop.f32.mrb[30].mxu0  ;;  %v6511_v58 = vadd.f32 %v4715_v56, %v2683_v26 }
 0x24f   : > { %v6931_v21 = vpop.eup %6930  ;;  %v5006_v11 = vmul.f32 %v6929_v30, %v9025_v32  ;;  %6948 = vpow2.f32 %v5848_v3  ;;  %v6343_v17 = vpop.f32.mrb[30].mxu1  ;;  %v9107_v37 = vadd.f32 %v6510_v42, %v8957_v31 }
 0x250   : > { %v4718_v46 = vpop.f32.mrb[31].mxu0  ;;  %v6933_v45 = vpop.eup %6932  ;;  %v5964_v27 = vpack.c.bf16 %v5008_v0, %v5007_v48  ;;  %v4919_v25 = vadd.f32 1.0, %v6931_v21  ;;  %6950 = vpow2.f32 %v5851_v36  ;;  %v9110_v60 = vadd.f32 %v6511_v58, %v8957_v31 }
 0x251   : > { %v2686_v52 = vpop.f32.mrb[31].mxu1  ;;  %v6935_v54 = vpop.eup %6934  ;;  %v5959_v34 = vpack.c.bf16 %v5006_v11, %v5005_v1  ;;  %v4917_v4 = vadd.f32 1.0, %v6933_v45  ;;  %6952 = vpow2.f32 %v5849_v8  ;;  %v5854_v39 = vmul.f32 -1.442695, %v9107_v37 }
 0x252   : > { %v6937_v32 = vpop.eup %6936  ;;  %6012 = vst [vmem:[%s9041_s19 + $0x38] sm:$0xff] %v5964_v27   ;;  %6954 = vrcp.f32 %v4919_v25  ;;  %v4920_v41 = vadd.f32 1.0, %v6935_v54  ;;  %v6512_v28 = vadd.f32 %v6479_v55, %v6343_v17  ;;  %v5852_v51 = vmul.f32 -1.442695, %v9110_v60 }
 0x253   : > { %6011 = vst [vmem:[%s9041_s19 + $0x30] sm:$0xff] %v5959_v34   ;;  %6956 = vrcp.f32 %v4917_v4  ;;  %v4918_v44 = vadd.f32 1.0, %v6937_v32  ;;  %v6513_v47 = vadd.f32 %v4718_v46, %v2686_v52  ;;  %v6939_v43 = vpop.eup %6938 }
 0x254   : > { %6958 = vrcp.f32 %v4920_v41  ;;  %v9117_v16 = vadd.f32 %v6512_v28, %v8957_v31  ;;  %v5011_v10 = vmul.f32 %v6939_v43, %v9038_v62 }
 0x255   : > { %v6941_v61 = vpop.eup %6940  ;;  %6960 = vrcp.f32 %v4918_v44  ;;  %v9120_v22 = vadd.f32 %v6513_v47, %v8957_v31 }
 0x256   : > { %v6943_v20 = vpop.eup %6942  ;;  %6962 = vpow2.f32 %v5854_v39  ;;  %v5855_v18 = vmul.f32 -1.442695, %v9117_v16  ;;  %v5009_v53 = vmul.f32 %v6941_v61, %v9045_v6 }
 0x257   : > { %v6945_v14 = vpop.eup %6944  ;;  %v5012_v9 = vmul.f32 %v6943_v20, %v9050_v24  ;;  %6964 = vpow2.f32 %v5852_v51  ;;  %v5853_v35 = vmul.f32 -1.442695, %v9120_v22 }
 0x258   : > { %v6947_v19 = vpop.eup %6946  ;;  %v5010_v31 = vmul.f32 %v6945_v14, %v9054_v49  ;;  %6966 = vpow2.f32 %v5855_v18 }
 0x259   : > { %v6949_v33 = vpop.eup %6948  ;;  %v5974_v29 = vpack.c.bf16 %v5012_v9, %v5011_v10  ;;  %v4923_v57 = vadd.f32 1.0, %v6947_v19  ;;  %6968 = vpow2.f32 %v5853_v35 }
 0x25a   : > { %v6951_v3 = vpop.eup %6950  ;;  %v5969_v5 = vpack.c.bf16 %v5010_v31, %v5009_v53  ;;  %v4921_v62 = vadd.f32 1.0, %v6949_v33 }
 0x25b   : > { %v6953_v50 = vpop.eup %6952  ;;  %6014 = vst [vmem:[%s9041_s19 + $0x48] sm:$0xff] %v5974_v29   ;;  %6970 = vrcp.f32 %v4923_v57  ;;  %v4924_v24 = vadd.f32 1.0, %v6951_v3 }
 0x25c   : > { %v6955_v12 = vpop.eup %6954  ;;  %6013 = vst [vmem:[%s9041_s19 + $0x40] sm:$0xff] %v5969_v5   ;;  %6972 = vrcp.f32 %v4921_v62  ;;  %v4922_v48 = vadd.f32 1.0, %v6953_v50 }
 0x25d   : > { %v6957_v36 = vpop.eup %6956  ;;  %6974 = vrcp.f32 %v4924_v24  ;;  %v5015_v7 = vmul.f32 %v6955_v12, %v9063_v63 }
 0x25e   : > { %v6959_v6 = vpop.eup %6958  ;;  %6976 = vrcp.f32 %v4922_v48  ;;  %v5013_v0 = vmul.f32 %v6957_v36, %v9067_v40 }
 0x25f   : > { %v6961_v49 = vpop.eup %6960  ;;  %v5016_v56 = vmul.f32 %v6959_v6, %v9073_v23 }
 0x260   : > { %v6963_v30 = vpop.eup %6962  ;;  %v5014_v8 = vmul.f32 %v6961_v49, %v9076_v38 }
 0x261   : > { %v6965_v42 = vpop.eup %6964  ;;  %v5984_v26 = vpack.c.bf16 %v5016_v56, %v5015_v7  ;;  %v4927_v55 = vadd.f32 1.0, %v6963_v30 }
 0x262   : > { %v6967_v21 = vpop.eup %6966  ;;  %v5979_v1 = vpack.c.bf16 %v5014_v8, %v5013_v0  ;;  %v4925_v11 = vadd.f32 1.0, %v6965_v42 }
 0x263   : > { %v6969_v58 = vpop.eup %6968  ;;  %6016 = vst [vmem:[%s9041_s19 + $0x58] sm:$0xff] %v5984_v26   ;;  %6978 = vrcp.f32 %v4927_v55  ;;  %v4928_v17 = vadd.f32 1.0, %v6967_v21 }
 0x264   : > { %6015 = vst [vmem:[%s9041_s19 + $0x50] sm:$0xff] %v5979_v1   ;;  %6980 = vrcp.f32 %v4925_v11  ;;  %v4926_v63 = vadd.f32 1.0, %v6969_v58 }
 0x265   : > { %v6971_v23 = vpop.eup %6970  ;;  %6982 = vrcp.f32 %v4928_v17 }
 0x266   : > { %v6973_v40 = vpop.eup %6972  ;;  %6984 = vrcp.f32 %v4926_v63  ;;  %v5019_v45 = vmul.f32 %v6971_v23, %v9085_v59 }
 0x267   : > { %v6975_v38 = vpop.eup %6974  ;;  %v5017_v25 = vmul.f32 %v6973_v40, %v9088_v2 }
 0x268   : > { %v6977_v46 = vpop.eup %6976  ;;  %v5020_v27 = vmul.f32 %v6975_v38, %v9095_v13 }
 0x269   : > { %v5018_v52 = vmul.f32 %v6977_v46, %v9098_v15 }
 0x26a   : > { %v5994_v54 = vpack.c.bf16 %v5020_v27, %v5019_v45 }
 0x26b   : > { %v5989_v34 = vpack.c.bf16 %v5018_v52, %v5017_v25 }
 0x26c   : > { %6018 = vst [vmem:[%s9041_s19 + $0x68] sm:$0xff] %v5994_v54  }
 0x26d   : > { %v6979_v4 = vpop.eup %6978  ;;  %6017 = vst [vmem:[%s9041_s19 + $0x60] sm:$0xff] %v5989_v34  }
 0x26e   : > { %v6981_v32 = vpop.eup %6980  ;;  %v5023_v13 = vmul.f32 %v6979_v4, %v9107_v37 }
 0x26f   : > { %v6983_v41 = vpop.eup %6982  ;;  %v5021_v15 = vmul.f32 %v6981_v32, %v9110_v60 }
 0x270   : > { %v6985_v59 = vpop.eup %6984  ;;  %v5024_v2 = vmul.f32 %v6983_v41, %v9117_v16 }
 0x271   : > { %v5022_v39 = vmul.f32 %v6985_v59, %v9120_v22 }
 0x272   : > { %v6004_v28 = vpack.c.bf16 %v5024_v2, %v5023_v13 }
 0x273   : > { %v5999_v44 = vpack.c.bf16 %v5022_v39, %v5021_v15 }
 0x274   : > { %6020 = vst [vmem:[%s9041_s19 + $0x78] sm:$0xff] %v6004_v28  }
 0x275   : > { %6019 = vst [vmem:[%s9041_s19 + $0x70] sm:$0xff] %v5999_v44  }
 0x276   : > { %7055 = shalt.err (!%p7052_p5)
}
 0x277   : > { %s7056_s6 = scalar_lea.hbm %s9151_s28, 2048  ;;  %s7060_s9 = scalar_lea.hbm %s9208_s3, 4096 }
 0x278   : > { %p7057_p6 = scmp.ne.s32.totalorder %s9151_s28, %s7056_s6  ;;  %p7061_p10 = scmp.lt.u32.totalorder %s9151_s28, %s9208_s3 }
 0x279   : > { %p7062_p11 = scmp.lt.u32.totalorder %s7060_s9, %s7056_s6  ;;  %p7064_p13 = scmp.lt.u32.totalorder %s7056_s6, %s9151_s28 }
 0x27a   : > { %p7058_p7 = pnand %p7057_p6, %p7185_p4 }
 0x27b   : > { %p7063_p12 = por %p7062_p11, %p7061_p10 }
 0x27c   : > { %p7059_p9 = pneg %p7058_p7 }
 0x27d   : > { %p7065_p0 = por %p7064_p13, %p7063_p12 }
 0x27f   : > { %p7066_p1 = pnand %p7065_p0, %p7059_p9 }
 0x281   : > { %7069 = shalt.err (!%p7066_p1)
}
 0x282   : > { %s7123_s18 = smov 64   ;;  %s7124_s19 = smov 4  }
 0x283   : > { %6749 = dma.vmem_to_hbm [thread:$0]  (%p7185_p4), %s9153_s23, 2048, %s9151_s28, %s9159_s15, %s7123_s18, %s7123_s18, %s7124_s19  }
 0x284 PF: > { %p6755_p2 = scmp.ge.s32.totalorder %s7120_s17, 2  ;;  %s5216_s21 = sand.u32 1, %s7100_s12  }
 0x285   : > { %s5217_s26 = scalar_lea.sflag [#allocation3], %s5216_s21 }
 0x286   : > { %p6752_p3 = pnand %p6755_p2, %p7192_p8 }
 0x288   : > { %7095 = dma.done.wait (!%p6752_p3), %s5217_s26, 2048  }
 0x289   : > { %7097 = vsyncadd (!%p6752_p3), %s5217_s26, 4294965248  ;;  %s16_s17 = sadd.s32 1, %s7120_s17   ;;  %s9282_s12 = smov %s7104_s13 }
 0x28a   : > { %p13_p5 = scmp.ge.s32.totalorder %s16_s17, 4   ;;  %s9283_s13 = smov %s7108_s14 }
 0x28b   : > { %s9284_s14 = smov %s7198_s25  ;;  %s9285_s15 = smov %s7116_s16 }
 0x28c   : > { %s9286_s16 = smov %s9288_s20  ;;  %15 = sbr.rel (!%p13_p5) target bundleno = 4 (0x4), region = 70 }
 0x293   :  { %5222 = vsyncpa [#allocation3], 1 }
 0x294   :  { %5224 = vsyncpa [#allocation3 + $0x1], 1 }

</bundles_post_ra>
